<compile_context>
chip_gen: v6e
topology: v6e:2x2x1
jax: 0.10.0
libtpu: 0.0.40
codegen_flags: <defaults>
</compile_context>

<pallas_src>
import numpy as np

import jax
import jax.numpy as jnp
from jax.experimental import pallas as pl
from jax.experimental.pallas import tpu as pltpu


_POOL_HALF = 224     # lanes per even/odd-w block in pooled-conv outputs
_POOL_OFF = 256      # lane offset of the odd-w block
_POOL_N = 512        # total lane width of pooled-conv outputs


# ---------------------------------------------------------------------------
# Fused forward kernel
# ---------------------------------------------------------------------------

def _cnn3_kernel(x1_ref,
                 w1, b1, w2, b2, w3, b3, w4, b4, wf1, bf1, wf2, bf2,
                 o_ref,
                 xp2, xp3, xp4):
    """Whole CNN3 forward for one tile of TB images, entirely in VMEM."""
    tb = x1_ref.shape[1]

    def stage(xp_ref, val):
        """Write `val` into the interior rows of an H-padded bf16 scratch and
        zero the two halo rows (W padding is folded into the banded weights).
        Halos are re-zeroed every step: cheap, and safe under megacore."""
        rows = xp_ref.shape[0] - 2
        zrow = jnp.zeros((1,) + tuple(xp_ref.shape[1:]), xp_ref.dtype)
        xp_ref[0:1, :, :] = zrow
        xp_ref[rows + 1:rows + 2, :, :] = zrow
        xp_ref[1:rows + 1, :, :] = val.astype(xp_ref.dtype)

    def conv_relu(xp_ref, w_ref, b_ref):
        """ReLU(3x3 same conv) via 3 banded matmuls (one per kh tap).
        xp_ref: (H+2, tb, W*Cin) bf16; w_ref: (3, W*Cin, Nout) bf16;
        returns (H*tb, Nout) f32."""
        hp, tbl, k = xp_ref.shape
        hout = hp - 2
        acc = jnp.dot(xp_ref[0:hout, :, :].reshape(hout * tbl, k), w_ref[0],
                      preferred_element_type=jnp.float32)
        for kh in (1, 2):
            lhs = xp_ref[kh:kh + hout, :, :].reshape(hout * tbl, k)
            acc = acc + jnp.dot(lhs, w_ref[kh],
                                preferred_element_type=jnp.float32)
        return jnp.maximum(acc + b_ref[...], 0.0)

    def pool2x2(y, hout):
        """2x2 max pool of a (hout*tb, 512) conv output whose columns are laid
        out as [even-w | pad | odd-w | pad]."""
        p = jnp.maximum(y[:, 0:_POOL_HALF],
                        y[:, _POOL_OFF:_POOL_OFF + _POOL_HALF])     # pool W
        p = p.reshape(hout // 2, 2, tb, _POOL_HALF)
        return jnp.maximum(p[:, 0], p[:, 1])                        # pool H

    # ---- conv1 (3 kh taps merged into one K=252 matmul) + relu + pool1 ----
    lhs1 = x1_ref[...].reshape(28 * tb, x1_ref.shape[2])
    y = jnp.maximum(jnp.dot(lhs1, w1[...], preferred_element_type=jnp.float32)
                    + b1[...], 0.0)                  # (28*tb, 512)
    stage(xp2, pool2x2(y, 28))                       # -> (16, tb, 14*16)

    # ---- conv2 + relu + pool2 --------------------------------------------
    y = conv_relu(xp2, w2, b2)                       # (14*tb, 512)
    stage(xp3, pool2x2(y, 14))                       # -> (9, tb, 7*32)

    # ---- conv3 + relu ------------------------------------------------------
    y = conv_relu(xp3, w3, b3)                       # (7*tb, 448)
    stage(xp4, y.reshape(7, tb, 448))                # -> (9, tb, 7*64)

    # ---- conv4 + relu ------------------------------------------------------
    y = conv_relu(xp4, w4, b4)                       # (7*tb, 448)

    # ---- fc1 + relu (flatten order (h, w, c); wf1 rows pre-permuted) -------
    a = y.reshape(7, tb, 448).astype(jnp.bfloat16)
    acc = jnp.dot(a[0], wf1[0], preferred_element_type=jnp.float32)
    for hh in range(1, 7):
        acc = acc + jnp.dot(a[hh], wf1[hh], preferred_element_type=jnp.float32)
    h1 = jnp.maximum(acc + bf1[...], 0.0)            # (tb, 128)

    # ---- fc2 (lane-dense: 9 real columns zero-padded to 128) ---------------
    o_ref[...] = jnp.dot(h1.astype(jnp.bfloat16), wf2[...],
                         preferred_element_type=jnp.float32) + bf2[...]


# ---------------------------------------------------------------------------
# Wrapper
# ---------------------------------------------------------------------------

@jax.jit
def cnn3_forward(x_nchw, kp):
    """x_nchw: (B, 3, 28, 28) f32; kp: packed kernel params.  Returns (B, 9)."""
    B = x_nchw.shape[0]
    tb = 32 if B >= 64 else 16               # >=16 (bf16 sublane tile); keeps
    Bp = ((B + tb - 1) // tb) * tb           # >=2 grid steps at large batch
    x = x_nchw.astype(jnp.float32)
    if Bp != B:
        x = jnp.pad(x, ((0, Bp - B), (0, 0), (0, 0), (0, 0)))

    # NCHW -> (H, B, W*C) with c minor (lane axis = (w, c)), cast to bf16,
    # then lay the three H-shifted copies side by side on the lane axis so
    # conv1 becomes a single K=252 banded matmul (no halo scratch in-kernel).
    xr = jnp.transpose(x, (2, 0, 3, 1)).reshape(28, Bp, 84).astype(jnp.bfloat16)
    zrow = jnp.zeros((1, Bp, 84), jnp.bfloat16)
    x1 = jnp.concatenate(
        [jnp.concatenate([zrow, xr[:-1]], axis=0),    # in[h-1]  (kh = 0 tap)
         xr,                                          # in[h]    (kh = 1 tap)
         jnp.concatenate([xr[1:], zrow], axis=0)],    # in[h+1]  (kh = 2 tap)
        axis=-1)                                      # (28, Bp, 252)

    weights = (kp["w1"], kp["b1"], kp["w2"], kp["b2"], kp["w3"], kp["b3"],
               kp["w4"], kp["b4"], kp["wf1"], kp["bf1"], kp["wf2"], kp["bf2"])
    vmem_spec = pl.BlockSpec(memory_space=pltpu.MemorySpace.VMEM)

    macs = (28 * 28 * 9 * 3 * 16 + 14 * 14 * 9 * 16 * 32
            + 7 * 7 * 9 * 32 * 64 + 7 * 7 * 9 * 64 * 64
            + 64 * 7 * 7 * 128 + 128 * 9)
    bytes_acc = (int(x1.size) * 2 + Bp * 128 * 4
                 + sum(int(w.size) * w.dtype.itemsize for w in weights))

    out = pl.pallas_call(
        _cnn3_kernel,
        out_shape=jax.ShapeDtypeStruct((Bp, 128), jnp.float32),
        grid=(Bp // tb,),
        in_specs=[pl.BlockSpec((28, tb, 252), lambda i: (0, i, 0))]
                 + [vmem_spec] * len(weights),
        out_specs=pl.BlockSpec((tb, 128), lambda i: (i, 0)),
        scratch_shapes=[
            pltpu.VMEM((16, tb, 14 * 16), jnp.bfloat16),   # conv2 input (H-pad)
            pltpu.VMEM((9, tb, 7 * 32), jnp.bfloat16),     # conv3 input
            pltpu.VMEM((9, tb, 7 * 64), jnp.bfloat16),     # conv4 input
        ],
        compiler_params=pltpu.CompilerParams(
            dimension_semantics=("parallel",),
            vmem_limit_bytes=40 * 1024 * 1024),
        cost_estimate=pl.CostEstimate(flops=2 * Bp * macs, transcendentals=0,
                                      bytes_accessed=bytes_acc),
    )(x1, *weights)
    return out[:B, :9]


# ---------------------------------------------------------------------------
# Parameters: torch-layout init + offline repacking for the kernel
# ---------------------------------------------------------------------------

def init_params(key):
    """Random parameters in standard PyTorch layouts."""
    def uniform(k, shape, fan_in):
        bound = 1.0 / np.sqrt(fan_in)
        return jax.random.uniform(k, shape, jnp.float32, -bound, bound)

    ks = jax.random.split(key, 12)
    p = {}
    conv_dims = [(3, 16), (16, 32), (32, 64), (64, 64)]
    for i, (cin, cout) in enumerate(conv_dims):
        p[f"conv{i + 1}_w"] = uniform(ks[2 * i], (cout, cin, 3, 3), 9 * cin)
        p[f"conv{i + 1}_b"] = uniform(ks[2 * i + 1], (cout,), 9 * cin)
    p["fc1_w"] = uniform(ks[8], (128, 64 * 7 * 7), 64 * 7 * 7)
    p["fc1_b"] = uniform(ks[9], (128,), 64 * 7 * 7)
    p["fc2_w"] = uniform(ks[10], (9, 128), 128)
    p["fc2_b"] = uniform(ks[11], (9,), 128)
    return p


def _pack_conv(w, b, width, pooled):
    """Pack a (Cout, Cin, 3, 3) conv into 3 banded (W*Cin, Nout) matrices (one
    per kh tap) acting on rows laid out as (w*Cin + ci), plus a (1, Nout) bias
    row.  The band encodes the kw taps and the zero padding along W.  For
    pooled layers, output columns are [even-w | pad | odd-w | pad]."""
    w = np.asarray(w, np.float32)
    b = np.asarray(b, np.float32)
    cout, cin = w.shape[0], w.shape[1]
    if pooled:
        n_out = _POOL_N

        def base(wo):
            return (wo // 2) * cout + (_POOL_OFF if (wo % 2) else 0)
    else:
        n_out = width * cout

        def base(wo):
            return wo * cout

    m = np.zeros((3, width * cin, n_out), np.float32)
    brow = np.zeros((1, n_out), np.float32)
    for wo in range(width):
        brow[0, base(wo):base(wo) + cout] = b
        for kh in range(3):
            for kw in range(3):
                wi = wo + kw - 1
                if 0 <= wi < width:
                    m[kh, wi * cin:(wi + 1) * cin,
                      base(wo):base(wo) + cout] = w[:, :, kh, kw].T
    return jnp.asarray(m, jnp.bfloat16), jnp.asarray(brow, jnp.float32)


def pack_params(p):
    """Offline repacking of torch-layout params into the kernel format."""
    kp = {}
    # conv1: merge the 3 kh taps into one (252, 512) matrix (kh-major rows,
    # matching the kh-major lane blocks of the merged input).
    w1t, kp["b1"] = _pack_conv(p["conv1_w"], p["conv1_b"], 28, True)
    kp["w1"] = w1t.reshape(3 * 28 * 3, _POOL_N)
    kp["w2"], kp["b2"] = _pack_conv(p["conv2_w"], p["conv2_b"], 14, True)
    kp["w3"], kp["b3"] = _pack_conv(p["conv3_w"], p["conv3_b"], 7, False)
    kp["w4"], kp["b4"] = _pack_conv(p["conv4_w"], p["conv4_b"], 7, False)
    # fc1: torch flatten order is (c, h, w); kernel flatten order is (h, w, c).
    f1 = np.asarray(p["fc1_w"], np.float32).reshape(128, 64, 7, 7)   # (j,c,h,w)
    f1 = np.transpose(f1, (2, 3, 1, 0)).reshape(7, 7 * 64, 128)      # (h, w*64+c, j)
    kp["wf1"] = jnp.asarray(f1, jnp.bfloat16)
    kp["bf1"] = jnp.asarray(p["fc1_b"], jnp.float32).reshape(1, 128)
    # fc2: zero-pad 9 -> 128 output columns for a lane-dense kernel output.
    wf2 = np.zeros((128, 128), np.float32)
    wf2[:, :9] = np.asarray(p["fc2_w"], np.float32).T
    kp["wf2"] = jnp.asarray(wf2, jnp.bfloat16)
    bf2 = np.zeros((1, 128), np.float32)
    bf2[0, :9] = np.asarray(p["fc2_b"], np.float32)
    kp["bf2"] = jnp.asarray(bf2, jnp.float32)
    return kp


# ---------------------------------------------------------------------------
# Pure-JAX reference (torch semantics) for a correctness check
# ---------------------------------------------------------------------------

def cnn3_reference(x_nchw, p):
    x = x_nchw.astype(jnp.float32)

    def conv(x, w, b):
        y = jax.lax.conv_general_dilated(
            x, w, (1, 1), "SAME",
            dimension_numbers=("NCHW", "OIHW", "NCHW"))
        return jax.nn.relu(y + b[None, :, None, None])

    def pool(x):
        B, C, H, W = x.shape
        return x.reshape(B, C, H // 2, 2, W // 2, 2).max(axis=(3, 5))

    x = pool(conv(x, p["conv1_w"], p["conv1_b"]))
    x = pool(conv(x, p["conv2_w"], p["conv2_b"]))
    x = conv(x, p["conv3_w"], p["conv3_b"])
    x = conv(x, p["conv4_w"], p["conv4_b"])
    x = x.reshape(x.shape[0], 64 * 7 * 7)
    x = jax.nn.relu(x @ p["fc1_w"].T + p["fc1_b"])
    return x @ p["fc2_w"].T + p["fc2_b"]


if __name__ == "__main__":
    key = jax.random.PRNGKey(0)
    x = jax.random.normal(key, (2, 3, 28, 28), dtype=jnp.float32)  # NCHW input
    params = init_params(jax.random.PRNGKey(1))
    kparams = pack_params(params)

    out = jax.block_until_ready(cnn3_forward(x, kparams))

    assert out.shape == (2, 9), out.shape
    assert out.dtype == jnp.float32
    assert bool(jnp.all(jnp.isfinite(out)))

    ref = cnn3_reference(x, params)
    err = float(jnp.max(jnp.abs(out - ref)))
    tol = 3e-2 + 3e-2 * float(jnp.max(jnp.abs(ref)))   # bf16-matmul tolerance
    assert err < tol, f"mismatch vs reference: max abs err = {err}"

    print("KERNEL_OK")
</pallas_src>

<mosaic_0001>
module attributes {stable_mosaic.version = 11 : i64} {
  func.func @_cnn3_kernel(%arg0: i32, %arg1: memref<28x16x252xbf16, #tpu.memory_space<vmem>>, %arg2: memref<252x512xbf16, #tpu.memory_space<vmem>>, %arg3: memref<1x512xf32, #tpu.memory_space<vmem>>, %arg4: memref<3x224x512xbf16, #tpu.memory_space<vmem>>, %arg5: memref<1x512xf32, #tpu.memory_space<vmem>>, %arg6: memref<3x224x448xbf16, #tpu.memory_space<vmem>>, %arg7: memref<1x448xf32, #tpu.memory_space<vmem>>, %arg8: memref<3x448x448xbf16, #tpu.memory_space<vmem>>, %arg9: memref<1x448xf32, #tpu.memory_space<vmem>>, %arg10: memref<7x448x128xbf16, #tpu.memory_space<vmem>>, %arg11: memref<1x128xf32, #tpu.memory_space<vmem>>, %arg12: memref<128x128xbf16, #tpu.memory_space<vmem>>, %arg13: memref<1x128xf32, #tpu.memory_space<vmem>>, %arg14: memref<16x128xf32, #tpu.memory_space<vmem>>, %arg15: memref<16x16x224xbf16, #tpu.memory_space<vmem>>, %arg16: memref<9x16x224xbf16, #tpu.memory_space<vmem>>, %arg17: memref<9x16x448xbf16, #tpu.memory_space<vmem>>) attributes {dimension_semantics = [#tpu.dimension_semantics<parallel>], iteration_bounds = array<i64: 1>, scalar_prefetch = 0 : i64, scratch_operands = 3 : i64, tpu.core_type = #tpu.core_type<tc>, window_params = [{transform_indices = @transform_0, window_bounds = array<i64: 28, 16, 252>}, {pipeline_mode = #tpu.pipeline_mode<synchronous>, transform_indices = @transform_1, window_bounds = array<i64: 252, 512>}, {pipeline_mode = #tpu.pipeline_mode<synchronous>, transform_indices = @transform_2, window_bounds = array<i64: 1, 512>}, {pipeline_mode = #tpu.pipeline_mode<synchronous>, transform_indices = @transform_3, window_bounds = array<i64: 3, 224, 512>}, {pipeline_mode = #tpu.pipeline_mode<synchronous>, transform_indices = @transform_4, window_bounds = array<i64: 1, 512>}, {pipeline_mode = #tpu.pipeline_mode<synchronous>, transform_indices = @transform_5, window_bounds = array<i64: 3, 224, 448>}, {pipeline_mode = #tpu.pipeline_mode<synchronous>, transform_indices = @transform_6, window_bounds = array<i64: 1, 448>}, {pipeline_mode = #tpu.pipeline_mode<synchronous>, transform_indices = @transform_7, window_bounds = array<i64: 3, 448, 448>}, {pipeline_mode = #tpu.pipeline_mode<synchronous>, transform_indices = @transform_8, window_bounds = array<i64: 1, 448>}, {pipeline_mode = #tpu.pipeline_mode<synchronous>, transform_indices = @transform_9, window_bounds = array<i64: 7, 448, 128>}, {pipeline_mode = #tpu.pipeline_mode<synchronous>, transform_indices = @transform_10, window_bounds = array<i64: 1, 128>}, {pipeline_mode = #tpu.pipeline_mode<synchronous>, transform_indices = @transform_11, window_bounds = array<i64: 128, 128>}, {pipeline_mode = #tpu.pipeline_mode<synchronous>, transform_indices = @transform_12, window_bounds = array<i64: 1, 128>}, {transform_indices = @transform_13, window_bounds = array<i64: 16, 128>}]} {
    %c0 = arith.constant 0 : index
    %c0_0 = arith.constant 0 : index
    %c0_1 = arith.constant 0 : index
    %0 = vector.load %arg1[%c0, %c0_0, %c0_1] : memref<28x16x252xbf16, #tpu.memory_space<vmem>>, vector<28x16x252xbf16>
    %1 = vector.shape_cast %0 : vector<28x16x252xbf16> to vector<448x252xbf16>
    %c0_2 = arith.constant 0 : index
    %c0_3 = arith.constant 0 : index
    %2 = vector.load %arg2[%c0_2, %c0_3] : memref<252x512xbf16, #tpu.memory_space<vmem>>, vector<252x512xbf16>
    %cst = arith.constant dense<0.000000e+00> : vector<448x512xf32>
    %3 = tpu.matmul %1, %2, %cst {dimension_numbers = #tpu.dot_dimension_numbers<[1], [0], [0], [1], [0, 0, 1, 1], [], []>} : vector<448x252xbf16>, vector<252x512xbf16>, vector<448x512xf32> -> vector<448x512xf32>
    %c0_4 = arith.constant 0 : index
    %c0_5 = arith.constant 0 : index
    %4 = vector.load %arg3[%c0_4, %c0_5] : memref<1x512xf32, #tpu.memory_space<vmem>>, vector<1x512xf32>
    %5 = vector.broadcast %4 : vector<1x512xf32> to vector<448x512xf32>
    %6 = arith.addf %3, %5 : vector<448x512xf32>
    %cst_6 = arith.constant 0.000000e+00 : f32
    %7 = vector.broadcast %cst_6 : f32 to vector<448x512xf32>
    %8 = arith.maximumf %6, %7 : vector<448x512xf32>
    %9 = vector.extract_strided_slice %8 {offsets = [0, 0], sizes = [448, 224], strides = [1, 1]} : vector<448x512xf32> to vector<448x224xf32>
    %10 = vector.extract_strided_slice %8 {offsets = [0, 256], sizes = [448, 224], strides = [1, 1]} : vector<448x512xf32> to vector<448x224xf32>
    %11 = arith.maximumf %9, %10 : vector<448x224xf32>
    %12 = vector.shape_cast %11 : vector<448x224xf32> to vector<14x2x16x224xf32>
    %13 = vector.extract_strided_slice %12 {offsets = [0, 0, 0, 0], sizes = [14, 1, 16, 224], strides = [1, 1, 1, 1]} : vector<14x2x16x224xf32> to vector<14x1x16x224xf32>
    %14 = vector.shape_cast %13 : vector<14x1x16x224xf32> to vector<14x16x224xf32>
    %15 = vector.extract_strided_slice %12 {offsets = [0, 1, 0, 0], sizes = [14, 1, 16, 224], strides = [1, 1, 1, 1]} : vector<14x2x16x224xf32> to vector<14x1x16x224xf32>
    %16 = vector.shape_cast %15 : vector<14x1x16x224xf32> to vector<14x16x224xf32>
    %17 = arith.maximumf %14, %16 : vector<14x16x224xf32>
    %cst_7 = arith.constant 0.000000e+00 : bf16
    %18 = vector.broadcast %cst_7 : bf16 to vector<1x16x224xbf16>
    %c0_8 = arith.constant 0 : index
    %c0_9 = arith.constant 0 : index
    %c0_10 = arith.constant 0 : index
    %19 = vector.load %arg15[%c0_8, %c0_9, %c0_10] : memref<16x16x224xbf16, #tpu.memory_space<vmem>>, vector<1x16x224xbf16>
    tpu.vector_store %arg15[%c0_8, %c0_9, %c0_10], %18 {strides = array<i32>} : memref<16x16x224xbf16, #tpu.memory_space<vmem>>, vector<1x16x224xbf16>,
    %c15 = arith.constant 15 : index
    %c0_11 = arith.constant 0 : index
    %c0_12 = arith.constant 0 : index
    %20 = vector.load %arg15[%c15, %c0_11, %c0_12] : memref<16x16x224xbf16, #tpu.memory_space<vmem>>, vector<1x16x224xbf16>
    tpu.vector_store %arg15[%c15, %c0_11, %c0_12], %18 {strides = array<i32>} : memref<16x16x224xbf16, #tpu.memory_space<vmem>>, vector<1x16x224xbf16>,
    %21 = arith.truncf %17 : vector<14x16x224xf32> to vector<14x16x224xbf16>
    %c1 = arith.constant 1 : index
    %c0_13 = arith.constant 0 : index
    %c0_14 = arith.constant 0 : index
    %22 = vector.load %arg15[%c1, %c0_13, %c0_14] : memref<16x16x224xbf16, #tpu.memory_space<vmem>>, vector<14x16x224xbf16>
    tpu.vector_store %arg15[%c1, %c0_13, %c0_14], %21 {strides = array<i32>} : memref<16x16x224xbf16, #tpu.memory_space<vmem>>, vector<14x16x224xbf16>,
    %c0_15 = arith.constant 0 : index
    %c0_16 = arith.constant 0 : index
    %c0_17 = arith.constant 0 : index
    %23 = vector.load %arg15[%c0_15, %c0_16, %c0_17] : memref<16x16x224xbf16, #tpu.memory_space<vmem>>, vector<14x16x224xbf16>
    %24 = vector.shape_cast %23 : vector<14x16x224xbf16> to vector<224x224xbf16>
    %c0_18 = arith.constant 0 : index
    %c0_19 = arith.constant 0 : index
    %c0_20 = arith.constant 0 : index
    %25 = vector.load %arg4[%c0_18, %c0_19, %c0_20] : memref<3x224x512xbf16, #tpu.memory_space<vmem>>, vector<1x224x512xbf16>
    %26 = vector.shape_cast %25 : vector<1x224x512xbf16> to vector<224x512xbf16>
    %cst_21 = arith.constant dense<0.000000e+00> : vector<224x512xf32>
    %27 = tpu.matmul %24, %26, %cst_21 {dimension_numbers = #tpu.dot_dimension_numbers<[1], [0], [0], [1], [0, 0, 1, 1], [], []>} : vector<224x224xbf16>, vector<224x512xbf16>, vector<224x512xf32> -> vector<224x512xf32>
    %c1_22 = arith.constant 1 : index
    %c0_23 = arith.constant 0 : index
    %c0_24 = arith.constant 0 : index
    %28 = vector.load %arg15[%c1_22, %c0_23, %c0_24] : memref<16x16x224xbf16, #tpu.memory_space<vmem>>, vector<14x16x224xbf16>
    %29 = vector.shape_cast %28 : vector<14x16x224xbf16> to vector<224x224xbf16>
    %c1_25 = arith.constant 1 : index
    %c0_26 = arith.constant 0 : index
    %c0_27 = arith.constant 0 : index
    %30 = vector.load %arg4[%c1_25, %c0_26, %c0_27] : memref<3x224x512xbf16, #tpu.memory_space<vmem>>, vector<1x224x512xbf16>
    %31 = vector.shape_cast %30 : vector<1x224x512xbf16> to vector<224x512xbf16>
    %cst_28 = arith.constant dense<0.000000e+00> : vector<224x512xf32>
    %32 = tpu.matmul %29, %31, %cst_28 {dimension_numbers = #tpu.dot_dimension_numbers<[1], [0], [0], [1], [0, 0, 1, 1], [], []>} : vector<224x224xbf16>, vector<224x512xbf16>, vector<224x512xf32> -> vector<224x512xf32>
    %33 = arith.addf %27, %32 : vector<224x512xf32>
    %c2 = arith.constant 2 : index
    %c0_29 = arith.constant 0 : index
    %c0_30 = arith.constant 0 : index
    %34 = vector.load %arg15[%c2, %c0_29, %c0_30] : memref<16x16x224xbf16, #tpu.memory_space<vmem>>, vector<14x16x224xbf16>
    %35 = vector.shape_cast %34 : vector<14x16x224xbf16> to vector<224x224xbf16>
    %c2_31 = arith.constant 2 : index
    %c0_32 = arith.constant 0 : index
    %c0_33 = arith.constant 0 : index
    %36 = vector.load %arg4[%c2_31, %c0_32, %c0_33] : memref<3x224x512xbf16, #tpu.memory_space<vmem>>, vector<1x224x512xbf16>
    %37 = vector.shape_cast %36 : vector<1x224x512xbf16> to vector<224x512xbf16>
    %cst_34 = arith.constant dense<0.000000e+00> : vector<224x512xf32>
    %38 = tpu.matmul %35, %37, %cst_34 {dimension_numbers = #tpu.dot_dimension_numbers<[1], [0], [0], [1], [0, 0, 1, 1], [], []>} : vector<224x224xbf16>, vector<224x512xbf16>, vector<224x512xf32> -> vector<224x512xf32>
    %39 = arith.addf %33, %38 : vector<224x512xf32>
    %c0_35 = arith.constant 0 : index
    %c0_36 = arith.constant 0 : index
    %40 = vector.load %arg5[%c0_35, %c0_36] : memref<1x512xf32, #tpu.memory_space<vmem>>, vector<1x512xf32>
    %41 = vector.broadcast %40 : vector<1x512xf32> to vector<224x512xf32>
    %42 = arith.addf %39, %41 : vector<224x512xf32>
    %cst_37 = arith.constant 0.000000e+00 : f32
    %43 = vector.broadcast %cst_37 : f32 to vector<224x512xf32>
    %44 = arith.maximumf %42, %43 : vector<224x512xf32>
    %45 = vector.extract_strided_slice %44 {offsets = [0, 0], sizes = [224, 224], strides = [1, 1]} : vector<224x512xf32> to vector<224x224xf32>
    %46 = vector.extract_strided_slice %44 {offsets = [0, 256], sizes = [224, 224], strides = [1, 1]} : vector<224x512xf32> to vector<224x224xf32>
    %47 = arith.maximumf %45, %46 : vector<224x224xf32>
    %48 = vector.shape_cast %47 : vector<224x224xf32> to vector<7x2x16x224xf32>
    %49 = vector.extract_strided_slice %48 {offsets = [0, 0, 0, 0], sizes = [7, 1, 16, 224], strides = [1, 1, 1, 1]} : vector<7x2x16x224xf32> to vector<7x1x16x224xf32>
    %50 = vector.shape_cast %49 : vector<7x1x16x224xf32> to vector<7x16x224xf32>
    %51 = vector.extract_strided_slice %48 {offsets = [0, 1, 0, 0], sizes = [7, 1, 16, 224], strides = [1, 1, 1, 1]} : vector<7x2x16x224xf32> to vector<7x1x16x224xf32>
    %52 = vector.shape_cast %51 : vector<7x1x16x224xf32> to vector<7x16x224xf32>
    %53 = arith.maximumf %50, %52 : vector<7x16x224xf32>
    %cst_38 = arith.constant 0.000000e+00 : bf16
    %54 = vector.broadcast %cst_38 : bf16 to vector<1x16x224xbf16>
    %c0_39 = arith.constant 0 : index
    %c0_40 = arith.constant 0 : index
    %c0_41 = arith.constant 0 : index
    %55 = vector.load %arg16[%c0_39, %c0_40, %c0_41] : memref<9x16x224xbf16, #tpu.memory_space<vmem>>, vector<1x16x224xbf16>
    tpu.vector_store %arg16[%c0_39, %c0_40, %c0_41], %54 {strides = array<i32>} : memref<9x16x224xbf16, #tpu.memory_space<vmem>>, vector<1x16x224xbf16>,
    %c8 = arith.constant 8 : index
    %c0_42 = arith.constant 0 : index
    %c0_43 = arith.constant 0 : index
    %56 = vector.load %arg16[%c8, %c0_42, %c0_43] : memref<9x16x224xbf16, #tpu.memory_space<vmem>>, vector<1x16x224xbf16>
    tpu.vector_store %arg16[%c8, %c0_42, %c0_43], %54 {strides = array<i32>} : memref<9x16x224xbf16, #tpu.memory_space<vmem>>, vector<1x16x224xbf16>,
    %57 = arith.truncf %53 : vector<7x16x224xf32> to vector<7x16x224xbf16>
    %c1_44 = arith.constant 1 : index
    %c0_45 = arith.constant 0 : index
    %c0_46 = arith.constant 0 : index
    %58 = vector.load %arg16[%c1_44, %c0_45, %c0_46] : memref<9x16x224xbf16, #tpu.memory_space<vmem>>, vector<7x16x224xbf16>
    tpu.vector_store %arg16[%c1_44, %c0_45, %c0_46], %57 {strides = array<i32>} : memref<9x16x224xbf16, #tpu.memory_space<vmem>>, vector<7x16x224xbf16>,
    %c0_47 = arith.constant 0 : index
    %c0_48 = arith.constant 0 : index
    %c0_49 = arith.constant 0 : index
    %59 = vector.load %arg16[%c0_47, %c0_48, %c0_49] : memref<9x16x224xbf16, #tpu.memory_space<vmem>>, vector<7x16x224xbf16>
    %60 = vector.shape_cast %59 : vector<7x16x224xbf16> to vector<112x224xbf16>
    %c0_50 = arith.constant 0 : index
    %c0_51 = arith.constant 0 : index
    %c0_52 = arith.constant 0 : index
    %61 = vector.load %arg6[%c0_50, %c0_51, %c0_52] : memref<3x224x448xbf16, #tpu.memory_space<vmem>>, vector<1x224x448xbf16>
    %62 = vector.shape_cast %61 : vector<1x224x448xbf16> to vector<224x448xbf16>
    %cst_53 = arith.constant dense<0.000000e+00> : vector<112x448xf32>
    %63 = tpu.matmul %60, %62, %cst_53 {dimension_numbers = #tpu.dot_dimension_numbers<[1], [0], [0], [1], [0, 0, 1, 1], [], []>} : vector<112x224xbf16>, vector<224x448xbf16>, vector<112x448xf32> -> vector<112x448xf32>
    %c1_54 = arith.constant 1 : index
    %c0_55 = arith.constant 0 : index
    %c0_56 = arith.constant 0 : index
    %64 = vector.load %arg16[%c1_54, %c0_55, %c0_56] : memref<9x16x224xbf16, #tpu.memory_space<vmem>>, vector<7x16x224xbf16>
    %65 = vector.shape_cast %64 : vector<7x16x224xbf16> to vector<112x224xbf16>
    %c1_57 = arith.constant 1 : index
    %c0_58 = arith.constant 0 : index
    %c0_59 = arith.constant 0 : index
    %66 = vector.load %arg6[%c1_57, %c0_58, %c0_59] : memref<3x224x448xbf16, #tpu.memory_space<vmem>>, vector<1x224x448xbf16>
    %67 = vector.shape_cast %66 : vector<1x224x448xbf16> to vector<224x448xbf16>
    %cst_60 = arith.constant dense<0.000000e+00> : vector<112x448xf32>
    %68 = tpu.matmul %65, %67, %cst_60 {dimension_numbers = #tpu.dot_dimension_numbers<[1], [0], [0], [1], [0, 0, 1, 1], [], []>} : vector<112x224xbf16>, vector<224x448xbf16>, vector<112x448xf32> -> vector<112x448xf32>
    %69 = arith.addf %63, %68 : vector<112x448xf32>
    %c2_61 = arith.constant 2 : index
    %c0_62 = arith.constant 0 : index
    %c0_63 = arith.constant 0 : index
    %70 = vector.load %arg16[%c2_61, %c0_62, %c0_63] : memref<9x16x224xbf16, #tpu.memory_space<vmem>>, vector<7x16x224xbf16>
    %71 = vector.shape_cast %70 : vector<7x16x224xbf16> to vector<112x224xbf16>
    %c2_64 = arith.constant 2 : index
    %c0_65 = arith.constant 0 : index
    %c0_66 = arith.constant 0 : index
    %72 = vector.load %arg6[%c2_64, %c0_65, %c0_66] : memref<3x224x448xbf16, #tpu.memory_space<vmem>>, vector<1x224x448xbf16>
    %73 = vector.shape_cast %72 : vector<1x224x448xbf16> to vector<224x448xbf16>
    %cst_67 = arith.constant dense<0.000000e+00> : vector<112x448xf32>
    %74 = tpu.matmul %71, %73, %cst_67 {dimension_numbers = #tpu.dot_dimension_numbers<[1], [0], [0], [1], [0, 0, 1, 1], [], []>} : vector<112x224xbf16>, vector<224x448xbf16>, vector<112x448xf32> -> vector<112x448xf32>
    %75 = arith.addf %69, %74 : vector<112x448xf32>
    %c0_68 = arith.constant 0 : index
    %c0_69 = arith.constant 0 : index
    %76 = vector.load %arg7[%c0_68, %c0_69] : memref<1x448xf32, #tpu.memory_space<vmem>>, vector<1x448xf32>
    %77 = vector.broadcast %76 : vector<1x448xf32> to vector<112x448xf32>
    %78 = arith.addf %75, %77 : vector<112x448xf32>
    %cst_70 = arith.constant 0.000000e+00 : f32
    %79 = vector.broadcast %cst_70 : f32 to vector<112x448xf32>
    %80 = arith.maximumf %78, %79 : vector<112x448xf32>
    %81 = vector.shape_cast %80 : vector<112x448xf32> to vector<7x16x448xf32>
    %cst_71 = arith.constant 0.000000e+00 : bf16
    %82 = vector.broadcast %cst_71 : bf16 to vector<1x16x448xbf16>
    %c0_72 = arith.constant 0 : index
    %c0_73 = arith.constant 0 : index
    %c0_74 = arith.constant 0 : index
    %83 = vector.load %arg17[%c0_72, %c0_73, %c0_74] : memref<9x16x448xbf16, #tpu.memory_space<vmem>>, vector<1x16x448xbf16>
    tpu.vector_store %arg17[%c0_72, %c0_73, %c0_74], %82 {strides = array<i32>} : memref<9x16x448xbf16, #tpu.memory_space<vmem>>, vector<1x16x448xbf16>,
    %c8_75 = arith.constant 8 : index
    %c0_76 = arith.constant 0 : index
    %c0_77 = arith.constant 0 : index
    %84 = vector.load %arg17[%c8_75, %c0_76, %c0_77] : memref<9x16x448xbf16, #tpu.memory_space<vmem>>, vector<1x16x448xbf16>
    tpu.vector_store %arg17[%c8_75, %c0_76, %c0_77], %82 {strides = array<i32>} : memref<9x16x448xbf16, #tpu.memory_space<vmem>>, vector<1x16x448xbf16>,
    %85 = arith.truncf %81 : vector<7x16x448xf32> to vector<7x16x448xbf16>
    %c1_78 = arith.constant 1 : index
    %c0_79 = arith.constant 0 : index
    %c0_80 = arith.constant 0 : index
    %86 = vector.load %arg17[%c1_78, %c0_79, %c0_80] : memref<9x16x448xbf16, #tpu.memory_space<vmem>>, vector<7x16x448xbf16>
    tpu.vector_store %arg17[%c1_78, %c0_79, %c0_80], %85 {strides = array<i32>} : memref<9x16x448xbf16, #tpu.memory_space<vmem>>, vector<7x16x448xbf16>,
    %c0_81 = arith.constant 0 : index
    %c0_82 = arith.constant 0 : index
    %c0_83 = arith.constant 0 : index
    %87 = vector.load %arg17[%c0_81, %c0_82, %c0_83] : memref<9x16x448xbf16, #tpu.memory_space<vmem>>, vector<7x16x448xbf16>
    %88 = vector.shape_cast %87 : vector<7x16x448xbf16> to vector<112x448xbf16>
    %c0_84 = arith.constant 0 : index
    %c0_85 = arith.constant 0 : index
    %c0_86 = arith.constant 0 : index
    %89 = vector.load %arg8[%c0_84, %c0_85, %c0_86] : memref<3x448x448xbf16, #tpu.memory_space<vmem>>, vector<1x448x448xbf16>
    %90 = vector.shape_cast %89 : vector<1x448x448xbf16> to vector<448x448xbf16>
    %cst_87 = arith.constant dense<0.000000e+00> : vector<112x448xf32>
    %91 = tpu.matmul %88, %90, %cst_87 {dimension_numbers = #tpu.dot_dimension_numbers<[1], [0], [0], [1], [0, 0, 1, 1], [], []>} : vector<112x448xbf16>, vector<448x448xbf16>, vector<112x448xf32> -> vector<112x448xf32>
    %c1_88 = arith.constant 1 : index
    %c0_89 = arith.constant 0 : index
    %c0_90 = arith.constant 0 : index
    %92 = vector.load %arg17[%c1_88, %c0_89, %c0_90] : memref<9x16x448xbf16, #tpu.memory_space<vmem>>, vector<7x16x448xbf16>
    %93 = vector.shape_cast %92 : vector<7x16x448xbf16> to vector<112x448xbf16>
    %c1_91 = arith.constant 1 : index
    %c0_92 = arith.constant 0 : index
    %c0_93 = arith.constant 0 : index
    %94 = vector.load %arg8[%c1_91, %c0_92, %c0_93] : memref<3x448x448xbf16, #tpu.memory_space<vmem>>, vector<1x448x448xbf16>
    %95 = vector.shape_cast %94 : vector<1x448x448xbf16> to vector<448x448xbf16>
    %cst_94 = arith.constant dense<0.000000e+00> : vector<112x448xf32>
    %96 = tpu.matmul %93, %95, %cst_94 {dimension_numbers = #tpu.dot_dimension_numbers<[1], [0], [0], [1], [0, 0, 1, 1], [], []>} : vector<112x448xbf16>, vector<448x448xbf16>, vector<112x448xf32> -> vector<112x448xf32>
    %97 = arith.addf %91, %96 : vector<112x448xf32>
    %c2_95 = arith.constant 2 : index
    %c0_96 = arith.constant 0 : index
    %c0_97 = arith.constant 0 : index
    %98 = vector.load %arg17[%c2_95, %c0_96, %c0_97] : memref<9x16x448xbf16, #tpu.memory_space<vmem>>, vector<7x16x448xbf16>
    %99 = vector.shape_cast %98 : vector<7x16x448xbf16> to vector<112x448xbf16>
    %c2_98 = arith.constant 2 : index
    %c0_99 = arith.constant 0 : index
    %c0_100 = arith.constant 0 : index
    %100 = vector.load %arg8[%c2_98, %c0_99, %c0_100] : memref<3x448x448xbf16, #tpu.memory_space<vmem>>, vector<1x448x448xbf16>
    %101 = vector.shape_cast %100 : vector<1x448x448xbf16> to vector<448x448xbf16>
    %cst_101 = arith.constant dense<0.000000e+00> : vector<112x448xf32>
    %102 = tpu.matmul %99, %101, %cst_101 {dimension_numbers = #tpu.dot_dimension_numbers<[1], [0], [0], [1], [0, 0, 1, 1], [], []>} : vector<112x448xbf16>, vector<448x448xbf16>, vector<112x448xf32> -> vector<112x448xf32>
    %103 = arith.addf %97, %102 : vector<112x448xf32>
    %c0_102 = arith.constant 0 : index
    %c0_103 = arith.constant 0 : index
    %104 = vector.load %arg9[%c0_102, %c0_103] : memref<1x448xf32, #tpu.memory_space<vmem>>, vector<1x448xf32>
    %105 = vector.broadcast %104 : vector<1x448xf32> to vector<112x448xf32>
    %106 = arith.addf %103, %105 : vector<112x448xf32>
    %cst_104 = arith.constant 0.000000e+00 : f32
    %107 = vector.broadcast %cst_104 : f32 to vector<112x448xf32>
    %108 = arith.maximumf %106, %107 : vector<112x448xf32>
    %109 = vector.shape_cast %108 : vector<112x448xf32> to vector<7x16x448xf32>
    %110 = arith.truncf %109 : vector<7x16x448xf32> to vector<7x16x448xbf16>
    %111 = vector.extract_strided_slice %110 {offsets = [0, 0, 0], sizes = [1, 16, 448], strides = [1, 1, 1]} : vector<7x16x448xbf16> to vector<1x16x448xbf16>
    %112 = vector.shape_cast %111 : vector<1x16x448xbf16> to vector<16x448xbf16>
    %c0_105 = arith.constant 0 : index
    %c0_106 = arith.constant 0 : index
    %c0_107 = arith.constant 0 : index
    %113 = vector.load %arg10[%c0_105, %c0_106, %c0_107] : memref<7x448x128xbf16, #tpu.memory_space<vmem>>, vector<1x448x128xbf16>
    %114 = vector.shape_cast %113 : vector<1x448x128xbf16> to vector<448x128xbf16>
    %cst_108 = arith.constant dense<0.000000e+00> : vector<16x128xf32>
    %115 = tpu.matmul %112, %114, %cst_108 {dimension_numbers = #tpu.dot_dimension_numbers<[1], [0], [0], [1], [0, 0, 1, 1], [], []>} : vector<16x448xbf16>, vector<448x128xbf16>, vector<16x128xf32> -> vector<16x128xf32>
    %116 = vector.extract_strided_slice %110 {offsets = [1, 0, 0], sizes = [1, 16, 448], strides = [1, 1, 1]} : vector<7x16x448xbf16> to vector<1x16x448xbf16>
    %117 = vector.shape_cast %116 : vector<1x16x448xbf16> to vector<16x448xbf16>
    %c1_109 = arith.constant 1 : index
    %c0_110 = arith.constant 0 : index
    %c0_111 = arith.constant 0 : index
    %118 = vector.load %arg10[%c1_109, %c0_110, %c0_111] : memref<7x448x128xbf16, #tpu.memory_space<vmem>>, vector<1x448x128xbf16>
    %119 = vector.shape_cast %118 : vector<1x448x128xbf16> to vector<448x128xbf16>
    %cst_112 = arith.constant dense<0.000000e+00> : vector<16x128xf32>
    %120 = tpu.matmul %117, %119, %cst_112 {dimension_numbers = #tpu.dot_dimension_numbers<[1], [0], [0], [1], [0, 0, 1, 1], [], []>} : vector<16x448xbf16>, vector<448x128xbf16>, vector<16x128xf32> -> vector<16x128xf32>
    %121 = arith.addf %115, %120 : vector<16x128xf32>
    %122 = vector.extract_strided_slice %110 {offsets = [2, 0, 0], sizes = [1, 16, 448], strides = [1, 1, 1]} : vector<7x16x448xbf16> to vector<1x16x448xbf16>
    %123 = vector.shape_cast %122 : vector<1x16x448xbf16> to vector<16x448xbf16>
    %c2_113 = arith.constant 2 : index
    %c0_114 = arith.constant 0 : index
    %c0_115 = arith.constant 0 : index
    %124 = vector.load %arg10[%c2_113, %c0_114, %c0_115] : memref<7x448x128xbf16, #tpu.memory_space<vmem>>, vector<1x448x128xbf16>
    %125 = vector.shape_cast %124 : vector<1x448x128xbf16> to vector<448x128xbf16>
    %cst_116 = arith.constant dense<0.000000e+00> : vector<16x128xf32>
    %126 = tpu.matmul %123, %125, %cst_116 {dimension_numbers = #tpu.dot_dimension_numbers<[1], [0], [0], [1], [0, 0, 1, 1], [], []>} : vector<16x448xbf16>, vector<448x128xbf16>, vector<16x128xf32> -> vector<16x128xf32>
    %127 = arith.addf %121, %126 : vector<16x128xf32>
    %128 = vector.extract_strided_slice %110 {offsets = [3, 0, 0], sizes = [1, 16, 448], strides = [1, 1, 1]} : vector<7x16x448xbf16> to vector<1x16x448xbf16>
    %129 = vector.shape_cast %128 : vector<1x16x448xbf16> to vector<16x448xbf16>
    %c3 = arith.constant 3 : index
    %c0_117 = arith.constant 0 : index
    %c0_118 = arith.constant 0 : index
    %130 = vector.load %arg10[%c3, %c0_117, %c0_118] : memref<7x448x128xbf16, #tpu.memory_space<vmem>>, vector<1x448x128xbf16>
    %131 = vector.shape_cast %130 : vector<1x448x128xbf16> to vector<448x128xbf16>
    %cst_119 = arith.constant dense<0.000000e+00> : vector<16x128xf32>
    %132 = tpu.matmul %129, %131, %cst_119 {dimension_numbers = #tpu.dot_dimension_numbers<[1], [0], [0], [1], [0, 0, 1, 1], [], []>} : vector<16x448xbf16>, vector<448x128xbf16>, vector<16x128xf32> -> vector<16x128xf32>
    %133 = arith.addf %127, %132 : vector<16x128xf32>
    %134 = vector.extract_strided_slice %110 {offsets = [4, 0, 0], sizes = [1, 16, 448], strides = [1, 1, 1]} : vector<7x16x448xbf16> to vector<1x16x448xbf16>
    %135 = vector.shape_cast %134 : vector<1x16x448xbf16> to vector<16x448xbf16>
    %c4 = arith.constant 4 : index
    %c0_120 = arith.constant 0 : index
    %c0_121 = arith.constant 0 : index
    %136 = vector.load %arg10[%c4, %c0_120, %c0_121] : memref<7x448x128xbf16, #tpu.memory_space<vmem>>, vector<1x448x128xbf16>
    %137 = vector.shape_cast %136 : vector<1x448x128xbf16> to vector<448x128xbf16>
    %cst_122 = arith.constant dense<0.000000e+00> : vector<16x128xf32>
    %138 = tpu.matmul %135, %137, %cst_122 {dimension_numbers = #tpu.dot_dimension_numbers<[1], [0], [0], [1], [0, 0, 1, 1], [], []>} : vector<16x448xbf16>, vector<448x128xbf16>, vector<16x128xf32> -> vector<16x128xf32>
    %139 = arith.addf %133, %138 : vector<16x128xf32>
    %140 = vector.extract_strided_slice %110 {offsets = [5, 0, 0], sizes = [1, 16, 448], strides = [1, 1, 1]} : vector<7x16x448xbf16> to vector<1x16x448xbf16>
    %141 = vector.shape_cast %140 : vector<1x16x448xbf16> to vector<16x448xbf16>
    %c5 = arith.constant 5 : index
    %c0_123 = arith.constant 0 : index
    %c0_124 = arith.constant 0 : index
    %142 = vector.load %arg10[%c5, %c0_123, %c0_124] : memref<7x448x128xbf16, #tpu.memory_space<vmem>>, vector<1x448x128xbf16>
    %143 = vector.shape_cast %142 : vector<1x448x128xbf16> to vector<448x128xbf16>
    %cst_125 = arith.constant dense<0.000000e+00> : vector<16x128xf32>
    %144 = tpu.matmul %141, %143, %cst_125 {dimension_numbers = #tpu.dot_dimension_numbers<[1], [0], [0], [1], [0, 0, 1, 1], [], []>} : vector<16x448xbf16>, vector<448x128xbf16>, vector<16x128xf32> -> vector<16x128xf32>
    %145 = arith.addf %139, %144 : vector<16x128xf32>
    %146 = vector.extract_strided_slice %110 {offsets = [6, 0, 0], sizes = [1, 16, 448], strides = [1, 1, 1]} : vector<7x16x448xbf16> to vector<1x16x448xbf16>
    %147 = vector.shape_cast %146 : vector<1x16x448xbf16> to vector<16x448xbf16>
    %c6 = arith.constant 6 : index
    %c0_126 = arith.constant 0 : index
    %c0_127 = arith.constant 0 : index
    %148 = vector.load %arg10[%c6, %c0_126, %c0_127] : memref<7x448x128xbf16, #tpu.memory_space<vmem>>, vector<1x448x128xbf16>
    %149 = vector.shape_cast %148 : vector<1x448x128xbf16> to vector<448x128xbf16>
    %cst_128 = arith.constant dense<0.000000e+00> : vector<16x128xf32>
    %150 = tpu.matmul %147, %149, %cst_128 {dimension_numbers = #tpu.dot_dimension_numbers<[1], [0], [0], [1], [0, 0, 1, 1], [], []>} : vector<16x448xbf16>, vector<448x128xbf16>, vector<16x128xf32> -> vector<16x128xf32>
    %151 = arith.addf %145, %150 : vector<16x128xf32>
    %c0_129 = arith.constant 0 : index
    %c0_130 = arith.constant 0 : index
    %152 = vector.load %arg11[%c0_129, %c0_130] : memref<1x128xf32, #tpu.memory_space<vmem>>, vector<1x128xf32>
    %153 = vector.broadcast %152 : vector<1x128xf32> to vector<16x128xf32>
    %154 = arith.addf %151, %153 : vector<16x128xf32>
    %cst_131 = arith.constant 0.000000e+00 : f32
    %155 = vector.broadcast %cst_131 : f32 to vector<16x128xf32>
    %156 = arith.maximumf %154, %155 : vector<16x128xf32>
    %157 = arith.truncf %156 : vector<16x128xf32> to vector<16x128xbf16>
    %c0_132 = arith.constant 0 : index
    %c0_133 = arith.constant 0 : index
    %158 = vector.load %arg12[%c0_132, %c0_133] : memref<128x128xbf16, #tpu.memory_space<vmem>>, vector<128x128xbf16>
    %cst_134 = arith.constant dense<0.000000e+00> : vector<16x128xf32>
    %159 = tpu.matmul %157, %158, %cst_134 {dimension_numbers = #tpu.dot_dimension_numbers<[1], [0], [0], [1], [0, 0, 1, 1], [], []>} : vector<16x128xbf16>, vector<128x128xbf16>, vector<16x128xf32> -> vector<16x128xf32>
    %c0_135 = arith.constant 0 : index
    %c0_136 = arith.constant 0 : index
    %160 = vector.load %arg13[%c0_135, %c0_136] : memref<1x128xf32, #tpu.memory_space<vmem>>, vector<1x128xf32>
    %161 = vector.broadcast %160 : vector<1x128xf32> to vector<16x128xf32>
    %162 = arith.addf %159, %161 : vector<16x128xf32>
    %c0_137 = arith.constant 0 : index
    %c0_138 = arith.constant 0 : index
    %163 = vector.load %arg14[%c0_137, %c0_138] : memref<16x128xf32, #tpu.memory_space<vmem>>, vector<16x128xf32>
    tpu.vector_store %arg14[%c0_137, %c0_138], %162 {strides = array<i32>} : memref<16x128xf32, #tpu.memory_space<vmem>>, vector<16x128xf32>,
    return
  }
  func.func @transform_0(%arg0: i32) -> (i32, i32, i32) {
    %c0_i32 = arith.constant 0 : i32
    %c0_i32_0 = arith.constant 0 : i32
    %c0_i32_1 = arith.constant 0 : i32
    return %c0_i32, %arg0, %c0_i32_0 : i32, i32, i32
  }
  func.func @transform_1(%arg0: i32) -> (i32, i32) {
    %c0_i32 = arith.constant 0 : i32
    %c0_i32_0 = arith.constant 0 : i32
    %c0_i32_1 = arith.constant 0 : i32
    return %c0_i32, %c0_i32_0 : i32, i32
  }
  func.func @transform_2(%arg0: i32) -> (i32, i32) {
    %c0_i32 = arith.constant 0 : i32
    %c0_i32_0 = arith.constant 0 : i32
    %c0_i32_1 = arith.constant 0 : i32
    return %c0_i32, %c0_i32_0 : i32, i32
  }
  func.func @transform_3(%arg0: i32) -> (i32, i32, i32) {
    %c0_i32 = arith.constant 0 : i32
    %c0_i32_0 = arith.constant 0 : i32
    %c0_i32_1 = arith.constant 0 : i32
    %c0_i32_2 = arith.constant 0 : i32
    return %c0_i32, %c0_i32_0, %c0_i32_1 : i32, i32, i32
  }
  func.func @transform_4(%arg0: i32) -> (i32, i32) {
    %c0_i32 = arith.constant 0 : i32
    %c0_i32_0 = arith.constant 0 : i32
    %c0_i32_1 = arith.constant 0 : i32
    return %c0_i32, %c0_i32_0 : i32, i32
  }
  func.func @transform_5(%arg0: i32) -> (i32, i32, i32) {
    %c0_i32 = arith.constant 0 : i32
    %c0_i32_0 = arith.constant 0 : i32
    %c0_i32_1 = arith.constant 0 : i32
    %c0_i32_2 = arith.constant 0 : i32
    return %c0_i32, %c0_i32_0, %c0_i32_1 : i32, i32, i32
  }
  func.func @transform_6(%arg0: i32) -> (i32, i32) {
    %c0_i32 = arith.constant 0 : i32
    %c0_i32_0 = arith.constant 0 : i32
    %c0_i32_1 = arith.constant 0 : i32
    return %c0_i32, %c0_i32_0 : i32, i32
  }
  func.func @transform_7(%arg0: i32) -> (i32, i32, i32) {
    %c0_i32 = arith.constant 0 : i32
    %c0_i32_0 = arith.constant 0 : i32
    %c0_i32_1 = arith.constant 0 : i32
    %c0_i32_2 = arith.constant 0 : i32
    return %c0_i32, %c0_i32_0, %c0_i32_1 : i32, i32, i32
  }
  func.func @transform_8(%arg0: i32) -> (i32, i32) {
    %c0_i32 = arith.constant 0 : i32
    %c0_i32_0 = arith.constant 0 : i32
    %c0_i32_1 = arith.constant 0 : i32
    return %c0_i32, %c0_i32_0 : i32, i32
  }
  func.func @transform_9(%arg0: i32) -> (i32, i32, i32) {
    %c0_i32 = arith.constant 0 : i32
    %c0_i32_0 = arith.constant 0 : i32
    %c0_i32_1 = arith.constant 0 : i32
    %c0_i32_2 = arith.constant 0 : i32
    return %c0_i32, %c0_i32_0, %c0_i32_1 : i32, i32, i32
  }
  func.func @transform_10(%arg0: i32) -> (i32, i32) {
    %c0_i32 = arith.constant 0 : i32
    %c0_i32_0 = arith.constant 0 : i32
    %c0_i32_1 = arith.constant 0 : i32
    return %c0_i32, %c0_i32_0 : i32, i32
  }
  func.func @transform_11(%arg0: i32) -> (i32, i32) {
    %c0_i32 = arith.constant 0 : i32
    %c0_i32_0 = arith.constant 0 : i32
    %c0_i32_1 = arith.constant 0 : i32
    return %c0_i32, %c0_i32_0 : i32, i32
  }
  func.func @transform_12(%arg0: i32) -> (i32, i32) {
    %c0_i32 = arith.constant 0 : i32
    %c0_i32_0 = arith.constant 0 : i32
    %c0_i32_1 = arith.constant 0 : i32
    return %c0_i32, %c0_i32_0 : i32, i32
  }
  func.func @transform_13(%arg0: i32) -> (i32, i32) {
    %c0_i32 = arith.constant 0 : i32
    %c0_i32_0 = arith.constant 0 : i32
    return %arg0, %c0_i32 : i32, i32
  }
}

</mosaic_0001>

<bundles_post_ra>
// kernel: cnn3_forward.1
= control target key start
LH: loop header
LB: loop body
LE: loop exit
PB: predicated region body
PF: predicated region fallthrough
CT: control target
= control target key end

     0   :  { %vm840_vm0 = vcmask 1045504   ;;  %vm755_vm1 = vcmask 1014784   ;;  %vm1871_vm2 = vcmask 1043456   ;;  %vm1872_vm3 = vcmask 785412   ;;  %s24678_s1 = inlined_call_operand.vmem [shape: bf16[252,512], index: 1, kind: input, shape index: {}]   ;;  %s24679_s0 = inlined_call_operand.vmem [shape: bf16[28,16,252], index: 0, kind: input, shape index: {}]   ;;  %s24680_s3 = inlined_call_operand.vmem [shape: bf16[3,224,512], index: 3, kind: input, shape index: {}]   ;;  %s24681_s2 = inlined_call_operand.vmem [shape: f32[1,512], index: 2, kind: input, shape index: {}]   ;;  %s24682_s5 = inlined_call_operand.vmem [shape: bf16[3,224,448], index: 5, kind: input, shape index: {}]   ;;  %s24683_s4 = inlined_call_operand.vmem [shape: f32[1,512], index: 4, kind: input, shape index: {}]   ;;  %s24684_s7 = inlined_call_operand.vmem [shape: bf16[3,448,448], index: 7, kind: input, shape index: {}]   ;;  %s24685_s6 = inlined_call_operand.vmem [shape: f32[1,448], index: 6, kind: input, shape index: {}]   ;;  %s24686_s9 = inlined_call_operand.vmem [shape: bf16[7,448,128], index: 9, kind: input, shape index: {}]   ;;  %s24687_s8 = inlined_call_operand.vmem [shape: f32[1,448], index: 8, kind: input, shape index: {}]   ;;  %s24688_s11 = inlined_call_operand.vmem [shape: bf16[128,128], index: 11, kind: input, shape index: {}]   ;;  %s24689_s10 = inlined_call_operand.vmem [shape: f32[1,128], index: 10, kind: input, shape index: {}]   ;;  %s24690_s12 = inlined_call_operand.vmem [shape: f32[1,128], index: 12, kind: input, shape index: {}]   ;;  %s24691_s13 = inlined_call_operand.vmem [shape: f32[16,128], index: 13, kind: output, shape index: {}]  }
   0x1   :  { %v16461_v0 = vld [vmem:[%s24678_s1 + $0xe4] ss:$16 sps:$4 sm:$0xff]   ;;  %v16463_v1 = vld [vmem:[%s24678_s1 + $0xec] ss:$16 sps:$4 sm:$0xff]   ;;  %v16465_v2 = vld [vmem:[%s24678_s1 + $0xe0] ss:$16 sps:$4 sm:$0xff]  }
   0x2   :  { %853 = vmatprep.subr.bf16.mxu0 %v16461_v0  ;;  %v16466_v3 = vld [vmem:[%s24678_s1 + $0xe8] ss:$16 sps:$4 sm:$0xff]   ;;  %1166 = vmatprep.subr.bf16.mxu1 %v16463_v1  ;;  %v16467_v4 = vld [vmem:[%s24678_s1 + $0xc4] ss:$16 sps:$4 sm:$0xff]   ;;  %v16469_v5 = vld [vmem:[%s24678_s1 + $0xcc] ss:$16 sps:$4 sm:$0xff]  }
   0x3   :  { %854 = vmatpush1.bf16.msra.mxu0 %v16465_v2  ;;  %1167 = vmatpush1.bf16.msra.mxu1 %v16466_v3  ;;  %v16471_v6 = vld [vmem:[%s24678_s1 + $0xc0] ss:$16 sps:$4 sm:$0xff]   ;;  %v16472_v7 = vld [vmem:[%s24678_s1 + $0xc8] ss:$16 sps:$4 sm:$0xff]   ;;  %v16473_v8 = vld [vmem:[%s24678_s1 + $0xa4] ss:$16 sps:$4 sm:$0xff]  }
   0x4   :  { %855 = vmatprep.subr.bf16.mxu0 %v16467_v4  ;;  %1168 = vmatprep.subr.bf16.mxu1 %v16469_v5  ;;  %v16475_v9 = vld [vmem:[%s24678_s1 + $0xac] ss:$16 sps:$4 sm:$0xff]   ;;  %v16477_v10 = vld [vmem:[%s24678_s1 + $0xa0] ss:$16 sps:$4 sm:$0xff]   ;;  %v16478_v11 = vld [vmem:[%s24678_s1 + $0xa8] ss:$16 sps:$4 sm:$0xff]  }
   0x5   :  { %v16479_v12 = vld [vmem:[%s24678_s1 + $0x84] ss:$16 sps:$4 sm:$0xff]   ;;  %v16481_v13 = vld [vmem:[%s24678_s1 + $0x8c] ss:$16 sps:$4 sm:$0xff]   ;;  %v16483_v14 = vld [vmem:[%s24678_s1 + $0x80] ss:$16 sps:$4 sm:$0xff]  }
   0x6   :  { %v16484_v15 = vld [vmem:[%s24678_s1 + $0x88] ss:$16 sps:$4 sm:$0xff]   ;;  %v16485_v16 = vld [vmem:[%s24678_s1 + $0x64] ss:$16 sps:$4 sm:$0xff]   ;;  %v16487_v17 = vld [vmem:[%s24678_s1 + $0x6c] ss:$16 sps:$4 sm:$0xff]  }
   0x7   :  { %856 = vmatpush1.bf16.msra.mxu0 %v16471_v6  ;;  %1169 = vmatpush1.bf16.msra.mxu1 %v16472_v7  ;;  %v16489_v18 = vld [vmem:[%s24678_s1 + $0x60] ss:$16 sps:$4 sm:$0xff]   ;;  %v16490_v19 = vld [vmem:[%s24678_s1 + $0x68] ss:$16 sps:$4 sm:$0xff]   ;;  %v16491_v20 = vld [vmem:[%s24678_s1 + $0x44] ss:$16 sps:$4 sm:$0xff]  }
   0x8   :  { %857 = vmatprep.subr.bf16.mxu0 %v16473_v8  ;;  %1170 = vmatprep.subr.bf16.mxu1 %v16475_v9  ;;  %v16493_v21 = vld [vmem:[%s24678_s1 + $0x4c] ss:$16 sps:$4 sm:$0xff]   ;;  %v16495_v22 = vld [vmem:[%s24678_s1 + $0x40] ss:$16 sps:$4 sm:$0xff]   ;;  %v16496_v23 = vld [vmem:[%s24678_s1 + $0x48] ss:$16 sps:$4 sm:$0xff]  }
   0x9   :  { %v16497_v24 = vld [vmem:[%s24678_s1 + $0x24] ss:$16 sps:$4 sm:$0xff]   ;;  %v16499_v25 = vld [vmem:[%s24678_s1 + $0x2c] ss:$16 sps:$4 sm:$0xff]   ;;  %v16501_v26 = vld [vmem:[%s24678_s1 + $0x20] ss:$16 sps:$4 sm:$0xff]  }
   0xa   :  { %v16502_v27 = vld [vmem:[%s24678_s1 + $0x28] ss:$16 sps:$4 sm:$0xff]   ;;  %v16503_v28 = vld [vmem:[%s24678_s1 + $0x4] ss:$16 sps:$4 sm:$0xff]   ;;  %v16505_v29 = vld [vmem:[%s24678_s1 + $0xc] ss:$16 sps:$4 sm:$0xff]  }
   0xb   :  { %858 = vmatpush1.bf16.msra.mxu0 %v16477_v10  ;;  %1171 = vmatpush1.bf16.msra.mxu1 %v16478_v11  ;;  %v16507_v30 = vld [vmem:[%s24678_s1] ss:$16 sps:$4 sm:$0xff]   ;;  %v16508_v31 = vld [vmem:[%s24678_s1 + $0x8] ss:$16 sps:$4 sm:$0xff]   ;;  %v16515_v36 = vld [vmem:[%s24678_s1 + $0x1c4] ss:$16 sps:$4 sm:$0xff]  }
   0xc   :  { %859 = vmatprep.subr.bf16.mxu0 %v16479_v12  ;;  %1172 = vmatprep.subr.bf16.mxu1 %v16481_v13  ;;  %v16509_v32 = vld [vmem:[%s24678_s1 + $0x1e4] ss:$16 sps:$4 sm:$0x3f]   ;;  %v16511_v33 = vld [vmem:[%s24678_s1 + $0x1ec] ss:$16 sps:$4 sm:$0x3f]   ;;  %vm18778_vm4 = vmor %vm1872_vm3, %vm1871_vm2 }
   0xd   :  { %v16513_v34 = vld [vmem:[%s24678_s1 + $0x1e0] ss:$16 sps:$4 sm:$0x3f]   ;;  %v16514_v35 = vld [vmem:[%s24678_s1 + $0x1e8] ss:$16 sps:$4 sm:$0x3f]  }
   0xe   :  { %v842_v37 = vsel %vm840_vm0, %v16513_v34, 0  ;;  %v848_v38 = vsel %vm840_vm0, %v16514_v35, 0  ;;  %v16517_v39 = vld [vmem:[%s24678_s1 + $0x1cc] ss:$16 sps:$4 sm:$0xff]   ;;  %v16519_v40 = vld [vmem:[%s24678_s1 + $0x1c0] ss:$16 sps:$4 sm:$0xff]  }
   0xf   :  { %860 = vmatpush1.bf16.msra.mxu0 %v16483_v14  ;;  %1173 = vmatpush1.bf16.msra.mxu1 %v16484_v15  ;;  %v16520_v41 = vld [vmem:[%s24678_s1 + $0x1c8] ss:$16 sps:$4 sm:$0xff]   ;;  %v16521_v42 = vld [vmem:[%s24678_s1 + $0x1a4] ss:$16 sps:$4 sm:$0xff]   ;;  %v16523_v43 = vld [vmem:[%s24678_s1 + $0x1ac] ss:$16 sps:$4 sm:$0xff]  }
  0x10   :  { %861 = vmatprep.subr.bf16.mxu0 %v16485_v16  ;;  %1174 = vmatprep.subr.bf16.mxu1 %v16487_v17  ;;  %v16525_v44 = vld [vmem:[%s24678_s1 + $0x1a0] ss:$16 sps:$4 sm:$0xff]   ;;  %v16526_v45 = vld [vmem:[%s24678_s1 + $0x1a8] ss:$16 sps:$4 sm:$0xff]   ;;  %v16527_v46 = vld [vmem:[%s24678_s1 + $0x184] ss:$16 sps:$4 sm:$0xff]  }
  0x11   :  { %v16529_v47 = vld [vmem:[%s24678_s1 + $0x18c] ss:$16 sps:$4 sm:$0xff]   ;;  %v16531_v48 = vld [vmem:[%s24678_s1 + $0x180] ss:$16 sps:$4 sm:$0xff]   ;;  %v16532_v49 = vld [vmem:[%s24678_s1 + $0x188] ss:$16 sps:$4 sm:$0xff]  }
  0x12   :  { %v16559_v50 = vld [vmem:[%s24679_s0 + $0x4] ss:$8 sps:$4 sm:$0xff]   ;;  %v16537_v53 = vld [vmem:[%s24678_s1 + $0x160] ss:$16 sps:$4 sm:$0xff]   ;;  %v16538_v54 = vld [vmem:[%s24678_s1 + $0x168] ss:$16 sps:$4 sm:$0xff]  }
  0x13   :  { %862 = vmatpush1.bf16.msra.mxu0 %v16489_v18  ;;  %1175 = vmatpush1.bf16.msra.mxu1 %v16490_v19  ;;  %v16533_v51 = vld [vmem:[%s24678_s1 + $0x164] ss:$16 sps:$4 sm:$0xff]   ;;  %v16535_v52 = vld [vmem:[%s24678_s1 + $0x16c] ss:$16 sps:$4 sm:$0xff]   ;;  %v16543_v57 = vld [vmem:[%s24678_s1 + $0x140] ss:$16 sps:$4 sm:$0xff]  }
  0x14   :  { %863 = vmatprep.subr.bf16.mxu0 %v16491_v20  ;;  %1176 = vmatprep.subr.bf16.mxu1 %v16493_v21  ;;  %v16539_v55 = vld [vmem:[%s24678_s1 + $0x144] ss:$16 sps:$4 sm:$0xff]   ;;  %v16541_v56 = vld [vmem:[%s24678_s1 + $0x14c] ss:$16 sps:$4 sm:$0xff]   ;;  %v16544_v58 = vld [vmem:[%s24678_s1 + $0x148] ss:$16 sps:$4 sm:$0xff]  }
  0x15   :  { %14031 = vmatprep.mubr.msk.bf16.mxu0 %vm755_vm1, %v16559_v50  ;;  %14060 = vmatprep.mubr.msk.bf16.mxu1 %vm755_vm1, %v16559_v50  ;;  %v16545_v59 = vld [vmem:[%s24678_s1 + $0x124] ss:$16 sps:$4 sm:$0xff]   ;;  %v16547_v60 = vld [vmem:[%s24678_s1 + $0x12c] ss:$16 sps:$4 sm:$0xff]   ;;  %v16549_v61 = vld [vmem:[%s24678_s1 + $0x120] ss:$16 sps:$4 sm:$0xff]  }
  0x16   :  { %v16550_v62 = vld [vmem:[%s24678_s1 + $0x128] ss:$16 sps:$4 sm:$0xff]   ;;  %v16551_v63 = vld [vmem:[%s24678_s1 + $0x104] ss:$16 sps:$4 sm:$0xff]   ;;  %v16553_v0 = vld [vmem:[%s24678_s1 + $0x10c] ss:$16 sps:$4 sm:$0xff]  }
  0x17   :  { %864 = vmatpush1.bf16.msra.mxu0 %v16495_v22  ;;  %1177 = vmatpush1.bf16.msra.mxu1 %v16496_v23  ;;  %v16555_v1 = vld [vmem:[%s24678_s1 + $0x100] ss:$16 sps:$4 sm:$0xff]   ;;  %v16556_v2 = vld [vmem:[%s24678_s1 + $0x108] ss:$16 sps:$4 sm:$0xff]   ;;  %v16601_v4 = vld [vmem:[%s24680_s3 + $0x2a4] ss:$16 sps:$4 sm:$0xff]  }
  0x18   :  { %865 = vmatprep.subr.bf16.mxu0 %v16497_v24  ;;  %1178 = vmatprep.subr.bf16.mxu1 %v16499_v25  ;;  %v16557_v3 = vld [vmem:[%s24679_s0] ss:$8 sps:$4 sm:$0xff]   ;;  %v16560_v5 = vld [vmem:[%s24679_s0 + $0x14] ss:$8 sps:$4 sm:$0xff]   ;;  %v16562_v13 = vld [vmem:[%s24679_s0 + $0x10] ss:$8 sps:$4 sm:$0xff]  }
  0x19   :  { %v16604_v6 = vld [vmem:[%s24680_s3 + $0x2ac] ss:$16 sps:$4 sm:$0xff]   ;;  %v16599_v7 = vld [vmem:[%s24680_s3 + $0x2a0] ss:$16 sps:$4 sm:$0xff]   ;;  %v16602_v8 = vld [vmem:[%s24680_s3 + $0x2a8] ss:$16 sps:$4 sm:$0xff]  }
  0x1a   :  { %v16611_v9 = vld [vmem:[%s24680_s3 + $0x280] ss:$16 sps:$4 sm:$0xff]   ;;  %v16613_v10 = vld [vmem:[%s24680_s3 + $0x284] ss:$16 sps:$4 sm:$0xff]   ;;  %v16614_v11 = vld [vmem:[%s24680_s3 + $0x288] ss:$16 sps:$4 sm:$0xff]  }
  0x1b   :  { %866 = vmatpush1.bf16.msra.mxu0 %v16501_v26  ;;  %1179 = vmatpush1.bf16.msra.mxu1 %v16502_v27  ;;  %v16616_v12 = vld [vmem:[%s24680_s3 + $0x28c] ss:$16 sps:$4 sm:$0xff]   ;;  %v16623_v15 = vld [vmem:[%s24680_s3 + $0x260] ss:$16 sps:$4 sm:$0xff]   ;;  %v16625_v16 = vld [vmem:[%s24680_s3 + $0x264] ss:$16 sps:$4 sm:$0xff]  }
  0x1c   :  { %867 = vmatprep.subr.bf16.mxu0 %v16503_v28  ;;  %1180 = vmatprep.subr.bf16.mxu1 %v16505_v29  ;;  %v16563_v14 = vld [vmem:[%s24679_s0 + $0x24] ss:$8 sps:$4 sm:$0xff]   ;;  %v16626_v17 = vld [vmem:[%s24680_s3 + $0x268] ss:$16 sps:$4 sm:$0xff]   ;;  %v16566_v20 = vld [vmem:[%s24679_s0 + $0x34] ss:$8 sps:$4 sm:$0xff]  }
  0x1d   :  { %v16628_v18 = vld [vmem:[%s24680_s3 + $0x26c] ss:$16 sps:$4 sm:$0xff]   ;;  %v16565_v19 = vld [vmem:[%s24679_s0 + $0x20] ss:$8 sps:$4 sm:$0xff]   ;;  %v16568_v21 = vld [vmem:[%s24679_s0 + $0x30] ss:$8 sps:$4 sm:$0xff]  }
  0x1e   :  { %v16569_v22 = vld [vmem:[%s24679_s0 + $0x44] ss:$8 sps:$4 sm:$0xff]   ;;  %v16635_v23 = vld [vmem:[%s24680_s3 + $0x240] ss:$16 sps:$4 sm:$0xff]   ;;  %v16638_v25 = vld [vmem:[%s24680_s3 + $0x248] ss:$16 sps:$4 sm:$0xff]  }
  0x1f   :  { %868 = vmatpush1.bf16.msra.mxu0 %v16507_v30  ;;  %1181 = vmatpush1.bf16.msra.mxu1 %v16508_v31  ;;  %v16637_v24 = vld [vmem:[%s24680_s3 + $0x244] ss:$16 sps:$4 sm:$0xff]   ;;  %v16640_v26 = vld [vmem:[%s24680_s3 + $0x24c] ss:$16 sps:$4 sm:$0xff]   ;;  %v16571_v27 = vld [vmem:[%s24679_s0 + $0x40] ss:$8 sps:$4 sm:$0xff]  }
  0x20   :  { %14030 = vmatprep.subr.msk.bf16.mxu0 %vm840_vm0, %v16509_v32  ;;  %14059 = vmatprep.subr.msk.bf16.mxu1 %vm840_vm0, %v16511_v33  ;;  %v16572_v28 = vld [vmem:[%s24679_s0 + $0x54] ss:$8 sps:$4 sm:$0xff]   ;;  %v16574_v29 = vld [vmem:[%s24679_s0 + $0x50] ss:$8 sps:$4 sm:$0xff]   ;;  %v16575_v30 = vld [vmem:[%s24679_s0 + $0x64] ss:$8 sps:$4 sm:$0xff]  }
  0x21   :  { %v16647_v31 = vld [vmem:[%s24680_s3 + $0x220] ss:$16 sps:$4 sm:$0xff]   ;;  %v16649_v32 = vld [vmem:[%s24680_s3 + $0x224] ss:$16 sps:$4 sm:$0xff]   ;;  %v16650_v33 = vld [vmem:[%s24680_s3 + $0x228] ss:$16 sps:$4 sm:$0xff]  }
  0x22   :  { %v16652_v34 = vld [vmem:[%s24680_s3 + $0x22c] ss:$16 sps:$4 sm:$0xff]   ;;  %v16577_v35 = vld [vmem:[%s24679_s0 + $0x60] ss:$8 sps:$4 sm:$0xff]   ;;  %vm2651_vm5 = vcmask 785408   ;;  %vm7374_vm6 = vcmask 523268  }
  0x23   :  { %870 = vmatpush2.bf16.msra.mxu0 %v842_v37  ;;  %1183 = vmatpush2.bf16.msra.mxu1 %v848_v38  ;;  %v16580_v37 = vld [vmem:[%s24679_s0 + $0x70] ss:$8 sps:$4 sm:$0xff]   ;;  %v16581_v38 = vld [vmem:[%s24679_s0 + $0x84] ss:$8 sps:$4 sm:$0xff]   ;;  %vm21669_vm7 = vmor %vm7374_vm6, %vm1871_vm2  ;;  %vm8555_vm8 = vcmask 523264   ;;  %vm18085_vm9 = vmmov 0  }
  0x24   :  { %871 = vmatprep.subr.bf16.mxu0 %v16515_v36  ;;  %1184 = vmatprep.subr.bf16.mxu1 %v16517_v39  ;;  %v16578_v36 = vld [vmem:[%s24679_s0 + $0x74] ss:$8 sps:$4 sm:$0xff]   ;;  %v16659_v39 = vld [vmem:[%s24680_s3 + $0x200] ss:$16 sps:$4 sm:$0xff]   ;;  %v16671_v50 = vld [vmem:[%s24680_s3 + $0x1e8] ss:$16 sps:$4 sm:$0xff]  }
  0x27   :  { %872 = vmatpush2.bf16.msra.mxu0 %v16519_v40  ;;  %1185 = vmatpush2.bf16.msra.mxu1 %v16520_v41  ;;  %v16661_v40 = vld [vmem:[%s24680_s3 + $0x204] ss:$16 sps:$4 sm:$0xff]   ;;  %v16662_v41 = vld [vmem:[%s24680_s3 + $0x208] ss:$16 sps:$4 sm:$0xff]  }
  0x28   :  { %873 = vmatprep.subr.bf16.mxu0 %v16521_v42  ;;  %1186 = vmatprep.subr.bf16.mxu1 %v16523_v43  ;;  %v16664_v42 = vld [vmem:[%s24680_s3 + $0x20c] ss:$16 sps:$4 sm:$0xff]   ;;  %v16583_v43 = vld [vmem:[%s24679_s0 + $0x80] ss:$8 sps:$4 sm:$0xff]  }
  0x2b   :  { %874 = vmatpush2.bf16.msra.mxu0 %v16525_v44  ;;  %1187 = vmatpush2.bf16.msra.mxu1 %v16526_v45  ;;  %v16584_v44 = vld [vmem:[%s24679_s0 + $0x94] ss:$8 sps:$4 sm:$0xff]   ;;  %v16586_v45 = vld [vmem:[%s24679_s0 + $0x90] ss:$8 sps:$4 sm:$0xff]  }
  0x2c   :  { %875 = vmatprep.subr.bf16.mxu0 %v16527_v46  ;;  %1188 = vmatprep.subr.bf16.mxu1 %v16529_v47  ;;  %v16670_v46 = vld [vmem:[%s24680_s3 + $0x1e4] ss:$16 sps:$4 sm:$0xff]   ;;  %v16673_v47 = vld [vmem:[%s24680_s3 + $0x1ec] ss:$16 sps:$4 sm:$0xff]  }
  0x2f   :  { %876 = vmatpush2.bf16.msra.mxu0 %v16531_v48  ;;  %1189 = vmatpush2.bf16.msra.mxu1 %v16532_v49  ;;  %v16587_v48 = vld [vmem:[%s24679_s0 + $0xa4] ss:$8 sps:$4 sm:$0xff]   ;;  %v16668_v49 = vld [vmem:[%s24680_s3 + $0x1e0] ss:$16 sps:$4 sm:$0xff]  }
  0x30   :  { %877 = vmatprep.subr.bf16.mxu0 %v16533_v51  ;;  %1190 = vmatprep.subr.bf16.mxu1 %v16535_v52  ;;  %v16679_v51 = vld [vmem:[%s24680_s3 + $0x1c4] ss:$16 sps:$4 sm:$0xff]   ;;  %v16682_v52 = vld [vmem:[%s24680_s3 + $0x1cc] ss:$16 sps:$4 sm:$0xff]  }
  0x33   :  { %878 = vmatpush2.bf16.msra.mxu0 %v16537_v53  ;;  %1191 = vmatpush2.bf16.msra.mxu1 %v16538_v54  ;;  %v16677_v53 = vld [vmem:[%s24680_s3 + $0x1c0] ss:$16 sps:$4 sm:$0xff]   ;;  %v16680_v54 = vld [vmem:[%s24680_s3 + $0x1c8] ss:$16 sps:$4 sm:$0xff]  }
  0x34   :  { %879 = vmatprep.subr.bf16.mxu0 %v16539_v55  ;;  %1192 = vmatprep.subr.bf16.mxu1 %v16541_v56  ;;  %v16589_v55 = vld [vmem:[%s24679_s0 + $0xa0] ss:$8 sps:$4 sm:$0xff]   ;;  %v16685_v56 = vld [vmem:[%s24680_s3 + $0x364] ss:$16 sps:$4 sm:$0xff]  }
  0x37   :  { %880 = vmatpush2.bf16.msra.mxu0 %v16543_v57  ;;  %1193 = vmatpush2.bf16.msra.mxu1 %v16544_v58  ;;  %v16688_v57 = vld [vmem:[%s24680_s3 + $0x36c] ss:$16 sps:$4 sm:$0xff]  }
  0x38   :  { %881 = vmatprep.subr.bf16.mxu0 %v16545_v59  ;;  %1194 = vmatprep.subr.bf16.mxu1 %v16547_v60  ;;  %v16590_v58 = vld [vmem:[%s24679_s0 + $0xb4] ss:$8 sps:$4 sm:$0xff]   ;;  %v16683_v59 = vld [vmem:[%s24680_s3 + $0x360] ss:$16 sps:$4 sm:$0xff]   ;;  %v16686_v60 = vld [vmem:[%s24680_s3 + $0x368] ss:$16 sps:$4 sm:$0xff]  }
  0x3b   :  { %882 = vmatpush2.bf16.msra.mxu0 %v16549_v61  ;;  %1195 = vmatpush2.bf16.msra.mxu1 %v16550_v62  ;;  %v16694_v61 = vld [vmem:[%s24680_s3 + $0x344] ss:$16 sps:$4 sm:$0xff]   ;;  %v16697_v62 = vld [vmem:[%s24680_s3 + $0x34c] ss:$16 sps:$4 sm:$0xff]  }
  0x3c   :  { %883 = vmatprep.subr.bf16.mxu0 %v16551_v63  ;;  %1196 = vmatprep.subr.bf16.mxu1 %v16553_v0  ;;  %v16692_v63 = vld [vmem:[%s24680_s3 + $0x340] ss:$16 sps:$4 sm:$0xff]   ;;  %v16695_v0 = vld [vmem:[%s24680_s3 + $0x348] ss:$16 sps:$4 sm:$0xff]  }
  0x3f   :  { %884 = vmatpush2.bf16.msra.mxu0 %v16555_v1  ;;  %1197 = vmatpush2.bf16.msra.mxu1 %v16556_v2  ;;  %v16700_v1 = vld [vmem:[%s24680_s3 + $0x324] ss:$16 sps:$4 sm:$0xff]   ;;  %v16703_v2 = vld [vmem:[%s24680_s3 + $0x32c] ss:$16 sps:$4 sm:$0xff]  }
  0x40   :  { %2694 = vmatprep.subr.bf16.mxu0 %v16601_v4  ;;  %2867 = vmatprep.subr.bf16.mxu1 %v16604_v6  ;;  %v16701_v4 = vld [vmem:[%s24680_s3 + $0x328] ss:$16 sps:$4 sm:$0xff]   ;;  %v16593_v6 = vld [vmem:[%s24679_s0 + $0xc4] ss:$8 sps:$4 sm:$0xff]  }
  0x42   :  { %886 = vmatmul.mubr.bf16.vlgmr.msra.gmra.mxu0 %v16557_v3  ;;  %1199 = vmatmul.mubr.bf16.vlgmr.msra.gmra.mxu1 %v16557_v3  ;;  %v16698_v3 = vld [vmem:[%s24680_s3 + $0x320] ss:$16 sps:$4 sm:$0xff]  }
  0x43   :  { %14032 = vmatprep.mubr.msk.bf16.mxu0 %vm755_vm1, %v16560_v5  ;;  %14061 = vmatprep.mubr.msk.bf16.mxu1 %vm755_vm1, %v16560_v5  ;;  %v16592_v5 = vld [vmem:[%s24679_s0 + $0xb0] ss:$8 sps:$4 sm:$0xff]  }
  0x44   :  { %2695 = vmatpush1.bf16.msra.mxu0 %v16599_v7  ;;  %2868 = vmatpush1.bf16.msra.mxu1 %v16602_v8  ;;  %v16709_v7 = vld [vmem:[%s24680_s3 + $0x304] ss:$16 sps:$4 sm:$0xff]   ;;  %v16712_v8 = vld [vmem:[%s24680_s3 + $0x30c] ss:$16 sps:$4 sm:$0xff]  }
  0x45   :  { %2696 = vmatprep.subr.bf16.mxu0 %v16613_v10  ;;  %2869 = vmatprep.subr.bf16.mxu1 %v16616_v12  ;;  %v16710_v10 = vld [vmem:[%s24680_s3 + $0x308] ss:$16 sps:$4 sm:$0xff]   ;;  %v16718_v12 = vld [vmem:[%s24680_s3 + $0x2ec] ss:$16 sps:$4 sm:$0xff]  }
  0x48   :  { %2697 = vmatpush1.bf16.msra.mxu0 %v16611_v9  ;;  %2870 = vmatpush1.bf16.msra.mxu1 %v16614_v11  ;;  %v16707_v9 = vld [vmem:[%s24680_s3 + $0x300] ss:$16 sps:$4 sm:$0xff]   ;;  %v16715_v11 = vld [vmem:[%s24680_s3 + $0x2e4] ss:$16 sps:$4 sm:$0xff]  }
  0x49   :  { %2698 = vmatprep.subr.bf16.mxu0 %v16625_v16  ;;  %2871 = vmatprep.subr.bf16.mxu1 %v16628_v18  ;;  %v16596_v16 = vld [vmem:[%s24679_s0 + $0xd4] ss:$8 sps:$4 sm:$0xff]  }
  0x4a   :  { %896 = vmatmul.mubr.bf16.gmra.mxu0 %v16562_v13  ;;  %1209 = vmatmul.mubr.bf16.gmra.mxu1 %v16562_v13  ;;  %v16713_v13 = vld [vmem:[%s24680_s3 + $0x2e0] ss:$16 sps:$4 sm:$0xff]   ;;  %v16724_v18 = vld [vmem:[%s24680_s3 + $0x2cc] ss:$16 sps:$4 sm:$0xff]  }
  0x4b   :  { %14033 = vmatprep.mubr.msk.bf16.mxu0 %vm755_vm1, %v16563_v14  ;;  %14062 = vmatprep.mubr.msk.bf16.mxu1 %vm755_vm1, %v16563_v14  ;;  %v16716_v14 = vld [vmem:[%s24680_s3 + $0x2e8] ss:$16 sps:$4 sm:$0xff]  }
  0x4c   :  { %2699 = vmatpush1.bf16.msra.mxu0 %v16623_v15  ;;  %2872 = vmatpush1.bf16.msra.mxu1 %v16626_v17  ;;  %v16595_v15 = vld [vmem:[%s24679_s0 + $0xc0] ss:$8 sps:$4 sm:$0xff]   ;;  %v16721_v17 = vld [vmem:[%s24680_s3 + $0x2c4] ss:$16 sps:$4 sm:$0xff]  }
  0x4d   :  { %2700 = vmatprep.subr.bf16.mxu0 %v16637_v24  ;;  %2873 = vmatprep.subr.bf16.mxu1 %v16640_v26  ;;  %v16608_v24 = vld [vmem:[%s24679_s0 + $0xf4] ss:$8 sps:$4 sm:$0xff]   ;;  %v16617_v26 = vld [vmem:[%s24679_s0 + $0x104] ss:$8 sps:$4 sm:$0xff]  }
  0x50   :  { %2701 = vmatpush1.bf16.msra.mxu0 %v16635_v23  ;;  %2874 = vmatpush1.bf16.msra.mxu1 %v16638_v25  ;;  %v16607_v23 = vld [vmem:[%s24679_s0 + $0xe0] ss:$8 sps:$4 sm:$0xff]   ;;  %v16610_v25 = vld [vmem:[%s24679_s0 + $0xf0] ss:$8 sps:$4 sm:$0xff]  }
  0x51   :  { %2702 = vmatprep.subr.bf16.mxu0 %v16649_v32  ;;  %2875 = vmatprep.subr.bf16.mxu1 %v16652_v34  ;;  %v16632_v32 = vld [vmem:[%s24679_s0 + $0x134] ss:$8 sps:$4 sm:$0xff]   ;;  %v16641_v34 = vld [vmem:[%s24679_s0 + $0x144] ss:$8 sps:$4 sm:$0xff]  }
  0x52   :  { %906 = vmatmul.mubr.bf16.gmra.mxu0 %v16565_v19  ;;  %1219 = vmatmul.mubr.bf16.gmra.mxu1 %v16565_v19  ;;  %v16719_v19 = vld [vmem:[%s24680_s3 + $0x2c0] ss:$16 sps:$4 sm:$0xff]  }
  0x53   :  { %14034 = vmatprep.mubr.msk.bf16.mxu0 %vm755_vm1, %v16566_v20  ;;  %14063 = vmatprep.mubr.msk.bf16.mxu1 %vm755_vm1, %v16566_v20  ;;  %v16722_v20 = vld [vmem:[%s24680_s3 + $0x2c8] ss:$16 sps:$4 sm:$0xff]  }
  0x54   :  { %2703 = vmatpush1.bf16.msra.mxu0 %v16647_v31  ;;  %2876 = vmatpush1.bf16.msra.mxu1 %v16650_v33  ;;  %v16631_v31 = vld [vmem:[%s24679_s0 + $0x120] ss:$8 sps:$4 sm:$0xff]   ;;  %v16634_v33 = vld [vmem:[%s24679_s0 + $0x130] ss:$8 sps:$4 sm:$0xff]  }
  0x55   :  { %2704 = vmatprep.subr.bf16.mxu0 %v16661_v40  ;;  %2877 = vmatprep.subr.bf16.mxu1 %v16664_v42  ;;  %v16656_v40 = vld [vmem:[%s24679_s0 + $0x174] ss:$8 sps:$4 sm:$0xff]   ;;  %v167_v42 = vlaneseq }
  0x58   :  { %2705 = vmatpush1.bf16.msra.mxu0 %v16659_v39  ;;  %2878 = vmatpush1.bf16.msra.mxu1 %v16662_v41  ;;  %v16655_v39 = vld [vmem:[%s24679_s0 + $0x160] ss:$8 sps:$4 sm:$0xff]   ;;  %v16658_v41 = vld [vmem:[%s24679_s0 + $0x170] ss:$8 sps:$4 sm:$0xff]  }
  0x59   :  { %2706 = vmatprep.subr.bf16.mxu0 %v16670_v46  ;;  %2879 = vmatprep.subr.bf16.mxu1 %v16673_v47  ;;  %v16667_v46 = vld [vmem:[%s24679_s0 + $0x180] ss:$8 sps:$4 sm:$0xff]  }
  0x5a   :  { %916 = vmatmul.mubr.bf16.gmra.mxu0 %v16568_v21  ;;  %1229 = vmatmul.mubr.bf16.gmra.mxu1 %v16568_v21  ;;  %v16598_v21 = vld [vmem:[%s24679_s0 + $0xd0] ss:$8 sps:$4 sm:$0xff]  }
  0x5b   :  { %14035 = vmatprep.mubr.msk.bf16.mxu0 %vm755_vm1, %v16569_v22  ;;  %14064 = vmatprep.mubr.msk.bf16.mxu1 %vm755_vm1, %v16569_v22  ;;  %v16605_v22 = vld [vmem:[%s24679_s0 + $0xe4] ss:$8 sps:$4 sm:$0xff]  }
  0x5c   :  { %2707 = vmatpush1.bf16.msra.mxu0 %v16668_v49  ;;  %2880 = vmatpush1.bf16.msra.mxu1 %v16671_v50  ;;  %v16674_v49 = vld [vmem:[%s24679_s0 + $0x194] ss:$8 sps:$4 sm:$0xff]  }
  0x5d   :  { %2708 = vmatprep.subr.bf16.mxu0 %v16679_v51  ;;  %2881 = vmatprep.subr.bf16.mxu1 %v16682_v52 }
  0x60   :  { %2709 = vmatpush1.bf16.msra.mxu0 %v16677_v53  ;;  %2882 = vmatpush1.bf16.msra.mxu1 %v16680_v54 }
  0x61   :  { %2714 = vmatprep.subr.bf16.mxu0 %v16685_v56  ;;  %2887 = vmatprep.subr.bf16.mxu1 %v16688_v57 }
  0x62   :  { %926 = vmatmul.mubr.bf16.gmra.mxu0 %v16571_v27  ;;  %1239 = vmatmul.mubr.bf16.gmra.mxu1 %v16571_v27  ;;  %v16619_v27 = vld [vmem:[%s24679_s0 + $0x100] ss:$8 sps:$4 sm:$0xff]  }
  0x63   :  { %14036 = vmatprep.mubr.msk.bf16.mxu0 %vm755_vm1, %v16572_v28  ;;  %14065 = vmatprep.mubr.msk.bf16.mxu1 %vm755_vm1, %v16572_v28  ;;  %v16620_v28 = vld [vmem:[%s24679_s0 + $0x114] ss:$8 sps:$4 sm:$0xff]  }
  0x64   :  { %2715 = vmatpush2.bf16.msra.mxu0 %v16683_v59  ;;  %2888 = vmatpush2.bf16.msra.mxu1 %v16686_v60 }
  0x65   :  { %2716 = vmatprep.subr.bf16.mxu0 %v16694_v61  ;;  %2889 = vmatprep.subr.bf16.mxu1 %v16697_v62 }
  0x68   :  { %2717 = vmatpush2.bf16.msra.mxu0 %v16692_v63  ;;  %2890 = vmatpush2.bf16.msra.mxu1 %v16695_v0  ;;  %v16676_v0 = vld [vmem:[%s24679_s0 + $0x190] ss:$8 sps:$4 sm:$0xff]  }
  0x69   :  { %2718 = vmatprep.subr.bf16.mxu0 %v16700_v1  ;;  %2891 = vmatprep.subr.bf16.mxu1 %v16703_v2  ;;  %v16689_v1 = vld [vmem:[%s24679_s0 + $0x1a4] ss:$8 sps:$4 sm:$0xff]  }
  0x6a   :  { %936 = vmatmul.mubr.bf16.gmra.mxu0 %v16574_v29  ;;  %1249 = vmatmul.mubr.bf16.gmra.mxu1 %v16574_v29  ;;  %v16622_v29 = vld [vmem:[%s24679_s0 + $0x110] ss:$8 sps:$4 sm:$0xff]  }
  0x6b   :  { %14037 = vmatprep.mubr.msk.bf16.mxu0 %vm755_vm1, %v16575_v30  ;;  %14066 = vmatprep.mubr.msk.bf16.mxu1 %vm755_vm1, %v16575_v30  ;;  %v16629_v30 = vld [vmem:[%s24679_s0 + $0x124] ss:$8 sps:$4 sm:$0xff]  }
  0x6c   :  { %2719 = vmatpush2.bf16.msra.mxu0 %v16698_v3  ;;  %2892 = vmatpush2.bf16.msra.mxu1 %v16701_v4 }
  0x6d   :  { %2720 = vmatprep.subr.bf16.mxu0 %v16709_v7  ;;  %2893 = vmatprep.subr.bf16.mxu1 %v16712_v8 }
  0x70   :  { %2721 = vmatpush2.bf16.msra.mxu0 %v16707_v9  ;;  %2894 = vmatpush2.bf16.msra.mxu1 %v16710_v10 }
  0x71   :  { %2722 = vmatprep.subr.bf16.mxu0 %v16715_v11  ;;  %2895 = vmatprep.subr.bf16.mxu1 %v16718_v12 }
  0x72   :  { %946 = vmatmul.mubr.bf16.gmra.mxu0 %v16577_v35  ;;  %1259 = vmatmul.mubr.bf16.gmra.mxu1 %v16577_v35  ;;  %v16643_v35 = vld [vmem:[%s24679_s0 + $0x140] ss:$8 sps:$4 sm:$0xff]  }
  0x73   :  { %14038 = vmatprep.mubr.msk.bf16.mxu0 %vm755_vm1, %v16578_v36  ;;  %14067 = vmatprep.mubr.msk.bf16.mxu1 %vm755_vm1, %v16578_v36  ;;  %v16644_v36 = vld [vmem:[%s24679_s0 + $0x154] ss:$8 sps:$4 sm:$0xff]  }
  0x74   :  { %2723 = vmatpush2.bf16.msra.mxu0 %v16713_v13  ;;  %2896 = vmatpush2.bf16.msra.mxu1 %v16716_v14 }
  0x75   :  { %2724 = vmatprep.subr.bf16.mxu0 %v16721_v17  ;;  %2897 = vmatprep.subr.bf16.mxu1 %v16724_v18 }
  0x78   :  { %2725 = vmatpush2.bf16.msra.mxu0 %v16719_v19  ;;  %2898 = vmatpush2.bf16.msra.mxu1 %v16722_v20 }
  0x7a   :  { %956 = vmatmul.mubr.bf16.gmra.mxu0 %v16580_v37  ;;  %1269 = vmatmul.mubr.bf16.gmra.mxu1 %v16580_v37  ;;  %v16646_v37 = vld [vmem:[%s24679_s0 + $0x150] ss:$8 sps:$4 sm:$0xff]  }
  0x7b   :  { %14039 = vmatprep.mubr.msk.bf16.mxu0 %vm755_vm1, %v16581_v38  ;;  %14068 = vmatprep.mubr.msk.bf16.mxu1 %vm755_vm1, %v16581_v38  ;;  %v16653_v38 = vld [vmem:[%s24679_s0 + $0x164] ss:$8 sps:$4 sm:$0xff]  }
  0x82   :  { %966 = vmatmul.mubr.bf16.gmra.mxu0 %v16583_v43  ;;  %1279 = vmatmul.mubr.bf16.gmra.mxu1 %v16583_v43  ;;  %v16665_v43 = vld [vmem:[%s24679_s0 + $0x184] ss:$8 sps:$4 sm:$0xff]  }
  0x83   :  { %14040 = vmatprep.mubr.msk.bf16.mxu0 %vm755_vm1, %v16584_v44  ;;  %14069 = vmatprep.mubr.msk.bf16.mxu1 %vm755_vm1, %v16584_v44  ;;  %v168_v44 = vshrl.u32 %v167_v42, 7 }
  0x85   :  { %v18718_v47 = vsub.s32 2, %v168_v44  ;;  %v18732_v54 = vsub.s32 1, %v168_v44 }
  0x87   :  { %24706 = vst [vmem:[#allocation6_spill] sm:$0xff] %v18718_v47  ;;  %24707 = vst [vmem:[#allocation7_spill] sm:$0xff] %v18732_v54 }
  0x8a   :  { %976 = vmatmul.mubr.bf16.gmra.mxu0 %v16586_v45  ;;  %1289 = vmatmul.mubr.bf16.gmra.mxu1 %v16586_v45  ;;  %v18713_v45 = vsub.s32 0, %v168_v44 }
  0x8b   :  { %14041 = vmatprep.mubr.msk.bf16.mxu0 %vm755_vm1, %v16587_v48  ;;  %14070 = vmatprep.mubr.msk.bf16.mxu1 %vm755_vm1, %v16587_v48  ;;  %v165_v48 = vld [vmem:[%s24681_s2] sm:$0xf] }
  0x8c   :  { %24705 = vst [vmem:[#allocation5_spill] sm:$0xff] %v18713_v45  ;;  %v18727_v50 = vrot.slane %v165_v48, %v18713_v45  ;;  %v18730_v52 = vrot.slane %v165_v48, %v18718_v47  ;;  %v18741_v60 = vrot.slane %v165_v48, %v18732_v54 }
  0x92   :  { %986 = vmatmul.mubr.bf16.gmra.mxu0 %v16589_v55  ;;  %1299 = vmatmul.mubr.bf16.gmra.mxu1 %v16589_v55  ;;  %v18734_v55 = vsub.s32 3, %v168_v44 }
  0x93   :  { %14042 = vmatprep.mubr.msk.bf16.mxu0 %vm755_vm1, %v16590_v58  ;;  %14071 = vmatprep.mubr.msk.bf16.mxu1 %vm755_vm1, %v16590_v58 }
  0x94   :  { %24708 = vst [vmem:[#allocation8_spill] sm:$0xff] %v18734_v55  ;;  %v18744_v61 = vrot.slane %v165_v48, %v18734_v55 }
  0x9a   :  { %996 = vmatmul.mubr.bf16.gmra.mxu0 %v16592_v5  ;;  %1309 = vmatmul.mubr.bf16.gmra.mxu1 %v16592_v5 }
  0x9b   :  { %14043 = vmatprep.mubr.msk.bf16.mxu0 %vm755_vm1, %v16593_v6  ;;  %14072 = vmatprep.mubr.msk.bf16.mxu1 %vm755_vm1, %v16593_v6 }
  0xa2   :  { %1006 = vmatmul.mubr.bf16.gmra.mxu0 %v16595_v15  ;;  %1319 = vmatmul.mubr.bf16.gmra.mxu1 %v16595_v15 }
  0xa3   :  { %14044 = vmatprep.mubr.msk.bf16.mxu0 %vm755_vm1, %v16596_v16  ;;  %14073 = vmatprep.mubr.msk.bf16.mxu1 %vm755_vm1, %v16596_v16 }
  0xaa   :  { %1016 = vmatmul.mubr.bf16.gmra.mxu0 %v16598_v21  ;;  %1329 = vmatmul.mubr.bf16.gmra.mxu1 %v16598_v21 }
  0xab   :  { %14045 = vmatprep.mubr.msk.bf16.mxu0 %vm755_vm1, %v16605_v22  ;;  %14074 = vmatprep.mubr.msk.bf16.mxu1 %vm755_vm1, %v16605_v22 }
  0xb2   :  { %1026 = vmatmul.mubr.bf16.gmra.mxu0 %v16607_v23  ;;  %1339 = vmatmul.mubr.bf16.gmra.mxu1 %v16607_v23 }
  0xb3   :  { %14046 = vmatprep.mubr.msk.bf16.mxu0 %vm755_vm1, %v16608_v24  ;;  %14075 = vmatprep.mubr.msk.bf16.mxu1 %vm755_vm1, %v16608_v24 }
  0xba   :  { %1036 = vmatmul.mubr.bf16.gmra.mxu0 %v16610_v25  ;;  %1349 = vmatmul.mubr.bf16.gmra.mxu1 %v16610_v25 }
  0xbb   :  { %14047 = vmatprep.mubr.msk.bf16.mxu0 %vm755_vm1, %v16617_v26  ;;  %14076 = vmatprep.mubr.msk.bf16.mxu1 %vm755_vm1, %v16617_v26 }
  0xc2   :  { %1046 = vmatmul.mubr.bf16.gmra.mxu0 %v16619_v27  ;;  %1359 = vmatmul.mubr.bf16.gmra.mxu1 %v16619_v27  ;;  %v16691_v27 = vld [vmem:[%s24679_s0 + $0x1a0] ss:$8 sps:$4 sm:$0xff]  }
  0xc3   :  { %14048 = vmatprep.mubr.msk.bf16.mxu0 %vm755_vm1, %v16620_v28  ;;  %14077 = vmatprep.mubr.msk.bf16.mxu1 %vm755_vm1, %v16620_v28 }
  0xca   :  { %1056 = vmatmul.mubr.bf16.gmra.mxu0 %v16622_v29  ;;  %1369 = vmatmul.mubr.bf16.gmra.mxu1 %v16622_v29 }
  0xcb   :  { %14049 = vmatprep.mubr.msk.bf16.mxu0 %vm755_vm1, %v16629_v30  ;;  %14078 = vmatprep.mubr.msk.bf16.mxu1 %vm755_vm1, %v16629_v30 }
  0xd2   :  { %1066 = vmatmul.mubr.bf16.gmra.mxu0 %v16631_v31  ;;  %1379 = vmatmul.mubr.bf16.gmra.mxu1 %v16631_v31 }
  0xd3   :  { %14050 = vmatprep.mubr.msk.bf16.mxu0 %vm755_vm1, %v16632_v32  ;;  %14079 = vmatprep.mubr.msk.bf16.mxu1 %vm755_vm1, %v16632_v32  ;;  %v16704_v32 = vld [vmem:[%s24679_s0 + $0x1b4] ss:$8 sps:$4 sm:$0xff]  }
  0xda   :  { %1076 = vmatmul.mubr.bf16.gmra.mxu0 %v16634_v33  ;;  %1389 = vmatmul.mubr.bf16.gmra.mxu1 %v16634_v33 }
  0xdb   :  { %14051 = vmatprep.mubr.msk.bf16.mxu0 %vm755_vm1, %v16641_v34  ;;  %14080 = vmatprep.mubr.msk.bf16.mxu1 %vm755_vm1, %v16641_v34 }
  0xe2   :  { %1086 = vmatmul.mubr.bf16.gmra.mxu0 %v16643_v35  ;;  %1399 = vmatmul.mubr.bf16.gmra.mxu1 %v16643_v35 }
  0xe3   :  { %14052 = vmatprep.mubr.msk.bf16.mxu0 %vm755_vm1, %v16644_v36  ;;  %14081 = vmatprep.mubr.msk.bf16.mxu1 %vm755_vm1, %v16644_v36 }
  0xea   :  { %1096 = vmatmul.mubr.bf16.gmra.mxu0 %v16646_v37  ;;  %1409 = vmatmul.mubr.bf16.gmra.mxu1 %v16646_v37 }
  0xeb   :  { %14053 = vmatprep.mubr.msk.bf16.mxu0 %vm755_vm1, %v16653_v38  ;;  %14082 = vmatprep.mubr.msk.bf16.mxu1 %vm755_vm1, %v16653_v38 }
  0xf2   :  { %1106 = vmatmul.mubr.bf16.gmra.mxu0 %v16655_v39  ;;  %1419 = vmatmul.mubr.bf16.gmra.mxu1 %v16655_v39 }
  0xf3   :  { %14054 = vmatprep.mubr.msk.bf16.mxu0 %vm755_vm1, %v16656_v40  ;;  %14083 = vmatprep.mubr.msk.bf16.mxu1 %vm755_vm1, %v16656_v40 }
  0xfa   :  { %1116 = vmatmul.mubr.bf16.gmra.mxu0 %v16658_v41  ;;  %1429 = vmatmul.mubr.bf16.gmra.mxu1 %v16658_v41 }
  0xfb   :  { %14055 = vmatprep.mubr.msk.bf16.mxu0 %vm755_vm1, %v16665_v43  ;;  %14084 = vmatprep.mubr.msk.bf16.mxu1 %vm755_vm1, %v16665_v43 }
 0x102   :  { %v887_v51 = vpop.f32.mrf.mxu0  ;;  %1126 = vmatmul.mubr.bf16.gmra.mxu0 %v16667_v46  ;;  %v1200_v53 = vpop.f32.mrf.mxu1  ;;  %1439 = vmatmul.mubr.bf16.gmra.mxu1 %v16667_v46 }
 0x103   :  { %14056 = vmatprep.mubr.msk.bf16.mxu0 %vm755_vm1, %v16674_v49  ;;  %14085 = vmatprep.mubr.msk.bf16.mxu1 %vm755_vm1, %v16674_v49  ;;  %v888_v58 = vadd.f32 %v887_v51, %v18727_v50  ;;  %v1201_v59 = vadd.f32 %v1200_v53, %v18730_v52 }
 0x104   :  { %v889_v56 = vpop.f32.mrf.mxu0  ;;  %v1202_v57 = vpop.f32.mrf.mxu1 }
 0x105   :  { %v1479_v4 = vmax.f32 %v888_v58, 0.0  ;;  %v1481_v5 = vmax.f32 %v1201_v59, 0.0  ;;  %v890_v6 = vadd.f32 %v889_v56, %v18741_v60  ;;  %v1203_v7 = vadd.f32 %v1202_v57, %v18744_v61 }
 0x106   :  { %v891_v62 = vpop.f32.mrf.mxu0  ;;  %v1204_v63 = vpop.f32.mrf.mxu1 }
 0x107   :  { %v892_v10 = vadd.f32 %v891_v62, %v18727_v50  ;;  %v1205_v13 = vadd.f32 %v1204_v63, %v18730_v52  ;;  %v1703_v21 = vmax.f32 %v1479_v4, %v1481_v5  ;;  %v1480_v22 = vmax.f32 %v890_v6, 0.0 }
 0x108   :  { %v893_v2 = vpop.f32.mrf.mxu0  ;;  %v1206_v3 = vpop.f32.mrf.mxu1  ;;  %v1482_v23 = vmax.f32 %v1203_v7, 0.0 }
 0x109   :  { %v894_v14 = vadd.f32 %v893_v2, %v18741_v60  ;;  %v1207_v17 = vadd.f32 %v1206_v3, %v18744_v61  ;;  %v1483_v28 = vmax.f32 %v892_v10, 0.0  ;;  %v1485_v33 = vmax.f32 %v1205_v13, 0.0  ;;  %v16748_v10 = vld [vmem:[%s24680_s3 + $0xe4] ss:$16 sps:$4 sm:$0xff]  }
 0x10a   :  { %v897_v8 = vpop.f32.mrf.mxu0  ;;  %1136 = vmatmul.mubr.bf16.gmra.mxu0 %v16676_v0  ;;  %v1210_v9 = vpop.f32.mrf.mxu1  ;;  %1449 = vmatmul.mubr.bf16.gmra.mxu1 %v16676_v0  ;;  %v1704_v43 = vmax.f32 %v1480_v22, %v1482_v23 }
 0x10b   :  { %v898_v11 = vadd.f32 %v897_v8, %v18727_v50  ;;  %v1211_v12 = vadd.f32 %v1210_v9, %v18730_v52  ;;  %14057 = vmatprep.mubr.msk.bf16.mxu0 %vm755_vm1, %v16689_v1  ;;  %14086 = vmatprep.mubr.msk.bf16.mxu1 %vm755_vm1, %v16689_v1  ;;  %v1484_v34 = vmax.f32 %v894_v14, 0.0  ;;  %v1486_v39 = vmax.f32 %v1207_v17, 0.0  ;;  %v16706_v8 = vld [vmem:[%s24679_s0 + $0x1b0] ss:$8 sps:$4 sm:$0xff]  }
 0x10c   :  { %v899_v15 = vpop.f32.mrf.mxu0  ;;  %v1212_v16 = vpop.f32.mrf.mxu1  ;;  %v1705_v63 = vmax.f32 %v1483_v28, %v1485_v33  ;;  %v24709_v1 = vmov 0  ;;  %3488 = vmatprep.subr.bf16.mxu0 %v16748_v10 }
 0x10d   :  { %v1487_v18 = vmax.f32 %v898_v11, 0.0  ;;  %v1489_v19 = vmax.f32 %v1211_v12, 0.0  ;;  %v900_v20 = vadd.f32 %v899_v15, %v18741_v60  ;;  %v1213_v24 = vadd.f32 %v1212_v16, %v18744_v61  ;;  %v16751_v16 = vld [vmem:[%s24680_s3 + $0xec] ss:$16 sps:$4 sm:$0xff]  }
 0x10e   :  { %v901_v25 = vpop.f32.mrf.mxu0  ;;  %v1214_v26 = vpop.f32.mrf.mxu1  ;;  %v1706_v0 = vmax.f32 %v1484_v34, %v1486_v39  ;;  %v24710_v1 = vsel %vm18778_vm4, 4294967295, %v24709_v1  ;;  %3661 = vmatprep.subr.bf16.mxu1 %v16751_v16 }
 0x10f   :  { %v1488_v29 = vmax.f32 %v900_v20, 0.0  ;;  %v902_v30 = vadd.f32 %v901_v25, %v18727_v50  ;;  %v1215_v31 = vadd.f32 %v1214_v26, %v18730_v52  ;;  %v1707_v35 = vmax.f32 %v1487_v18, %v1489_v19  ;;  %24711 = vst [vmem:[#allocation9_spill] sm:$0xff] %v24710_v1 }
 0x110   :  { %v1490_v36 = vmax.f32 %v1213_v24, 0.0  ;;  %v903_v37 = vpop.f32.mrf.mxu0  ;;  %v1216_v38 = vpop.f32.mrf.mxu1 }
 0x111   :  { %v1491_v40 = vmax.f32 %v902_v30, 0.0  ;;  %v1493_v41 = vmax.f32 %v1215_v31, 0.0  ;;  %v904_v42 = vadd.f32 %v903_v37, %v18741_v60  ;;  %v1217_v46 = vadd.f32 %v1216_v38, %v18744_v61 }
 0x112   :  { %v1708_v44 = vmax.f32 %v1488_v29, %v1490_v36  ;;  %v907_v48 = vpop.f32.mrf.mxu0  ;;  %1146 = vmatmul.mubr.bf16.gmra.mxu0 %v16691_v27  ;;  %v1220_v49 = vpop.f32.mrf.mxu1  ;;  %1459 = vmatmul.mubr.bf16.gmra.mxu1 %v16691_v27  ;;  %v1815_v53 = vmax.f32 %v1703_v21, %v1707_v35 }
 0x113   :  { %v1492_v51 = vmax.f32 %v904_v42, 0.0  ;;  %14058 = vmatprep.mubr.msk.bf16.mxu0 %vm755_vm1, %v16704_v32  ;;  %14087 = vmatprep.mubr.msk.bf16.mxu1 %vm755_vm1, %v16704_v32  ;;  %v1709_v57 = vmax.f32 %v1491_v40, %v1493_v41  ;;  %v1494_v58 = vmax.f32 %v1217_v46, 0.0  ;;  %v908_v4 = vadd.f32 %v907_v48, %v18727_v50 }
 0x114   :  { %v1816_v56 = vmax.f32 %v1704_v43, %v1708_v44  ;;  %v909_v59 = vpop.f32.mrf.mxu0  ;;  %v1222_v62 = vpop.f32.mrf.mxu1  ;;  %v1221_v5 = vadd.f32 %v1220_v49, %v18730_v52 }
 0x115   :  { %v1710_v3 = vmax.f32 %v1492_v51, %v1494_v58  ;;  %v910_v9 = vadd.f32 %v909_v59, %v18741_v60  ;;  %v1817_v11 = vmax.f32 %v1705_v63, %v1709_v57  ;;  %v1223_v13 = vadd.f32 %v1222_v62, %v18744_v61 }
 0x116   :  { %v16205_v2 = vpack.c.bf16 %v1816_v56, %v1815_v53  ;;  %v911_v6 = vpop.f32.mrf.mxu0  ;;  %v1224_v7 = vpop.f32.mrf.mxu1  ;;  %v1495_v18 = vmax.f32 %v908_v4, 0.0  ;;  %v1497_v19 = vmax.f32 %v1221_v5, 0.0  ;;  %v16749_v4 = vld [vmem:[%s24680_s3 + $0xe8] ss:$16 sps:$4 sm:$0xff]  }
 0x117   :  { %v1818_v12 = vmax.f32 %v1706_v0, %v1710_v3  ;;  %v1496_v22 = vmax.f32 %v910_v9, 0.0  ;;  %v1498_v24 = vmax.f32 %v1223_v13, 0.0  ;;  %v912_v25 = vadd.f32 %v911_v6, %v18727_v50  ;;  %v16746_v3 = vld [vmem:[%s24680_s3 + $0xe0] ss:$16 sps:$4 sm:$0xff]  }
 0x118   :  { %2048 = vst.msk [vmem:[#allocation2 + $0x10] sm:$0xff] %vm18778_vm4, %v16205_v2  ;;  %v913_v14 = vpop.f32.mrf.mxu0  ;;  %v1226_v15 = vpop.f32.mrf.mxu1  ;;  %v1225_v26 = vadd.f32 %v1224_v7, %v18730_v52  ;;  %v1711_v33 = vmax.f32 %v1495_v18, %v1497_v19 }
 0x119   :  { %v16206_v17 = vpack.c.bf16 %v1818_v12, %v1817_v11  ;;  %v914_v34 = vadd.f32 %v913_v14, %v18741_v60  ;;  %v1227_v35 = vadd.f32 %v1226_v15, %v18744_v61  ;;  %v1712_v43 = vmax.f32 %v1496_v22, %v1498_v24  ;;  %v16757_v14 = vld [vmem:[%s24680_s3 + $0xc4] ss:$16 sps:$4 sm:$0xff]   ;;  %v16760_v15 = vld [vmem:[%s24680_s3 + $0xcc] ss:$16 sps:$4 sm:$0xff]  }
 0x11a   :  { %v917_v20 = vpop.f32.mrf.mxu0  ;;  %1156 = vmatmul.mubr.bf16.gmra.mxu0 %v16706_v8  ;;  %v1230_v21 = vpop.f32.mrf.mxu1  ;;  %1469 = vmatmul.mubr.bf16.gmra.mxu1 %v16706_v8  ;;  %v1499_v44 = vmax.f32 %v912_v25, 0.0  ;;  %v1501_v46 = vmax.f32 %v1225_v26, 0.0  ;;  %v16755_v25 = vld [vmem:[%s24680_s3 + $0xc0] ss:$16 sps:$4 sm:$0xff]   ;;  %v16758_v26 = vld [vmem:[%s24680_s3 + $0xc8] ss:$16 sps:$4 sm:$0xff]  }
 0x11b   :  { %v918_v23 = vadd.f32 %v917_v20, %v18727_v50  ;;  %2049 = vst.msk [vmem:[#allocation2 + $0x18] sm:$0xff] %vm18778_vm4, %v16206_v17  ;;  %v1231_v27 = vadd.f32 %v1230_v21, %v18730_v52  ;;  %v1500_v59 = vmax.f32 %v914_v34, 0.0  ;;  %v1502_v62 = vmax.f32 %v1227_v35, 0.0 }
 0x11c   :  { %v919_v28 = vpop.f32.mrf.mxu0  ;;  %v1232_v29 = vpop.f32.mrf.mxu1  ;;  %v1713_v16 = vmax.f32 %v1499_v44, %v1501_v46  ;;  %v16764_v44 = vld [vmem:[%s24680_s3 + $0xa8] ss:$16 sps:$4 sm:$0xff]  }
 0x11d   :  { %v1503_v30 = vmax.f32 %v918_v23, 0.0  ;;  %v920_v31 = vadd.f32 %v919_v28, %v18741_v60  ;;  %v1233_v32 = vadd.f32 %v1232_v29, %v18744_v61  ;;  %v1505_v36 = vmax.f32 %v1231_v27, 0.0 }
 0x11e   :  { %v921_v37 = vpop.f32.mrf.mxu0  ;;  %v1234_v38 = vpop.f32.mrf.mxu1  ;;  %v1714_v19 = vmax.f32 %v1500_v59, %v1502_v62 }
 0x11f   :  { %v1504_v39 = vmax.f32 %v920_v31, 0.0  ;;  %v1506_v40 = vmax.f32 %v1233_v32, 0.0  ;;  %v922_v41 = vadd.f32 %v921_v37, %v18727_v50  ;;  %v1235_v42 = vadd.f32 %v1234_v38, %v18730_v52  ;;  %v16763_v32 = vld [vmem:[%s24680_s3 + $0xa4] ss:$16 sps:$4 sm:$0xff]  }
 0x120   :  { %v1715_v48 = vmax.f32 %v1503_v30, %v1505_v36  ;;  %v923_v49 = vpop.f32.mrf.mxu0  ;;  %v1236_v51 = vpop.f32.mrf.mxu1 }
 0x121   :  { %v1716_v53 = vmax.f32 %v1504_v39, %v1506_v40  ;;  %v1507_v56 = vmax.f32 %v922_v41, 0.0  ;;  %v1509_v57 = vmax.f32 %v1235_v42, 0.0  ;;  %v924_v58 = vadd.f32 %v923_v49, %v18741_v60 }
 0x122   :  { %v1237_v63 = vadd.f32 %v1236_v51, %v18744_v61  ;;  %v927_v0 = vpop.f32.mrf.mxu0  ;;  %v1240_v2 = vpop.f32.mrf.mxu1  ;;  %v1819_v5 = vmax.f32 %v1711_v33, %v1715_v48  ;;  %v16725_v8 = vld [vmem:[#allocation2 + $0x10] ss:$8 sps:$4 sm:$0xff]   ;;  %v16727_v9 = vld [vmem:[#allocation2 + $0x14] ss:$8 sps:$4 sm:$0xff]  }
 0x123   :  { %v1820_v6 = vmax.f32 %v1712_v43, %v1716_v53  ;;  %v1508_v7 = vmax.f32 %v924_v58, 0.0  ;;  %v1717_v10 = vmax.f32 %v1507_v56, %v1509_v57  ;;  %v928_v18 = vadd.f32 %v927_v0, %v18727_v50  ;;  %14256 = vmatprep.mubr.msk.bf16.mxu0 %vm2651_vm5, %v16727_v9  ;;  %14270 = vmatprep.mubr.msk.bf16.mxu1 %vm2651_vm5, %v16727_v9  ;;  %v16766_v33 = vld [vmem:[%s24680_s3 + $0xac] ss:$16 sps:$4 sm:$0xff]   ;;  %v16761_v43 = vld [vmem:[%s24680_s3 + $0xa0] ss:$16 sps:$4 sm:$0xff]  }
 0x124   :  { %v1510_v11 = vmax.f32 %v1237_v63, 0.0  ;;  %v929_v12 = vpop.f32.mrf.mxu0  ;;  %v1242_v13 = vpop.f32.mrf.mxu1  ;;  %v1241_v21 = vadd.f32 %v1240_v2, %v18730_v52  ;;  %2727 = vmatmul.mubr.bf16.vlgmr.msra.gmra.mxu0 %v16725_v8  ;;  %2900 = vmatmul.mubr.bf16.vlgmr.msra.gmra.mxu1 %v16725_v8  ;;  %v16772_v57 = vld [vmem:[%s24680_s3 + $0x84] ss:$16 sps:$4 sm:$0xff]   ;;  %v16775_v63 = vld [vmem:[%s24680_s3 + $0x8c] ss:$16 sps:$4 sm:$0xff]  }
 0x125   :  { %v16207_v17 = vpack.c.bf16 %v1820_v6, %v1819_v5  ;;  %v930_v24 = vadd.f32 %v929_v12, %v18741_v60  ;;  %3489 = vmatpush1.bf16.msra.mxu0 %v16746_v3  ;;  %3662 = vmatpush1.bf16.msra.mxu1 %v16749_v4  ;;  %v1821_v27 = vmax.f32 %v1713_v16, %v1717_v10  ;;  %v1511_v34 = vmax.f32 %v928_v18, 0.0  ;;  %v16773_v12 = vld [vmem:[%s24680_s3 + $0x88] ss:$16 sps:$4 sm:$0xff]  }
 0x126   :  { %v1718_v20 = vmax.f32 %v1508_v7, %v1510_v11  ;;  %v931_v22 = vpop.f32.mrf.mxu0  ;;  %v1244_v23 = vpop.f32.mrf.mxu1  ;;  %v1243_v29 = vadd.f32 %v1242_v13, %v18744_v61  ;;  %3490 = vmatprep.subr.bf16.mxu0 %v16757_v14  ;;  %3663 = vmatprep.subr.bf16.mxu1 %v16760_v15  ;;  %v1513_v36 = vmax.f32 %v1241_v21, 0.0  ;;  %v16770_v11 = vld [vmem:[%s24680_s3 + $0x80] ss:$16 sps:$4 sm:$0xff]  }
 0x127   :  { %2050 = vst.msk [vmem:[#allocation2 + $0x20] sm:$0xff] %vm18778_vm4, %v16207_v17  ;;  %v18844_v37 = vadd.f32 %v931_v22, %v18727_v50  ;;  %v18847_v38 = vadd.f32 %v1244_v23, %v18730_v52  ;;  %v1512_v41 = vmax.f32 %v930_v24, 0.0 }
 0x128   :  { %v1822_v28 = vmax.f32 %v1714_v19, %v1718_v20  ;;  %v933_v30 = vpop.f32.mrf.mxu0  ;;  %v1246_v31 = vpop.f32.mrf.mxu1  ;;  %v1514_v46 = vmax.f32 %v1243_v29, 0.0  ;;  %v1719_v0 = vmax.f32 %v1511_v34, %v1513_v36 }
 0x129   :  { %3491 = vmatpush1.bf16.msra.mxu0 %v16755_v25  ;;  %3664 = vmatpush1.bf16.msra.mxu1 %v16758_v26  ;;  %v934_v48 = vadd.f32 %v933_v30, %v18741_v60  ;;  %v1247_v49 = vadd.f32 %v1246_v31, %v18744_v61  ;;  %v1515_v2 = vmax.f32 %v18844_v37, 0.0  ;;  %v1517_v3 = vmax.f32 %v18847_v38, 0.0 }
 0x12a   :  { %v16208_v35 = vpack.c.bf16 %v1822_v28, %v1821_v27  ;;  %v937_v39 = vpop.f32.mrf.mxu0  ;;  %v1250_v40 = vpop.f32.mrf.mxu1  ;;  %3492 = vmatprep.subr.bf16.mxu0 %v16763_v32  ;;  %3665 = vmatprep.subr.bf16.mxu1 %v16766_v33  ;;  %v1720_v13 = vmax.f32 %v1512_v41, %v1514_v46  ;;  %v16776_v46 = vld [vmem:[%s24680_s3 + $0x60] ss:$16 sps:$4 sm:$0xff]  }
 0x12b   :  { %v938_v42 = vadd.f32 %v937_v39, %v18727_v50  ;;  %v1251_v51 = vadd.f32 %v1250_v40, %v18730_v52  ;;  %v1516_v14 = vmax.f32 %v934_v48, 0.0  ;;  %v1518_v15 = vmax.f32 %v1247_v49, 0.0  ;;  %v16778_v48 = vld [vmem:[%s24680_s3 + $0x64] ss:$16 sps:$4 sm:$0xff]  }
 0x12c   :  { %2051 = vst.msk [vmem:[#allocation2 + $0x28] sm:$0xff] %vm18778_vm4, %v16208_v35  ;;  %v939_v53 = vpop.f32.mrf.mxu0  ;;  %v1252_v56 = vpop.f32.mrf.mxu1  ;;  %v1721_v35 = vmax.f32 %v1515_v2, %v1517_v3 }
 0x12d   :  { %v1519_v58 = vmax.f32 %v938_v42, 0.0  ;;  %v940_v59 = vadd.f32 %v939_v53, %v18741_v60  ;;  %v1253_v62 = vadd.f32 %v1252_v56, %v18744_v61  ;;  %v1521_v4 = vmax.f32 %v1251_v51, 0.0  ;;  %3493 = vmatpush1.bf16.msra.mxu0 %v16761_v43  ;;  %3666 = vmatpush1.bf16.msra.mxu1 %v16764_v44 }
 0x12e   :  { %v941_v5 = vpop.f32.mrf.mxu0  ;;  %v1254_v6 = vpop.f32.mrf.mxu1  ;;  %3494 = vmatprep.subr.bf16.mxu0 %v16772_v57  ;;  %3667 = vmatprep.subr.bf16.mxu1 %v16775_v63  ;;  %v1722_v36 = vmax.f32 %v1516_v14, %v1518_v15  ;;  %v16779_v57 = vld [vmem:[%s24680_s3 + $0x68] ss:$16 sps:$4 sm:$0xff]  }
 0x12f   :  { %v1520_v7 = vmax.f32 %v940_v59, 0.0  ;;  %v1522_v8 = vmax.f32 %v1253_v62, 0.0  ;;  %v942_v9 = vadd.f32 %v941_v5, %v18727_v50  ;;  %v1255_v10 = vadd.f32 %v1254_v6, %v18730_v52 }
 0x130   :  { %v1723_v16 = vmax.f32 %v1519_v58, %v1521_v4  ;;  %v943_v17 = vpop.f32.mrf.mxu0  ;;  %v1256_v18 = vpop.f32.mrf.mxu1  ;;  %v16781_v58 = vld [vmem:[%s24680_s3 + $0x6c] ss:$16 sps:$4 sm:$0xff]  }
 0x131   :  { %v1724_v19 = vmax.f32 %v1520_v7, %v1522_v8  ;;  %v1523_v20 = vmax.f32 %v942_v9, 0.0  ;;  %v1525_v21 = vmax.f32 %v1255_v10, 0.0  ;;  %v944_v22 = vadd.f32 %v943_v17, %v18741_v60  ;;  %3495 = vmatpush1.bf16.msra.mxu0 %v16770_v11  ;;  %3668 = vmatpush1.bf16.msra.mxu1 %v16773_v12  ;;  %v16785_v11 = vld [vmem:[%s24680_s3 + $0x40] ss:$16 sps:$4 sm:$0xff]   ;;  %v16787_v12 = vld [vmem:[%s24680_s3 + $0x44] ss:$16 sps:$4 sm:$0xff]  }
 0x132   :  { %v1257_v23 = vadd.f32 %v1256_v18, %v18744_v61  ;;  %v947_v24 = vpop.f32.mrf.mxu0  ;;  %v1260_v25 = vpop.f32.mrf.mxu1  ;;  %v1823_v26 = vmax.f32 %v1719_v0, %v1723_v16  ;;  %3496 = vmatprep.subr.bf16.mxu0 %v16778_v48  ;;  %3669 = vmatprep.subr.bf16.mxu1 %v16781_v58  ;;  %v16790_v17 = vld [vmem:[%s24680_s3 + $0x4c] ss:$16 sps:$4 sm:$0xff]  }
 0x133   :  { %v1824_v27 = vmax.f32 %v1720_v13, %v1724_v19  ;;  %v1524_v28 = vmax.f32 %v944_v22, 0.0  ;;  %v16728_v29 = vld [vmem:[#allocation2 + $0x24] ss:$8 sps:$4 sm:$0xff]   ;;  %v16730_v30 = vld [vmem:[#allocation2 + $0x20] ss:$8 sps:$4 sm:$0xff]   ;;  %v1725_v31 = vmax.f32 %v1523_v20, %v1525_v21  ;;  %v948_v39 = vadd.f32 %v947_v24, %v18727_v50 }
 0x134   :  { %v1526_v32 = vmax.f32 %v1257_v23, 0.0  ;;  %v949_v33 = vpop.f32.mrf.mxu0  ;;  %v1262_v34 = vpop.f32.mrf.mxu1  ;;  %14257 = vmatprep.mubr.msk.bf16.mxu0 %vm2651_vm5, %v16728_v29  ;;  %14271 = vmatprep.mubr.msk.bf16.mxu1 %vm2651_vm5, %v16728_v29  ;;  %v1261_v40 = vadd.f32 %v1260_v25, %v18730_v52  ;;  %v16788_v13 = vld [vmem:[%s24680_s3 + $0x48] ss:$16 sps:$4 sm:$0xff]  }
 0x135   :  { %v16209_v37 = vpack.c.bf16 %v1824_v27, %v1823_v26  ;;  %2737 = vmatmul.mubr.bf16.gmra.mxu0 %v16730_v30  ;;  %2910 = vmatmul.mubr.bf16.gmra.mxu1 %v16730_v30  ;;  %v950_v43 = vadd.f32 %v949_v33, %v18741_v60  ;;  %v1263_v44 = vadd.f32 %v1262_v34, %v18744_v61  ;;  %v1527_v62 = vmax.f32 %v948_v39, 0.0 }
 0x136   :  { %v1726_v38 = vmax.f32 %v1524_v28, %v1526_v32  ;;  %v951_v41 = vpop.f32.mrf.mxu0  ;;  %v1264_v42 = vpop.f32.mrf.mxu1  ;;  %v1825_v49 = vmax.f32 %v1721_v35, %v1725_v31  ;;  %v1529_v63 = vmax.f32 %v1261_v40, 0.0  ;;  %3497 = vmatpush1.bf16.msra.mxu0 %v16776_v46  ;;  %3670 = vmatpush1.bf16.msra.mxu1 %v16779_v57 }
 0x137   :  { %2052 = vst.msk [vmem:[#allocation2 + $0x30] sm:$0xff] %vm18778_vm4, %v16209_v37  ;;  %v1528_v3 = vmax.f32 %v950_v43, 0.0  ;;  %v1530_v4 = vmax.f32 %v1263_v44, 0.0  ;;  %v952_v6 = vadd.f32 %v951_v41, %v18727_v50  ;;  %v1265_v7 = vadd.f32 %v1264_v42, %v18730_v52  ;;  %3498 = vmatprep.subr.bf16.mxu0 %v16787_v12  ;;  %3671 = vmatprep.subr.bf16.mxu1 %v16790_v17 }
 0x138   :  { %v1826_v51 = vmax.f32 %v1722_v36, %v1726_v38  ;;  %v953_v53 = vpop.f32.mrf.mxu0  ;;  %v1266_v56 = vpop.f32.mrf.mxu1  ;;  %v1727_v18 = vmax.f32 %v1527_v62, %v1529_v63 }
 0x139   :  { %v954_v19 = vadd.f32 %v953_v53, %v18741_v60  ;;  %v1267_v20 = vadd.f32 %v1266_v56, %v18744_v61  ;;  %v1728_v28 = vmax.f32 %v1528_v3, %v1530_v4  ;;  %v1531_v29 = vmax.f32 %v952_v6, 0.0 }
 0x13a   :  { %v16210_v59 = vpack.c.bf16 %v1826_v51, %v1825_v49  ;;  %v957_v0 = vpop.f32.mrf.mxu0  ;;  %v1270_v2 = vpop.f32.mrf.mxu1  ;;  %3499 = vmatpush1.bf16.msra.mxu0 %v16785_v11  ;;  %v1533_v30 = vmax.f32 %v1265_v7, 0.0  ;;  %3672 = vmatpush1.bf16.msra.mxu1 %v16788_v13  ;;  %v16791_v7 = vld [vmem:[%s24680_s3 + $0x20] ss:$16 sps:$4 sm:$0xff]   ;;  %v16794_v13 = vld [vmem:[%s24680_s3 + $0x28] ss:$16 sps:$4 sm:$0xff]  }
 0x13b   :  { %v958_v5 = vadd.f32 %v957_v0, %v18727_v50  ;;  %v1271_v8 = vadd.f32 %v1270_v2, %v18730_v52  ;;  %v1532_v38 = vmax.f32 %v954_v19, 0.0  ;;  %v1534_v39 = vmax.f32 %v1267_v20, 0.0 }
 0x13c   :  { %2053 = vst.msk [vmem:[#allocation2 + $0x38] sm:$0xff] %vm18778_vm4, %v16210_v59  ;;  %v959_v9 = vpop.f32.mrf.mxu0  ;;  %v1272_v10 = vpop.f32.mrf.mxu1  ;;  %v1729_v58 = vmax.f32 %v1531_v29, %v1533_v30  ;;  %v16800_v30 = vld [vmem:[%s24680_s3] ss:$16 sps:$4 sm:$0xff]  }
 0x13d   :  { %v1535_v14 = vmax.f32 %v958_v5, 0.0  ;;  %v960_v15 = vadd.f32 %v959_v9, %v18741_v60  ;;  %v1273_v16 = vadd.f32 %v1272_v10, %v18744_v61  ;;  %v1537_v21 = vmax.f32 %v1271_v8, 0.0  ;;  %v16793_v8 = vld [vmem:[%s24680_s3 + $0x24] ss:$16 sps:$4 sm:$0xff]  }
 0x13e   :  { %v961_v22 = vpop.f32.mrf.mxu0  ;;  %v1274_v23 = vpop.f32.mrf.mxu1  ;;  %v1730_v63 = vmax.f32 %v1532_v38, %v1534_v39  ;;  %3500 = vmatprep.subr.bf16.mxu0 %v16793_v8 }
 0x13f   :  { %v1536_v24 = vmax.f32 %v960_v15, 0.0  ;;  %v1538_v25 = vmax.f32 %v1273_v16, 0.0  ;;  %v962_v26 = vadd.f32 %v961_v22, %v18727_v50  ;;  %v1275_v27 = vadd.f32 %v1274_v23, %v18730_v52  ;;  %3501 = vmatpush1.bf16.msra.mxu0 %v16791_v7 }
 0x140   :  { %v1731_v31 = vmax.f32 %v1535_v14, %v1537_v21  ;;  %v963_v32 = vpop.f32.mrf.mxu0  ;;  %v1276_v33 = vpop.f32.mrf.mxu1  ;;  %v16796_v14 = vld [vmem:[%s24680_s3 + $0x2c] ss:$16 sps:$4 sm:$0xff]  }
 0x141   :  { %v1732_v34 = vmax.f32 %v1536_v24, %v1538_v25  ;;  %v1539_v35 = vmax.f32 %v962_v26, 0.0  ;;  %v1541_v36 = vmax.f32 %v1275_v27, 0.0  ;;  %v964_v37 = vadd.f32 %v963_v32, %v18741_v60  ;;  %3673 = vmatprep.subr.bf16.mxu1 %v16796_v14  ;;  %v16803_v32 = vld [vmem:[%s24680_s3 + $0x8] ss:$16 sps:$4 sm:$0xff]  }
 0x142   :  { %v1277_v40 = vadd.f32 %v1276_v33, %v18744_v61  ;;  %v967_v41 = vpop.f32.mrf.mxu0  ;;  %v1280_v42 = vpop.f32.mrf.mxu1  ;;  %v1827_v43 = vmax.f32 %v1727_v18, %v1731_v31  ;;  %3674 = vmatpush1.bf16.msra.mxu1 %v16794_v13  ;;  %v16802_v31 = vld [vmem:[%s24680_s3 + $0x4] ss:$16 sps:$4 sm:$0xff]  }
 0x143   :  { %v1828_v44 = vmax.f32 %v1728_v28, %v1732_v34  ;;  %v1540_v46 = vmax.f32 %v964_v37, 0.0  ;;  %v16731_v48 = vld [vmem:[#allocation2 + $0x34] ss:$8 sps:$4 sm:$0xff]   ;;  %v16733_v49 = vld [vmem:[#allocation2 + $0x30] ss:$8 sps:$4 sm:$0xff]   ;;  %v1733_v51 = vmax.f32 %v1539_v35, %v1541_v36  ;;  %v968_v62 = vadd.f32 %v967_v41, %v18727_v50  ;;  %3502 = vmatprep.subr.bf16.mxu0 %v16802_v31 }
 0x144   :  { %v1542_v53 = vmax.f32 %v1277_v40, 0.0  ;;  %v969_v56 = vpop.f32.mrf.mxu0  ;;  %v1282_v57 = vpop.f32.mrf.mxu1  ;;  %14258 = vmatprep.mubr.msk.bf16.mxu0 %vm2651_vm5, %v16731_v48  ;;  %14272 = vmatprep.mubr.msk.bf16.mxu1 %vm2651_vm5, %v16731_v48  ;;  %v1281_v2 = vadd.f32 %v1280_v42, %v18730_v52  ;;  %v16805_v36 = vld [vmem:[%s24680_s3 + $0xc] ss:$16 sps:$4 sm:$0xff]  }
 0x145   :  { %v16211_v59 = vpack.c.bf16 %v1828_v44, %v1827_v43  ;;  %2747 = vmatmul.mubr.bf16.gmra.mxu0 %v16733_v49  ;;  %2920 = vmatmul.mubr.bf16.gmra.mxu1 %v16733_v49  ;;  %v970_v5 = vadd.f32 %v969_v56, %v18741_v60  ;;  %v1283_v6 = vadd.f32 %v1282_v57, %v18744_v61  ;;  %v1543_v15 = vmax.f32 %v968_v62, 0.0  ;;  %v16811_v31 = vld [vmem:[%s24680_s3 + $0x1ac] ss:$16 sps:$4 sm:$0xff]  }
 0x146   :  { %v1734_v0 = vmax.f32 %v1540_v46, %v1542_v53  ;;  %v971_v3 = vpop.f32.mrf.mxu0  ;;  %v1284_v4 = vpop.f32.mrf.mxu1  ;;  %v1829_v9 = vmax.f32 %v1729_v58, %v1733_v51  ;;  %v1545_v17 = vmax.f32 %v1281_v2, 0.0  ;;  %3675 = vmatprep.subr.bf16.mxu1 %v16805_v36  ;;  %3503 = vmatpush1.bf16.msra.mxu0 %v16800_v30  ;;  %v16809_v30 = vld [vmem:[%s24680_s3 + $0x1a8] ss:$16 sps:$4 sm:$0xff]  }
 0x147   :  { %2054 = vst.msk [vmem:[#allocation2 + $0x40] sm:$0xff] %vm18778_vm4, %v16211_v59  ;;  %v972_v18 = vadd.f32 %v971_v3, %v18727_v50  ;;  %v1285_v19 = vadd.f32 %v1284_v4, %v18730_v52  ;;  %v1544_v22 = vmax.f32 %v970_v5, 0.0  ;;  %v1546_v23 = vmax.f32 %v1283_v6, 0.0  ;;  %3676 = vmatpush1.bf16.msra.mxu1 %v16803_v32 }
 0x148   :  { %v1830_v10 = vmax.f32 %v1730_v63, %v1734_v0  ;;  %v973_v11 = vpop.f32.mrf.mxu0  ;;  %v1286_v12 = vpop.f32.mrf.mxu1  ;;  %v1735_v37 = vmax.f32 %v1543_v15, %v1545_v17  ;;  %3681 = vmatprep.subr.bf16.mxu1 %v16811_v31 }
 0x149   :  { %v974_v25 = vadd.f32 %v973_v11, %v18741_v60  ;;  %v1287_v26 = vadd.f32 %v1286_v12, %v18744_v61  ;;  %v1547_v38 = vmax.f32 %v972_v18, 0.0  ;;  %v1549_v39 = vmax.f32 %v1285_v19, 0.0 }
 0x14a   :  { %v16212_v16 = vpack.c.bf16 %v1830_v10, %v1829_v9  ;;  %v977_v20 = vpop.f32.mrf.mxu0  ;;  %v1290_v21 = vpop.f32.mrf.mxu1  ;;  %v1736_v49 = vmax.f32 %v1544_v22, %v1546_v23 }
 0x14b   :  { %v978_v24 = vadd.f32 %v977_v20, %v18727_v50  ;;  %v1291_v27 = vadd.f32 %v1290_v21, %v18730_v52  ;;  %v1548_v51 = vmax.f32 %v974_v25, 0.0  ;;  %v1550_v53 = vmax.f32 %v1287_v26, 0.0  ;;  %v16808_v25 = vld [vmem:[%s24680_s3 + $0x1a4] ss:$16 sps:$4 sm:$0xff]   ;;  %3682 = vmatpush2.bf16.msra.mxu1 %v16809_v30 }
 0x14c   :  { %2055 = vst.msk [vmem:[#allocation2 + $0x48] sm:$0xff] %vm18778_vm4, %v16212_v16  ;;  %v979_v28 = vpop.f32.mrf.mxu0  ;;  %v1292_v29 = vpop.f32.mrf.mxu1  ;;  %v1737_v14 = vmax.f32 %v1547_v38, %v1549_v39  ;;  %3508 = vmatprep.subr.bf16.mxu0 %v16808_v25 }
 0x14d   :  { %v1551_v33 = vmax.f32 %v978_v24, 0.0  ;;  %v980_v34 = vadd.f32 %v979_v28, %v18741_v60  ;;  %v1293_v35 = vadd.f32 %v1292_v29, %v18744_v61  ;;  %v1553_v40 = vmax.f32 %v1291_v27, 0.0  ;;  %v16806_v24 = vld [vmem:[%s24680_s3 + $0x1a0] ss:$16 sps:$4 sm:$0xff]  }
 0x14e   :  { %v981_v41 = vpop.f32.mrf.mxu0  ;;  %v1294_v42 = vpop.f32.mrf.mxu1  ;;  %v1738_v15 = vmax.f32 %v1548_v51, %v1550_v53  ;;  %3509 = vmatpush2.bf16.msra.mxu0 %v16806_v24 }
 0x14f   :  { %v1552_v43 = vmax.f32 %v980_v34, 0.0  ;;  %v1554_v44 = vmax.f32 %v1293_v35, 0.0  ;;  %v982_v46 = vadd.f32 %v981_v41, %v18727_v50  ;;  %v1295_v48 = vadd.f32 %v1294_v42, %v18730_v52 }
 0x150   :  { %v1739_v56 = vmax.f32 %v1551_v33, %v1553_v40  ;;  %v983_v57 = vpop.f32.mrf.mxu0  ;;  %v1296_v58 = vpop.f32.mrf.mxu1 }
 0x151   :  { %v1740_v59 = vmax.f32 %v1552_v43, %v1554_v44  ;;  %v1555_v62 = vmax.f32 %v982_v46, 0.0  ;;  %v1557_v63 = vmax.f32 %v1295_v48, 0.0  ;;  %v984_v0 = vadd.f32 %v983_v57, %v18741_v60  ;;  %v16815_v46 = vld [vmem:[%s24680_s3 + $0x180] ss:$16 sps:$4 sm:$0xff]   ;;  %v16817_v48 = vld [vmem:[%s24680_s3 + $0x184] ss:$16 sps:$4 sm:$0xff]  }
 0x152   :  { %v1297_v2 = vadd.f32 %v1296_v58, %v18744_v61  ;;  %v987_v3 = vpop.f32.mrf.mxu0  ;;  %v1300_v4 = vpop.f32.mrf.mxu1  ;;  %v1831_v5 = vmax.f32 %v1735_v37, %v1739_v56  ;;  %v16820_v57 = vld [vmem:[%s24680_s3 + $0x18c] ss:$16 sps:$4 sm:$0xff]   ;;  %3510 = vmatprep.subr.bf16.mxu0 %v16817_v48 }
 0x153   :  { %v1832_v6 = vmax.f32 %v1736_v49, %v1740_v59  ;;  %v1556_v7 = vmax.f32 %v984_v0, 0.0  ;;  %v16734_v8 = vld [vmem:[#allocation2 + $0x44] ss:$8 sps:$4 sm:$0xff]   ;;  %v16736_v9 = vld [vmem:[#allocation2 + $0x40] ss:$8 sps:$4 sm:$0xff]   ;;  %v1741_v10 = vmax.f32 %v1555_v62, %v1557_v63  ;;  %v988_v18 = vadd.f32 %v987_v3, %v18727_v50  ;;  %3683 = vmatprep.subr.bf16.mxu1 %v16820_v57  ;;  %3511 = vmatpush2.bf16.msra.mxu0 %v16815_v46 }
 0x154   :  { %v1558_v11 = vmax.f32 %v1297_v2, 0.0  ;;  %v989_v12 = vpop.f32.mrf.mxu0  ;;  %v1302_v13 = vpop.f32.mrf.mxu1  ;;  %14259 = vmatprep.mubr.msk.bf16.mxu0 %vm2651_vm5, %v16734_v8  ;;  %14273 = vmatprep.mubr.msk.bf16.mxu1 %vm2651_vm5, %v16734_v8  ;;  %v1301_v19 = vadd.f32 %v1300_v4, %v18730_v52  ;;  %v16818_v49 = vld [vmem:[%s24680_s3 + $0x188] ss:$16 sps:$4 sm:$0xff]  }
 0x155   :  { %v16213_v16 = vpack.c.bf16 %v1832_v6, %v1831_v5  ;;  %2757 = vmatmul.mubr.bf16.gmra.mxu0 %v16736_v9  ;;  %2930 = vmatmul.mubr.bf16.gmra.mxu1 %v16736_v9  ;;  %v990_v22 = vadd.f32 %v989_v12, %v18741_v60  ;;  %v1303_v23 = vadd.f32 %v1302_v13, %v18744_v61  ;;  %v1559_v33 = vmax.f32 %v988_v18, 0.0 }
 0x156   :  { %v1742_v17 = vmax.f32 %v1556_v7, %v1558_v11  ;;  %v991_v20 = vpop.f32.mrf.mxu0  ;;  %v1304_v21 = vpop.f32.mrf.mxu1  ;;  %v1833_v26 = vmax.f32 %v1737_v14, %v1741_v10  ;;  %v1561_v34 = vmax.f32 %v1301_v19, 0.0  ;;  %3684 = vmatpush2.bf16.msra.mxu1 %v16818_v49  ;;  %v16824_v49 = vld [vmem:[%s24680_s3 + $0x168] ss:$16 sps:$4 sm:$0xff]  }
 0x157   :  { %2056 = vst.msk [vmem:[#allocation2 + $0x50] sm:$0xff] %vm18778_vm4, %v16213_v16  ;;  %v1560_v37 = vmax.f32 %v990_v22, 0.0  ;;  %v1562_v38 = vmax.f32 %v1303_v23, 0.0  ;;  %v992_v40 = vadd.f32 %v991_v20, %v18727_v50  ;;  %v1305_v41 = vadd.f32 %v1304_v21, %v18730_v52 }
 0x158   :  { %v1834_v27 = vmax.f32 %v1738_v15, %v1742_v17  ;;  %v993_v28 = vpop.f32.mrf.mxu0  ;;  %v1306_v29 = vpop.f32.mrf.mxu1  ;;  %v1743_v58 = vmax.f32 %v1559_v33, %v1561_v34 }
 0x159   :  { %v994_v59 = vadd.f32 %v993_v28, %v18741_v60  ;;  %v1307_v62 = vadd.f32 %v1306_v29, %v18744_v61  ;;  %v1744_v7 = vmax.f32 %v1560_v37, %v1562_v38  ;;  %v1563_v8 = vmax.f32 %v992_v40, 0.0 }
 0x15a   :  { %v16214_v32 = vpack.c.bf16 %v1834_v27, %v1833_v26  ;;  %v997_v35 = vpop.f32.mrf.mxu0  ;;  %v1310_v36 = vpop.f32.mrf.mxu1  ;;  %v1565_v9 = vmax.f32 %v1305_v41, 0.0  ;;  %v16821_v41 = vld [vmem:[%s24680_s3 + $0x160] ss:$16 sps:$4 sm:$0xff]  }
 0x15b   :  { %v998_v39 = vadd.f32 %v997_v35, %v18727_v50  ;;  %v1311_v42 = vadd.f32 %v1310_v36, %v18730_v52  ;;  %v1564_v17 = vmax.f32 %v994_v59, 0.0  ;;  %v1566_v18 = vmax.f32 %v1307_v62, 0.0 }
 0x15c   :  { %2057 = vst.msk [vmem:[#allocation2 + $0x58] sm:$0xff] %vm18778_vm4, %v16214_v32  ;;  %v999_v43 = vpop.f32.mrf.mxu0  ;;  %v1312_v44 = vpop.f32.mrf.mxu1  ;;  %v1745_v31 = vmax.f32 %v1563_v8, %v1565_v9  ;;  %v16833_v8 = vld [vmem:[%s24680_s3 + $0x148] ss:$16 sps:$4 sm:$0xff]  }
 0x15d   :  { %v1567_v51 = vmax.f32 %v998_v39, 0.0  ;;  %v1000_v53 = vadd.f32 %v999_v43, %v18741_v60  ;;  %v1313_v56 = vadd.f32 %v1312_v44, %v18744_v61  ;;  %v1569_v63 = vmax.f32 %v1311_v42, 0.0  ;;  %v16823_v42 = vld [vmem:[%s24680_s3 + $0x164] ss:$16 sps:$4 sm:$0xff]  }
 0x15e   :  { %v1001_v0 = vpop.f32.mrf.mxu0  ;;  %v1314_v2 = vpop.f32.mrf.mxu1  ;;  %v1746_v33 = vmax.f32 %v1564_v17, %v1566_v18  ;;  %3512 = vmatprep.subr.bf16.mxu0 %v16823_v42 }
 0x15f   :  { %v1568_v3 = vmax.f32 %v1000_v53, 0.0  ;;  %v1570_v4 = vmax.f32 %v1313_v56, 0.0  ;;  %v1002_v5 = vadd.f32 %v1001_v0, %v18727_v50  ;;  %v1315_v6 = vadd.f32 %v1314_v2, %v18730_v52  ;;  %3513 = vmatpush2.bf16.msra.mxu0 %v16821_v41 }
 0x160   :  { %v1747_v10 = vmax.f32 %v1567_v51, %v1569_v63  ;;  %v1003_v11 = vpop.f32.mrf.mxu0  ;;  %v1316_v12 = vpop.f32.mrf.mxu1  ;;  %v16826_v51 = vld [vmem:[%s24680_s3 + $0x16c] ss:$16 sps:$4 sm:$0xff]  }
 0x161   :  { %v1748_v13 = vmax.f32 %v1568_v3, %v1570_v4  ;;  %v1571_v14 = vmax.f32 %v1002_v5, 0.0  ;;  %v1573_v15 = vmax.f32 %v1315_v6, 0.0  ;;  %v1004_v16 = vadd.f32 %v1003_v11, %v18741_v60  ;;  %3685 = vmatprep.subr.bf16.mxu1 %v16826_v51  ;;  %v16830_v6 = vld [vmem:[%s24680_s3 + $0x140] ss:$16 sps:$4 sm:$0xff]  }
 0x162   :  { %v1317_v19 = vadd.f32 %v1316_v12, %v18744_v61  ;;  %v1007_v20 = vpop.f32.mrf.mxu0  ;;  %v1320_v21 = vpop.f32.mrf.mxu1  ;;  %v1835_v22 = vmax.f32 %v1743_v58, %v1747_v10  ;;  %3686 = vmatpush2.bf16.msra.mxu1 %v16824_v49  ;;  %v16835_v12 = vld [vmem:[%s24680_s3 + $0x14c] ss:$16 sps:$4 sm:$0xff]  }
 0x163   :  { %v1836_v23 = vmax.f32 %v1744_v7, %v1748_v13  ;;  %v1572_v24 = vmax.f32 %v1004_v16, 0.0  ;;  %v16737_v25 = vld [vmem:[#allocation2 + $0x54] ss:$8 sps:$4 sm:$0xff]   ;;  %v16739_v26 = vld [vmem:[#allocation2 + $0x50] ss:$8 sps:$4 sm:$0xff]   ;;  %v1749_v27 = vmax.f32 %v1571_v14, %v1573_v15  ;;  %v1008_v35 = vadd.f32 %v1007_v20, %v18727_v50  ;;  %3687 = vmatprep.subr.bf16.mxu1 %v16835_v12 }
 0x164   :  { %v1574_v28 = vmax.f32 %v1317_v19, 0.0  ;;  %v1009_v29 = vpop.f32.mrf.mxu0  ;;  %v1322_v30 = vpop.f32.mrf.mxu1  ;;  %14260 = vmatprep.mubr.msk.bf16.mxu0 %vm2651_vm5, %v16737_v25  ;;  %14274 = vmatprep.mubr.msk.bf16.mxu1 %vm2651_vm5, %v16737_v25  ;;  %v1321_v38 = vadd.f32 %v1320_v21, %v18730_v52  ;;  %v16832_v7 = vld [vmem:[%s24680_s3 + $0x144] ss:$16 sps:$4 sm:$0xff]   ;;  %v16836_v19 = vld [vmem:[%s24680_s3 + $0x120] ss:$16 sps:$4 sm:$0xff]  }
 0x165   :  { %v16215_v32 = vpack.c.bf16 %v1836_v23, %v1835_v22  ;;  %2767 = vmatmul.mubr.bf16.gmra.mxu0 %v16739_v26  ;;  %2940 = vmatmul.mubr.bf16.gmra.mxu1 %v16739_v26  ;;  %v1010_v39 = vadd.f32 %v1009_v29, %v18741_v60  ;;  %v1323_v40 = vadd.f32 %v1322_v30, %v18744_v61  ;;  %v1575_v56 = vmax.f32 %v1008_v35, 0.0  ;;  %v16838_v20 = vld [vmem:[%s24680_s3 + $0x124] ss:$16 sps:$4 sm:$0xff]   ;;  %v16841_v25 = vld [vmem:[%s24680_s3 + $0x12c] ss:$16 sps:$4 sm:$0xff]  }
 0x166   :  { %v1750_v34 = vmax.f32 %v1572_v24, %v1574_v28  ;;  %v1011_v36 = vpop.f32.mrf.mxu0  ;;  %v1324_v37 = vpop.f32.mrf.mxu1  ;;  %v1837_v43 = vmax.f32 %v1745_v31, %v1749_v27  ;;  %v1577_v59 = vmax.f32 %v1321_v38, 0.0  ;;  %3514 = vmatprep.subr.bf16.mxu0 %v16832_v7  ;;  %3688 = vmatpush2.bf16.msra.mxu1 %v16833_v8  ;;  %v16848_v8 = vld [vmem:[%s24680_s3 + $0x108] ss:$16 sps:$4 sm:$0xff]  }
 0x167   :  { %2058 = vst.msk [vmem:[#allocation2 + $0x60] sm:$0xff] %vm18778_vm4, %v16215_v32  ;;  %v1576_v62 = vmax.f32 %v1010_v39, 0.0  ;;  %v1578_v63 = vmax.f32 %v1323_v40, 0.0  ;;  %v19043_v2 = vadd.f32 %v1011_v36, %v18727_v50  ;;  %v1325_v13 = vadd.f32 %v1324_v37, %v18730_v52  ;;  %3515 = vmatpush2.bf16.msra.mxu0 %v16830_v6  ;;  %v16839_v32 = vld [vmem:[%s24680_s3 + $0x128] ss:$16 sps:$4 sm:$0xff]   ;;  %3689 = vmatprep.subr.bf16.mxu1 %v16841_v25 }
 0x168   :  { %v1838_v44 = vmax.f32 %v1746_v33, %v1750_v34  ;;  %v1013_v46 = vpop.f32.mrf.mxu0  ;;  %v1326_v48 = vpop.f32.mrf.mxu1  ;;  %v1751_v26 = vmax.f32 %v1575_v56, %v1577_v59  ;;  %3516 = vmatprep.subr.bf16.mxu0 %v16838_v20  ;;  %v18083_v59 = vmov 0  }
 0x169   :  { %v1014_v14 = vadd.f32 %v1013_v46, %v18741_v60  ;;  %v1327_v15 = vadd.f32 %v1326_v48, %v18744_v61  ;;  %v1752_v27 = vmax.f32 %v1576_v62, %v1578_v63  ;;  %v1579_v28 = vmax.f32 %v19043_v2, 0.0  ;;  %1874 = vst.msk [vmem:[#allocation2] sm:$0xff] %vm18778_vm4, %v18083_v59  ;;  %1875 = vst.msk [vmem:[#allocation2 + $0x8] sm:$0xff] %vm18778_vm4, %v18083_v59 }
 0x16a   :  { %v16216_v53 = vpack.c.bf16 %v1838_v44, %v1837_v43  ;;  %v1017_v57 = vpop.f32.mrf.mxu0  ;;  %v1330_v58 = vpop.f32.mrf.mxu1  ;;  %v1581_v37 = vmax.f32 %v1325_v13, 0.0  ;;  %3690 = vmatpush2.bf16.msra.mxu1 %v16839_v32  ;;  %1877 = vst.msk [vmem:[#allocation2 + $0xf0] sm:$0xff] %vm18778_vm4, %v18083_v59  ;;  %1878 = vst.msk [vmem:[#allocation2 + $0xf8] sm:$0xff] %vm18778_vm4, %v18083_v59 }
 0x16b   :  { %v1018_v0 = vadd.f32 %v1017_v57, %v18727_v50  ;;  %v1331_v3 = vadd.f32 %v1330_v58, %v18730_v52  ;;  %v1580_v38 = vmax.f32 %v1014_v14, 0.0  ;;  %v1582_v39 = vmax.f32 %v1327_v15, 0.0  ;;  %3517 = vmatpush2.bf16.msra.mxu0 %v16836_v19  ;;  %5156 = vst.msk [vmem:[#allocation3] sm:$0xff] %vm18778_vm4, %v18083_v59  ;;  %5157 = vst.msk [vmem:[#allocation3 + $0x8] sm:$0xff] %vm18778_vm4, %v18083_v59 }
 0x16c   :  { %2059 = vst.msk [vmem:[#allocation2 + $0x68] sm:$0xff] %vm18778_vm4, %v16216_v53  ;;  %v1019_v4 = vpop.f32.mrf.mxu0  ;;  %v1332_v5 = vpop.f32.mrf.mxu1  ;;  %5159 = vst.msk [vmem:[#allocation3 + $0x80] sm:$0xff] %vm18778_vm4, %v18083_v59  ;;  %v1753_v62 = vmax.f32 %v1579_v28, %v1581_v37  ;;  %v16856_v37 = vld [vmem:[%s24680_s3 + $0x464] ss:$16 sps:$4 sm:$0xff]  }
 0x16d   :  { %v1583_v9 = vmax.f32 %v1018_v0, 0.0  ;;  %v1020_v10 = vadd.f32 %v1019_v4, %v18741_v60  ;;  %v1333_v11 = vadd.f32 %v1332_v5, %v18744_v61  ;;  %v1585_v16 = vmax.f32 %v1331_v3, 0.0  ;;  %5160 = vst.msk [vmem:[#allocation3 + $0x88] sm:$0xff] %vm18778_vm4, %v18083_v59  ;;  %7373 = vst [vmem:[#allocation4] sm:$0xff] %v18083_v59  ;;  %v16845_v4 = vld [vmem:[%s24680_s3 + $0x100] ss:$16 sps:$4 sm:$0xff]  }
 0x16e   :  { %v1021_v17 = vpop.f32.mrf.mxu0  ;;  %v1334_v18 = vpop.f32.mrf.mxu1  ;;  %v1754_v63 = vmax.f32 %v1580_v38, %v1582_v39  ;;  %v16847_v5 = vld [vmem:[%s24680_s3 + $0x104] ss:$16 sps:$4 sm:$0xff]  }
 0x16f   :  { %v1584_v21 = vmax.f32 %v1020_v10, 0.0  ;;  %v1586_v22 = vmax.f32 %v1333_v11, 0.0  ;;  %v1022_v23 = vadd.f32 %v1021_v17, %v18727_v50  ;;  %v1335_v24 = vadd.f32 %v1334_v18, %v18730_v52  ;;  %3518 = vmatprep.subr.bf16.mxu0 %v16847_v5 }
 0x170   :  { %v1755_v29 = vmax.f32 %v1583_v9, %v1585_v16  ;;  %v1023_v30 = vpop.f32.mrf.mxu0  ;;  %v1336_v31 = vpop.f32.mrf.mxu1  ;;  %v16850_v9 = vld [vmem:[%s24680_s3 + $0x10c] ss:$16 sps:$4 sm:$0xff]   ;;  %3519 = vmatpush2.bf16.msra.mxu0 %v16845_v4 }
 0x171   :  { %v1756_v33 = vmax.f32 %v1584_v21, %v1586_v22  ;;  %v1587_v34 = vmax.f32 %v1022_v23, 0.0  ;;  %v1589_v35 = vmax.f32 %v1335_v24, 0.0  ;;  %v1024_v36 = vadd.f32 %v1023_v30, %v18741_v60  ;;  %3691 = vmatprep.subr.bf16.mxu1 %v16850_v9  ;;  %4368 = vmatprep.subr.bf16.mxu0 %v16856_v37 }
 0x172   :  { %v1337_v40 = vadd.f32 %v1336_v31, %v18744_v61  ;;  %v1027_v41 = vpop.f32.mrf.mxu0  ;;  %v1340_v42 = vpop.f32.mrf.mxu1  ;;  %v1839_v43 = vmax.f32 %v1751_v26, %v1755_v29  ;;  %3692 = vmatpush2.bf16.msra.mxu1 %v16848_v8 }
 0x173   :  { %v1840_v44 = vmax.f32 %v1752_v27, %v1756_v33  ;;  %v1588_v46 = vmax.f32 %v1024_v36, 0.0  ;;  %v16740_v48 = vld [vmem:[#allocation2 + $0x64] ss:$8 sps:$4 sm:$0xff]   ;;  %v16742_v49 = vld [vmem:[#allocation2 + $0x60] ss:$8 sps:$4 sm:$0xff]   ;;  %v1757_v51 = vmax.f32 %v1587_v34, %v1589_v35  ;;  %v1028_v6 = vadd.f32 %v1027_v41, %v18727_v50 }
 0x174   :  { %v1590_v53 = vmax.f32 %v1337_v40, 0.0  ;;  %v1029_v56 = vpop.f32.mrf.mxu0  ;;  %v1342_v57 = vpop.f32.mrf.mxu1  ;;  %14261 = vmatprep.mubr.msk.bf16.mxu0 %vm2651_vm5, %v16740_v48  ;;  %14275 = vmatprep.mubr.msk.bf16.mxu1 %vm2651_vm5, %v16740_v48  ;;  %v1341_v7 = vadd.f32 %v1340_v42, %v18730_v52  ;;  %v16859_v42 = vld [vmem:[%s24680_s3 + $0x46c] ss:$16 sps:$4 sm:$0xff]  }
 0x175   :  { %v16217_v58 = vpack.c.bf16 %v1840_v44, %v1839_v43  ;;  %2777 = vmatmul.mubr.bf16.gmra.mxu0 %v16742_v49  ;;  %2950 = vmatmul.mubr.bf16.gmra.mxu1 %v16742_v49  ;;  %v1841_v10 = vmax.f32 %v1753_v62, %v1757_v51  ;;  %v1030_v12 = vadd.f32 %v1029_v56, %v18741_v60  ;;  %v1591_v19 = vmax.f32 %v1028_v6, 0.0 }
 0x176   :  { %v1758_v0 = vmax.f32 %v1588_v46, %v1590_v53  ;;  %v1031_v2 = vpop.f32.mrf.mxu0  ;;  %v1344_v3 = vpop.f32.mrf.mxu1  ;;  %v1343_v13 = vadd.f32 %v1342_v57, %v18744_v61  ;;  %v1593_v20 = vmax.f32 %v1341_v7, 0.0  ;;  %4541 = vmatprep.subr.bf16.mxu1 %v16859_v42 }
 0x177   :  { %2060 = vst.msk [vmem:[#allocation2 + $0x70] sm:$0xff] %vm18778_vm4, %v16217_v58  ;;  %v1592_v22 = vmax.f32 %v1030_v12, 0.0  ;;  %v1032_v24 = vadd.f32 %v1031_v2, %v18727_v50  ;;  %v1345_v31 = vadd.f32 %v1344_v3, %v18730_v52 }
 0x178   :  { %v1842_v11 = vmax.f32 %v1754_v63, %v1758_v0  ;;  %v1033_v14 = vpop.f32.mrf.mxu0  ;;  %v1346_v15 = vpop.f32.mrf.mxu1  ;;  %v1594_v23 = vmax.f32 %v1343_v13, 0.0  ;;  %v1759_v43 = vmax.f32 %v1591_v19, %v1593_v20 }
 0x179   :  { %v1034_v32 = vadd.f32 %v1033_v14, %v18741_v60  ;;  %v1347_v33 = vadd.f32 %v1346_v15, %v18744_v61  ;;  %v1595_v46 = vmax.f32 %v1032_v24, 0.0  ;;  %v1597_v59 = vmax.f32 %v1345_v31, 0.0 }
 0x17a   :  { %v16218_v16 = vpack.c.bf16 %v1842_v11, %v1841_v10  ;;  %v1037_v17 = vpop.f32.mrf.mxu0  ;;  %v1350_v18 = vpop.f32.mrf.mxu1  ;;  %v1760_v44 = vmax.f32 %v1592_v22, %v1594_v23 }
 0x17b   :  { %v1038_v21 = vadd.f32 %v1037_v17, %v18727_v50  ;;  %v1351_v25 = vadd.f32 %v1350_v18, %v18730_v52  ;;  %v1596_v62 = vmax.f32 %v1034_v32, 0.0  ;;  %v1598_v63 = vmax.f32 %v1347_v33, 0.0 }
 0x17c   :  { %2061 = vst.msk [vmem:[#allocation2 + $0x78] sm:$0xff] %vm18778_vm4, %v16218_v16  ;;  %v1039_v26 = vpop.f32.mrf.mxu0  ;;  %v1352_v27 = vpop.f32.mrf.mxu1  ;;  %v1761_v14 = vmax.f32 %v1595_v46, %v1597_v59 }
 0x17d   :  { %v1599_v28 = vmax.f32 %v1038_v21, 0.0  ;;  %v1040_v29 = vadd.f32 %v1039_v26, %v18741_v60  ;;  %v1353_v30 = vadd.f32 %v1352_v27, %v18744_v61  ;;  %v1601_v34 = vmax.f32 %v1351_v25, 0.0 }
 0x17e   :  { %v1041_v35 = vpop.f32.mrf.mxu0  ;;  %v1354_v36 = vpop.f32.mrf.mxu1  ;;  %v1762_v15 = vmax.f32 %v1596_v62, %v1598_v63 }
 0x17f   :  { %v1600_v38 = vmax.f32 %v1040_v29, 0.0  ;;  %v1602_v39 = vmax.f32 %v1353_v30, 0.0  ;;  %v1042_v40 = vadd.f32 %v1041_v35, %v18727_v50  ;;  %v1355_v41 = vadd.f32 %v1354_v36, %v18730_v52 }
 0x180   :  { %v1763_v48 = vmax.f32 %v1599_v28, %v1601_v34  ;;  %v1043_v49 = vpop.f32.mrf.mxu0  ;;  %v1356_v51 = vpop.f32.mrf.mxu1 }
 0x181   :  { %v1764_v53 = vmax.f32 %v1600_v38, %v1602_v39  ;;  %v1603_v56 = vmax.f32 %v1042_v40, 0.0  ;;  %v1605_v57 = vmax.f32 %v1355_v41, 0.0  ;;  %v1044_v58 = vadd.f32 %v1043_v49, %v18741_v60 }
 0x182   :  { %v1357_v0 = vadd.f32 %v1356_v51, %v18744_v61  ;;  %v1047_v2 = vpop.f32.mrf.mxu0  ;;  %v1360_v3 = vpop.f32.mrf.mxu1  ;;  %v1843_v4 = vmax.f32 %v1759_v43, %v1763_v48 }
 0x183   :  { %v1844_v5 = vmax.f32 %v1760_v44, %v1764_v53  ;;  %v1604_v6 = vmax.f32 %v1044_v58, 0.0  ;;  %v16743_v7 = vld [vmem:[#allocation2 + $0x74] ss:$8 sps:$4 sm:$0xff]   ;;  %v16745_v8 = vld [vmem:[#allocation2 + $0x70] ss:$8 sps:$4 sm:$0xff]   ;;  %v1765_v9 = vmax.f32 %v1603_v56, %v1605_v57  ;;  %v1048_v19 = vadd.f32 %v1047_v2, %v18727_v50 }
 0x184   :  { %v1606_v10 = vmax.f32 %v1357_v0, 0.0  ;;  %v1049_v11 = vpop.f32.mrf.mxu0  ;;  %v1362_v12 = vpop.f32.mrf.mxu1  ;;  %14262 = vmatprep.mubr.msk.bf16.mxu0 %vm2651_vm5, %v16743_v7  ;;  %14276 = vmatprep.mubr.msk.bf16.mxu1 %vm2651_vm5, %v16743_v7  ;;  %v1361_v20 = vadd.f32 %v1360_v3, %v18730_v52 }
 0x185   :  { %v16219_v13 = vpack.c.bf16 %v1844_v5, %v1843_v4  ;;  %2787 = vmatmul.mubr.bf16.gmra.mxu0 %v16745_v8  ;;  %2960 = vmatmul.mubr.bf16.gmra.mxu1 %v16745_v8  ;;  %v1845_v21 = vmax.f32 %v1761_v14, %v1765_v9  ;;  %v1050_v23 = vadd.f32 %v1049_v11, %v18741_v60  ;;  %v1607_v30 = vmax.f32 %v1048_v19, 0.0 }
 0x186   :  { %v1766_v16 = vmax.f32 %v1604_v6, %v1606_v10  ;;  %v1051_v17 = vpop.f32.mrf.mxu0  ;;  %v1364_v18 = vpop.f32.mrf.mxu1  ;;  %v1363_v24 = vadd.f32 %v1362_v12, %v18744_v61  ;;  %v1609_v31 = vmax.f32 %v1361_v20, 0.0 }
 0x187   :  { %2062 = vst.msk [vmem:[#allocation2 + $0x80] sm:$0xff] %vm18778_vm4, %v16219_v13  ;;  %v1608_v33 = vmax.f32 %v1050_v23, 0.0  ;;  %v1052_v35 = vadd.f32 %v1051_v17, %v18727_v50  ;;  %v1365_v42 = vadd.f32 %v1364_v18, %v18730_v52 }
 0x188   :  { %v1846_v22 = vmax.f32 %v1762_v15, %v1766_v16  ;;  %v1053_v25 = vpop.f32.mrf.mxu0  ;;  %v1366_v26 = vpop.f32.mrf.mxu1  ;;  %v1610_v34 = vmax.f32 %v1363_v24, 0.0  ;;  %v1767_v58 = vmax.f32 %v1607_v30, %v1609_v31 }
 0x189   :  { %v1054_v43 = vadd.f32 %v1053_v25, %v18741_v60  ;;  %v1367_v44 = vadd.f32 %v1366_v26, %v18744_v61  ;;  %v1611_v62 = vmax.f32 %v1052_v35, 0.0  ;;  %v1613_v7 = vmax.f32 %v1365_v42, 0.0 }
 0x18a   :  { %v16220_v27 = vpack.c.bf16 %v1846_v22, %v1845_v21  ;;  %v1057_v28 = vpop.f32.mrf.mxu0  ;;  %v1370_v29 = vpop.f32.mrf.mxu1  ;;  %v1768_v59 = vmax.f32 %v1608_v33, %v1610_v34 }
 0x18b   :  { %v1058_v32 = vadd.f32 %v1057_v28, %v18727_v50  ;;  %v1371_v36 = vadd.f32 %v1370_v29, %v18730_v52  ;;  %v1612_v8 = vmax.f32 %v1054_v43, 0.0  ;;  %v1614_v9 = vmax.f32 %v1367_v44, 0.0 }
 0x18c   :  { %2063 = vst.msk [vmem:[#allocation2 + $0x88] sm:$0xff] %vm18778_vm4, %v16220_v27  ;;  %v1059_v37 = vpop.f32.mrf.mxu0  ;;  %v1372_v38 = vpop.f32.mrf.mxu1  ;;  %v1769_v23 = vmax.f32 %v1611_v62, %v1613_v7 }
 0x18d   :  { %v1615_v39 = vmax.f32 %v1058_v32, 0.0  ;;  %v1060_v40 = vadd.f32 %v1059_v37, %v18741_v60  ;;  %v1373_v41 = vadd.f32 %v1372_v38, %v18744_v61  ;;  %v1617_v46 = vmax.f32 %v1371_v36, 0.0 }
 0x18e   :  { %v1061_v48 = vpop.f32.mrf.mxu0  ;;  %v1374_v49 = vpop.f32.mrf.mxu1  ;;  %v1770_v24 = vmax.f32 %v1612_v8, %v1614_v9 }
 0x18f   :  { %v1616_v51 = vmax.f32 %v1060_v40, 0.0  ;;  %v1618_v53 = vmax.f32 %v1373_v41, 0.0  ;;  %v1062_v56 = vadd.f32 %v1061_v48, %v18727_v50  ;;  %v1375_v57 = vadd.f32 %v1374_v49, %v18730_v52 }
 0x190   :  { %v1771_v63 = vmax.f32 %v1615_v39, %v1617_v46  ;;  %v1063_v0 = vpop.f32.mrf.mxu0  ;;  %v1376_v2 = vpop.f32.mrf.mxu1 }
 0x191   :  { %v1772_v3 = vmax.f32 %v1616_v51, %v1618_v53  ;;  %v1619_v4 = vmax.f32 %v1062_v56, 0.0  ;;  %v1621_v5 = vmax.f32 %v1375_v57, 0.0  ;;  %v1064_v6 = vadd.f32 %v1063_v0, %v18741_v60 }
 0x192   :  { %v1377_v10 = vadd.f32 %v1376_v2, %v18744_v61  ;;  %v1067_v11 = vpop.f32.mrf.mxu0  ;;  %v1380_v12 = vpop.f32.mrf.mxu1  ;;  %v1847_v13 = vmax.f32 %v1767_v58, %v1771_v63 }
 0x193   :  { %v1848_v14 = vmax.f32 %v1768_v59, %v1772_v3  ;;  %v1620_v15 = vmax.f32 %v1064_v6, 0.0  ;;  %v16752_v16 = vld [vmem:[#allocation2 + $0x84] ss:$8 sps:$4 sm:$0xff]   ;;  %v16754_v17 = vld [vmem:[#allocation2 + $0x80] ss:$8 sps:$4 sm:$0xff]   ;;  %v1773_v18 = vmax.f32 %v1619_v4, %v1621_v5  ;;  %v1068_v28 = vadd.f32 %v1067_v11, %v18727_v50 }
 0x194   :  { %v1622_v19 = vmax.f32 %v1377_v10, 0.0  ;;  %v1069_v20 = vpop.f32.mrf.mxu0  ;;  %v1382_v21 = vpop.f32.mrf.mxu1  ;;  %14263 = vmatprep.mubr.msk.bf16.mxu0 %vm2651_vm5, %v16752_v16  ;;  %14277 = vmatprep.mubr.msk.bf16.mxu1 %vm2651_vm5, %v16752_v16  ;;  %v1381_v29 = vadd.f32 %v1380_v12, %v18730_v52 }
 0x195   :  { %v16221_v22 = vpack.c.bf16 %v1848_v14, %v1847_v13  ;;  %2797 = vmatmul.mubr.bf16.gmra.mxu0 %v16754_v17  ;;  %2970 = vmatmul.mubr.bf16.gmra.mxu1 %v16754_v17  ;;  %v1849_v30 = vmax.f32 %v1769_v23, %v1773_v18  ;;  %v1070_v32 = vadd.f32 %v1069_v20, %v18741_v60  ;;  %v1623_v39 = vmax.f32 %v1068_v28, 0.0 }
 0x196   :  { %v1774_v25 = vmax.f32 %v1620_v15, %v1622_v19  ;;  %v1071_v26 = vpop.f32.mrf.mxu0  ;;  %v1384_v27 = vpop.f32.mrf.mxu1  ;;  %v1383_v33 = vadd.f32 %v1382_v21, %v18744_v61  ;;  %v1625_v40 = vmax.f32 %v1381_v29, 0.0 }
 0x197   :  { %2064 = vst.msk [vmem:[#allocation2 + $0x90] sm:$0xff] %vm18778_vm4, %v16221_v22  ;;  %v1624_v42 = vmax.f32 %v1070_v32, 0.0  ;;  %v1072_v44 = vadd.f32 %v1071_v26, %v18727_v50  ;;  %v1385_v57 = vadd.f32 %v1384_v27, %v18730_v52 }
 0x198   :  { %v1850_v31 = vmax.f32 %v1770_v24, %v1774_v25  ;;  %v1073_v34 = vpop.f32.mrf.mxu0  ;;  %v1386_v35 = vpop.f32.mrf.mxu1  ;;  %v1626_v43 = vmax.f32 %v1383_v33, 0.0  ;;  %v1775_v6 = vmax.f32 %v1623_v39, %v1625_v40 }
 0x199   :  { %v1074_v58 = vadd.f32 %v1073_v34, %v18741_v60  ;;  %v1387_v59 = vadd.f32 %v1386_v35, %v18744_v61  ;;  %v1627_v8 = vmax.f32 %v1072_v44, 0.0  ;;  %v1629_v16 = vmax.f32 %v1385_v57, 0.0 }
 0x19a   :  { %v16222_v36 = vpack.c.bf16 %v1850_v31, %v1849_v30  ;;  %v1077_v37 = vpop.f32.mrf.mxu0  ;;  %v1390_v38 = vpop.f32.mrf.mxu1  ;;  %v1776_v7 = vmax.f32 %v1624_v42, %v1626_v43 }
 0x19b   :  { %v1078_v41 = vadd.f32 %v1077_v37, %v18727_v50  ;;  %v1391_v46 = vadd.f32 %v1390_v38, %v18730_v52  ;;  %v1628_v17 = vmax.f32 %v1074_v58, 0.0  ;;  %v1630_v18 = vmax.f32 %v1387_v59, 0.0 }
 0x19c   :  { %2065 = vst.msk [vmem:[#allocation2 + $0x98] sm:$0xff] %vm18778_vm4, %v16222_v36  ;;  %v1079_v48 = vpop.f32.mrf.mxu0  ;;  %v1392_v49 = vpop.f32.mrf.mxu1  ;;  %v1777_v32 = vmax.f32 %v1627_v8, %v1629_v16 }
 0x19d   :  { %v1631_v51 = vmax.f32 %v1078_v41, 0.0  ;;  %v1080_v53 = vadd.f32 %v1079_v48, %v18741_v60  ;;  %v1393_v56 = vadd.f32 %v1392_v49, %v18744_v61  ;;  %v1633_v62 = vmax.f32 %v1391_v46, 0.0 }
 0x19e   :  { %v1081_v63 = vpop.f32.mrf.mxu0  ;;  %v1394_v0 = vpop.f32.mrf.mxu1  ;;  %v1778_v33 = vmax.f32 %v1628_v17, %v1630_v18 }
 0x19f   :  { %v1632_v2 = vmax.f32 %v1080_v53, 0.0  ;;  %v1634_v3 = vmax.f32 %v1393_v56, 0.0  ;;  %v1082_v4 = vadd.f32 %v1081_v63, %v18727_v50  ;;  %v1395_v5 = vadd.f32 %v1394_v0, %v18730_v52 }
 0x1a0   :  { %v1779_v9 = vmax.f32 %v1631_v51, %v1633_v62  ;;  %v1083_v10 = vpop.f32.mrf.mxu0  ;;  %v1396_v11 = vpop.f32.mrf.mxu1 }
 0x1a1   :  { %v1780_v12 = vmax.f32 %v1632_v2, %v1634_v3  ;;  %v1635_v13 = vmax.f32 %v1082_v4, 0.0  ;;  %v1637_v14 = vmax.f32 %v1395_v5, 0.0  ;;  %v1084_v15 = vadd.f32 %v1083_v10, %v18741_v60 }
 0x1a2   :  { %v1397_v19 = vadd.f32 %v1396_v11, %v18744_v61  ;;  %v1087_v20 = vpop.f32.mrf.mxu0  ;;  %v1400_v21 = vpop.f32.mrf.mxu1  ;;  %v1851_v22 = vmax.f32 %v1775_v6, %v1779_v9 }
 0x1a3   :  { %v1852_v23 = vmax.f32 %v1776_v7, %v1780_v12  ;;  %v1636_v24 = vmax.f32 %v1084_v15, 0.0  ;;  %v16767_v25 = vld [vmem:[#allocation2 + $0x94] ss:$8 sps:$4 sm:$0xff]   ;;  %v16769_v26 = vld [vmem:[#allocation2 + $0x90] ss:$8 sps:$4 sm:$0xff]   ;;  %v1781_v27 = vmax.f32 %v1635_v13, %v1637_v14  ;;  %v1088_v37 = vadd.f32 %v1087_v20, %v18727_v50 }
 0x1a4   :  { %v1638_v28 = vmax.f32 %v1397_v19, 0.0  ;;  %v1089_v29 = vpop.f32.mrf.mxu0  ;;  %v1402_v30 = vpop.f32.mrf.mxu1  ;;  %14264 = vmatprep.mubr.msk.bf16.mxu0 %vm2651_vm5, %v16767_v25  ;;  %14278 = vmatprep.mubr.msk.bf16.mxu1 %vm2651_vm5, %v16767_v25  ;;  %v1401_v38 = vadd.f32 %v1400_v21, %v18730_v52  ;;  %v19614_v1 = vld [vmem:[#allocation2 + $0x90] ss:$8 sps:$4 sm:$0xff]  }
 0x1a5   :  { %v16223_v31 = vpack.c.bf16 %v1852_v23, %v1851_v22  ;;  %2807 = vmatmul.mubr.bf16.gmra.mxu0 %v16769_v26  ;;  %2980 = vmatmul.mubr.bf16.gmra.mxu1 %v16769_v26  ;;  %v1853_v39 = vmax.f32 %v1777_v32, %v1781_v27  ;;  %v1090_v41 = vadd.f32 %v1089_v29, %v18741_v60  ;;  %v1639_v51 = vmax.f32 %v1088_v37, 0.0 }
 0x1a6   :  { %v1782_v34 = vmax.f32 %v1636_v24, %v1638_v28  ;;  %v1091_v35 = vpop.f32.mrf.mxu0  ;;  %v1404_v36 = vpop.f32.mrf.mxu1  ;;  %v1403_v42 = vadd.f32 %v1402_v30, %v18744_v61  ;;  %v1641_v53 = vmax.f32 %v1401_v38, 0.0 }
 0x1a7   :  { %2066 = vst.msk [vmem:[#allocation2 + $0xa0] sm:$0xff] %vm18778_vm4, %v16223_v31  ;;  %v1640_v57 = vmax.f32 %v1090_v41, 0.0  ;;  %v1092_v59 = vadd.f32 %v1091_v35, %v18727_v50  ;;  %v1405_v5 = vadd.f32 %v1404_v36, %v18730_v52 }
 0x1a8   :  { %v1854_v40 = vmax.f32 %v1778_v33, %v1782_v34  ;;  %v1093_v43 = vpop.f32.mrf.mxu0  ;;  %v1406_v44 = vpop.f32.mrf.mxu1  ;;  %v1642_v58 = vmax.f32 %v1403_v42, 0.0  ;;  %v1783_v15 = vmax.f32 %v1639_v51, %v1641_v53 }
 0x1a9   :  { %v1094_v6 = vadd.f32 %v1093_v43, %v18741_v60  ;;  %v1407_v7 = vadd.f32 %v1406_v44, %v18744_v61  ;;  %v1643_v17 = vmax.f32 %v1092_v59, 0.0  ;;  %v1645_v25 = vmax.f32 %v1405_v5, 0.0 }
 0x1aa   :  { %v16224_v46 = vpack.c.bf16 %v1854_v40, %v1853_v39  ;;  %v1097_v48 = vpop.f32.mrf.mxu0  ;;  %v1410_v49 = vpop.f32.mrf.mxu1  ;;  %v1784_v16 = vmax.f32 %v1640_v57, %v1642_v58 }
 0x1ab   :  { %v1098_v56 = vadd.f32 %v1097_v48, %v18727_v50  ;;  %v1411_v62 = vadd.f32 %v1410_v49, %v18730_v52  ;;  %v1644_v26 = vmax.f32 %v1094_v6, 0.0  ;;  %v1646_v27 = vmax.f32 %v1407_v7, 0.0 }
 0x1ac   :  { %2067 = vst.msk [vmem:[#allocation2 + $0xa8] sm:$0xff] %vm18778_vm4, %v16224_v46  ;;  %v1099_v63 = vpop.f32.mrf.mxu0  ;;  %v1412_v0 = vpop.f32.mrf.mxu1  ;;  %v1785_v41 = vmax.f32 %v1643_v17, %v1645_v25 }
 0x1ad   :  { %v1647_v2 = vmax.f32 %v1098_v56, 0.0  ;;  %v1100_v3 = vadd.f32 %v1099_v63, %v18741_v60  ;;  %v1413_v4 = vadd.f32 %v1412_v0, %v18744_v61  ;;  %v1649_v8 = vmax.f32 %v1411_v62, 0.0 }
 0x1ae   :  { %v1101_v9 = vpop.f32.mrf.mxu0  ;;  %v1414_v10 = vpop.f32.mrf.mxu1  ;;  %v1786_v42 = vmax.f32 %v1644_v26, %v1646_v27 }
 0x1af   :  { %v1648_v11 = vmax.f32 %v1100_v3, 0.0  ;;  %v1650_v12 = vmax.f32 %v1413_v4, 0.0  ;;  %v1102_v13 = vadd.f32 %v1101_v9, %v18727_v50  ;;  %v1415_v14 = vadd.f32 %v1414_v10, %v18730_v52 }
 0x1b0   :  { %v1787_v18 = vmax.f32 %v1647_v2, %v1649_v8  ;;  %v1103_v19 = vpop.f32.mrf.mxu0  ;;  %v1416_v20 = vpop.f32.mrf.mxu1 }
 0x1b1   :  { %v1788_v21 = vmax.f32 %v1648_v11, %v1650_v12  ;;  %v1651_v22 = vmax.f32 %v1102_v13, 0.0  ;;  %v1653_v23 = vmax.f32 %v1415_v14, 0.0  ;;  %v1104_v24 = vadd.f32 %v1103_v19, %v18741_v60 }
 0x1b2   :  { %v1417_v28 = vadd.f32 %v1416_v20, %v18744_v61  ;;  %v1107_v29 = vpop.f32.mrf.mxu0  ;;  %v1420_v30 = vpop.f32.mrf.mxu1  ;;  %v1855_v31 = vmax.f32 %v1783_v15, %v1787_v18 }
 0x1b3   :  { %v1856_v32 = vmax.f32 %v1784_v16, %v1788_v21  ;;  %v1652_v33 = vmax.f32 %v1104_v24, 0.0  ;;  %v16782_v34 = vld [vmem:[#allocation2 + $0xa4] ss:$8 sps:$4 sm:$0xff]   ;;  %v16784_v35 = vld [vmem:[#allocation2 + $0xa0] ss:$8 sps:$4 sm:$0xff]   ;;  %v1789_v36 = vmax.f32 %v1651_v22, %v1653_v23  ;;  %v1108_v48 = vadd.f32 %v1107_v29, %v18727_v50 }
 0x1b4   :  { %v1654_v37 = vmax.f32 %v1417_v28, 0.0  ;;  %v1109_v38 = vpop.f32.mrf.mxu0  ;;  %v1422_v39 = vpop.f32.mrf.mxu1  ;;  %14265 = vmatprep.mubr.msk.bf16.mxu0 %vm2651_vm5, %v16782_v34  ;;  %14279 = vmatprep.mubr.msk.bf16.mxu1 %vm2651_vm5, %v16782_v34  ;;  %v1421_v49 = vadd.f32 %v1420_v30, %v18730_v52 }
 0x1b5   :  { %v16225_v40 = vpack.c.bf16 %v1856_v32, %v1855_v31  ;;  %2817 = vmatmul.mubr.bf16.gmra.mxu0 %v16784_v35  ;;  %2990 = vmatmul.mubr.bf16.gmra.mxu1 %v16784_v35  ;;  %v1857_v51 = vmax.f32 %v1785_v41, %v1789_v36  ;;  %v1110_v56 = vadd.f32 %v1109_v38, %v18741_v60  ;;  %v1655_v2 = vmax.f32 %v1108_v48, 0.0 }
 0x1b6   :  { %v1790_v43 = vmax.f32 %v1652_v33, %v1654_v37  ;;  %v1111_v44 = vpop.f32.mrf.mxu0  ;;  %v1424_v46 = vpop.f32.mrf.mxu1  ;;  %v1423_v57 = vadd.f32 %v1422_v39, %v18744_v61  ;;  %v1657_v3 = vmax.f32 %v1421_v49, 0.0 }
 0x1b7   :  { %2068 = vst.msk [vmem:[#allocation2 + $0xb0] sm:$0xff] %vm18778_vm4, %v16225_v40  ;;  %v1656_v5 = vmax.f32 %v1110_v56, 0.0  ;;  %v1112_v7 = vadd.f32 %v1111_v44, %v18727_v50  ;;  %v1425_v14 = vadd.f32 %v1424_v46, %v18730_v52 }
 0x1b8   :  { %v1858_v53 = vmax.f32 %v1786_v42, %v1790_v43  ;;  %v1113_v58 = vpop.f32.mrf.mxu0  ;;  %v1426_v59 = vpop.f32.mrf.mxu1  ;;  %v1658_v6 = vmax.f32 %v1423_v57, 0.0  ;;  %v1791_v24 = vmax.f32 %v1655_v2, %v1657_v3 }
 0x1b9   :  { %v1114_v15 = vadd.f32 %v1113_v58, %v18741_v60  ;;  %v1427_v16 = vadd.f32 %v1426_v59, %v18744_v61  ;;  %v1659_v26 = vmax.f32 %v1112_v7, 0.0  ;;  %v1661_v34 = vmax.f32 %v1425_v14, 0.0 }
 0x1ba   :  { %v16226_v62 = vpack.c.bf16 %v1858_v53, %v1857_v51  ;;  %v1117_v63 = vpop.f32.mrf.mxu0  ;;  %v1430_v0 = vpop.f32.mrf.mxu1  ;;  %v1792_v25 = vmax.f32 %v1656_v5, %v1658_v6 }
 0x1bb   :  { %v1118_v4 = vadd.f32 %v1117_v63, %v18727_v50  ;;  %v1431_v8 = vadd.f32 %v1430_v0, %v18730_v52  ;;  %v1660_v35 = vmax.f32 %v1114_v15, 0.0  ;;  %v1662_v36 = vmax.f32 %v1427_v16, 0.0 }
 0x1bc   :  { %2069 = vst.msk [vmem:[#allocation2 + $0xb8] sm:$0xff] %vm18778_vm4, %v16226_v62  ;;  %v1119_v9 = vpop.f32.mrf.mxu0  ;;  %v1432_v10 = vpop.f32.mrf.mxu1  ;;  %v1793_v56 = vmax.f32 %v1659_v26, %v1661_v34 }
 0x1bd   :  { %v1663_v11 = vmax.f32 %v1118_v4, 0.0  ;;  %v1120_v12 = vadd.f32 %v1119_v9, %v18741_v60  ;;  %v1433_v13 = vadd.f32 %v1432_v10, %v18744_v61  ;;  %v1665_v17 = vmax.f32 %v1431_v8, 0.0 }
 0x1be   :  { %v1121_v18 = vpop.f32.mrf.mxu0  ;;  %v1434_v19 = vpop.f32.mrf.mxu1  ;;  %v1794_v57 = vmax.f32 %v1660_v35, %v1662_v36 }
 0x1bf   :  { %v1664_v20 = vmax.f32 %v1120_v12, 0.0  ;;  %v1666_v21 = vmax.f32 %v1433_v13, 0.0  ;;  %v1122_v22 = vadd.f32 %v1121_v18, %v18727_v50  ;;  %v1435_v23 = vadd.f32 %v1434_v19, %v18730_v52 }
 0x1c0   :  { %v1795_v27 = vmax.f32 %v1663_v11, %v1665_v17  ;;  %v1123_v28 = vpop.f32.mrf.mxu0  ;;  %v1436_v29 = vpop.f32.mrf.mxu1 }
 0x1c1   :  { %v1796_v30 = vmax.f32 %v1664_v20, %v1666_v21  ;;  %v1667_v31 = vmax.f32 %v1122_v22, 0.0  ;;  %v1669_v32 = vmax.f32 %v1435_v23, 0.0  ;;  %v1124_v33 = vadd.f32 %v1123_v28, %v18741_v60 }
 0x1c2   :  { %v1437_v37 = vadd.f32 %v1436_v29, %v18744_v61  ;;  %v1127_v38 = vpop.f32.mrf.mxu0  ;;  %v1440_v39 = vpop.f32.mrf.mxu1  ;;  %v1859_v40 = vmax.f32 %v1791_v24, %v1795_v27 }
 0x1c3   :  { %v1860_v41 = vmax.f32 %v1792_v25, %v1796_v30  ;;  %v1668_v42 = vmax.f32 %v1124_v33, 0.0  ;;  %v16797_v43 = vld [vmem:[#allocation2 + $0xb4] ss:$8 sps:$4 sm:$0xff]   ;;  %v16799_v44 = vld [vmem:[#allocation2 + $0xb0] ss:$8 sps:$4 sm:$0xff]   ;;  %v1797_v46 = vmax.f32 %v1667_v31, %v1669_v32  ;;  %v1128_v63 = vadd.f32 %v1127_v38, %v18727_v50 }
 0x1c4   :  { %v1670_v48 = vmax.f32 %v1437_v37, 0.0  ;;  %v1129_v49 = vpop.f32.mrf.mxu0  ;;  %v1442_v51 = vpop.f32.mrf.mxu1  ;;  %14266 = vmatprep.mubr.msk.bf16.mxu0 %vm2651_vm5, %v16797_v43  ;;  %14280 = vmatprep.mubr.msk.bf16.mxu1 %vm2651_vm5, %v16797_v43  ;;  %v1441_v0 = vadd.f32 %v1440_v39, %v18730_v52 }
 0x1c5   :  { %v16227_v53 = vpack.c.bf16 %v1860_v41, %v1859_v40  ;;  %2827 = vmatmul.mubr.bf16.gmra.mxu0 %v16799_v44  ;;  %3000 = vmatmul.mubr.bf16.gmra.mxu1 %v16799_v44  ;;  %v1861_v2 = vmax.f32 %v1793_v56, %v1797_v46  ;;  %v1130_v4 = vadd.f32 %v1129_v49, %v18741_v60  ;;  %v1671_v11 = vmax.f32 %v1128_v63, 0.0 }
 0x1c6   :  { %v1798_v58 = vmax.f32 %v1668_v42, %v1670_v48  ;;  %v1131_v59 = vpop.f32.mrf.mxu0  ;;  %v1444_v62 = vpop.f32.mrf.mxu1  ;;  %v1443_v5 = vadd.f32 %v1442_v51, %v18744_v61  ;;  %v1673_v12 = vmax.f32 %v1441_v0, 0.0 }
 0x1c7   :  { %2070 = vst.msk [vmem:[#allocation2 + $0xc0] sm:$0xff] %vm18778_vm4, %v16227_v53  ;;  %v1672_v14 = vmax.f32 %v1130_v4, 0.0  ;;  %v1132_v16 = vadd.f32 %v1131_v59, %v18727_v50  ;;  %v1445_v23 = vadd.f32 %v1444_v62, %v18730_v52 }
 0x1c8   :  { %v1862_v3 = vmax.f32 %v1794_v57, %v1798_v58  ;;  %v1133_v6 = vpop.f32.mrf.mxu0  ;;  %v1446_v7 = vpop.f32.mrf.mxu1  ;;  %v1674_v15 = vmax.f32 %v1443_v5, 0.0  ;;  %v1799_v33 = vmax.f32 %v1671_v11, %v1673_v12 }
 0x1c9   :  { %v1134_v24 = vadd.f32 %v1133_v6, %v18741_v60  ;;  %v1447_v25 = vadd.f32 %v1446_v7, %v18744_v61  ;;  %v1675_v35 = vmax.f32 %v1132_v16, 0.0  ;;  %v1677_v43 = vmax.f32 %v1445_v23, 0.0 }
 0x1ca   :  { %v16228_v8 = vpack.c.bf16 %v1862_v3, %v1861_v2  ;;  %v1137_v9 = vpop.f32.mrf.mxu0  ;;  %v1450_v10 = vpop.f32.mrf.mxu1  ;;  %v1800_v34 = vmax.f32 %v1672_v14, %v1674_v15 }
 0x1cb   :  { %v1138_v13 = vadd.f32 %v1137_v9, %v18727_v50  ;;  %v1451_v17 = vadd.f32 %v1450_v10, %v18730_v52  ;;  %v1676_v44 = vmax.f32 %v1134_v24, 0.0  ;;  %v1678_v46 = vmax.f32 %v1447_v25, 0.0 }
 0x1cc   :  { %2071 = vst.msk [vmem:[#allocation2 + $0xc8] sm:$0xff] %vm18778_vm4, %v16228_v8  ;;  %v1139_v18 = vpop.f32.mrf.mxu0  ;;  %v1452_v19 = vpop.f32.mrf.mxu1  ;;  %v1801_v4 = vmax.f32 %v1675_v35, %v1677_v43 }
 0x1cd   :  { %v1679_v20 = vmax.f32 %v1138_v13, 0.0  ;;  %v1140_v21 = vadd.f32 %v1139_v18, %v18741_v60  ;;  %v1453_v22 = vadd.f32 %v1452_v19, %v18744_v61  ;;  %v1681_v26 = vmax.f32 %v1451_v17, 0.0 }
 0x1ce   :  { %v1141_v27 = vpop.f32.mrf.mxu0  ;;  %v1454_v28 = vpop.f32.mrf.mxu1  ;;  %v1802_v5 = vmax.f32 %v1676_v44, %v1678_v46 }
 0x1cf   :  { %v1680_v29 = vmax.f32 %v1140_v21, 0.0  ;;  %v1682_v30 = vmax.f32 %v1453_v22, 0.0  ;;  %v1142_v31 = vadd.f32 %v1141_v27, %v18727_v50  ;;  %v1455_v32 = vadd.f32 %v1454_v28, %v18730_v52 }
 0x1d0   :  { %v1803_v36 = vmax.f32 %v1679_v20, %v1681_v26  ;;  %v1143_v37 = vpop.f32.mrf.mxu0  ;;  %v1456_v38 = vpop.f32.mrf.mxu1 }
 0x1d1   :  { %v1804_v39 = vmax.f32 %v1680_v29, %v1682_v30  ;;  %v1683_v40 = vmax.f32 %v1142_v31, 0.0  ;;  %v1685_v41 = vmax.f32 %v1455_v32, 0.0  ;;  %v1144_v42 = vadd.f32 %v1143_v37, %v18741_v60 }
 0x1d2   :  { %v1457_v48 = vadd.f32 %v1456_v38, %v18744_v61  ;;  %v1147_v49 = vpop.f32.mrf.mxu0  ;;  %v1460_v51 = vpop.f32.mrf.mxu1  ;;  %v1863_v53 = vmax.f32 %v1799_v33, %v1803_v36 }
 0x1d3   :  { %v1864_v56 = vmax.f32 %v1800_v34, %v1804_v39  ;;  %v1684_v57 = vmax.f32 %v1144_v42, 0.0  ;;  %v19246_v58 = vld [vmem:[#allocation2 + $0xc4] ss:$8 sps:$4 sm:$0xff]   ;;  %v19248_v59 = vld [vmem:[#allocation2 + $0xc0] ss:$8 sps:$4 sm:$0xff]   ;;  %v1805_v62 = vmax.f32 %v1683_v40, %v1685_v41  ;;  %v1148_v9 = vadd.f32 %v1147_v49, %v18727_v50 }
 0x1d4   :  { %v1686_v63 = vmax.f32 %v1457_v48, 0.0  ;;  %v1149_v0 = vpop.f32.mrf.mxu0  ;;  %v1462_v2 = vpop.f32.mrf.mxu1  ;;  %14267 = vmatprep.mubr.msk.bf16.mxu0 %vm2651_vm5, %v19246_v58  ;;  %14281 = vmatprep.mubr.msk.bf16.mxu1 %vm2651_vm5, %v19246_v58  ;;  %v1461_v10 = vadd.f32 %v1460_v51, %v18730_v52 }
 0x1d5   :  { %v16229_v3 = vpack.c.bf16 %v1864_v56, %v1863_v53  ;;  %2837 = vmatmul.mubr.bf16.gmra.mxu0 %v19248_v59  ;;  %3010 = vmatmul.mubr.bf16.gmra.mxu1 %v19248_v59  ;;  %v1865_v11 = vmax.f32 %v1801_v4, %v1805_v62  ;;  %v1150_v13 = vadd.f32 %v1149_v0, %v18741_v60  ;;  %v1687_v20 = vmax.f32 %v1148_v9, 0.0 }
 0x1d6   :  { %v1806_v6 = vmax.f32 %v1684_v57, %v1686_v63  ;;  %v1151_v7 = vpop.f32.mrf.mxu0  ;;  %v1464_v8 = vpop.f32.mrf.mxu1  ;;  %v1463_v14 = vadd.f32 %v1462_v2, %v18744_v61  ;;  %v1689_v21 = vmax.f32 %v1461_v10, 0.0 }
 0x1d7   :  { %2072 = vst.msk [vmem:[#allocation2 + $0xd0] sm:$0xff] %vm18778_vm4, %v16229_v3  ;;  %v1688_v23 = vmax.f32 %v1150_v13, 0.0  ;;  %v1152_v25 = vadd.f32 %v1151_v7, %v18727_v50  ;;  %v1465_v32 = vadd.f32 %v1464_v8, %v18730_v52  ;;  %v16853_v13 = vld [vmem:[#allocation2 + $0x4] ss:$8 sps:$4 sm:$0xff]  }
 0x1d8   :  { %v1866_v12 = vmax.f32 %v1802_v5, %v1806_v6  ;;  %v1153_v15 = vpop.f32.mrf.mxu0  ;;  %v1466_v16 = vpop.f32.mrf.mxu1  ;;  %v1690_v24 = vmax.f32 %v1463_v14, 0.0  ;;  %v1807_v42 = vmax.f32 %v1687_v20, %v1689_v21  ;;  %v16865_v20 = vld [vmem:[%s24680_s3 + $0x444] ss:$16 sps:$4 sm:$0xff]   ;;  %v16868_v21 = vld [vmem:[%s24680_s3 + $0x44c] ss:$16 sps:$4 sm:$0xff]  }
 0x1d9   :  { %v1154_v33 = vadd.f32 %v1153_v15, %v18741_v60  ;;  %v1467_v34 = vadd.f32 %v1466_v16, %v18744_v61  ;;  %v1691_v44 = vmax.f32 %v1152_v25, 0.0  ;;  %v1693_v62 = vmax.f32 %v1465_v32, 0.0  ;;  %v16851_v16 = vld [vmem:[#allocation2] ss:$8 sps:$4 sm:$0xff]  }
 0x1da   :  { %v16230_v17 = vpack.c.bf16 %v1866_v12, %v1865_v11  ;;  %v1157_v18 = vpop.f32.mrf.mxu0  ;;  %v1470_v19 = vpop.f32.mrf.mxu1  ;;  %v1808_v43 = vmax.f32 %v1688_v23, %v1690_v24  ;;  %v16863_v24 = vld [vmem:[%s24680_s3 + $0x440] ss:$16 sps:$4 sm:$0xff]   ;;  %v16866_v25 = vld [vmem:[%s24680_s3 + $0x448] ss:$16 sps:$4 sm:$0xff]  }
 0x1db   :  { %v1158_v22 = vadd.f32 %v1157_v18, %v18727_v50  ;;  %v1471_v26 = vadd.f32 %v1470_v19, %v18730_v52  ;;  %v1692_v63 = vmax.f32 %v1154_v33, 0.0  ;;  %v1694_v0 = vmax.f32 %v1467_v34, 0.0  ;;  %v16857_v18 = vld [vmem:[%s24680_s3 + $0x468] ss:$16 sps:$4 sm:$0xff]   ;;  %v16860_v19 = vld [vmem:[#allocation2 + $0x14] ss:$8 sps:$4 sm:$0xff]  }
 0x1dc   :  { %2073 = vst.msk [vmem:[#allocation2 + $0xd8] sm:$0xff] %vm18778_vm4, %v16230_v17  ;;  %v1159_v27 = vpop.f32.mrf.mxu0  ;;  %v1472_v28 = vpop.f32.mrf.mxu1  ;;  %v16854_v17 = vld [vmem:[%s24680_s3 + $0x460] ss:$16 sps:$4 sm:$0xff]   ;;  %v16875_v32 = vld [vmem:[%s24680_s3 + $0x428] ss:$16 sps:$4 sm:$0xff]  }
 0x1dd   :  { %v1695_v29 = vmax.f32 %v1158_v22, 0.0  ;;  %v1160_v30 = vadd.f32 %v1159_v27, %v18741_v60  ;;  %v1473_v31 = vadd.f32 %v1472_v28, %v18744_v61  ;;  %v1697_v35 = vmax.f32 %v1471_v26, 0.0  ;;  %v16874_v26 = vld [vmem:[%s24680_s3 + $0x424] ss:$16 sps:$4 sm:$0xff]   ;;  %v16877_v27 = vld [vmem:[%s24680_s3 + $0x42c] ss:$16 sps:$4 sm:$0xff]  }
 0x1de   :  { %v1161_v36 = vpop.f32.mrf.mxu0  ;;  %v1474_v37 = vpop.f32.mrf.mxu1  ;;  %v1810_v9 = vmax.f32 %v1692_v63, %v1694_v0  ;;  %v19334_v33 = vld [vmem:[#allocation2 + $0x24] ss:$8 sps:$4 sm:$0xff]   ;;  %v16902_v63 = vld [vmem:[%s24680_s3 + $0x3c8] ss:$16 sps:$4 sm:$0xff]  }
 0x1df   :  { %v1696_v38 = vmax.f32 %v1160_v30, 0.0  ;;  %v1698_v39 = vmax.f32 %v1473_v31, 0.0  ;;  %v1162_v40 = vadd.f32 %v1161_v36, %v18727_v50  ;;  %v1475_v41 = vadd.f32 %v1474_v37, %v18730_v52  ;;  %v16862_v30 = vld [vmem:[#allocation2 + $0x10] ss:$8 sps:$4 sm:$0xff]   ;;  %v16883_v34 = vld [vmem:[%s24680_s3 + $0x404] ss:$16 sps:$4 sm:$0xff]  }
 0x1e0   :  { %v1811_v46 = vmax.f32 %v1695_v29, %v1697_v35  ;;  %v1163_v48 = vpop.f32.mrf.mxu0  ;;  %v1476_v49 = vpop.f32.mrf.mxu1  ;;  %v16872_v31 = vld [vmem:[%s24680_s3 + $0x420] ss:$16 sps:$4 sm:$0xff]   ;;  %v16886_v35 = vld [vmem:[%s24680_s3 + $0x40c] ss:$16 sps:$4 sm:$0xff]   ;;  %v16910_v0 = vld [vmem:[%s24680_s3 + $0x3a4] ss:$16 sps:$4 sm:$0xff]  }
 0x1e1   :  { %v1812_v51 = vmax.f32 %v1696_v38, %v1698_v39  ;;  %v1699_v53 = vmax.f32 %v1162_v40, 0.0  ;;  %v1701_v56 = vmax.f32 %v1475_v41, 0.0  ;;  %v1164_v57 = vadd.f32 %v1163_v48, %v18741_v60  ;;  %v16881_v38 = vld [vmem:[%s24680_s3 + $0x400] ss:$16 sps:$4 sm:$0xff]   ;;  %v16884_v39 = vld [vmem:[%s24680_s3 + $0x408] ss:$16 sps:$4 sm:$0xff]  }
 0x1e2   :  { %v1477_v2 = vadd.f32 %v1476_v49, %v18744_v61  ;;  %v1867_v3 = vmax.f32 %v1807_v42, %v1811_v46  ;;  %v1809_v60 = vmax.f32 %v1691_v44, %v1693_v62  ;;  %v16892_v40 = vld [vmem:[%s24680_s3 + $0x3e4] ss:$16 sps:$4 sm:$0xff]   ;;  %v16895_v41 = vld [vmem:[%s24680_s3 + $0x3ec] ss:$16 sps:$4 sm:$0xff]   ;;  %v19366_v44 = vld [vmem:[#allocation2 + $0x20] ss:$8 sps:$4 sm:$0xff]  }
 0x1e3   :  { %v1868_v50 = vmax.f32 %v1808_v43, %v1812_v51  ;;  %v1700_v4 = vmax.f32 %v1164_v57, 0.0  ;;  %v19276_v52 = vld [vmem:[#allocation2 + $0xd4] ss:$8 sps:$4 sm:$0xff]   ;;  %v19278_v5 = vld [vmem:[#allocation2 + $0xd0] ss:$8 sps:$4 sm:$0xff]   ;;  %v1813_v6 = vmax.f32 %v1699_v53, %v1701_v56 }
 0x1e4   :  { %v1702_v7 = vmax.f32 %v1477_v2, 0.0  ;;  %14268 = vmatprep.mubr.msk.bf16.mxu0 %vm2651_vm5, %v19276_v52  ;;  %14282 = vmatprep.mubr.msk.bf16.mxu1 %vm2651_vm5, %v19276_v52  ;;  %v19308_v22 = vpop.f32.mrf.mxu0  ;;  %v19310_v23 = vpop.f32.mrf.mxu1  ;;  %v16890_v46 = vld [vmem:[%s24680_s3 + $0x3e0] ss:$16 sps:$4 sm:$0xff]   ;;  %v16893_v48 = vld [vmem:[%s24680_s3 + $0x3e8] ss:$16 sps:$4 sm:$0xff]  }
 0x1e5   :  { %v16231_v8 = vpack.c.bf16 %v1868_v50, %v1867_v3  ;;  %2847 = vmatmul.mubr.bf16.gmra.mxu0 %v19278_v5  ;;  %3020 = vmatmul.mubr.bf16.gmra.mxu1 %v19278_v5  ;;  %v1869_v61 = vmax.f32 %v1809_v60, %v1813_v6  ;;  %v19374_v49 = vld [vmem:[#allocation2 + $0x34] ss:$8 sps:$4 sm:$0xff]   ;;  %v16899_v62 = vld [vmem:[%s24680_s3 + $0x3c0] ss:$16 sps:$4 sm:$0xff]  }
 0x1e6   :  { %v1814_v10 = vmax.f32 %v1700_v4, %v1702_v7  ;;  %v19324_v28 = vpop.f32.mrf.mxu0  ;;  %v19326_v29 = vpop.f32.mrf.mxu1  ;;  %v16901_v51 = vld [vmem:[%s24680_s3 + $0x3c4] ss:$16 sps:$4 sm:$0xff]   ;;  %v16904_v53 = vld [vmem:[%s24680_s3 + $0x3cc] ss:$16 sps:$4 sm:$0xff]   ;;  %v19408_v4 = vld [vmem:[#allocation2 + $0x30] ss:$8 sps:$4 sm:$0xff]  }
 0x1e7   :  { %2074 = vst.msk [vmem:[#allocation2 + $0xe0] sm:$0xff] %vm18778_vm4, %v16231_v8  ;;  %v16913_v2 = vld [vmem:[%s24680_s3 + $0x3ac] ss:$16 sps:$4 sm:$0xff]   ;;  %v16908_v6 = vld [vmem:[%s24680_s3 + $0x3a0] ss:$16 sps:$4 sm:$0xff]  }
 0x1e8   :  { %v1870_v11 = vmax.f32 %v1810_v9, %v1814_v10  ;;  %v19346_v36 = vpop.f32.mrf.mxu0  ;;  %v19348_v37 = vpop.f32.mrf.mxu1  ;;  %v16911_v7 = vld [vmem:[%s24680_s3 + $0x3a8] ss:$16 sps:$4 sm:$0xff]   ;;  %v19416_v8 = vld [vmem:[#allocation2 + $0x44] ss:$8 sps:$4 sm:$0xff]  }
 0x1e9   :  { %v16919_v60 = vld [vmem:[%s24680_s3 + $0x384] ss:$16 sps:$4 sm:$0xff]   ;;  %v16922_v9 = vld [vmem:[%s24680_s3 + $0x38c] ss:$16 sps:$4 sm:$0xff]  }
 0x1ea   :  { %v16232_v12 = vpack.c.bf16 %v1870_v11, %v1869_v61  ;;  %v19362_v42 = vpop.f32.mrf.mxu0  ;;  %v19364_v43 = vpop.f32.mrf.mxu1  ;;  %v16917_v11 = vld [vmem:[%s24680_s3 + $0x380] ss:$16 sps:$4 sm:$0xff]  }
 0x1ec   :  { %2075 = vst.msk [vmem:[#allocation2 + $0xe8] sm:$0xff] %vm18778_vm4, %v16232_v12  ;;  %v16920_v12 = vld [vmem:[%s24680_s3 + $0x388] ss:$16 sps:$4 sm:$0xff]  }
 0x1f3   :  { %v16842_v14 = vld [vmem:[#allocation2 + $0xe4] ss:$8 sps:$4 sm:$0xff]   ;;  %v16844_v15 = vld [vmem:[#allocation2 + $0xe0] ss:$8 sps:$4 sm:$0xff]  }
 0x1f4   :  { %14269 = vmatprep.mubr.msk.bf16.mxu0 %vm2651_vm5, %v16842_v14  ;;  %14283 = vmatprep.mubr.msk.bf16.mxu1 %vm2651_vm5, %v16842_v14  ;;  %v16931_v14 = vld [vmem:[%s24680_s3 + $0x52c] ss:$16 sps:$4 sm:$0xff]  }
 0x1f5   :  { %2857 = vmatmul.mubr.bf16.gmra.mxu0 %v16844_v15  ;;  %3030 = vmatmul.mubr.bf16.gmra.mxu1 %v16844_v15  ;;  %v19382_v56 = vpop.f32.mrf.mxu0  ;;  %v19384_v57 = vpop.f32.mrf.mxu1 }
 0x1f6   :  { %14368 = vmatprep.mubr.msk.bf16.mxu0 %vm2651_vm5, %v16853_v13  ;;  %14382 = vmatprep.mubr.msk.bf16.mxu1 %vm2651_vm5, %v16853_v13  ;;  %v16928_v13 = vld [vmem:[%s24680_s3 + $0x524] ss:$16 sps:$4 sm:$0xff]  }
 0x1f7   :  { %v19404_v3 = vpop.f32.mrf.mxu0  ;;  %v19406_v50 = vpop.f32.mrf.mxu1 }
 0x1f9   :  { %v19424_v10 = vpop.f32.mrf.mxu0  ;;  %v19426_v61 = vpop.f32.mrf.mxu1 }
 0x1fb   :  { %v19446_v15 = vpop.f32.mrf.mxu0 }
 0x1fd   :  { %3521 = vmatmul.mubr.bf16.vlgmr.msra.gmra.mxu0 %v16851_v16  ;;  %3694 = vmatmul.mubr.bf16.vlgmr.msra.gmra.mxu1 %v16851_v16  ;;  %v19448_v16 = vpop.f32.mrf.mxu1 }
 0x1fe   :  { %14369 = vmatprep.mubr.msk.bf16.mxu0 %vm2651_vm5, %v16860_v19  ;;  %14383 = vmatprep.mubr.msk.bf16.mxu1 %vm2651_vm5, %v16860_v19  ;;  %v19454_v19 = vld [vmem:[#allocation2 + $0x40] ss:$8 sps:$4 sm:$0xff]  }
 0x1ff   :  { %4369 = vmatpush1.bf16.msra.mxu0 %v16854_v17  ;;  %4542 = vmatpush1.bf16.msra.mxu1 %v16857_v18 }
 0x200   :  { %4370 = vmatprep.subr.bf16.mxu0 %v16865_v20  ;;  %4543 = vmatprep.subr.bf16.mxu1 %v16868_v21  ;;  %v16926_v20 = vld [vmem:[%s24680_s3 + $0x520] ss:$16 sps:$4 sm:$0xff]   ;;  %v16929_v21 = vld [vmem:[%s24680_s3 + $0x528] ss:$16 sps:$4 sm:$0xff]  }
 0x203   :  { %4371 = vmatpush1.bf16.msra.mxu0 %v16863_v24  ;;  %4544 = vmatpush1.bf16.msra.mxu1 %v16866_v25  ;;  %v19462_v24 = vld [vmem:[#allocation2 + $0x54] ss:$8 sps:$4 sm:$0xff]  }
 0x204   :  { %4372 = vmatprep.subr.bf16.mxu0 %v16874_v26  ;;  %4545 = vmatprep.subr.bf16.mxu1 %v16877_v27  ;;  %v16937_v25 = vld [vmem:[%s24680_s3 + $0x504] ss:$16 sps:$4 sm:$0xff]   ;;  %v16940_v26 = vld [vmem:[%s24680_s3 + $0x50c] ss:$16 sps:$4 sm:$0xff]  }
 0x205   :  { %3531 = vmatmul.mubr.bf16.gmra.mxu0 %v16862_v30  ;;  %3704 = vmatmul.mubr.bf16.gmra.mxu1 %v16862_v30  ;;  %v19450_v17 = vpop.f32.mrf.mxu0  ;;  %v19452_v18 = vpop.f32.mrf.mxu1 }
 0x206   :  { %14370 = vmatprep.mubr.msk.bf16.mxu0 %vm2651_vm5, %v19334_v33  ;;  %14384 = vmatprep.mubr.msk.bf16.mxu1 %vm2651_vm5, %v19334_v33 }
 0x207   :  { %4373 = vmatpush1.bf16.msra.mxu0 %v16872_v31  ;;  %4546 = vmatpush1.bf16.msra.mxu1 %v16875_v32  ;;  %v19476_v27 = vpop.f32.mrf.mxu0  ;;  %v19478_v30 = vpop.f32.mrf.mxu1  ;;  %v16935_v31 = vld [vmem:[%s24680_s3 + $0x500] ss:$16 sps:$4 sm:$0xff]   ;;  %v16938_v32 = vld [vmem:[%s24680_s3 + $0x508] ss:$16 sps:$4 sm:$0xff]  }
 0x208   :  { %4374 = vmatprep.subr.bf16.mxu0 %v16883_v34  ;;  %4547 = vmatprep.subr.bf16.mxu1 %v16886_v35  ;;  %v16946_v34 = vld [vmem:[%s24680_s3 + $0x4e4] ss:$16 sps:$4 sm:$0xff]   ;;  %v16949_v35 = vld [vmem:[%s24680_s3 + $0x4ec] ss:$16 sps:$4 sm:$0xff]  }
 0x20b   :  { %4375 = vmatpush1.bf16.msra.mxu0 %v16881_v38  ;;  %4548 = vmatpush1.bf16.msra.mxu1 %v16884_v39  ;;  %v19492_v38 = vpop.f32.mrf.mxu0  ;;  %v19494_v39 = vpop.f32.mrf.mxu1 }
 0x20c   :  { %4376 = vmatprep.subr.bf16.mxu0 %v16892_v40  ;;  %4549 = vmatprep.subr.bf16.mxu1 %v16895_v41  ;;  %v19496_v40 = vld [vmem:[#allocation2 + $0x50] ss:$8 sps:$4 sm:$0xff]  }
 0x20d   :  { %3541 = vmatmul.mubr.bf16.gmra.mxu0 %v19366_v44  ;;  %3714 = vmatmul.mubr.bf16.gmra.mxu1 %v19366_v44  ;;  %v16944_v41 = vld [vmem:[%s24680_s3 + $0x4e0] ss:$16 sps:$4 sm:$0xff]  }
 0x20e   :  { %14371 = vmatprep.mubr.msk.bf16.mxu0 %vm2651_vm5, %v19374_v49  ;;  %14385 = vmatprep.mubr.msk.bf16.mxu1 %vm2651_vm5, %v19374_v49 }
 0x20f   :  { %4377 = vmatpush1.bf16.msra.mxu0 %v16890_v46  ;;  %4550 = vmatpush1.bf16.msra.mxu1 %v16893_v48  ;;  %v16947_v46 = vld [vmem:[%s24680_s3 + $0x4e8] ss:$16 sps:$4 sm:$0xff]   ;;  %v19504_v48 = vld [vmem:[#allocation2 + $0x64] ss:$8 sps:$4 sm:$0xff]  }
 0x210   :  { %4378 = vmatprep.subr.bf16.mxu0 %v16901_v51  ;;  %4551 = vmatprep.subr.bf16.mxu1 %v16904_v53  ;;  %v16955_v51 = vld [vmem:[%s24680_s3 + $0x4c4] ss:$16 sps:$4 sm:$0xff]   ;;  %v16958_v53 = vld [vmem:[%s24680_s3 + $0x4cc] ss:$16 sps:$4 sm:$0xff]  }
 0x213   :  { %4379 = vmatpush1.bf16.msra.mxu0 %v16899_v62  ;;  %4552 = vmatpush1.bf16.msra.mxu1 %v16902_v63  ;;  %v19518_v62 = vpop.f32.mrf.mxu0  ;;  %v19520_v63 = vpop.f32.mrf.mxu1 }
 0x214   :  { %4380 = vmatprep.subr.bf16.mxu0 %v16910_v0  ;;  %4553 = vmatprep.subr.bf16.mxu1 %v16913_v2  ;;  %v16953_v0 = vld [vmem:[%s24680_s3 + $0x4c0] ss:$16 sps:$4 sm:$0xff]   ;;  %v16956_v2 = vld [vmem:[%s24680_s3 + $0x4c8] ss:$16 sps:$4 sm:$0xff]  }
 0x215   :  { %3551 = vmatmul.mubr.bf16.gmra.mxu0 %v19408_v4  ;;  %3724 = vmatmul.mubr.bf16.gmra.mxu1 %v19408_v4 }
 0x216   :  { %14372 = vmatprep.mubr.msk.bf16.mxu0 %vm2651_vm5, %v19416_v8  ;;  %14386 = vmatprep.mubr.msk.bf16.mxu1 %vm2651_vm5, %v19416_v8 }
 0x217   :  { %4381 = vmatpush1.bf16.msra.mxu0 %v16908_v6  ;;  %4554 = vmatpush1.bf16.msra.mxu1 %v16911_v7  ;;  %v16961_v6 = vld [vmem:[%s24680_s3 + $0x4a4] ss:$16 sps:$4 sm:$0xff]   ;;  %v16964_v7 = vld [vmem:[%s24680_s3 + $0x4ac] ss:$16 sps:$4 sm:$0xff]  }
 0x218   :  { %4382 = vmatprep.subr.bf16.mxu0 %v16919_v60  ;;  %4555 = vmatprep.subr.bf16.mxu1 %v16922_v9  ;;  %v19534_v60 = vpop.f32.mrf.mxu0  ;;  %v19536_v9 = vpop.f32.mrf.mxu1 }
 0x219   :  { %24712 = vst [vmem:[#allocation10_spill] sm:$0xff] %v19534_v60  ;;  %24713 = vst [vmem:[#allocation11_spill] sm:$0xff] %v19536_v9 }
 0x21b   :  { %4383 = vmatpush1.bf16.msra.mxu0 %v16917_v11  ;;  %4556 = vmatpush1.bf16.msra.mxu1 %v16920_v12  ;;  %v19538_v11 = vld [vmem:[#allocation2 + $0x60] ss:$8 sps:$4 sm:$0xff]  }
 0x21c   :  { %4388 = vmatprep.subr.bf16.mxu0 %v16928_v13  ;;  %4561 = vmatprep.subr.bf16.mxu1 %v16931_v14  ;;  %v16959_v12 = vld [vmem:[%s24680_s3 + $0x4a0] ss:$16 sps:$4 sm:$0xff]   ;;  %v16962_v13 = vld [vmem:[%s24680_s3 + $0x4a8] ss:$16 sps:$4 sm:$0xff]   ;;  %v19546_v14 = vld [vmem:[#allocation2 + $0x74] ss:$8 sps:$4 sm:$0xff]  }
 0x21d   :  { %3561 = vmatmul.mubr.bf16.gmra.mxu0 %v19454_v19  ;;  %3734 = vmatmul.mubr.bf16.gmra.mxu1 %v19454_v19 }
 0x21e   :  { %14373 = vmatprep.mubr.msk.bf16.mxu0 %vm2651_vm5, %v19462_v24  ;;  %14387 = vmatprep.mubr.msk.bf16.mxu1 %vm2651_vm5, %v19462_v24 }
 0x21f   :  { %4389 = vmatpush2.bf16.msra.mxu0 %v16926_v20  ;;  %4562 = vmatpush2.bf16.msra.mxu1 %v16929_v21  ;;  %v16967_v20 = vld [vmem:[%s24680_s3 + $0x484] ss:$16 sps:$4 sm:$0xff]   ;;  %v16970_v21 = vld [vmem:[%s24680_s3 + $0x48c] ss:$16 sps:$4 sm:$0xff]  }
 0x220   :  { %4390 = vmatprep.subr.bf16.mxu0 %v16937_v25  ;;  %4563 = vmatprep.subr.bf16.mxu1 %v16940_v26  ;;  %v19554_v25 = vpop.f32.mrf.mxu0  ;;  %v19556_v26 = vpop.f32.mrf.mxu1 }
 0x221   :  { %24714 = vst [vmem:[#allocation12_spill] sm:$0xff] %v19554_v25  ;;  %24715 = vst [vmem:[#allocation13_spill] sm:$0xff] %v19556_v26 }
 0x223   :  { %4391 = vmatpush2.bf16.msra.mxu0 %v16935_v31  ;;  %4564 = vmatpush2.bf16.msra.mxu1 %v16938_v32  ;;  %v16965_v31 = vld [vmem:[%s24680_s3 + $0x480] ss:$16 sps:$4 sm:$0xff]   ;;  %v16968_v32 = vld [vmem:[%s24680_s3 + $0x488] ss:$16 sps:$4 sm:$0xff]  }
 0x224   :  { %4392 = vmatprep.subr.bf16.mxu0 %v16946_v34  ;;  %4565 = vmatprep.subr.bf16.mxu1 %v16949_v35  ;;  %v19570_v34 = vpop.f32.mrf.mxu0  ;;  %v19572_v35 = vpop.f32.mrf.mxu1 }
 0x225   :  { %3571 = vmatmul.mubr.bf16.gmra.mxu0 %v19496_v40  ;;  %3744 = vmatmul.mubr.bf16.gmra.mxu1 %v19496_v40  ;;  %24716 = vst [vmem:[#allocation14_spill] sm:$0xff] %v19570_v34  ;;  %24717 = vst [vmem:[#allocation15_spill] sm:$0xff] %v19572_v35 }
 0x226   :  { %14374 = vmatprep.mubr.msk.bf16.mxu0 %vm2651_vm5, %v19504_v48  ;;  %14388 = vmatprep.mubr.msk.bf16.mxu1 %vm2651_vm5, %v19504_v48 }
 0x227   :  { %4393 = vmatpush2.bf16.msra.mxu0 %v16944_v41  ;;  %4566 = vmatpush2.bf16.msra.mxu1 %v16947_v46  ;;  %v19574_v41 = vld [vmem:[#allocation2 + $0x70] ss:$8 sps:$4 sm:$0xff]   ;;  %v19576_v46 = vld [vmem:[#allocation2 + $0x84] ss:$8 sps:$4 sm:$0xff]  }
 0x228   :  { %4394 = vmatprep.subr.bf16.mxu0 %v16955_v51  ;;  %4567 = vmatprep.subr.bf16.mxu1 %v16958_v53  ;;  %v19578_v51 = vpop.f32.mrf.mxu0  ;;  %v19580_v53 = vpop.f32.mrf.mxu1 }
 0x229   :  { %24718 = vst [vmem:[#allocation16_spill] sm:$0xff] %v19578_v51  ;;  %24719 = vst [vmem:[#allocation17_spill] sm:$0xff] %v19580_v53 }
 0x22b   :  { %4395 = vmatpush2.bf16.msra.mxu0 %v16953_v0  ;;  %4568 = vmatpush2.bf16.msra.mxu1 %v16956_v2  ;;  %v19588_v0 = vpop.f32.mrf.mxu0  ;;  %v19590_v2 = vpop.f32.mrf.mxu1 }
 0x22c   :  { %4396 = vmatprep.subr.bf16.mxu0 %v16961_v6  ;;  %4569 = vmatprep.subr.bf16.mxu1 %v16964_v7  ;;  %24720 = vst [vmem:[#allocation18_spill] sm:$0xff] %v19588_v0  ;;  %24721 = vst [vmem:[#allocation19_spill] sm:$0xff] %v19590_v2 }
 0x22d   :  { %3581 = vmatmul.mubr.bf16.gmra.mxu0 %v19538_v11  ;;  %3754 = vmatmul.mubr.bf16.gmra.mxu1 %v19538_v11  ;;  %v19592_v6 = vpop.f32.mrf.mxu0  ;;  %v19594_v7 = vpop.f32.mrf.mxu1 }
 0x22e   :  { %14375 = vmatprep.mubr.msk.bf16.mxu0 %vm2651_vm5, %v19546_v14  ;;  %14389 = vmatprep.mubr.msk.bf16.mxu1 %vm2651_vm5, %v19546_v14  ;;  %24722 = vst [vmem:[#allocation20_spill] sm:$0xff] %v19592_v6  ;;  %24723 = vst [vmem:[#allocation21_spill] sm:$0xff] %v19594_v7  ;;  %v19616_v7 = vld [vmem:[#allocation2 + $0xa4] ss:$8 sps:$4 sm:$0xff]  }
 0x22f   :  { %4397 = vmatpush2.bf16.msra.mxu0 %v16959_v12  ;;  %4570 = vmatpush2.bf16.msra.mxu1 %v16962_v13  ;;  %v19596_v12 = vld [vmem:[#allocation2 + $0x80] ss:$8 sps:$4 sm:$0xff]   ;;  %v19598_v13 = vld [vmem:[#allocation2 + $0x94] ss:$8 sps:$4 sm:$0xff]  }
 0x230   :  { %4398 = vmatprep.subr.bf16.mxu0 %v16967_v20  ;;  %4571 = vmatprep.subr.bf16.mxu1 %v16970_v21  ;;  %v19606_v20 = vpop.f32.mrf.mxu0  ;;  %v19608_v21 = vpop.f32.mrf.mxu1 }
 0x231   :  { %24724 = vst [vmem:[#allocation22_spill] sm:$0xff] %v19606_v20  ;;  %24725 = vst [vmem:[#allocation23_spill] sm:$0xff] %v19608_v21  ;;  %v19632_v21 = vld [vmem:[#allocation2 + $0xa0] ss:$8 sps:$4 sm:$0xff]   ;;  %v19634_v20 = vld [vmem:[#allocation2 + $0xb4] ss:$8 sps:$4 sm:$0xff]  }
 0x233   :  { %4399 = vmatpush2.bf16.msra.mxu0 %v16965_v31  ;;  %4572 = vmatpush2.bf16.msra.mxu1 %v16968_v32  ;;  %v19610_v31 = vpop.f32.mrf.mxu0  ;;  %v19612_v32 = vpop.f32.mrf.mxu1 }
 0x234   :  { %24726 = vst [vmem:[#allocation24_spill] sm:$0xff] %v19610_v31  ;;  %24727 = vst [vmem:[#allocation25_spill] sm:$0xff] %v19612_v32 }
 0x235   :  { %3591 = vmatmul.mubr.bf16.gmra.mxu0 %v19574_v41  ;;  %3764 = vmatmul.mubr.bf16.gmra.mxu1 %v19574_v41  ;;  %v19618_v6 = vpop.f32.mrf.mxu0  ;;  %v19620_v2 = vpop.f32.mrf.mxu1 }
 0x236   :  { %14376 = vmatprep.mubr.msk.bf16.mxu0 %vm2651_vm5, %v19576_v46  ;;  %14390 = vmatprep.mubr.msk.bf16.mxu1 %vm2651_vm5, %v19576_v46  ;;  %24728 = vst [vmem:[#allocation26_spill] sm:$0xff] %v19618_v6  ;;  %24729 = vst [vmem:[#allocation27_spill] sm:$0xff] %v19620_v2 }
 0x237   :  { %v19628_v31 = vpop.f32.mrf.mxu0  ;;  %v19630_v32 = vpop.f32.mrf.mxu1 }
 0x238   :  { %24730 = vst [vmem:[#allocation28_spill] sm:$0xff] %v19628_v31  ;;  %24731 = vst [vmem:[#allocation29_spill] sm:$0xff] %v19630_v32 }
 0x239   :  { %v19636_v6 = vpop.f32.mrf.mxu0  ;;  %v19638_v2 = vpop.f32.mrf.mxu1 }
 0x23a   :  { %24732 = vst [vmem:[#allocation30_spill] sm:$0xff] %v19636_v6  ;;  %24733 = vst [vmem:[#allocation31_spill] sm:$0xff] %v19638_v2  ;;  %v19654_v6 = vld [vmem:[#allocation2 + $0xb0] ss:$8 sps:$4 sm:$0xff]  }
 0x23b   :  { %v19646_v31 = vpop.f32.mrf.mxu0  ;;  %v19648_v32 = vpop.f32.mrf.mxu1 }
 0x23c   :  { %24734 = vst [vmem:[#allocation32_spill] sm:$0xff] %v19646_v31  ;;  %24735 = vst [vmem:[#allocation33_spill] sm:$0xff] %v19648_v32 }
 0x23d   :  { %3601 = vmatmul.mubr.bf16.gmra.mxu0 %v19596_v12  ;;  %3774 = vmatmul.mubr.bf16.gmra.mxu1 %v19596_v12 }
 0x23e   :  { %14377 = vmatprep.mubr.msk.bf16.mxu0 %vm2651_vm5, %v19598_v13  ;;  %14391 = vmatprep.mubr.msk.bf16.mxu1 %vm2651_vm5, %v19598_v13 }
 0x245   :  { %3611 = vmatmul.mubr.bf16.gmra.mxu0 %v19614_v1  ;;  %3784 = vmatmul.mubr.bf16.gmra.mxu1 %v19614_v1  ;;  %v19650_v0 = vpop.f32.mrf.mxu0  ;;  %v19652_v53 = vpop.f32.mrf.mxu1 }
 0x246   :  { %14378 = vmatprep.mubr.msk.bf16.mxu0 %vm2651_vm5, %v19616_v7  ;;  %14392 = vmatprep.mubr.msk.bf16.mxu1 %vm2651_vm5, %v19616_v7  ;;  %24736 = vst [vmem:[#allocation34_spill] sm:$0xff] %v19650_v0  ;;  %24737 = vst [vmem:[#allocation35_spill] sm:$0xff] %v19652_v53 }
 0x247   :  { %v19662_v2 = vpop.f32.mrf.mxu0  ;;  %v19664_v31 = vpop.f32.mrf.mxu1 }
 0x248   :  { %24738 = vst [vmem:[#allocation36_spill] sm:$0xff] %v19662_v2  ;;  %24739 = vst [vmem:[#allocation37_spill] sm:$0xff] %v19664_v31 }
 0x249   :  { %v19666_v32 = vpop.f32.mrf.mxu0  ;;  %v19668_v0 = vpop.f32.mrf.mxu1 }
 0x24a   :  { %24740 = vst [vmem:[#allocation38_spill] sm:$0xff] %v19666_v32  ;;  %24741 = vst [vmem:[#allocation39_spill] sm:$0xff] %v19668_v0 }
 0x24b   :  { %v19676_v53 = vpop.f32.mrf.mxu0 }
 0x24c   :  { %24742 = vst [vmem:[#allocation40_spill] sm:$0xff] %v19676_v53 }
 0x24d   :  { %3621 = vmatmul.mubr.bf16.gmra.mxu0 %v19632_v21  ;;  %3794 = vmatmul.mubr.bf16.gmra.mxu1 %v19632_v21 }
 0x24e   :  { %14379 = vmatprep.mubr.msk.bf16.mxu0 %vm2651_vm5, %v19634_v20  ;;  %14393 = vmatprep.mubr.msk.bf16.mxu1 %vm2651_vm5, %v19634_v20 }
 0x255   :  { %3631 = vmatmul.mubr.bf16.gmra.mxu0 %v19654_v6  ;;  %3804 = vmatmul.mubr.bf16.gmra.mxu1 %v19654_v6  ;;  %v19680_v2 = vpop.f32.mrf.mxu0 }
 0x256   :  { %14380 = vmatprep.mubr.msk.bf16.mxu0 %vm2651_vm5, %v19246_v58  ;;  %14394 = vmatprep.mubr.msk.bf16.mxu1 %vm2651_vm5, %v19246_v58  ;;  %v19678_v58 = vpop.f32.mrf.mxu1  ;;  %24744 = vst [vmem:[#allocation42_spill] sm:$0xff] %v19680_v2 }
 0x257   :  { %24743 = vst [vmem:[#allocation41_spill] sm:$0xff] %v19678_v58  ;;  %v19684_v32 = vpop.f32.mrf.mxu0 }
 0x258   :  { %v19682_v31 = vpop.f32.mrf.mxu1  ;;  %24746 = vst [vmem:[#allocation44_spill] sm:$0xff] %v19684_v32  ;;  %v16982_v32 = vld [vmem:[#allocation2 + $0xf0] ss:$8 sps:$4 sm:$0xff]  }
 0x259   :  { %24745 = vst [vmem:[#allocation43_spill] sm:$0xff] %v19682_v31 }
 0x25a   :  { %v19686_v0 = vpop.f32.mrf.mxu1 }
 0x25b   :  { %24747 = vst [vmem:[#allocation45_spill] sm:$0xff] %v19686_v0 }
 0x25d   :  { %3641 = vmatmul.mubr.bf16.gmra.mxu0 %v19248_v59  ;;  %3814 = vmatmul.mubr.bf16.gmra.mxu1 %v19248_v59  ;;  %v19694_v59 = vpop.f32.mrf.mxu0 }
 0x25e   :  { %14381 = vmatprep.mubr.msk.bf16.mxu0 %vm2651_vm5, %v19276_v52  ;;  %14395 = vmatprep.mubr.msk.bf16.mxu1 %vm2651_vm5, %v19276_v52  ;;  %24748 = vst [vmem:[#allocation46_spill] sm:$0xff] %v19694_v59  ;;  %v19696_v52 = vpop.f32.mrf.mxu1 }
 0x25f   :  { %24749 = vst [vmem:[#allocation47_spill] sm:$0xff] %v19696_v52  ;;  %v19698_v2 = vpop.f32.mrf.mxu0 }
 0x260   :  { %24750 = vst [vmem:[#allocation48_spill] sm:$0xff] %v19698_v2  ;;  %v19700_v31 = vpop.f32.mrf.mxu1 }
 0x261   :  { %24751 = vst [vmem:[#allocation49_spill] sm:$0xff] %v19700_v31 }
 0x265   :  { %3651 = vmatmul.mubr.bf16.gmra.mxu0 %v19278_v5  ;;  %3824 = vmatmul.mubr.bf16.gmra.mxu1 %v19278_v5  ;;  %v19708_v5 = vpop.f32.mrf.mxu0 }
 0x266   :  { %14536 = vmatprep.mubr.msk.bf16.mxu0 %vm2651_vm5, %v19334_v33  ;;  %14550 = vmatprep.mubr.msk.bf16.mxu1 %vm2651_vm5, %v19334_v33  ;;  %24752 = vst [vmem:[#allocation50_spill] sm:$0xff] %v19708_v5  ;;  %v19710_v33 = vpop.f32.mrf.mxu1 }
 0x267   :  { %24753 = vst [vmem:[#allocation51_spill] sm:$0xff] %v19710_v33  ;;  %v19712_v59 = vpop.f32.mrf.mxu0 }
 0x268   :  { %24754 = vst [vmem:[#allocation52_spill] sm:$0xff] %v19712_v59  ;;  %v19714_v52 = vpop.f32.mrf.mxu1 }
 0x269   :  { %24755 = vst [vmem:[#allocation53_spill] sm:$0xff] %v19714_v52 }
 0x26d   :  { %4401 = vmatmul.mubr.bf16.vlgmr.msra.gmra.mxu0 %v19366_v44  ;;  %4574 = vmatmul.mubr.bf16.vlgmr.msra.gmra.mxu1 %v19366_v44  ;;  %v19722_v44 = vpop.f32.mrf.mxu0 }
 0x26e   :  { %14537 = vmatprep.mubr.msk.bf16.mxu0 %vm2651_vm5, %v19374_v49  ;;  %14551 = vmatprep.mubr.msk.bf16.mxu1 %vm2651_vm5, %v19374_v49  ;;  %24756 = vst [vmem:[#allocation54_spill] sm:$0xff] %v19722_v44  ;;  %v19724_v49 = vpop.f32.mrf.mxu1 }
 0x26f   :  { %24757 = vst [vmem:[#allocation55_spill] sm:$0xff] %v19724_v49  ;;  %v19726_v5 = vpop.f32.mrf.mxu0  ;;  %v16979_v49 = vld [vmem:[#allocation2 + $0xe0] ss:$8 sps:$4 sm:$0xff]  }
 0x270   :  { %24758 = vst [vmem:[#allocation56_spill] sm:$0xff] %v19726_v5  ;;  %v19728_v33 = vpop.f32.mrf.mxu1 }
 0x271   :  { %24759 = vst [vmem:[#allocation57_spill] sm:$0xff] %v19728_v33 }
 0x275   :  { %4411 = vmatmul.mubr.bf16.gmra.mxu0 %v19408_v4  ;;  %4584 = vmatmul.mubr.bf16.gmra.mxu1 %v19408_v4  ;;  %v19730_v59 = vpop.f32.mrf.mxu0  ;;  %v19732_v52 = vpop.f32.mrf.mxu1 }
 0x276   :  { %14538 = vmatprep.mubr.msk.bf16.mxu0 %vm2651_vm5, %v19416_v8  ;;  %14552 = vmatprep.mubr.msk.bf16.mxu1 %vm2651_vm5, %v19416_v8  ;;  %24760 = vst [vmem:[#allocation58_spill] sm:$0xff] %v19730_v59  ;;  %24761 = vst [vmem:[#allocation59_spill] sm:$0xff] %v19732_v52 }
 0x277   :  { %v19740_v4 = vpop.f32.mrf.mxu0  ;;  %v19742_v8 = vpop.f32.mrf.mxu1 }
 0x278   :  { %24762 = vst [vmem:[#allocation60_spill] sm:$0xff] %v19740_v4  ;;  %24763 = vst [vmem:[#allocation61_spill] sm:$0xff] %v19742_v8 }
 0x279   :  { %v19744_v5 = vpop.f32.mrf.mxu0  ;;  %v19746_v33 = vpop.f32.mrf.mxu1 }
 0x27a   :  { %24764 = vst [vmem:[#allocation62_spill] sm:$0xff] %v19744_v5  ;;  %24765 = vst [vmem:[#allocation63_spill] sm:$0xff] %v19746_v33  ;;  %v16980_v5 = vld [vmem:[#allocation2 + $0xf4] ss:$8 sps:$4 sm:$0xff]  }
 0x27d   :  { %4421 = vmatmul.mubr.bf16.gmra.mxu0 %v19454_v19  ;;  %4594 = vmatmul.mubr.bf16.gmra.mxu1 %v19454_v19  ;;  %v19754_v19 = vpop.f32.mrf.mxu0 }
 0x27e   :  { %14539 = vmatprep.mubr.msk.bf16.mxu0 %vm2651_vm5, %v19462_v24  ;;  %14553 = vmatprep.mubr.msk.bf16.mxu1 %vm2651_vm5, %v19462_v24  ;;  %24766 = vst [vmem:[#allocation64_spill] sm:$0xff] %v19754_v19  ;;  %v19756_v24 = vpop.f32.mrf.mxu1 }
 0x27f   :  { %24767 = vst [vmem:[#allocation65_spill] sm:$0xff] %v19756_v24 }
 0x285   :  { %4431 = vmatmul.mubr.bf16.gmra.mxu0 %v19496_v40  ;;  %4604 = vmatmul.mubr.bf16.gmra.mxu1 %v19496_v40  ;;  %v19758_v4 = vpop.f32.mrf.mxu0  ;;  %v19760_v8 = vpop.f32.mrf.mxu1 }
 0x286   :  { %14540 = vmatprep.mubr.msk.bf16.mxu0 %vm2651_vm5, %v19504_v48  ;;  %14554 = vmatprep.mubr.msk.bf16.mxu1 %vm2651_vm5, %v19504_v48  ;;  %24768 = vst [vmem:[#allocation66_spill] sm:$0xff] %v19758_v4  ;;  %24769 = vst [vmem:[#allocation67_spill] sm:$0xff] %v19760_v8 }
 0x287   :  { %v19768_v40 = vpop.f32.mrf.mxu0  ;;  %v19770_v48 = vpop.f32.mrf.mxu1 }
 0x288   :  { %24770 = vst [vmem:[#allocation68_spill] sm:$0xff] %v19768_v40  ;;  %24771 = vst [vmem:[#allocation69_spill] sm:$0xff] %v19770_v48  ;;  %v16986_v40 = vld [vmem:[%s24682_s5 + $0x2a0] ss:$16 sps:$4 sm:$0xff]  }
 0x289   :  { %v19772_v19 = vpop.f32.mrf.mxu0  ;;  %v19774_v24 = vpop.f32.mrf.mxu1 }
 0x28a   :  { %24772 = vst [vmem:[#allocation70_spill] sm:$0xff] %v19772_v19  ;;  %24773 = vst [vmem:[#allocation71_spill] sm:$0xff] %v19774_v24 }
 0x28b   :  { %v19788_v19 = vpop.f32.mrf.mxu0  ;;  %v19790_v24 = vpop.f32.mrf.mxu1 }
 0x28c   :  { %24774 = vst [vmem:[#allocation72_spill] sm:$0xff] %v19788_v19  ;;  %24775 = vst [vmem:[#allocation73_spill] sm:$0xff] %v19790_v24  ;;  %v16989_v19 = vld [vmem:[%s24682_s5 + $0x288] ss:$16 sps:$4 sm:$0xff]  }
 0x28d   :  { %4441 = vmatmul.mubr.bf16.gmra.mxu0 %v19538_v11  ;;  %4614 = vmatmul.mubr.bf16.gmra.mxu1 %v19538_v11  ;;  %v16983_v11 = vld [vmem:[%s24682_s5 + $0x2a8] ss:$16 sps:$4 sm:$0xff]  }
 0x28e   :  { %14541 = vmatprep.mubr.msk.bf16.mxu0 %vm2651_vm5, %v19546_v14  ;;  %14555 = vmatprep.mubr.msk.bf16.mxu1 %vm2651_vm5, %v19546_v14  ;;  %v16985_v14 = vld [vmem:[%s24682_s5 + $0x2ac] ss:$16 sps:$4 sm:$0xff]  }
 0x28f   :  { %5868 = vmatprep.subr.bf16.mxu1 %v16985_v14  ;;  %v16991_v14 = vld [vmem:[%s24682_s5 + $0x28c] ss:$16 sps:$4 sm:$0xff]  }
 0x290   :  { %5869 = vmatpush1.bf16.msra.mxu1 %v16983_v11 }
 0x291   :  { %5870 = vmatprep.subr.bf16.mxu1 %v16991_v14 }
 0x294   :  { %5871 = vmatpush1.bf16.msra.mxu1 %v16989_v19  ;;  %v16998_v19 = vld [vmem:[%s24682_s5 + $0x268] ss:$16 sps:$4 sm:$0xff]  }
 0x295   :  { %4451 = vmatmul.mubr.bf16.gmra.mxu0 %v19574_v41  ;;  %4624 = vmatmul.mubr.bf16.gmra.mxu1 %v19574_v41  ;;  %v19792_v41 = vpop.f32.mrf.mxu0  ;;  %v19794_v48 = vpop.f32.mrf.mxu1 }
 0x296   :  { %14542 = vmatprep.mubr.msk.bf16.mxu0 %vm2651_vm5, %v19576_v46  ;;  %14556 = vmatprep.mubr.msk.bf16.mxu1 %vm2651_vm5, %v19576_v46  ;;  %24776 = vst [vmem:[#allocation74_spill] sm:$0xff] %v19792_v41  ;;  %24777 = vst [vmem:[#allocation75_spill] sm:$0xff] %v19794_v48  ;;  %v16988_v46 = vld [vmem:[%s24682_s5 + $0x2a4] ss:$16 sps:$4 sm:$0xff]   ;;  %v17000_v48 = vld [vmem:[%s24682_s5 + $0x26c] ss:$16 sps:$4 sm:$0xff]  }
 0x297   :  { %5765 = vmatprep.subr.bf16.mxu0 %v16988_v46  ;;  %v19808_v41 = vpop.f32.mrf.mxu0  ;;  %v19810_v11 = vpop.f32.mrf.mxu1  ;;  %v16994_v46 = vld [vmem:[%s24682_s5 + $0x284] ss:$16 sps:$4 sm:$0xff]   ;;  %5872 = vmatprep.subr.bf16.mxu1 %v17000_v48  ;;  %v17006_v48 = vld [vmem:[%s24682_s5 + $0x24c] ss:$16 sps:$4 sm:$0xff]  }
 0x298   :  { %24778 = vst [vmem:[#allocation76_spill] sm:$0xff] %v19808_v41  ;;  %24779 = vst [vmem:[#allocation77_spill] sm:$0xff] %v19810_v11  ;;  %5766 = vmatpush1.bf16.msra.mxu0 %v16986_v40  ;;  %v16992_v11 = vld [vmem:[%s24682_s5 + $0x280] ss:$16 sps:$4 sm:$0xff]   ;;  %5873 = vmatpush1.bf16.msra.mxu1 %v16998_v19 }
 0x299   :  { %5767 = vmatprep.subr.bf16.mxu0 %v16994_v46  ;;  %v19824_v41 = vpop.f32.mrf.mxu0  ;;  %v16995_v40 = vld [vmem:[%s24682_s5 + $0x260] ss:$16 sps:$4 sm:$0xff]   ;;  %5874 = vmatprep.subr.bf16.mxu1 %v17006_v48  ;;  %v17015_v48 = vld [vmem:[%s24682_s5 + $0x204] ss:$16 sps:$4 sm:$0xff]  }
 0x29a   :  { %24780 = vst [vmem:[#allocation78_spill] sm:$0xff] %v19824_v41  ;;  %v16977_v41 = vld [vmem:[#allocation2 + $0xe4] ss:$8 sps:$4 sm:$0xff]  }
 0x29b   :  { %v19840_v14 = vpop.f32.mrf.mxu0 }
 0x29c   :  { %5768 = vmatpush1.bf16.msra.mxu0 %v16992_v11  ;;  %24782 = vst [vmem:[#allocation80_spill] sm:$0xff] %v19840_v14  ;;  %v17003_v11 = vld [vmem:[%s24682_s5 + $0x244] ss:$16 sps:$4 sm:$0xff]  }
 0x29d   :  { %4461 = vmatmul.mubr.bf16.gmra.mxu0 %v19596_v12  ;;  %4634 = vmatmul.mubr.bf16.gmra.mxu1 %v19596_v12  ;;  %v19826_v12 = vpop.f32.mrf.mxu1  ;;  %v17009_v14 = vld [vmem:[%s24682_s5 + $0x224] ss:$16 sps:$4 sm:$0xff]  }
 0x29e   :  { %14543 = vmatprep.mubr.msk.bf16.mxu0 %vm2651_vm5, %v19598_v13  ;;  %14557 = vmatprep.mubr.msk.bf16.mxu1 %vm2651_vm5, %v19598_v13  ;;  %24781 = vst [vmem:[#allocation79_spill] sm:$0xff] %v19826_v12  ;;  %v16997_v13 = vld [vmem:[%s24682_s5 + $0x264] ss:$16 sps:$4 sm:$0xff]   ;;  %v16976_v12 = vld [vmem:[#allocation2 + $0xd0] ss:$8 sps:$4 sm:$0xff]  }
 0x29f   :  { %5769 = vmatprep.subr.bf16.mxu0 %v16997_v13  ;;  %v19842_v46 = vpop.f32.mrf.mxu1 }
 0x2a0   :  { %24783 = vst [vmem:[#allocation81_spill] sm:$0xff] %v19842_v46  ;;  %5770 = vmatpush1.bf16.msra.mxu0 %v16995_v40 }
 0x2a1   :  { %5771 = vmatprep.subr.bf16.mxu0 %v17003_v11  ;;  %v17010_v11 = vld [vmem:[%s24682_s5 + $0x228] ss:$16 sps:$4 sm:$0xff]  }
 0x2a5   :  { %4471 = vmatmul.mubr.bf16.gmra.mxu0 %v19614_v1  ;;  %4644 = vmatmul.mubr.bf16.gmra.mxu1 %v19614_v1  ;;  %v19856_v13 = vpop.f32.mrf.mxu0  ;;  %v19858_v46 = vpop.f32.mrf.mxu1  ;;  %v17001_v1 = vld [vmem:[%s24682_s5 + $0x240] ss:$16 sps:$4 sm:$0xff]  }
 0x2a6   :  { %14544 = vmatprep.mubr.msk.bf16.mxu0 %vm2651_vm5, %v19616_v7  ;;  %14558 = vmatprep.mubr.msk.bf16.mxu1 %vm2651_vm5, %v19616_v7  ;;  %24784 = vst [vmem:[#allocation82_spill] sm:$0xff] %v19856_v13  ;;  %24785 = vst [vmem:[#allocation83_spill] sm:$0xff] %v19858_v46  ;;  %v17004_v7 = vld [vmem:[%s24682_s5 + $0x248] ss:$16 sps:$4 sm:$0xff]   ;;  %v17012_v46 = vld [vmem:[%s24682_s5 + $0x22c] ss:$16 sps:$4 sm:$0xff]  }
 0x2a7   :  { %v19872_v40 = vpop.f32.mrf.mxu0  ;;  %v19874_v19 = vpop.f32.mrf.mxu1  ;;  %5772 = vmatpush1.bf16.msra.mxu0 %v17001_v1  ;;  %5875 = vmatpush1.bf16.msra.mxu1 %v17004_v7  ;;  %v17007_v13 = vld [vmem:[%s24682_s5 + $0x220] ss:$16 sps:$4 sm:$0xff]   ;;  %v17018_v1 = vld [vmem:[%s24682_s5 + $0x20c] ss:$16 sps:$4 sm:$0xff]  }
 0x2a8   :  { %24786 = vst [vmem:[#allocation84_spill] sm:$0xff] %v19872_v40  ;;  %24787 = vst [vmem:[#allocation85_spill] sm:$0xff] %v19874_v19  ;;  %5773 = vmatprep.subr.bf16.mxu0 %v17009_v14  ;;  %5876 = vmatprep.subr.bf16.mxu1 %v17012_v46  ;;  %v16971_v7 = vld [vmem:[#allocation2 + $0xc4] ss:$8 sps:$4 sm:$0xff]  }
 0x2a9   :  { %v19894_v14 = vpop.f32.mrf.mxu0  ;;  %v19896_v46 = vpop.f32.mrf.mxu1  ;;  %v17021_v19 = vld [vmem:[%s24682_s5 + $0x1e4] ss:$16 sps:$4 sm:$0xff]  }
 0x2aa   :  { %24788 = vst [vmem:[#allocation86_spill] sm:$0xff] %v19894_v14  ;;  %24789 = vst [vmem:[#allocation87_spill] sm:$0xff] %v19896_v46 }
 0x2ab   :  { %5774 = vmatpush1.bf16.msra.mxu0 %v17007_v13  ;;  %5877 = vmatpush1.bf16.msra.mxu1 %v17010_v11  ;;  %v17024_v13 = vld [vmem:[%s24682_s5 + $0x1ec] ss:$16 sps:$4 sm:$0xff]   ;;  %v19910_v11 = vpop.f32.mrf.mxu0  ;;  %v19912_v46 = vpop.f32.mrf.mxu1 }
 0x2ac   :  { %5775 = vmatprep.subr.bf16.mxu0 %v17015_v48  ;;  %5878 = vmatprep.subr.bf16.mxu1 %v17018_v1  ;;  %24790 = vst [vmem:[#allocation88_spill] sm:$0xff] %v19910_v11  ;;  %24791 = vst [vmem:[#allocation89_spill] sm:$0xff] %v19912_v46  ;;  %v17019_v48 = vld [vmem:[%s24682_s5 + $0x1e0] ss:$16 sps:$4 sm:$0xff]   ;;  %v17022_v1 = vld [vmem:[%s24682_s5 + $0x1e8] ss:$16 sps:$4 sm:$0xff]  }
 0x2ad   :  { %4481 = vmatmul.mubr.bf16.gmra.mxu0 %v19632_v21  ;;  %4654 = vmatmul.mubr.bf16.gmra.mxu1 %v19632_v21  ;;  %v17013_v21 = vld [vmem:[%s24682_s5 + $0x200] ss:$16 sps:$4 sm:$0xff]  }
 0x2ae   :  { %14545 = vmatprep.mubr.msk.bf16.mxu0 %vm2651_vm5, %v19634_v20  ;;  %14559 = vmatprep.mubr.msk.bf16.mxu1 %vm2651_vm5, %v19634_v20  ;;  %v17016_v20 = vld [vmem:[%s24682_s5 + $0x208] ss:$16 sps:$4 sm:$0xff]  }
 0x2af   :  { %5776 = vmatpush1.bf16.msra.mxu0 %v17013_v21  ;;  %5879 = vmatpush1.bf16.msra.mxu1 %v17016_v20  ;;  %v17027_v21 = vld [vmem:[%s24682_s5 + $0x1c4] ss:$16 sps:$4 sm:$0xff]   ;;  %v16973_v46 = vld [vmem:[#allocation2 + $0xc0] ss:$8 sps:$4 sm:$0xff]  }
 0x2b0   :  { %5777 = vmatprep.subr.bf16.mxu0 %v17021_v19  ;;  %5880 = vmatprep.subr.bf16.mxu1 %v17024_v13  ;;  %v17030_v19 = vld [vmem:[%s24682_s5 + $0x1cc] ss:$16 sps:$4 sm:$0xff]  }
 0x2b3   :  { %5778 = vmatpush1.bf16.msra.mxu0 %v17019_v48  ;;  %5881 = vmatpush1.bf16.msra.mxu1 %v17022_v1  ;;  %v17033_v48 = vld [vmem:[%s24682_s5 + $0x364] ss:$16 sps:$4 sm:$0xff]   ;;  %v17036_v1 = vld [vmem:[%s24682_s5 + $0x36c] ss:$16 sps:$4 sm:$0xff]  }
 0x2b4   :  { %5779 = vmatprep.subr.bf16.mxu0 %v17027_v21  ;;  %5882 = vmatprep.subr.bf16.mxu1 %v17030_v19  ;;  %v17031_v21 = vld [vmem:[%s24682_s5 + $0x360] ss:$16 sps:$4 sm:$0xff]   ;;  %v17034_v19 = vld [vmem:[%s24682_s5 + $0x368] ss:$16 sps:$4 sm:$0xff]  }
 0x2b5   :  { %v19920_v14 = vpop.f32.mrf.mxu0  ;;  %v19922_v40 = vpop.f32.mrf.mxu1  ;;  %4491 = vmatmul.mubr.bf16.gmra.mxu0 %v19654_v6  ;;  %4664 = vmatmul.mubr.bf16.gmra.mxu1 %v19654_v6  ;;  %v17025_v6 = vld [vmem:[%s24682_s5 + $0x1c0] ss:$16 sps:$4 sm:$0xff]  }
 0x2b6   :  { %24792 = vst [vmem:[#allocation90_spill] sm:$0xff] %v19920_v14  ;;  %24793 = vst [vmem:[#allocation91_spill] sm:$0xff] %v19922_v40  ;;  %14546 = vmatprep.mubr.msk.bf16.mxu0 %vm2651_vm5, %v16971_v7  ;;  %14560 = vmatprep.mubr.msk.bf16.mxu1 %vm2651_vm5, %v16971_v7  ;;  %v17028_v7 = vld [vmem:[%s24682_s5 + $0x1c8] ss:$16 sps:$4 sm:$0xff]  }
 0x2b7   :  { %v19934_v20 = vpop.f32.mrf.mxu0  ;;  %v19936_v13 = vpop.f32.mrf.mxu1  ;;  %5780 = vmatpush1.bf16.msra.mxu0 %v17025_v6  ;;  %5883 = vmatpush1.bf16.msra.mxu1 %v17028_v7  ;;  %v17039_v6 = vld [vmem:[%s24682_s5 + $0x344] ss:$16 sps:$4 sm:$0xff]   ;;  %v17042_v7 = vld [vmem:[%s24682_s5 + $0x34c] ss:$16 sps:$4 sm:$0xff]  }
 0x2b8   :  { %24794 = vst [vmem:[#allocation92_spill] sm:$0xff] %v19934_v20  ;;  %24795 = vst [vmem:[#allocation93_spill] sm:$0xff] %v19936_v13  ;;  %v16974_v20 = vld [vmem:[#allocation2 + $0xd4] ss:$8 sps:$4 sm:$0xff]   ;;  %5785 = vmatprep.subr.bf16.mxu0 %v17033_v48  ;;  %5888 = vmatprep.subr.bf16.mxu1 %v17036_v1 }
 0x2b9   :  { %v19944_v40 = vpop.f32.mrf.mxu0  ;;  %v19946_v14 = vpop.f32.mrf.mxu1 }
 0x2ba   :  { %24796 = vst [vmem:[#allocation94_spill] sm:$0xff] %v19944_v40  ;;  %24797 = vst [vmem:[#allocation95_spill] sm:$0xff] %v19946_v14 }
 0x2bb   :  { %v19954_v13 = vpop.f32.mrf.mxu0  ;;  %v19956_v11 = vpop.f32.mrf.mxu1  ;;  %5786 = vmatpush2.bf16.msra.mxu0 %v17031_v21  ;;  %5889 = vmatpush2.bf16.msra.mxu1 %v17034_v19  ;;  %v17045_v21 = vld [vmem:[%s24682_s5 + $0x324] ss:$16 sps:$4 sm:$0xff]   ;;  %v17048_v19 = vld [vmem:[%s24682_s5 + $0x32c] ss:$16 sps:$4 sm:$0xff]  }
 0x2bc   :  { %24798 = vst [vmem:[#allocation96_spill] sm:$0xff] %v19954_v13  ;;  %24799 = vst [vmem:[#allocation97_spill] sm:$0xff] %v19956_v11  ;;  %5787 = vmatprep.subr.bf16.mxu0 %v17039_v6  ;;  %5890 = vmatprep.subr.bf16.mxu1 %v17042_v7  ;;  %v17043_v6 = vld [vmem:[%s24682_s5 + $0x320] ss:$16 sps:$4 sm:$0xff]   ;;  %v17046_v7 = vld [vmem:[%s24682_s5 + $0x328] ss:$16 sps:$4 sm:$0xff]  }
 0x2bd   :  { %v19964_v14 = vpop.f32.mrf.mxu0  ;;  %v19966_v40 = vpop.f32.mrf.mxu1  ;;  %4501 = vmatmul.mubr.bf16.gmra.mxu0 %v16973_v46  ;;  %4674 = vmatmul.mubr.bf16.gmra.mxu1 %v16973_v46  ;;  %v17037_v46 = vld [vmem:[%s24682_s5 + $0x340] ss:$16 sps:$4 sm:$0xff]  }
 0x2be   :  { %14547 = vmatprep.mubr.msk.bf16.mxu0 %vm2651_vm5, %v16974_v20  ;;  %14561 = vmatprep.mubr.msk.bf16.mxu1 %vm2651_vm5, %v16974_v20  ;;  %v17040_v20 = vld [vmem:[%s24682_s5 + $0x348] ss:$16 sps:$4 sm:$0xff]  }
 0x2bf   :  { %v19976_v48 = vpop.f32.mrf.mxu0  ;;  %v19978_v1 = vpop.f32.mrf.mxu1  ;;  %5788 = vmatpush2.bf16.msra.mxu0 %v17037_v46  ;;  %5891 = vmatpush2.bf16.msra.mxu1 %v17040_v20  ;;  %v17051_v46 = vld [vmem:[%s24682_s5 + $0x304] ss:$16 sps:$4 sm:$0xff]   ;;  %v17054_v20 = vld [vmem:[%s24682_s5 + $0x30c] ss:$16 sps:$4 sm:$0xff]  }
 0x2c0   :  { %5789 = vmatprep.subr.bf16.mxu0 %v17045_v21  ;;  %5892 = vmatprep.subr.bf16.mxu1 %v17048_v19 }
 0x2c1   :  { %v19986_v11 = vpop.f32.mrf.mxu0  ;;  %v19988_v13 = vpop.f32.mrf.mxu1 }
 0x2c3   :  { %v19996_v24 = vpop.f32.mrf.mxu0  ;;  %v19998_v8 = vpop.f32.mrf.mxu1  ;;  %5790 = vmatpush2.bf16.msra.mxu0 %v17043_v6  ;;  %5893 = vmatpush2.bf16.msra.mxu1 %v17046_v7  ;;  %v17057_v6 = vld [vmem:[%s24682_s5 + $0x2e4] ss:$16 sps:$4 sm:$0xff]   ;;  %v17060_v7 = vld [vmem:[%s24682_s5 + $0x2ec] ss:$16 sps:$4 sm:$0xff]  }
 0x2c4   :  { %5791 = vmatprep.subr.bf16.mxu0 %v17051_v46  ;;  %5894 = vmatprep.subr.bf16.mxu1 %v17054_v20  ;;  %v17055_v46 = vld [vmem:[%s24682_s5 + $0x2e0] ss:$16 sps:$4 sm:$0xff]   ;;  %v17058_v20 = vld [vmem:[%s24682_s5 + $0x2e8] ss:$16 sps:$4 sm:$0xff]  }
 0x2c5   :  { %v20006_v4 = vpop.f32.mrf.mxu0  ;;  %v20008_v33 = vpop.f32.mrf.mxu1  ;;  %4511 = vmatmul.mubr.bf16.gmra.mxu0 %v16976_v12  ;;  %4684 = vmatmul.mubr.bf16.gmra.mxu1 %v16976_v12  ;;  %v17049_v12 = vld [vmem:[%s24682_s5 + $0x300] ss:$16 sps:$4 sm:$0xff]  }
 0x2c6   :  { %14548 = vmatprep.mubr.msk.bf16.mxu0 %vm2651_vm5, %v16977_v41  ;;  %14562 = vmatprep.mubr.msk.bf16.mxu1 %vm2651_vm5, %v16977_v41  ;;  %v17052_v41 = vld [vmem:[%s24682_s5 + $0x308] ss:$16 sps:$4 sm:$0xff]  }
 0x2c7   :  { %v20018_v21 = vpop.f32.mrf.mxu0  ;;  %v20020_v19 = vpop.f32.mrf.mxu1  ;;  %5792 = vmatpush2.bf16.msra.mxu0 %v17049_v12  ;;  %5895 = vmatpush2.bf16.msra.mxu1 %v17052_v41  ;;  %v17063_v12 = vld [vmem:[%s24682_s5 + $0x2c4] ss:$16 sps:$4 sm:$0xff]   ;;  %v17066_v41 = vld [vmem:[%s24682_s5 + $0x2cc] ss:$16 sps:$4 sm:$0xff]  }
 0x2c8   :  { %5793 = vmatprep.subr.bf16.mxu0 %v17057_v6  ;;  %5896 = vmatprep.subr.bf16.mxu1 %v17060_v7 }
 0x2c9   :  { %v20028_v52 = vpop.f32.mrf.mxu0  ;;  %v20030_v59 = vpop.f32.mrf.mxu1 }
 0x2cb   :  { %v20038_v44 = vpop.f32.mrf.mxu0  ;;  %v20040_v31 = vpop.f32.mrf.mxu1  ;;  %5794 = vmatpush2.bf16.msra.mxu0 %v17055_v46  ;;  %5897 = vmatpush2.bf16.msra.mxu1 %v17058_v20 }
 0x2cc   :  { %5795 = vmatprep.subr.bf16.mxu0 %v17063_v12  ;;  %5898 = vmatprep.subr.bf16.mxu1 %v17066_v41 }
 0x2cd   :  { %v20048_v2 = vpop.f32.mrf.mxu0  ;;  %v20050_v0 = vpop.f32.mrf.mxu1  ;;  %4521 = vmatmul.mubr.bf16.gmra.mxu0 %v16979_v49  ;;  %4694 = vmatmul.mubr.bf16.gmra.mxu1 %v16979_v49  ;;  %v17061_v49 = vld [vmem:[%s24682_s5 + $0x2c0] ss:$16 sps:$4 sm:$0xff]  }
 0x2ce   :  { %14549 = vmatprep.mubr.msk.bf16.mxu0 %vm2651_vm5, %v16980_v5  ;;  %14563 = vmatprep.mubr.msk.bf16.mxu1 %vm2651_vm5, %v16980_v5  ;;  %v17064_v5 = vld [vmem:[%s24682_s5 + $0x2c8] ss:$16 sps:$4 sm:$0xff]  }
 0x2cf   :  { %v20060_v6 = vpop.f32.mrf.mxu0  ;;  %v20062_v7 = vpop.f32.mrf.mxu1  ;;  %5796 = vmatpush2.bf16.msra.mxu0 %v17061_v49  ;;  %5899 = vmatpush2.bf16.msra.mxu1 %v17064_v5 }
 0x2d1   :  { %v20070_v58 = vpop.f32.mrf.mxu0  ;;  %v20072_v53 = vpop.f32.mrf.mxu1 }
 0x2d3   :  { %v20074_v51 = vpop.f32.mrf.mxu0  ;;  %v20076_v35 = vpop.f32.mrf.mxu1 }
 0x2d5   :  { %v20078_v46 = vpop.f32.mrf.mxu0  ;;  %v20080_v20 = vpop.f32.mrf.mxu1  ;;  %4531 = vmatmul.mubr.bf16.gmra.mxu0 %v16982_v32  ;;  %4704 = vmatmul.mubr.bf16.gmra.mxu1 %v16982_v32 }
 0x2d6   :  { %24800 = vst [vmem:[#allocation98_spill] sm:$0xff] %v20078_v46  ;;  %24801 = vst [vmem:[#allocation99_spill] sm:$0xff] %v20080_v20 }
 0x2d7   :  { %v20082_v34 = vpop.f32.mrf.mxu0  ;;  %v20084_v12 = vpop.f32.mrf.mxu1 }
 0x2d8   :  { %24802 = vst [vmem:[#allocation100_spill] sm:$0xff] %v20082_v34  ;;  %24803 = vst [vmem:[#allocation101_spill] sm:$0xff] %v20084_v12 }
 0x2d9   :  { %v20086_v41 = vpop.f32.mrf.mxu0  ;;  %v20088_v26 = vpop.f32.mrf.mxu1 }
 0x2da   :  { %24804 = vst [vmem:[#allocation102_spill] sm:$0xff] %v20086_v41  ;;  %24805 = vst [vmem:[#allocation103_spill] sm:$0xff] %v20088_v26 }
 0x2db   :  { %v20090_v25 = vpop.f32.mrf.mxu0  ;;  %v20092_v9 = vpop.f32.mrf.mxu1 }
 0x2dc   :  { %24806 = vst [vmem:[#allocation104_spill] sm:$0xff] %v20090_v25  ;;  %24807 = vst [vmem:[#allocation105_spill] sm:$0xff] %v20092_v9 }
 0x2dd   :  { %v20094_v49 = vpop.f32.mrf.mxu0  ;;  %v20096_v5 = vpop.f32.mrf.mxu1 }
 0x2de   :  { %24808 = vst [vmem:[#allocation106_spill] sm:$0xff] %v20094_v49  ;;  %24809 = vst [vmem:[#allocation107_spill] sm:$0xff] %v20096_v5 }
 0x2df   :  { %v20098_v46 = vpop.f32.mrf.mxu0  ;;  %v20100_v20 = vpop.f32.mrf.mxu1 }
 0x2e0   :  { %24810 = vst [vmem:[#allocation108_spill] sm:$0xff] %v20098_v46  ;;  %24811 = vst [vmem:[#allocation109_spill] sm:$0xff] %v20100_v20 }
 0x2e1   :  { %v20102_v32 = vpop.f32.mrf.mxu0  ;;  %v20104_v34 = vpop.f32.mrf.mxu1 }
 0x2e2   :  { %24812 = vst [vmem:[#allocation110_spill] sm:$0xff] %v20102_v32  ;;  %24813 = vst [vmem:[#allocation111_spill] sm:$0xff] %v20104_v34 }
 0x2e3   :  { %v20106_v12 = vpop.f32.mrf.mxu0  ;;  %v20108_v41 = vpop.f32.mrf.mxu1 }
 0x2e4   :  { %24814 = vst [vmem:[#allocation112_spill] sm:$0xff] %v20106_v12  ;;  %24815 = vst [vmem:[#allocation113_spill] sm:$0xff] %v20108_v41 }
 0x2e5   :  { %v20110_v26 = vpop.f32.mrf.mxu0  ;;  %v20112_v25 = vpop.f32.mrf.mxu1 }
 0x2e6   :  { %24816 = vst [vmem:[#allocation114_spill] sm:$0xff] %v20110_v26  ;;  %24817 = vst [vmem:[#allocation115_spill] sm:$0xff] %v20112_v25 }
 0x2e7   :  { %v20114_v9 = vpop.f32.mrf.mxu0  ;;  %v20116_v49 = vpop.f32.mrf.mxu1 }
 0x2e8   :  { %24818 = vst [vmem:[#allocation116_spill] sm:$0xff] %v20114_v9  ;;  %24819 = vst [vmem:[#allocation117_spill] sm:$0xff] %v20116_v49 }
 0x2e9   :  { %v20118_v5 = vpop.f32.mrf.mxu0  ;;  %v20120_v46 = vpop.f32.mrf.mxu1 }
 0x2ea   :  { %24820 = vst [vmem:[#allocation118_spill] sm:$0xff] %v20118_v5  ;;  %24821 = vst [vmem:[#allocation119_spill] sm:$0xff] %v20120_v46 }
 0x2eb   :  { %v20122_v20 = vpop.f32.mrf.mxu0  ;;  %v20124_v32 = vpop.f32.mrf.mxu1 }
 0x2ec   :  { %24822 = vst [vmem:[#allocation120_spill] sm:$0xff] %v20122_v20  ;;  %24823 = vst [vmem:[#allocation121_spill] sm:$0xff] %v20124_v32 }
 0x2ed   :  { %v20126_v34 = vpop.f32.mrf.mxu0  ;;  %v20128_v12 = vpop.f32.mrf.mxu1 }
 0x2ee   :  { %24824 = vst [vmem:[#allocation122_spill] sm:$0xff] %v20126_v34  ;;  %24825 = vst [vmem:[#allocation123_spill] sm:$0xff] %v20128_v12 }
 0x2ef   :  { %v20130_v41 = vpop.f32.mrf.mxu0  ;;  %v20132_v26 = vpop.f32.mrf.mxu1 }
 0x2f0   :  { %24826 = vst [vmem:[#allocation124_spill] sm:$0xff] %v20130_v41  ;;  %24827 = vst [vmem:[#allocation125_spill] sm:$0xff] %v20132_v26 }
 0x2f1   :  { %v20134_v25 = vpop.f32.mrf.mxu0  ;;  %v20136_v9 = vpop.f32.mrf.mxu1 }
 0x2f2   :  { %24828 = vst [vmem:[#allocation126_spill] sm:$0xff] %v20134_v25  ;;  %24829 = vst [vmem:[#allocation127_spill] sm:$0xff] %v20136_v9 }
 0x2f3   :  { %v20138_v49 = vpop.f32.mrf.mxu0  ;;  %v20140_v5 = vpop.f32.mrf.mxu1 }
 0x2f4   :  { %24830 = vst [vmem:[#allocation128_spill] sm:$0xff] %v20138_v49  ;;  %24831 = vst [vmem:[#allocation129_spill] sm:$0xff] %v20140_v5 }
 0x2f5   :  { %v20142_v46 = vpop.f32.mrf.mxu0  ;;  %v20144_v20 = vpop.f32.mrf.mxu1 }
 0x2f6   :  { %24832 = vst [vmem:[#allocation130_spill] sm:$0xff] %v20142_v46  ;;  %24833 = vst [vmem:[#allocation131_spill] sm:$0xff] %v20144_v20 }
 0x2f7   :  { %v20146_v32 = vpop.f32.mrf.mxu0  ;;  %v20148_v34 = vpop.f32.mrf.mxu1 }
 0x2f8   :  { %24834 = vst [vmem:[#allocation132_spill] sm:$0xff] %v20146_v32  ;;  %24835 = vst [vmem:[#allocation133_spill] sm:$0xff] %v20148_v34 }
 0x2f9   :  { %v20150_v12 = vpop.f32.mrf.mxu0  ;;  %v20152_v41 = vpop.f32.mrf.mxu1 }
 0x2fa   :  { %24836 = vst [vmem:[#allocation134_spill] sm:$0xff] %v20150_v12  ;;  %24837 = vst [vmem:[#allocation135_spill] sm:$0xff] %v20152_v41 }
 0x2fb   :  { %v20154_v26 = vpop.f32.mrf.mxu0  ;;  %v20156_v25 = vpop.f32.mrf.mxu1 }
 0x2fc   :  { %24838 = vst [vmem:[#allocation136_spill] sm:$0xff] %v20154_v26  ;;  %24839 = vst [vmem:[#allocation137_spill] sm:$0xff] %v20156_v25  ;;  %v17081_v25 = vld [vmem:[%s24682_s5 + $0xe4] ss:$16 sps:$4 sm:$0xff]  }
 0x2fd   :  { %v20158_v9 = vpop.f32.mrf.mxu0  ;;  %v20160_v49 = vpop.f32.mrf.mxu1  ;;  %6335 = vmatprep.subr.bf16.mxu0 %v17081_v25 }
 0x2fe   :  { %24840 = vst [vmem:[#allocation138_spill] sm:$0xff] %v20158_v9  ;;  %24841 = vst [vmem:[#allocation139_spill] sm:$0xff] %v20160_v49  ;;  %v17084_v49 = vld [vmem:[%s24682_s5 + $0xec] ss:$16 sps:$4 sm:$0xff]  }
 0x2ff   :  { %v20162_v5 = vpop.f32.mrf.mxu0  ;;  %v20164_v46 = vpop.f32.mrf.mxu1  ;;  %6438 = vmatprep.subr.bf16.mxu1 %v17084_v49 }
 0x300   :  { %24842 = vst [vmem:[#allocation140_spill] sm:$0xff] %v20162_v5  ;;  %24843 = vst [vmem:[#allocation141_spill] sm:$0xff] %v20164_v46 }
 0x301   :  { %v20166_v20 = vpop.f32.mrf.mxu0  ;;  %v20168_v32 = vpop.f32.mrf.mxu1 }
 0x302   :  { %24844 = vst [vmem:[#allocation142_spill] sm:$0xff] %v20166_v20  ;;  %24845 = vst [vmem:[#allocation143_spill] sm:$0xff] %v20168_v32 }
 0x303   :  { %v20170_v34 = vpop.f32.mrf.mxu0  ;;  %v20172_v12 = vpop.f32.mrf.mxu1 }
 0x304   :  { %24846 = vst [vmem:[#allocation144_spill] sm:$0xff] %v20170_v34  ;;  %24847 = vst [vmem:[#allocation145_spill] sm:$0xff] %v20172_v12 }
 0x305   :  { %v20180_v9 = vpop.f32.mrf.mxu0  ;;  %v20182_v5 = vpop.f32.mrf.mxu1 }
 0x306   :  { %24848 = vst [vmem:[#allocation146_spill] sm:$0xff] %v20180_v9 }
 0x307   :  { %v20184_v20 = vpop.f32.mrf.mxu0  ;;  %v20186_v32 = vpop.f32.mrf.mxu1 }
 0x308   :  { %24849 = vst [vmem:[#allocation147_spill] sm:$0xff] %v20184_v20  ;;  %24850 = vst [vmem:[#allocation148_spill] sm:$0xff] %v20186_v32 }
 0x309   :  { %v20188_v34 = vpop.f32.mrf.mxu0  ;;  %v20190_v12 = vpop.f32.mrf.mxu1 }
 0x30a   :  { %24851 = vst [vmem:[#allocation149_spill] sm:$0xff] %v20188_v34  ;;  %24852 = vst [vmem:[#allocation150_spill] sm:$0xff] %v20190_v12 }
 0x30b   :  { %v20192_v46 = vpop.f32.mrf.mxu0  ;;  %v20194_v26 = vpop.f32.mrf.mxu1 }
 0x30c   :  { %24853 = vst [vmem:[#allocation151_spill] sm:$0xff] %v20192_v46 }
 0x30d   :  { %v20196_v41 = vpop.f32.mrf.mxu0  ;;  %v20198_v60 = vpop.f32.mrf.mxu1 }
 0x30e   :  { %24854 = vst [vmem:[#allocation152_spill] sm:$0xff] %v20196_v41  ;;  %24855 = vst [vmem:[#allocation153_spill] sm:$0xff] %v20198_v60  ;;  %v4826_v60 = vld [vmem:[%s24683_s4] sm:$0xf] }
 0x30f   :  { %v20200_v9 = vpop.f32.mrf.mxu0  ;;  %v20202_v25 = vpop.f32.mrf.mxu1 }
 0x310   :  { %24856 = vst [vmem:[#allocation154_spill] sm:$0xff] %v20200_v9 }
 0x311   :  { %v20204_v49 = vpop.f32.mrf.mxu0  ;;  %v20206_v20 = vpop.f32.mrf.mxu1 }
 0x312   :  { %24857 = vst [vmem:[#allocation155_spill] sm:$0xff] %v20204_v49  ;;  %24858 = vst [vmem:[#allocation156_spill] sm:$0xff] %v20206_v20  ;;  %v20224_v49 = vrot.slane %v4826_v60, %v18713_v45  ;;  %v20227_v20 = vrot.slane %v4826_v60, %v18718_v47  ;;  %v20245_v45 = vadd.f32 %v19976_v48, %v19324_v28  ;;  %v24875_v48 = vld [vmem:[#allocation103_spill] sm:$0xff] }
 0x313   :  { %v20208_v32 = vpop.f32.mrf.mxu0  ;;  %v20210_v34 = vpop.f32.mrf.mxu1  ;;  %v20249_v47 = vadd.f32 %v19978_v1, %v19326_v29  ;;  %v20265_v28 = vadd.f32 %v19996_v24, %v19362_v42  ;;  %v20269_v29 = vadd.f32 %v19998_v8, %v19364_v43  ;;  %v20285_v42 = vadd.f32 %v20020_v19, %v19406_v50  ;;  %v24870_v8 = vld [vmem:[#allocation101_spill] sm:$0xff]  ;;  %v24878_v19 = vld [vmem:[#allocation104_spill] sm:$0xff] }
 0x314   :  { %24859 = vst [vmem:[#allocation157_spill] sm:$0xff] %v20210_v34  ;;  %v20230_v34 = vrot.slane %v4826_v60, %v18732_v54  ;;  %v20305_v50 = vadd.f32 %v20040_v31, %v19448_v16 }
 0x315   :  { %v20212_v12 = vpop.f32.mrf.mxu0  ;;  %v20214_v46 = vpop.f32.mrf.mxu1 }
 0x316   :  { %24860 = vst [vmem:[#allocation158_spill] sm:$0xff] %v20212_v12  ;;  %24861 = vst [vmem:[#allocation159_spill] sm:$0xff] %v20214_v46  ;;  %v20233_v12 = vrot.slane %v4826_v60, %v18734_v55  ;;  %v20237_v46 = vadd.f32 %v19964_v14, %v19308_v22  ;;  %v20257_v22 = vadd.f32 %v19986_v11, %v19346_v36  ;;  %v24872_v14 = vld [vmem:[#allocation102_spill] sm:$0xff]  ;;  %v24893_v55 = vld [vmem:[#allocation109_spill] sm:$0xff] }
 0x317   :  { %v20219_v41 = vpop.f32.mrf.mxu0  ;;  %v20221_v9 = vpop.f32.mrf.mxu1  ;;  %v20277_v36 = vadd.f32 %v20008_v33, %v19384_v57  ;;  %v20297_v57 = vadd.f32 %v20030_v59, %v19426_v61  ;;  %v20309_v33 = vadd.f32 %v20048_v2, %v19450_v17  ;;  %v20317_v61 = vadd.f32 %v20060_v6, %v19476_v27  ;;  %v24864_v2 = vld [vmem:[#allocation98_spill] sm:$0xff] }
 0x318   :  { %24862 = vst [vmem:[#allocation160_spill] sm:$0xff] %v20219_v41  ;;  %v20241_v41 = vadd.f32 %v19966_v40, %v19310_v23  ;;  %v20261_v23 = vadd.f32 %v19988_v13, %v19348_v37  ;;  %v20273_v40 = vadd.f32 %v20006_v4, %v19382_v56  ;;  %v20281_v37 = vadd.f32 %v20018_v21, %v19404_v3  ;;  %v24868_v4 = vld [vmem:[#allocation100_spill] sm:$0xff]  ;;  %v24874_v13 = vld [vmem:[#allocation15_spill] sm:$0xff] }
 0x319   :  { %v20251_v54 = vpop.f32.mrf.mxu0  ;;  %v20253_v60 = vpop.f32.mrf.mxu1  ;;  %v20293_v56 = vadd.f32 %v20028_v52, %v19424_v10  ;;  %v20301_v3 = vadd.f32 %v20038_v44, %v19446_v15  ;;  %v20313_v10 = vadd.f32 %v20050_v0, %v19452_v18  ;;  %v20321_v15 = vadd.f32 %v20062_v7, %v19478_v30  ;;  %v24863_v0 = vld [vmem:[#allocation10_spill] sm:$0xff]  ;;  %v24865_v52 = vld [vmem:[#allocation11_spill] sm:$0xff]  ;;  %v24877_v21 = vld [vmem:[#allocation16_spill] sm:$0xff] }
 0x31a   :  { %v20329_v17 = vadd.f32 %v20070_v58, %v19492_v38  ;;  %v20333_v18 = vadd.f32 %v20072_v53, %v19494_v39  ;;  %v20337_v27 = vadd.f32 %v20074_v51, %v19518_v62  ;;  %v20341_v30 = vadd.f32 %v20076_v35, %v19520_v63  ;;  %v24866_v44 = vld [vmem:[#allocation99_spill] sm:$0xff]  ;;  %v24867_v58 = vld [vmem:[#allocation12_spill] sm:$0xff]  ;;  %v24869_v53 = vld [vmem:[#allocation13_spill] sm:$0xff] }
 0x31b   :  { %v20287_v24 = vpop.f32.mrf.mxu0  ;;  %v20289_v43 = vpop.f32.mrf.mxu1  ;;  %v20345_v31 = vadd.f32 %v24864_v2, %v24863_v0  ;;  %v20349_v38 = vadd.f32 %v24866_v44, %v24865_v52  ;;  %v20353_v39 = vadd.f32 %v24868_v4, %v24867_v58  ;;  %v20357_v62 = vadd.f32 %v24870_v8, %v24869_v53  ;;  %v24871_v35 = vld [vmem:[#allocation14_spill] sm:$0xff]  ;;  %v24880_v7 = vld [vmem:[#allocation17_spill] sm:$0xff]  ;;  %v24886_v4 = vld [vmem:[#allocation19_spill] sm:$0xff] }
 0x31c   :  { %v20365_v11 = vadd.f32 %v24872_v14, %v24871_v35  ;;  %v20369_v1 = vadd.f32 %v24875_v48, %v24874_v13  ;;  %v20373_v6 = vadd.f32 %v24878_v19, %v24877_v21  ;;  %v24881_v0 = vld [vmem:[#allocation105_spill] sm:$0xff]  ;;  %v24883_v52 = vld [vmem:[#allocation18_spill] sm:$0xff]  ;;  %v24887_v53 = vld [vmem:[#allocation107_spill] sm:$0xff] }
 0x31d   :  { %v20323_v59 = vpop.f32.mrf.mxu0  ;;  %v20325_v16 = vpop.f32.mrf.mxu1  ;;  %v20377_v2 = vadd.f32 %v24881_v0, %v24880_v7  ;;  %v24884_v44 = vld [vmem:[#allocation106_spill] sm:$0xff]  ;;  %v20385_v8 = vadd.f32 %v24887_v53, %v24886_v4  ;;  %v24889_v35 = vld [vmem:[#allocation20_spill] sm:$0xff]  ;;  %v24892_v48 = vld [vmem:[#allocation21_spill] sm:$0xff] }
 0x31e   :  { %24873 = vst [vmem:[#allocation10_spill] sm:$0xff] %v20365_v11  ;;  %24876 = vst [vmem:[#allocation98_spill] sm:$0xff] %v20369_v1  ;;  %v20381_v58 = vadd.f32 %v24884_v44, %v24883_v52  ;;  %v24890_v14 = vld [vmem:[#allocation108_spill] sm:$0xff]  ;;  %v20393_v21 = vadd.f32 %v24893_v55, %v24892_v48  ;;  %v24895_v0 = vld [vmem:[#allocation22_spill] sm:$0xff] }
 0x31f   :  { %v20359_v51 = vpop.f32.mrf.mxu0  ;;  %v20361_v63 = vpop.f32.mrf.mxu1  ;;  %24879 = vst [vmem:[#allocation11_spill] sm:$0xff] %v20373_v6  ;;  %24882 = vst [vmem:[#allocation99_spill] sm:$0xff] %v20377_v2  ;;  %v20389_v13 = vadd.f32 %v24890_v14, %v24889_v35  ;;  %v24896_v2 = vld [vmem:[#allocation110_spill] sm:$0xff]  ;;  %v24898_v44 = vld [vmem:[#allocation23_spill] sm:$0xff] }
 0x320   :  { %24885 = vst [vmem:[#allocation12_spill] sm:$0xff] %v20381_v58  ;;  %24888 = vst [vmem:[#allocation100_spill] sm:$0xff] %v20385_v8  ;;  %v20401_v52 = vadd.f32 %v24896_v2, %v24895_v0  ;;  %v24899_v58 = vld [vmem:[#allocation111_spill] sm:$0xff]  ;;  %v24901_v53 = vld [vmem:[#allocation24_spill] sm:$0xff] }
 0x321   :  { %24891 = vst [vmem:[#allocation13_spill] sm:$0xff] %v20389_v13  ;;  %24894 = vst [vmem:[#allocation101_spill] sm:$0xff] %v20393_v21  ;;  %v20395_v19 = vpop.f32.mrf.mxu0  ;;  %v20397_v7 = vpop.f32.mrf.mxu1  ;;  %v20405_v4 = vadd.f32 %v24899_v58, %v24898_v44  ;;  %v24902_v8 = vld [vmem:[#allocation112_spill] sm:$0xff]  ;;  %v24904_v14 = vld [vmem:[#allocation25_spill] sm:$0xff] }
 0x322   :  { %24897 = vst [vmem:[#allocation14_spill] sm:$0xff] %v20401_v52  ;;  %v20409_v35 = vadd.f32 %v24902_v8, %v24901_v53  ;;  %v24905_v13 = vld [vmem:[#allocation113_spill] sm:$0xff]  ;;  %v24907_v48 = vld [vmem:[#allocation26_spill] sm:$0xff]  ;;  %v24910_v1 = vld [vmem:[#allocation27_spill] sm:$0xff] }
 0x323   :  { %24900 = vst [vmem:[#allocation102_spill] sm:$0xff] %v20405_v4  ;;  %v20413_v55 = vadd.f32 %v24905_v13, %v24904_v14  ;;  %v24908_v21 = vld [vmem:[#allocation114_spill] sm:$0xff]  ;;  %v24911_v11 = vld [vmem:[#allocation115_spill] sm:$0xff]  ;;  %v24913_v0 = vld [vmem:[#allocation28_spill] sm:$0xff]  ;;  %v20431_v53 = vpop.f32.mrf.mxu0  ;;  %v20433_v13 = vpop.f32.mrf.mxu1 }
 0x324   :  { %24903 = vst [vmem:[#allocation15_spill] sm:$0xff] %v20409_v35  ;;  %v20417_v6 = vadd.f32 %v24908_v21, %v24907_v48  ;;  %v20421_v2 = vadd.f32 %v24911_v11, %v24910_v1  ;;  %v24914_v52 = vld [vmem:[#allocation116_spill] sm:$0xff]  ;;  %v24916_v44 = vld [vmem:[#allocation29_spill] sm:$0xff]  ;;  %24919 = vst [vmem:[#allocation18_spill] sm:$0xff] %v20431_v53 }
 0x325   :  { %24906 = vst [vmem:[#allocation103_spill] sm:$0xff] %v20413_v55  ;;  %v20425_v58 = vadd.f32 %v24914_v52, %v24913_v0  ;;  %v24917_v4 = vld [vmem:[#allocation117_spill] sm:$0xff]  ;;  %24920 = vst [vmem:[#allocation106_spill] sm:$0xff] %v20433_v13  ;;  %v24921_v14 = vld [vmem:[#allocation30_spill] sm:$0xff] }
 0x326   :  { %24909 = vst [vmem:[#allocation16_spill] sm:$0xff] %v20417_v6  ;;  %24912 = vst [vmem:[#allocation104_spill] sm:$0xff] %v20421_v2  ;;  %v20429_v8 = vadd.f32 %v24917_v4, %v24916_v44  ;;  %v24922_v55 = vld [vmem:[#allocation118_spill] sm:$0xff]  ;;  %v24924_v48 = vld [vmem:[#allocation31_spill] sm:$0xff] }
 0x327   :  { %24915 = vst [vmem:[#allocation17_spill] sm:$0xff] %v20425_v58  ;;  %v20437_v21 = vadd.f32 %v24922_v55, %v24921_v14  ;;  %v24925_v6 = vld [vmem:[#allocation119_spill] sm:$0xff]  ;;  %v24927_v1 = vld [vmem:[#allocation32_spill] sm:$0xff]  ;;  %v24930_v0 = vld [vmem:[#allocation33_spill] sm:$0xff] }
 0x328   :  { %24918 = vst [vmem:[#allocation105_spill] sm:$0xff] %v20429_v8  ;;  %v20441_v11 = vadd.f32 %v24925_v6, %v24924_v48  ;;  %v24928_v2 = vld [vmem:[#allocation120_spill] sm:$0xff]  ;;  %v24931_v58 = vld [vmem:[#allocation121_spill] sm:$0xff]  ;;  %v24933_v44 = vld [vmem:[#allocation34_spill] sm:$0xff] }
 0x329   :  { %24923 = vst [vmem:[#allocation19_spill] sm:$0xff] %v20437_v21  ;;  %v20445_v52 = vadd.f32 %v24928_v2, %v24927_v1  ;;  %v20449_v4 = vadd.f32 %v24931_v58, %v24930_v0  ;;  %v24934_v8 = vld [vmem:[#allocation122_spill] sm:$0xff]  ;;  %v24936_v13 = vld [vmem:[#allocation35_spill] sm:$0xff]  ;;  %v24939_v14 = vld [vmem:[#allocation36_spill] sm:$0xff]  ;;  %v20467_v1 = vpop.f32.mrf.mxu0  ;;  %v20469_v58 = vpop.f32.mrf.mxu1 }
 0x32a   :  { %24926 = vst [vmem:[#allocation107_spill] sm:$0xff] %v20441_v11  ;;  %v20453_v35 = vadd.f32 %v24934_v8, %v24933_v44  ;;  %v24937_v53 = vld [vmem:[#allocation123_spill] sm:$0xff]  ;;  %v24940_v21 = vld [vmem:[#allocation124_spill] sm:$0xff]  ;;  %v24942_v48 = vld [vmem:[#allocation37_spill] sm:$0xff] }
 0x32b   :  { %24929 = vst [vmem:[#allocation20_spill] sm:$0xff] %v20445_v52  ;;  %24932 = vst [vmem:[#allocation108_spill] sm:$0xff] %v20449_v4  ;;  %v20457_v55 = vadd.f32 %v24937_v53, %v24936_v13  ;;  %v20461_v6 = vadd.f32 %v24940_v21, %v24939_v14  ;;  %v24943_v11 = vld [vmem:[#allocation125_spill] sm:$0xff]  ;;  %v24947_v0 = vld [vmem:[#allocation38_spill] sm:$0xff] }
 0x32c   :  { %24935 = vst [vmem:[#allocation21_spill] sm:$0xff] %v20453_v35  ;;  %v20465_v2 = vadd.f32 %v24943_v11, %v24942_v48  ;;  %24945 = vst [vmem:[#allocation23_spill] sm:$0xff] %v20467_v1  ;;  %v24948_v4 = vld [vmem:[#allocation126_spill] sm:$0xff]  ;;  %v24950_v44 = vld [vmem:[#allocation39_spill] sm:$0xff] }
 0x32d   :  { %24938 = vst [vmem:[#allocation109_spill] sm:$0xff] %v20457_v55  ;;  %24941 = vst [vmem:[#allocation22_spill] sm:$0xff] %v20461_v6  ;;  %v20473_v8 = vadd.f32 %v24948_v4, %v24947_v0  ;;  %v24951_v35 = vld [vmem:[#allocation127_spill] sm:$0xff]  ;;  %v24953_v13 = vld [vmem:[#allocation40_spill] sm:$0xff] }
 0x32e   :  { %24944 = vst [vmem:[#allocation110_spill] sm:$0xff] %v20465_v2  ;;  %24946 = vst [vmem:[#allocation111_spill] sm:$0xff] %v20469_v58  ;;  %v20477_v53 = vadd.f32 %v24951_v35, %v24950_v44  ;;  %v24954_v55 = vld [vmem:[#allocation128_spill] sm:$0xff]  ;;  %v24956_v14 = vld [vmem:[#allocation41_spill] sm:$0xff] }
 0x32f   :  { %24949 = vst [vmem:[#allocation24_spill] sm:$0xff] %v20473_v8  ;;  %v20481_v21 = vadd.f32 %v24954_v55, %v24953_v13  ;;  %v24957_v6 = vld [vmem:[#allocation129_spill] sm:$0xff]  ;;  %v24959_v48 = vld [vmem:[#allocation42_spill] sm:$0xff]  ;;  %v24962_v58 = vld [vmem:[#allocation43_spill] sm:$0xff]  ;;  %v20503_v13 = vpop.f32.mrf.mxu0 }
 0x330   :  { %24952 = vst [vmem:[#allocation112_spill] sm:$0xff] %v20477_v53  ;;  %v20485_v11 = vadd.f32 %v24957_v6, %v24956_v14  ;;  %v24960_v2 = vld [vmem:[#allocation130_spill] sm:$0xff]  ;;  %v24963_v1 = vld [vmem:[#allocation131_spill] sm:$0xff]  ;;  %v24965_v0 = vld [vmem:[#allocation44_spill] sm:$0xff]  ;;  %v20505_v6 = vpop.f32.mrf.mxu1 }
 0x331   :  { %24955 = vst [vmem:[#allocation25_spill] sm:$0xff] %v20481_v21  ;;  %v20489_v52 = vadd.f32 %v24960_v2, %v24959_v48  ;;  %v20493_v4 = vadd.f32 %v24963_v1, %v24962_v58  ;;  %v24966_v8 = vld [vmem:[#allocation132_spill] sm:$0xff]  ;;  %v24968_v44 = vld [vmem:[#allocation45_spill] sm:$0xff]  ;;  %24971 = vst [vmem:[#allocation28_spill] sm:$0xff] %v20503_v13 }
 0x332   :  { %24958 = vst [vmem:[#allocation113_spill] sm:$0xff] %v20485_v11  ;;  %v20497_v35 = vadd.f32 %v24966_v8, %v24965_v0  ;;  %v24969_v53 = vld [vmem:[#allocation133_spill] sm:$0xff]  ;;  %24972 = vst [vmem:[#allocation116_spill] sm:$0xff] %v20505_v6  ;;  %v24973_v14 = vld [vmem:[#allocation46_spill] sm:$0xff] }
 0x333   :  { %24961 = vst [vmem:[#allocation26_spill] sm:$0xff] %v20489_v52  ;;  %24964 = vst [vmem:[#allocation114_spill] sm:$0xff] %v20493_v4  ;;  %v20501_v55 = vadd.f32 %v24969_v53, %v24968_v44  ;;  %v24974_v11 = vld [vmem:[#allocation134_spill] sm:$0xff]  ;;  %v24976_v48 = vld [vmem:[#allocation47_spill] sm:$0xff] }
 0x334   :  { %24967 = vst [vmem:[#allocation27_spill] sm:$0xff] %v20497_v35  ;;  %v20509_v2 = vadd.f32 %v24974_v11, %v24973_v14  ;;  %v24977_v52 = vld [vmem:[#allocation135_spill] sm:$0xff]  ;;  %v24979_v58 = vld [vmem:[#allocation48_spill] sm:$0xff]  ;;  %v24981_v0 = vld [vmem:[#allocation49_spill] sm:$0xff] }
 0x335   :  { %24970 = vst [vmem:[#allocation115_spill] sm:$0xff] %v20501_v55  ;;  %v20513_v1 = vadd.f32 %v24977_v52, %v24976_v48  ;;  %v24980_v4 = vld [vmem:[#allocation136_spill] sm:$0xff]  ;;  %v24982_v35 = vld [vmem:[#allocation137_spill] sm:$0xff]  ;;  %v24984_v44 = vld [vmem:[#allocation50_spill] sm:$0xff] }
 0x336   :  { %24975 = vst [vmem:[#allocation29_spill] sm:$0xff] %v20509_v2  ;;  %v20517_v8 = vadd.f32 %v24980_v4, %v24979_v58  ;;  %v20521_v53 = vadd.f32 %v24982_v35, %v24981_v0  ;;  %v24985_v13 = vld [vmem:[#allocation138_spill] sm:$0xff]  ;;  %v24987_v6 = vld [vmem:[#allocation51_spill] sm:$0xff]  ;;  %v24990_v14 = vld [vmem:[#allocation52_spill] sm:$0xff]  ;;  %v20539_v58 = vpop.f32.mrf.mxu0  ;;  %v20541_v35 = vpop.f32.mrf.mxu1 }
 0x337   :  { %24978 = vst [vmem:[#allocation117_spill] sm:$0xff] %v20513_v1  ;;  %v20525_v55 = vadd.f32 %v24985_v13, %v24984_v44  ;;  %v24988_v21 = vld [vmem:[#allocation139_spill] sm:$0xff]  ;;  %v24991_v2 = vld [vmem:[#allocation140_spill] sm:$0xff]  ;;  %v24993_v48 = vld [vmem:[#allocation53_spill] sm:$0xff] }
 0x338   :  { %24983 = vst [vmem:[#allocation30_spill] sm:$0xff] %v20521_v53  ;;  %v20529_v11 = vadd.f32 %v24988_v21, %v24987_v6  ;;  %v20533_v52 = vadd.f32 %v24991_v2, %v24990_v14  ;;  %v24994_v1 = vld [vmem:[#allocation141_spill] sm:$0xff]  ;;  %24996 = vst [vmem:[#allocation120_spill] sm:$0xff] %v20539_v58  ;;  %v24998_v0 = vld [vmem:[#allocation54_spill] sm:$0xff] }
 0x339   :  { %24986 = vst [vmem:[#allocation118_spill] sm:$0xff] %v20525_v55  ;;  %v20537_v4 = vadd.f32 %v24994_v1, %v24993_v48  ;;  %24997 = vst [vmem:[#allocation33_spill] sm:$0xff] %v20541_v35  ;;  %v24999_v53 = vld [vmem:[#allocation142_spill] sm:$0xff]  ;;  %v25001_v44 = vld [vmem:[#allocation55_spill] sm:$0xff] }
 0x33a   :  { %24989 = vst [vmem:[#allocation31_spill] sm:$0xff] %v20529_v11  ;;  %24992 = vst [vmem:[#allocation119_spill] sm:$0xff] %v20533_v52  ;;  %v20545_v13 = vadd.f32 %v24999_v53, %v24998_v0  ;;  %v25002_v55 = vld [vmem:[#allocation143_spill] sm:$0xff]  ;;  %v25004_v6 = vld [vmem:[#allocation56_spill] sm:$0xff] }
 0x33b   :  { %24995 = vst [vmem:[#allocation32_spill] sm:$0xff] %v20537_v4  ;;  %v20549_v21 = vadd.f32 %v25002_v55, %v25001_v44  ;;  %v25005_v11 = vld [vmem:[#allocation144_spill] sm:$0xff]  ;;  %v25006_v14 = vld [vmem:[#allocation57_spill] sm:$0xff]  ;;  %v25009_v48 = vld [vmem:[#allocation58_spill] sm:$0xff] }
 0x33c   :  { %25000 = vst [vmem:[#allocation121_spill] sm:$0xff] %v20545_v13  ;;  %v20553_v2 = vadd.f32 %v25005_v11, %v25004_v6  ;;  %v25007_v52 = vld [vmem:[#allocation145_spill] sm:$0xff]  ;;  %v25010_v58 = vld [vmem:[#allocation146_spill] sm:$0xff]  ;;  %v25012_v35 = vld [vmem:[#allocation59_spill] sm:$0xff]  ;;  %v20575_v6 = vpop.f32.mrf.mxu0 }
 0x33d   :  { %25003 = vst [vmem:[#allocation34_spill] sm:$0xff] %v20549_v21  ;;  %v20557_v1 = vadd.f32 %v25007_v52, %v25006_v14  ;;  %v20561_v4 = vadd.f32 %v25010_v58, %v25009_v48  ;;  %v20565_v53 = vadd.f32 %v20182_v5, %v25012_v35  ;;  %v25014_v0 = vld [vmem:[#allocation60_spill] sm:$0xff]  ;;  %v25015_v13 = vld [vmem:[#allocation147_spill] sm:$0xff]  ;;  %v25017_v44 = vld [vmem:[#allocation61_spill] sm:$0xff]  ;;  %v20577_v52 = vpop.f32.mrf.mxu1 }
 0x33e   :  { %v20569_v55 = vadd.f32 %v25015_v13, %v25014_v0  ;;  %v25018_v21 = vld [vmem:[#allocation148_spill] sm:$0xff]  ;;  %25020 = vst [vmem:[#allocation37_spill] sm:$0xff] %v20575_v6  ;;  %25021 = vst [vmem:[#allocation125_spill] sm:$0xff] %v20577_v52  ;;  %v25022_v14 = vld [vmem:[#allocation62_spill] sm:$0xff] }
 0x33f   :  { %25008 = vst [vmem:[#allocation122_spill] sm:$0xff] %v20557_v1  ;;  %25011 = vst [vmem:[#allocation35_spill] sm:$0xff] %v20561_v4  ;;  %v20573_v11 = vadd.f32 %v25018_v21, %v25017_v44  ;;  %v25023_v1 = vld [vmem:[#allocation149_spill] sm:$0xff]  ;;  %v25025_v48 = vld [vmem:[#allocation63_spill] sm:$0xff] }
 0x340   :  { %25013 = vst [vmem:[#allocation123_spill] sm:$0xff] %v20565_v53  ;;  %25016 = vst [vmem:[#allocation36_spill] sm:$0xff] %v20569_v55  ;;  %v20581_v58 = vadd.f32 %v25023_v1, %v25022_v14  ;;  %v25026_v4 = vld [vmem:[#allocation150_spill] sm:$0xff]  ;;  %v25027_v35 = vld [vmem:[#allocation64_spill] sm:$0xff] }
 0x341   :  { %25019 = vst [vmem:[#allocation124_spill] sm:$0xff] %v20573_v11  ;;  %v20585_v5 = vadd.f32 %v25026_v4, %v25025_v48  ;;  %v25028_v53 = vld [vmem:[#allocation151_spill] sm:$0xff]  ;;  %v25030_v0 = vld [vmem:[#allocation65_spill] sm:$0xff]  ;;  %v25032_v44 = vld [vmem:[#allocation66_spill] sm:$0xff] }
 0x342   :  { %25024 = vst [vmem:[#allocation38_spill] sm:$0xff] %v20581_v58  ;;  %v20589_v13 = vadd.f32 %v25028_v53, %v25027_v35  ;;  %v20593_v21 = vadd.f32 %v20194_v26, %v25030_v0  ;;  %v25033_v6 = vld [vmem:[#allocation152_spill] sm:$0xff]  ;;  %v25035_v52 = vld [vmem:[#allocation67_spill] sm:$0xff]  ;;  %v25036_v55 = vld [vmem:[#allocation153_spill] sm:$0xff]  ;;  %v4402_v35 = vpop.f32.mrf.mxu0 }
 0x343   :  { %v20597_v11 = vadd.f32 %v25033_v6, %v25032_v44  ;;  %v20601_v1 = vadd.f32 %v25036_v55, %v25035_v52  ;;  %v25038_v14 = vld [vmem:[#allocation68_spill] sm:$0xff]  ;;  %v25039_v58 = vld [vmem:[#allocation154_spill] sm:$0xff]  ;;  %v25041_v48 = vld [vmem:[#allocation69_spill] sm:$0xff]  ;;  %v4714_v55 = vadd.f32 %v4402_v35, %v20237_v46 }
 0x344   :  { %25029 = vst [vmem:[#allocation126_spill] sm:$0xff] %v20589_v13  ;;  %25031 = vst [vmem:[#allocation39_spill] sm:$0xff] %v20593_v21  ;;  %v20605_v4 = vadd.f32 %v25039_v58, %v25038_v14  ;;  %v20609_v53 = vadd.f32 %v20202_v25, %v25041_v48  ;;  %v4575_v13 = vpop.f32.mrf.mxu1  ;;  %v25043_v26 = vld [vmem:[#allocation70_spill] sm:$0xff]  ;;  %v25044_v0 = vld [vmem:[#allocation155_spill] sm:$0xff] }
 0x345   :  { %25034 = vst [vmem:[#allocation127_spill] sm:$0xff] %v20597_v11  ;;  %25037 = vst [vmem:[#allocation40_spill] sm:$0xff] %v20601_v1  ;;  %v20613_v21 = vadd.f32 %v25044_v0, %v25043_v26  ;;  %v25046_v6 = vld [vmem:[#allocation71_spill] sm:$0xff]  ;;  %v25047_v44 = vld [vmem:[#allocation156_spill] sm:$0xff]  ;;  %v4716_v52 = vadd.f32 %v4575_v13, %v20241_v41  ;;  %v4848_v41 = vadd.f32 %v20224_v49, %v4714_v55 }
 0x346   :  { %25040 = vst [vmem:[#allocation128_spill] sm:$0xff] %v20605_v4  ;;  %25042 = vst [vmem:[#allocation41_spill] sm:$0xff] %v20609_v53  ;;  %v20617_v11 = vadd.f32 %v25047_v44, %v25046_v6  ;;  %v25048_v58 = vld [vmem:[#allocation72_spill] sm:$0xff]  ;;  %v25049_v25 = vld [vmem:[#allocation73_spill] sm:$0xff]  ;;  %v4404_v44 = vpop.f32.mrf.mxu0  ;;  %v4577_v46 = vpop.f32.mrf.mxu1 }
 0x347   :  { %25045 = vst [vmem:[#allocation129_spill] sm:$0xff] %v20613_v21  ;;  %v20623_v14 = vadd.f32 %v20208_v32, %v25048_v58  ;;  %v25050_v48 = vld [vmem:[#allocation157_spill] sm:$0xff]  ;;  %v25051_v4 = vld [vmem:[#allocation74_spill] sm:$0xff]  ;;  %v25053_v0 = vld [vmem:[#allocation75_spill] sm:$0xff]  ;;  %v4850_v13 = vadd.f32 %v20227_v20, %v4716_v52  ;;  %v4715_v32 = vadd.f32 %v4404_v44, %v20245_v45  ;;  %v4717_v35 = vadd.f32 %v4577_v46, %v20249_v47 }
 0x348   :  { %v20627_v53 = vadd.f32 %v25050_v48, %v25049_v25  ;;  %v25052_v1 = vld [vmem:[#allocation158_spill] sm:$0xff]  ;;  %v25054_v21 = vld [vmem:[#allocation159_spill] sm:$0xff]  ;;  %v25056_v58 = vld [vmem:[#allocation76_spill] sm:$0xff]  ;;  %v4406_v52 = vpop.f32.mrf.mxu0  ;;  %v4579_v45 = vpop.f32.mrf.mxu1  ;;  %v4960_v44 = vmax.f32 %v4848_v41, 0.0 }
 0x349   :  { %v20631_v26 = vadd.f32 %v25052_v1, %v25051_v4  ;;  %v20635_v6 = vadd.f32 %v25054_v21, %v25053_v0  ;;  %v25057_v25 = vld [vmem:[#allocation160_spill] sm:$0xff]  ;;  %v25058_v1 = vld [vmem:[#allocation77_spill] sm:$0xff]  ;;  %v25059_v21 = vld [vmem:[#allocation78_spill] sm:$0xff]  ;;  %v4962_v47 = vmax.f32 %v4850_v13, 0.0  ;;  %v4849_v46 = vadd.f32 %v20230_v34, %v4715_v32 }
 0x34a   :  { %v20643_v48 = vadd.f32 %v25057_v25, %v25056_v58  ;;  %v20647_v4 = vadd.f32 %v20221_v9, %v25058_v1  ;;  %v20651_v0 = vadd.f32 %v20251_v54, %v25059_v21  ;;  %v4851_v58 = vadd.f32 %v20233_v12, %v4717_v35  ;;  %v25063_v25 = vld [vmem:[#allocation80_spill] sm:$0xff]  ;;  %v25064_v1 = vld [vmem:[#allocation81_spill] sm:$0xff] }
 0x34b   :  { %25055 = vst [vmem:[#allocation42_spill] sm:$0xff] %v20635_v6  ;;  %v25061_v6 = vld [vmem:[#allocation79_spill] sm:$0xff]  ;;  %v20661_v9 = vadd.f32 %v20287_v24, %v25063_v25  ;;  %v20665_v54 = vadd.f32 %v20289_v43, %v25064_v1  ;;  %v4718_v21 = vadd.f32 %v4406_v52, %v20257_v22  ;;  %v20669_v41 = vmax.f32 %v4960_v44, %v4962_v47 }
 0x34c   :  { %25060 = vst [vmem:[#allocation130_spill] sm:$0xff] %v20651_v0  ;;  %v20655_v55 = vadd.f32 %v20253_v60, %v25061_v6  ;;  %v4720_v60 = vadd.f32 %v4579_v45, %v20261_v23  ;;  %v4408_v6 = vpop.f32.mrf.mxu0  ;;  %v4961_v13 = vmax.f32 %v4849_v46, 0.0  ;;  %v4963_v32 = vmax.f32 %v4851_v58, 0.0  ;;  %v25065_v0 = vld [vmem:[#allocation82_spill] sm:$0xff]  ;;  %v25066_v46 = vld [vmem:[#allocation83_spill] sm:$0xff] }
 0x34d   :  { %v4719_v35 = vadd.f32 %v4408_v6, %v20265_v28  ;;  %v20674_v24 = vadd.f32 %v20323_v59, %v25065_v0  ;;  %v4852_v25 = vadd.f32 %v20224_v49, %v4718_v21  ;;  %v20686_v59 = vadd.f32 %v20325_v16, %v25066_v46  ;;  %v25068_v46 = vld [vmem:[#allocation85_spill] sm:$0xff] }
 0x34e   :  { %25062 = vst [vmem:[#allocation43_spill] sm:$0xff] %v20655_v55  ;;  %v4581_v55 = vpop.f32.mrf.mxu1  ;;  %v4854_v43 = vadd.f32 %v20227_v20, %v4720_v60  ;;  %v4412_v52 = vpop.f32.mrf.mxu0  ;;  %v20679_v45 = vmax.f32 %v4961_v13, %v4963_v32 }
 0x34f   :  { %v4721_v22 = vadd.f32 %v4581_v55, %v20269_v29  ;;  %v4853_v44 = vadd.f32 %v20230_v34, %v4719_v35  ;;  %v4722_v47 = vadd.f32 %v4412_v52, %v20273_v40  ;;  %v4964_v0 = vmax.f32 %v4852_v25, 0.0  ;;  %v25067_v55 = vld [vmem:[#allocation84_spill] sm:$0xff] }
 0x350   :  { %v4585_v23 = vpop.f32.mrf.mxu1  ;;  %v4966_v58 = vmax.f32 %v4854_v43, 0.0  ;;  %v4414_v21 = vpop.f32.mrf.mxu0  ;;  %v20691_v60 = vadd.f32 %v20359_v51, %v25067_v55 }
 0x351   :  { %v4724_v28 = vadd.f32 %v4585_v23, %v20277_v36  ;;  %v4855_v1 = vadd.f32 %v20233_v12, %v4721_v22  ;;  %v4856_v6 = vadd.f32 %v20224_v49, %v4722_v47  ;;  %v4723_v36 = vadd.f32 %v4414_v21, %v20281_v37 }
 0x352   :  { %v4587_v29 = vpop.f32.mrf.mxu1  ;;  %v20696_v13 = vmax.f32 %v4964_v0, %v4966_v58  ;;  %v4965_v16 = vmax.f32 %v4853_v44, 0.0  ;;  %v4416_v25 = vpop.f32.mrf.mxu0  ;;  %v20703_v47 = vadd.f32 %v20361_v63, %v25068_v46 }
 0x353   :  { %v4858_v40 = vadd.f32 %v20227_v20, %v4724_v28  ;;  %v4967_v32 = vmax.f32 %v4855_v1, 0.0  ;;  %v4725_v35 = vadd.f32 %v4587_v29, %v20285_v42  ;;  %v4968_v22 = vmax.f32 %v4856_v6, 0.0  ;;  %v25069_v28 = vld [vmem:[#allocation86_spill] sm:$0xff] }
 0x354   :  { %v4589_v43 = vpop.f32.mrf.mxu1  ;;  %v4857_v23 = vadd.f32 %v20230_v34, %v4723_v36  ;;  %v4726_v51 = vadd.f32 %v4416_v25, %v20293_v56  ;;  %v20707_v37 = vadd.f32 %v20395_v19, %v25069_v28  ;;  %v4418_v0 = vpop.f32.mrf.mxu0 }
 0x355   :  { %v4970_v52 = vmax.f32 %v4858_v40, 0.0  ;;  %v4859_v44 = vadd.f32 %v20233_v12, %v4725_v35  ;;  %v4728_v42 = vadd.f32 %v4589_v43, %v20297_v57  ;;  %v4727_v56 = vadd.f32 %v4418_v0, %v20301_v3 }
 0x356   :  { %v4591_v58 = vpop.f32.mrf.mxu1  ;;  %v4969_v21 = vmax.f32 %v4857_v23, 0.0  ;;  %v4860_v29 = vadd.f32 %v20224_v49, %v4726_v51  ;;  %v5075_v55 = vmax.f32 %v4965_v16, %v4967_v32  ;;  %v4422_v19 = vpop.f32.mrf.mxu0 }
 0x357   :  { %v5076_v1 = vmax.f32 %v4968_v22, %v4970_v52  ;;  %v4971_v6 = vmax.f32 %v4859_v44, 0.0  ;;  %v4862_v63 = vadd.f32 %v20227_v20, %v4728_v42  ;;  %v4729_v40 = vadd.f32 %v4591_v58, %v20305_v50 }
 0x358   :  { %v4595_v36 = vpop.f32.mrf.mxu1  ;;  %v4972_v25 = vmax.f32 %v4860_v29, 0.0  ;;  %v4861_v57 = vadd.f32 %v20230_v34, %v4727_v56  ;;  %v4730_v43 = vadd.f32 %v4422_v19, %v20309_v33  ;;  %v4424_v16 = vpop.f32.mrf.mxu0 }
 0x359   :  { %v5128_v35 = vmax.f32 %v20669_v41, %v5076_v1  ;;  %v5077_v22 = vmax.f32 %v4969_v21, %v4971_v6  ;;  %v4974_v52 = vmax.f32 %v4862_v63, 0.0  ;;  %v4863_v23 = vadd.f32 %v20233_v12, %v4729_v40 }
 0x35a   :  { %v4732_v3 = vadd.f32 %v4595_v36, %v20313_v10  ;;  %v4597_v32 = vpop.f32.mrf.mxu1  ;;  %v4973_v51 = vmax.f32 %v4861_v57, 0.0  ;;  %v4864_v50 = vadd.f32 %v20224_v49, %v4730_v43  ;;  %v4731_v46 = vadd.f32 %v4424_v16, %v20317_v61  ;;  %v4426_v0 = vpop.f32.mrf.mxu0  ;;  %v17172_v57 = vld [vmem:[#allocation3] ss:$8 sps:$4 sm:$0xff]  }
 0x35b   :  { %v4733_v41 = vadd.f32 %v4597_v32, %v20321_v15  ;;  %v5129_v28 = vmax.f32 %v20679_v45, %v5077_v22  ;;  %v5078_v44 = vmax.f32 %v4972_v25, %v4974_v52  ;;  %v4975_v42 = vmax.f32 %v4863_v23, 0.0 }
 0x35c   :  { %v4866_v33 = vadd.f32 %v20227_v20, %v4732_v3  ;;  %v4599_v58 = vpop.f32.mrf.mxu1  ;;  %v4976_v1 = vmax.f32 %v4864_v50, 0.0  ;;  %v4865_v10 = vadd.f32 %v20230_v34, %v4731_v46  ;;  %v4734_v29 = vadd.f32 %v4426_v0, %v20329_v17  ;;  %v4428_v63 = vpop.f32.mrf.mxu0 }
 0x35d   :  { %v4867_v21 = vadd.f32 %v20233_v12, %v4733_v41  ;;  %v16233_v56 = vpack.c.bf16 %v5129_v28, %v5128_v35  ;;  %v5130_v61 = vmax.f32 %v20696_v13, %v5078_v44  ;;  %v5079_v6 = vmax.f32 %v4973_v51, %v4975_v42  ;;  %v25071_v42 = vld [vmem:[#allocation87_spill] sm:$0xff] }
 0x35e   :  { %v4978_v15 = vmax.f32 %v4866_v33, 0.0  ;;  %v4601_v45 = vpop.f32.mrf.mxu1  ;;  %v4977_v40 = vmax.f32 %v4865_v10, 0.0  ;;  %v4868_v36 = vadd.f32 %v20224_v49, %v4734_v29  ;;  %v4736_v25 = vadd.f32 %v4599_v58, %v20333_v18  ;;  %v4432_v35 = vpop.f32.mrf.mxu0  ;;  %v25072_v29 = vld [vmem:[#allocation88_spill] sm:$0xff] }
 0x35f   :  { %v4979_v19 = vmax.f32 %v4867_v21, 0.0  ;;  %5246 = vst.msk [vmem:[#allocation3 + $0x10] sm:$0xff] %vm18778_vm4, %v16233_v56  ;;  %v5131_v43 = vmax.f32 %v5075_v55, %v5079_v6  ;;  %v4735_v17 = vadd.f32 %v4428_v63, %v20337_v27  ;;  %v4737_v13 = vadd.f32 %v4601_v45, %v20341_v30  ;;  %v25073_v56 = vld [vmem:[#allocation18_spill] sm:$0xff] }
 0x360   :  { %v20733_v22 = vmax.f32 %v4976_v1, %v4978_v15  ;;  %v4605_v52 = vpop.f32.mrf.mxu1  ;;  %v4980_v3 = vmax.f32 %v4868_v36, 0.0  ;;  %v4870_v16 = vadd.f32 %v20227_v20, %v4736_v25  ;;  %v4738_v32 = vadd.f32 %v4432_v35, %v20345_v31  ;;  %v4434_v46 = vpop.f32.mrf.mxu0  ;;  %v25074_v6 = vld [vmem:[#allocation10_spill] sm:$0xff] }
 0x361   :  { %v20737_v23 = vmax.f32 %v4977_v40, %v4979_v19  ;;  %v16234_v18 = vpack.c.bf16 %v5131_v43, %v5130_v61  ;;  %v4869_v51 = vadd.f32 %v20230_v34, %v4735_v17  ;;  %v4871_v55 = vadd.f32 %v20233_v12, %v4737_v13  ;;  %v25075_v63 = vld [vmem:[#allocation98_spill] sm:$0xff]  ;;  %v25076_v43 = vld [vmem:[#allocation11_spill] sm:$0xff] }
 0x362   :  { %v4740_v50 = vadd.f32 %v4605_v52, %v20349_v38  ;;  %v4607_v27 = vpop.f32.mrf.mxu1  ;;  %v4982_v41 = vmax.f32 %v4870_v16, 0.0  ;;  %v4872_v30 = vadd.f32 %v20224_v49, %v4738_v32  ;;  %v4739_v28 = vadd.f32 %v4434_v46, %v20353_v39  ;;  %v4436_v58 = vpop.f32.mrf.mxu0  ;;  %v25077_v13 = vld [vmem:[#allocation99_spill] sm:$0xff] }
 0x363   :  { %v4741_v44 = vadd.f32 %v4607_v27, %v20357_v62  ;;  %v20749_v33 = vadd.f32 %v20397_v7, %v25071_v42  ;;  %5247 = vst.msk [vmem:[#allocation3 + $0x18] sm:$0xff] %vm18778_vm4, %v16234_v18  ;;  %v4981_v31 = vmax.f32 %v4869_v51, 0.0  ;;  %v4983_v0 = vmax.f32 %v4871_v55, 0.0  ;;  %v25078_v27 = vld [vmem:[#allocation12_spill] sm:$0xff] }
 0x364   :  { %v4874_v38 = vadd.f32 %v20227_v20, %v4740_v50  ;;  %v4609_v1 = vpop.f32.mrf.mxu1  ;;  %v20754_v10 = vmax.f32 %v4980_v3, %v4982_v41  ;;  %v4984_v21 = vmax.f32 %v4872_v30, 0.0  ;;  %v4873_v39 = vadd.f32 %v20230_v34, %v4739_v28  ;;  %v4438_v40 = vpop.f32.mrf.mxu0  ;;  %v25079_v42 = vld [vmem:[#allocation100_spill] sm:$0xff] }
 0x365   :  { %v4875_v62 = vadd.f32 %v20233_v12, %v4741_v44  ;;  %v20760_v7 = vadd.f32 %v25073_v56, %v25072_v29  ;;  %v4742_v15 = vadd.f32 %v4436_v58, %v25074_v6  ;;  %v4744_v45 = vadd.f32 %v4609_v1, %v25075_v63 }
 0x366   :  { %v4986_v61 = vmax.f32 %v4874_v38, 0.0  ;;  %v4611_v19 = vpop.f32.mrf.mxu1  ;;  %v4985_v36 = vmax.f32 %v4873_v39, 0.0  ;;  %v4743_v17 = vadd.f32 %v4438_v40, %v25076_v43  ;;  %v5083_v52 = vmax.f32 %v4981_v31, %v4983_v0  ;;  %v4442_v18 = vpop.f32.mrf.mxu0  ;;  %v25082_v43 = vld [vmem:[#allocation14_spill] sm:$0xff] }
 0x367   :  { %v4987_v25 = vmax.f32 %v4875_v62, 0.0  ;;  %v4745_v35 = vadd.f32 %v4611_v19, %v25077_v13  ;;  %v4876_v16 = vadd.f32 %v20224_v49, %v4742_v15  ;;  %v4878_v32 = vadd.f32 %v20227_v20, %v4744_v45  ;;  %v25081_v15 = vld [vmem:[#allocation101_spill] sm:$0xff]  ;;  %v17082_v13 = vld [vmem:[%s24682_s5 + $0xe8] ss:$16 sps:$4 sm:$0xff]  }
 0x368   :  { %v5084_v3 = vmax.f32 %v4984_v21, %v4986_v61  ;;  %v4615_v51 = vpop.f32.mrf.mxu1  ;;  %v4877_v50 = vadd.f32 %v20230_v34, %v4743_v17  ;;  %v4746_v41 = vadd.f32 %v4442_v18, %v25078_v27  ;;  %v4444_v0 = vpop.f32.mrf.mxu0  ;;  %v25080_v61 = vld [vmem:[#allocation13_spill] sm:$0xff]  ;;  %v25083_v27 = vld [vmem:[#allocation102_spill] sm:$0xff] }
 0x369   :  { %v5085_v55 = vmax.f32 %v4985_v36, %v4987_v25  ;;  %v4879_v46 = vadd.f32 %v20233_v12, %v4745_v35  ;;  %v4988_v28 = vmax.f32 %v4876_v16, 0.0  ;;  %v4990_v44 = vmax.f32 %v4878_v32, 0.0  ;;  %v17079_v19 = vld [vmem:[%s24682_s5 + $0xe0] ss:$16 sps:$4 sm:$0xff]   ;;  %v17087_v35 = vld [vmem:[%s24682_s5 + $0xc4] ss:$16 sps:$4 sm:$0xff]  }
 0x36a   :  { %v5132_v30 = vmax.f32 %v20733_v22, %v5084_v3  ;;  %v4748_v31 = vadd.f32 %v4615_v51, %v25079_v42  ;;  %v4617_v38 = vpop.f32.mrf.mxu1  ;;  %v4989_v1 = vmax.f32 %v4877_v50, 0.0  ;;  %v4880_v39 = vadd.f32 %v20224_v49, %v4746_v41  ;;  %v17067_v62 = vld [vmem:[#allocation3 + $0x10] ss:$8 sps:$4 sm:$0xff]   ;;  %v4446_v63 = vpop.f32.mrf.mxu0  ;;  %v17069_v40 = vld [vmem:[#allocation3 + $0x14] ss:$8 sps:$4 sm:$0xff]  }
 0x36b   :  { %v5133_v58 = vmax.f32 %v20737_v23, %v5085_v55  ;;  %v4991_v21 = vmax.f32 %v4879_v46, 0.0  ;;  %v5086_v29 = vmax.f32 %v4988_v28, %v4990_v44  ;;  %v4747_v6 = vadd.f32 %v4444_v0, %v25080_v61  ;;  %14704 = vmatprep.mubr.msk.bf16.mxu0 %vm2651_vm5, %v17069_v40  ;;  %14711 = vmatprep.mubr.msk.bf16.mxu1 %vm2651_vm5, %v17069_v40  ;;  %v17090_v50 = vld [vmem:[%s24682_s5 + $0xcc] ss:$16 sps:$4 sm:$0xff]   ;;  %v25085_v0 = vld [vmem:[#allocation103_spill] sm:$0xff]  ;;  %v17088_v61 = vld [vmem:[%s24682_s5 + $0xc8] ss:$16 sps:$4 sm:$0xff]  }
 0x36c   :  { %v4882_v56 = vadd.f32 %v20227_v20, %v4748_v31  ;;  %v4749_v22 = vadd.f32 %v4617_v38, %v25081_v15  ;;  %v4619_v45 = vpop.f32.mrf.mxu1  ;;  %v4992_v25 = vmax.f32 %v4880_v39, 0.0  ;;  %v4750_v17 = vadd.f32 %v4446_v63, %v25082_v43  ;;  %v4448_v51 = vpop.f32.mrf.mxu0  ;;  %5798 = vmatmul.mubr.bf16.vlgmr.msra.gmra.mxu0 %v17067_v62  ;;  %5901 = vmatmul.mubr.bf16.vlgmr.msra.gmra.mxu1 %v17067_v62  ;;  %v25086_v15 = vld [vmem:[#allocation16_spill] sm:$0xff]  ;;  %v25089_v43 = vld [vmem:[#allocation106_spill] sm:$0xff] }
 0x36d   :  { %v16235_v23 = vpack.c.bf16 %v5133_v58, %v5132_v30  ;;  %v5087_v36 = vmax.f32 %v4989_v1, %v4991_v21  ;;  %v5134_v3 = vmax.f32 %v20754_v10, %v5086_v29  ;;  %v4881_v32 = vadd.f32 %v20230_v34, %v4747_v6  ;;  %v25084_v30 = vld [vmem:[#allocation15_spill] sm:$0xff]  ;;  %6336 = vmatpush1.bf16.msra.mxu0 %v17079_v19  ;;  %v25087_v63 = vld [vmem:[#allocation104_spill] sm:$0xff] }
 0x36e   :  { %v4994_v16 = vmax.f32 %v4882_v56, 0.0  ;;  %v4883_v18 = vadd.f32 %v20233_v12, %v4749_v22  ;;  %v4621_v55 = vpop.f32.mrf.mxu1  ;;  %v4884_v10 = vadd.f32 %v20224_v49, %v4750_v17  ;;  %v4752_v41 = vadd.f32 %v4619_v45, %v25083_v27  ;;  %v4452_v58 = vpop.f32.mrf.mxu0  ;;  %6439 = vmatpush1.bf16.msra.mxu1 %v17082_v13  ;;  %6337 = vmatprep.subr.bf16.mxu0 %v17087_v35  ;;  %v25090_v35 = vld [vmem:[#allocation17_spill] sm:$0xff] }
 0x36f   :  { %5248 = vst.msk [vmem:[#allocation3 + $0x20] sm:$0xff] %vm18778_vm4, %v16235_v23  ;;  %v5135_v46 = vmax.f32 %v5083_v52, %v5087_v36  ;;  %v4751_v28 = vadd.f32 %v4448_v51, %v25084_v30  ;;  %v4993_v42 = vmax.f32 %v4881_v32, 0.0  ;;  %v4753_v38 = vadd.f32 %v4621_v55, %v25085_v0  ;;  %v17085_v52 = vld [vmem:[%s24682_s5 + $0xc0] ss:$16 sps:$4 sm:$0xff]   ;;  %6440 = vmatprep.subr.bf16.mxu1 %v17090_v50  ;;  %v17093_v23 = vld [vmem:[%s24682_s5 + $0xa4] ss:$16 sps:$4 sm:$0xff]  }
 0x370   :  { %v20801_v44 = vmax.f32 %v4992_v25, %v4994_v16  ;;  %v4995_v31 = vmax.f32 %v4883_v18, 0.0  ;;  %v4625_v1 = vpop.f32.mrf.mxu1  ;;  %v4996_v39 = vmax.f32 %v4884_v10, 0.0  ;;  %v4886_v29 = vadd.f32 %v20227_v20, %v4752_v41  ;;  %v4454_v40 = vpop.f32.mrf.mxu0  ;;  %v17096_v36 = vld [vmem:[%s24682_s5 + $0xac] ss:$16 sps:$4 sm:$0xff]   ;;  %v25088_v25 = vld [vmem:[#allocation89_spill] sm:$0xff] }
 0x371   :  { %v16236_v21 = vpack.c.bf16 %v5135_v46, %v5134_v3  ;;  %v4885_v56 = vadd.f32 %v20230_v34, %v4751_v28  ;;  %v4887_v6 = vadd.f32 %v20233_v12, %v4753_v38  ;;  %v4754_v22 = vadd.f32 %v4452_v58, %v25086_v15  ;;  %v25091_v16 = vld [vmem:[#allocation105_spill] sm:$0xff]  ;;  %6338 = vmatpush1.bf16.msra.mxu0 %v17085_v52  ;;  %v17094_v0 = vld [vmem:[%s24682_s5 + $0xa8] ss:$16 sps:$4 sm:$0xff]  }
 0x372   :  { %v20812_v62 = vmax.f32 %v4993_v42, %v4995_v31  ;;  %v4756_v45 = vadd.f32 %v4625_v1, %v25087_v63  ;;  %v4627_v19 = vpop.f32.mrf.mxu1  ;;  %v20825_v17 = vadd.f32 %v25089_v43, %v25088_v25  ;;  %v4998_v13 = vmax.f32 %v4886_v29, 0.0  ;;  %v4456_v46 = vpop.f32.mrf.mxu0  ;;  %v17091_v27 = vld [vmem:[%s24682_s5 + $0xa0] ss:$16 sps:$4 sm:$0xff]   ;;  %6441 = vmatpush1.bf16.msra.mxu1 %v17088_v61  ;;  %v17099_v38 = vld [vmem:[%s24682_s5 + $0x84] ss:$16 sps:$4 sm:$0xff]   ;;  %v25093_v58 = vld [vmem:[#allocation90_spill] sm:$0xff]  ;;  %6339 = vmatprep.subr.bf16.mxu0 %v17093_v23 }
 0x373   :  { %5249 = vst.msk [vmem:[#allocation3 + $0x28] sm:$0xff] %vm18778_vm4, %v16236_v21  ;;  %v4755_v3 = vadd.f32 %v4454_v40, %v25090_v35  ;;  %v4757_v32 = vadd.f32 %v4627_v19, %v25091_v16  ;;  %v4997_v18 = vmax.f32 %v4885_v56, 0.0  ;;  %v4999_v51 = vmax.f32 %v4887_v6, 0.0  ;;  %v25092_v42 = vld [vmem:[#allocation19_spill] sm:$0xff]  ;;  %6442 = vmatprep.subr.bf16.mxu1 %v17096_v36  ;;  %v17102_v61 = vld [vmem:[%s24682_s5 + $0x8c] ss:$16 sps:$4 sm:$0xff]  }
 0x374   :  { %v4888_v55 = vadd.f32 %v20224_v49, %v4754_v22  ;;  %v4890_v50 = vadd.f32 %v20227_v20, %v4756_v45  ;;  %v4629_v10 = vpop.f32.mrf.mxu1  ;;  %v20836_v41 = vmax.f32 %v4996_v39, %v4998_v13  ;;  %v4758_v31 = vadd.f32 %v4456_v46, %v25092_v42  ;;  %v25094_v1 = vld [vmem:[#allocation23_spill] sm:$0xff]  ;;  %v4458_v6 = vpop.f32.mrf.mxu0  ;;  %v25096_v40 = vld [vmem:[#allocation20_spill] sm:$0xff] }
 0x375   :  { %v4889_v30 = vadd.f32 %v20230_v34, %v4755_v3  ;;  %v4891_v28 = vadd.f32 %v20233_v12, %v4757_v32  ;;  %v20849_v52 = vadd.f32 %v25094_v1, %v25093_v58  ;;  %v25095_v29 = vld [vmem:[#allocation107_spill] sm:$0xff]  ;;  %v4759_v19 = vadd.f32 %v4458_v6, %v25096_v40  ;;  %v25097_v35 = vld [vmem:[#allocation108_spill] sm:$0xff]  ;;  %6340 = vmatpush1.bf16.msra.mxu0 %v17091_v27 }
 0x376   :  { %v5000_v21 = vmax.f32 %v4888_v55, 0.0  ;;  %v5002_v39 = vmax.f32 %v4890_v50, 0.0  ;;  %v4760_v56 = vadd.f32 %v4629_v10, %v25095_v29  ;;  %v4631_v15 = vpop.f32.mrf.mxu1  ;;  %v4892_v45 = vadd.f32 %v20224_v49, %v4758_v31  ;;  %v4462_v16 = vpop.f32.mrf.mxu0  ;;  %v25098_v50 = vld [vmem:[#allocation21_spill] sm:$0xff]  ;;  %6443 = vmatpush1.bf16.msra.mxu1 %v17094_v0  ;;  %6341 = vmatprep.subr.bf16.mxu0 %v17099_v38  ;;  %v25100_v29 = vld [vmem:[#allocation22_spill] sm:$0xff] }
 0x377   :  { %v5001_v22 = vmax.f32 %v4889_v30, 0.0  ;;  %v5003_v63 = vmax.f32 %v4891_v28, 0.0  ;;  %v20857_v25 = vmax.f32 %v4997_v18, %v4999_v51  ;;  %v4761_v3 = vadd.f32 %v4631_v15, %v25097_v35  ;;  %v17097_v18 = vld [vmem:[%s24682_s5 + $0x80] ss:$16 sps:$4 sm:$0xff]   ;;  %v17100_v51 = vld [vmem:[%s24682_s5 + $0x88] ss:$16 sps:$4 sm:$0xff]   ;;  %6444 = vmatprep.subr.bf16.mxu1 %v17102_v61 }
 0x378   :  { %v5092_v43 = vmax.f32 %v5000_v21, %v5002_v39  ;;  %v4894_v13 = vadd.f32 %v20227_v20, %v4760_v56  ;;  %v4635_v23 = vpop.f32.mrf.mxu1  ;;  %v5004_v32 = vmax.f32 %v4892_v45, 0.0  ;;  %v4893_v55 = vadd.f32 %v20230_v34, %v4759_v19  ;;  %v25099_v28 = vld [vmem:[#allocation109_spill] sm:$0xff]  ;;  %v4464_v31 = vpop.f32.mrf.mxu0  ;;  %v17111_v6 = vld [vmem:[%s24682_s5 + $0x6c] ss:$16 sps:$4 sm:$0xff]  }
 0x379   :  { %v5093_v36 = vmax.f32 %v5001_v22, %v5003_v63  ;;  %v4762_v46 = vadd.f32 %v4462_v16, %v25098_v50  ;;  %v4895_v27 = vadd.f32 %v20233_v12, %v4761_v3  ;;  %v4764_v42 = vadd.f32 %v4635_v23, %v25099_v28  ;;  %v25101_v61 = vld [vmem:[#allocation110_spill] sm:$0xff]  ;;  %v25102_v35 = vld [vmem:[#allocation24_spill] sm:$0xff]  ;;  %6342 = vmatpush1.bf16.msra.mxu0 %v17097_v18  ;;  %v25104_v28 = vld [vmem:[#allocation25_spill] sm:$0xff] }
 0x37a   :  { %v5136_v10 = vmax.f32 %v20801_v44, %v5092_v43  ;;  %v5006_v30 = vmax.f32 %v4894_v13, 0.0  ;;  %v4637_v58 = vpop.f32.mrf.mxu1  ;;  %v17070_v1 = vld [vmem:[#allocation3 + $0x24] ss:$8 sps:$4 sm:$0xff]   ;;  %v17072_v0 = vld [vmem:[#allocation3 + $0x20] ss:$8 sps:$4 sm:$0xff]   ;;  %v5005_v39 = vmax.f32 %v4893_v55, 0.0  ;;  %v4763_v56 = vadd.f32 %v4464_v31, %v25100_v29  ;;  %6445 = vmatpush1.bf16.msra.mxu1 %v17100_v51 }
 0x37b   :  { %v5137_v21 = vmax.f32 %v20812_v62, %v5093_v36  ;;  %v4896_v38 = vadd.f32 %v20224_v49, %v4762_v46  ;;  %v17108_v44 = vld [vmem:[%s24682_s5 + $0x64] ss:$16 sps:$4 sm:$0xff]   ;;  %v5007_v22 = vmax.f32 %v4895_v27, 0.0  ;;  %v4898_v63 = vadd.f32 %v20227_v20, %v4764_v42  ;;  %v4466_v62 = vpop.f32.mrf.mxu0  ;;  %14705 = vmatprep.mubr.msk.bf16.mxu0 %vm2651_vm5, %v17070_v1  ;;  %14712 = vmatprep.mubr.msk.bf16.mxu1 %vm2651_vm5, %v17070_v1  ;;  %v17106_v46 = vld [vmem:[%s24682_s5 + $0x60] ss:$16 sps:$4 sm:$0xff]   ;;  %v25103_v27 = vld [vmem:[#allocation112_spill] sm:$0xff] }
 0x37c   :  { %v5094_v15 = vmax.f32 %v5004_v32, %v5006_v30  ;;  %v4765_v45 = vadd.f32 %v4637_v58, %v25101_v61  ;;  %v4639_v40 = vpop.f32.mrf.mxu1  ;;  %v4897_v13 = vadd.f32 %v20230_v34, %v4763_v56  ;;  %v4766_v3 = vadd.f32 %v4466_v62, %v25102_v35  ;;  %5808 = vmatmul.mubr.bf16.gmra.mxu0 %v17072_v0  ;;  %v17109_v18 = vld [vmem:[%s24682_s5 + $0x68] ss:$16 sps:$4 sm:$0xff]   ;;  %v17114_v51 = vld [vmem:[%s24682_s5 + $0x44] ss:$16 sps:$4 sm:$0xff]   ;;  %v17117_v29 = vld [vmem:[%s24682_s5 + $0x4c] ss:$16 sps:$4 sm:$0xff]  }
 0x37d   :  { %v16237_v19 = vpack.c.bf16 %v5137_v21, %v5136_v10  ;;  %v5008_v43 = vmax.f32 %v4896_v38, 0.0  ;;  %5911 = vmatmul.mubr.bf16.gmra.mxu1 %v17072_v0  ;;  %v5095_v23 = vmax.f32 %v5005_v39, %v5007_v22  ;;  %v5010_v36 = vmax.f32 %v4898_v63, 0.0  ;;  %v4468_v55 = vpop.f32.mrf.mxu0  ;;  %6343 = vmatprep.subr.bf16.mxu0 %v17108_v44  ;;  %v25105_v0 = vld [vmem:[#allocation113_spill] sm:$0xff]  ;;  %v25109_v35 = vld [vmem:[#allocation111_spill] sm:$0xff] }
 0x37e   :  { %v5138_v16 = vmax.f32 %v20836_v41, %v5094_v15  ;;  %v4899_v32 = vadd.f32 %v20233_v12, %v4765_v45  ;;  %v4641_v50 = vpop.f32.mrf.mxu1  ;;  %v5009_v10 = vmax.f32 %v4897_v13, 0.0  ;;  %v4900_v30 = vadd.f32 %v20224_v49, %v4766_v3  ;;  %6446 = vmatprep.subr.bf16.mxu1 %v17111_v6  ;;  %v25106_v15 = vld [vmem:[#allocation26_spill] sm:$0xff]  ;;  %6344 = vmatpush1.bf16.msra.mxu0 %v17106_v46  ;;  %v25108_v13 = vld [vmem:[#allocation91_spill] sm:$0xff] }
 0x37f   :  { %5250 = vst.msk [vmem:[#allocation3 + $0x30] sm:$0xff] %vm18778_vm4, %v16237_v19  ;;  %v4768_v41 = vadd.f32 %v4639_v40, %v25103_v27  ;;  %v4767_v42 = vadd.f32 %v4468_v55, %v25104_v28  ;;  %v5139_v31 = vmax.f32 %v20857_v25, %v5095_v23  ;;  %v20904_v58 = vmax.f32 %v5008_v43, %v5010_v36  ;;  %v4472_v39 = vpop.f32.mrf.mxu0  ;;  %v25107_v45 = vld [vmem:[#allocation114_spill] sm:$0xff]  ;;  %v17112_v43 = vld [vmem:[%s24682_s5 + $0x40] ss:$16 sps:$4 sm:$0xff]  }
 0x380   :  { %v5011_v1 = vmax.f32 %v4899_v32, 0.0  ;;  %v4769_v21 = vadd.f32 %v4641_v50, %v25105_v0  ;;  %v4645_v38 = vpop.f32.mrf.mxu1  ;;  %v5012_v56 = vmax.f32 %v4900_v30, 0.0  ;;  %v4770_v22 = vadd.f32 %v4472_v39, %v25106_v15  ;;  %v25110_v36 = vld [vmem:[#allocation27_spill] sm:$0xff]  ;;  %6447 = vmatpush1.bf16.msra.mxu1 %v17109_v18  ;;  %6345 = vmatprep.subr.bf16.mxu0 %v17114_v51  ;;  %v17115_v55 = vld [vmem:[%s24682_s5 + $0x48] ss:$16 sps:$4 sm:$0xff]   ;;  %v25112_v0 = vld [vmem:[#allocation29_spill] sm:$0xff] }
 0x381   :  { %v4902_v44 = vadd.f32 %v20227_v20, %v4768_v41  ;;  %v4901_v6 = vadd.f32 %v20230_v34, %v4767_v42  ;;  %v16238_v63 = vpack.c.bf16 %v5139_v31, %v5138_v16  ;;  %v4772_v62 = vadd.f32 %v4645_v38, %v25107_v45  ;;  %v4474_v40 = vpop.f32.mrf.mxu0  ;;  %v17120_v50 = vld [vmem:[%s24682_s5 + $0x24] ss:$16 sps:$4 sm:$0xff]   ;;  %6448 = vmatprep.subr.bf16.mxu1 %v17117_v29  ;;  %v17123_v18 = vld [vmem:[%s24682_s5 + $0x2c] ss:$16 sps:$4 sm:$0xff]  }
 0x382   :  { %v20913_v25 = vmax.f32 %v5009_v10, %v5011_v1  ;;  %v4903_v61 = vadd.f32 %v20233_v12, %v4769_v21  ;;  %v4647_v19 = vpop.f32.mrf.mxu1  ;;  %v20922_v3 = vadd.f32 %v25109_v35, %v25108_v13  ;;  %v4904_v16 = vadd.f32 %v20224_v49, %v4770_v22  ;;  %v25111_v27 = vld [vmem:[#allocation115_spill] sm:$0xff]  ;;  %v25113_v39 = vld [vmem:[#allocation92_spill] sm:$0xff]  ;;  %v25115_v22 = vld [vmem:[#allocation117_spill] sm:$0xff]  ;;  %6346 = vmatpush1.bf16.msra.mxu0 %v17112_v43 }
 0x383   :  { %v5014_v23 = vmax.f32 %v4902_v44, 0.0  ;;  %v4771_v32 = vadd.f32 %v4474_v40, %v25110_v36  ;;  %5251 = vst.msk [vmem:[#allocation3 + $0x38] sm:$0xff] %vm18778_vm4, %v16238_v63  ;;  %v5013_v46 = vmax.f32 %v4901_v6, 0.0  ;;  %v4906_v30 = vadd.f32 %v20227_v20, %v4772_v62  ;;  %v4476_v28 = vpop.f32.mrf.mxu0  ;;  %v25114_v38 = vld [vmem:[#allocation28_spill] sm:$0xff]  ;;  %6347 = vmatprep.subr.bf16.mxu0 %v17120_v50  ;;  %v17126_v43 = vld [vmem:[%s24682_s5 + $0x4] ss:$16 sps:$4 sm:$0xff]  }
 0x384   :  { %v5015_v10 = vmax.f32 %v4903_v61, 0.0  ;;  %v4773_v41 = vadd.f32 %v4647_v19, %v25111_v27  ;;  %v4649_v42 = vpop.f32.mrf.mxu1  ;;  %v5016_v31 = vmax.f32 %v4904_v16, 0.0  ;;  %v4774_v21 = vadd.f32 %v4476_v28, %v25112_v0  ;;  %v25116_v19 = vld [vmem:[#allocation30_spill] sm:$0xff]  ;;  %6449 = vmatpush1.bf16.msra.mxu1 %v17115_v55 }
 0x385   :  { %v20939_v51 = vmax.f32 %v5012_v56, %v5014_v23  ;;  %v4905_v1 = vadd.f32 %v20230_v34, %v4771_v32  ;;  %v20945_v44 = vadd.f32 %v25114_v38, %v25113_v39  ;;  %v5018_v6 = vmax.f32 %v4906_v30, 0.0  ;;  %v4478_v63 = vpop.f32.mrf.mxu0  ;;  %v17118_v56 = vld [vmem:[%s24682_s5 + $0x20] ss:$16 sps:$4 sm:$0xff]   ;;  %v17121_v35 = vld [vmem:[%s24682_s5 + $0x28] ss:$16 sps:$4 sm:$0xff]   ;;  %6450 = vmatprep.subr.bf16.mxu1 %v17123_v18 }
 0x386   :  { %v4907_v15 = vadd.f32 %v20233_v12, %v4773_v41  ;;  %v4776_v29 = vadd.f32 %v4649_v42, %v25115_v22  ;;  %v4651_v61 = vpop.f32.mrf.mxu1  ;;  %v4908_v62 = vadd.f32 %v20224_v49, %v4774_v21  ;;  %v4775_v40 = vadd.f32 %v4478_v63, %v20517_v8  ;;  %v17129_v55 = vld [vmem:[%s24682_s5 + $0xc] ss:$16 sps:$4 sm:$0xff]   ;;  %6348 = vmatpush1.bf16.msra.mxu0 %v17118_v56  ;;  %v17124_v18 = vld [vmem:[%s24682_s5] ss:$16 sps:$4 sm:$0xff]   ;;  %v17127_v38 = vld [vmem:[%s24682_s5 + $0x8] ss:$16 sps:$4 sm:$0xff]  }
 0x387   :  { %v5017_v45 = vmax.f32 %v4905_v1, 0.0  ;;  %v4777_v13 = vadd.f32 %v4651_v61, %v25116_v19  ;;  %v20961_v23 = vmax.f32 %v5013_v46, %v5015_v10  ;;  %v5100_v16 = vmax.f32 %v5016_v31, %v5018_v6  ;;  %v4482_v30 = vpop.f32.mrf.mxu0  ;;  %v25117_v28 = vld [vmem:[#allocation118_spill] sm:$0xff]  ;;  %v25118_v1 = vld [vmem:[#allocation31_spill] sm:$0xff]  ;;  %6349 = vmatprep.subr.bf16.mxu0 %v17126_v43 }
 0x388   :  { %v5019_v36 = vmax.f32 %v4907_v15, 0.0  ;;  %v4910_v32 = vadd.f32 %v20227_v20, %v4776_v29  ;;  %v4655_v8 = vpop.f32.mrf.mxu1  ;;  %v5020_v50 = vmax.f32 %v4908_v62, 0.0  ;;  %v4909_v27 = vadd.f32 %v20230_v34, %v4775_v40  ;;  %6451 = vmatpush1.bf16.msra.mxu1 %v17121_v35  ;;  %v25120_v62 = vld [vmem:[#allocation32_spill] sm:$0xff] }
 0x389   :  { %v4911_v41 = vadd.f32 %v20233_v12, %v4777_v13  ;;  %v4778_v42 = vadd.f32 %v4482_v30, %v25117_v28  ;;  %v5140_v46 = vmax.f32 %v20904_v58, %v5100_v16  ;;  %v4780_v0 = vadd.f32 %v4655_v8, %v25118_v1  ;;  %v4484_v21 = vpop.f32.mrf.mxu0  ;;  %v25119_v58 = vld [vmem:[#allocation119_spill] sm:$0xff]  ;;  %6452 = vmatprep.subr.bf16.mxu1 %v17129_v55  ;;  %v17138_v35 = vld [vmem:[%s24682_s5 + $0x1ac] ss:$16 sps:$4 sm:$0xff]   ;;  %v25121_v30 = vld [vmem:[#allocation121_spill] sm:$0xff] }
 0x38a   :  { %v5101_v10 = vmax.f32 %v5017_v45, %v5019_v36  ;;  %v5022_v31 = vmax.f32 %v4910_v32, 0.0  ;;  %v4657_v39 = vpop.f32.mrf.mxu1  ;;  %v5021_v6 = vmax.f32 %v4909_v27, 0.0  ;;  %v4779_v29 = vadd.f32 %v4484_v21, %v25119_v58  ;;  %v20980_v63 = vld [vmem:[#allocation3 + $0x34] ss:$8 sps:$4 sm:$0xff]   ;;  %v20985_v16 = vld [vmem:[#allocation3 + $0x30] ss:$8 sps:$4 sm:$0xff]   ;;  %6350 = vmatpush1.bf16.msra.mxu0 %v17124_v18 }
 0x38b   :  { %v5023_v15 = vmax.f32 %v4911_v41, 0.0  ;;  %v4912_v22 = vadd.f32 %v20224_v49, %v4778_v42  ;;  %v4914_v45 = vadd.f32 %v20227_v20, %v4780_v0  ;;  %v4781_v40 = vadd.f32 %v4657_v39, %v25120_v62  ;;  %v4486_v19 = vpop.f32.mrf.mxu0  ;;  %v17135_v36 = vld [vmem:[%s24682_s5 + $0x1a4] ss:$16 sps:$4 sm:$0xff]   ;;  %14706 = vmatprep.mubr.msk.bf16.mxu0 %vm2651_vm5, %v20980_v63  ;;  %14713 = vmatprep.mubr.msk.bf16.mxu1 %vm2651_vm5, %v20980_v63  ;;  %v25122_v0 = vld [vmem:[#allocation34_spill] sm:$0xff] }
 0x38c   :  { %v5141_v61 = vmax.f32 %v20913_v25, %v5101_v10  ;;  %v5102_v56 = vmax.f32 %v5020_v50, %v5022_v31  ;;  %v4659_v13 = vpop.f32.mrf.mxu1  ;;  %v4913_v32 = vadd.f32 %v20230_v34, %v4779_v29  ;;  %v4782_v8 = vadd.f32 %v4486_v19, %v25121_v30  ;;  %5818 = vmatmul.mubr.bf16.gmra.mxu0 %v20985_v16  ;;  %v17141_v58 = vld [vmem:[%s24682_s5 + $0x184] ss:$16 sps:$4 sm:$0xff]   ;;  %v17144_v29 = vld [vmem:[%s24682_s5 + $0x18c] ss:$16 sps:$4 sm:$0xff]  }
 0x38d   :  { %v5103_v43 = vmax.f32 %v5021_v6, %v5023_v15  ;;  %v5024_v25 = vmax.f32 %v4912_v22, 0.0  ;;  %v5026_v27 = vmax.f32 %v4914_v45, 0.0  ;;  %v4915_v41 = vadd.f32 %v20233_v12, %v4781_v40  ;;  %v4488_v28 = vpop.f32.mrf.mxu0  ;;  %5921 = vmatmul.mubr.bf16.gmra.mxu1 %v20985_v16  ;;  %v25123_v15 = vld [vmem:[#allocation122_spill] sm:$0xff]  ;;  %6355 = vmatprep.subr.bf16.mxu0 %v17135_v36  ;;  %v25124_v62 = vld [vmem:[#allocation35_spill] sm:$0xff] }
 0x38e   :  { %v16239_v55 = vpack.c.bf16 %v5141_v61, %v5140_v46  ;;  %v5142_v50 = vmax.f32 %v20939_v51, %v5102_v56  ;;  %v4661_v42 = vpop.f32.mrf.mxu1  ;;  %v5025_v31 = vmax.f32 %v4913_v32, 0.0  ;;  %v4916_v1 = vadd.f32 %v20224_v49, %v4782_v8  ;;  %6453 = vmatpush1.bf16.msra.mxu1 %v17127_v38  ;;  %v17133_v51 = vld [vmem:[%s24682_s5 + $0x1a0] ss:$16 sps:$4 sm:$0xff]   ;;  %v17136_v46 = vld [vmem:[%s24682_s5 + $0x1a8] ss:$16 sps:$4 sm:$0xff]  }
 0x38f   :  { %v5143_v10 = vmax.f32 %v20961_v23, %v5103_v43  ;;  %v4784_v21 = vadd.f32 %v4659_v13, %v25122_v0  ;;  %v21014_v39 = vmax.f32 %v5024_v25, %v5026_v27  ;;  %v5027_v23 = vmax.f32 %v4915_v41, 0.0  ;;  %v4492_v18 = vpop.f32.mrf.mxu0  ;;  %6458 = vmatprep.subr.bf16.mxu1 %v17138_v35  ;;  %v25125_v36 = vld [vmem:[#allocation123_spill] sm:$0xff]  ;;  %v25126_v8 = vld [vmem:[#allocation36_spill] sm:$0xff]  ;;  %6356 = vmatpush2.bf16.msra.mxu0 %v17133_v51 }
 0x390   :  { %5252 = vst.msk [vmem:[#allocation3 + $0x40] sm:$0xff] %vm18778_vm4, %v16239_v55  ;;  %v4783_v6 = vadd.f32 %v4488_v28, %v20553_v2  ;;  %v4785_v22 = vadd.f32 %v4661_v42, %v25123_v15  ;;  %v4665_v38 = vpop.f32.mrf.mxu1  ;;  %v5028_v56 = vmax.f32 %v4916_v1, 0.0  ;;  %v4786_v2 = vadd.f32 %v4492_v18, %v25124_v62  ;;  %v17139_v41 = vld [vmem:[%s24682_s5 + $0x180] ss:$16 sps:$4 sm:$0xff]   ;;  %v17142_v28 = vld [vmem:[%s24682_s5 + $0x188] ss:$16 sps:$4 sm:$0xff]   ;;  %6357 = vmatprep.subr.bf16.mxu0 %v17141_v58 }
 0x391   :  { %v16240_v61 = vpack.c.bf16 %v5143_v10, %v5142_v50  ;;  %v4918_v45 = vadd.f32 %v20227_v20, %v4784_v21  ;;  %v21026_v40 = vmax.f32 %v5025_v31, %v5027_v23  ;;  %v4788_v35 = vadd.f32 %v4665_v38, %v25125_v36  ;;  %v4494_v43 = vpop.f32.mrf.mxu0  ;;  %v25127_v50 = vld [vmem:[#allocation124_spill] sm:$0xff]  ;;  %v25128_v42 = vld [vmem:[#allocation93_spill] sm:$0xff]  ;;  %v25130_v58 = vld [vmem:[#allocation38_spill] sm:$0xff] }
 0x392   :  { %v4917_v19 = vadd.f32 %v20230_v34, %v4783_v6  ;;  %v4919_v13 = vadd.f32 %v20233_v12, %v4785_v22  ;;  %v4667_v25 = vpop.f32.mrf.mxu1  ;;  %v4920_v30 = vadd.f32 %v20224_v49, %v4786_v2  ;;  %v4787_v55 = vadd.f32 %v4494_v43, %v25126_v8  ;;  %6459 = vmatpush2.bf16.msra.mxu1 %v17136_v46  ;;  %v25129_v10 = vld [vmem:[#allocation116_spill] sm:$0xff]  ;;  %v17147_v51 = vld [vmem:[%s24682_s5 + $0x164] ss:$16 sps:$4 sm:$0xff]  }
 0x393   :  { %5253 = vst.msk [vmem:[#allocation3 + $0x48] sm:$0xff] %vm18778_vm4, %v16240_v61  ;;  %v5030_v32 = vmax.f32 %v4918_v45, 0.0  ;;  %v4789_v27 = vadd.f32 %v4667_v25, %v25127_v50  ;;  %v21044_v31 = vadd.f32 %v25129_v10, %v25128_v42  ;;  %v4922_v21 = vadd.f32 %v20227_v20, %v4788_v35  ;;  %v4496_v23 = vpop.f32.mrf.mxu0  ;;  %6460 = vmatprep.subr.bf16.mxu1 %v17144_v29  ;;  %v17150_v46 = vld [vmem:[%s24682_s5 + $0x16c] ss:$16 sps:$4 sm:$0xff]   ;;  %v25132_v25 = vld [vmem:[#allocation39_spill] sm:$0xff] }
 0x394   :  { %v5029_v1 = vmax.f32 %v4917_v19, 0.0  ;;  %v5031_v0 = vmax.f32 %v4919_v13, 0.0  ;;  %v4669_v6 = vpop.f32.mrf.mxu1  ;;  %v5032_v22 = vmax.f32 %v4920_v30, 0.0  ;;  %v4921_v18 = vadd.f32 %v20230_v34, %v4787_v55  ;;  %v17145_v13 = vld [vmem:[%s24682_s5 + $0x160] ss:$16 sps:$4 sm:$0xff]   ;;  %v25131_v35 = vld [vmem:[#allocation126_spill] sm:$0xff]  ;;  %6358 = vmatpush2.bf16.msra.mxu0 %v17139_v41 }
 0x395   :  { %v21053_v15 = vmax.f32 %v5028_v56, %v5030_v32  ;;  %v4923_v38 = vadd.f32 %v20233_v12, %v4789_v27  ;;  %v5034_v45 = vmax.f32 %v4922_v21, 0.0  ;;  %v4790_v29 = vadd.f32 %v4496_v23, %v25130_v58  ;;  %v4498_v2 = vpop.f32.mrf.mxu0  ;;  %v17148_v30 = vld [vmem:[%s24682_s5 + $0x168] ss:$16 sps:$4 sm:$0xff]   ;;  %6359 = vmatprep.subr.bf16.mxu0 %v17147_v51  ;;  %v25133_v41 = vld [vmem:[#allocation127_spill] sm:$0xff] }
 0x396   :  { %v21057_v61 = vmax.f32 %v5029_v1, %v5031_v0  ;;  %v4792_v62 = vadd.f32 %v4669_v6, %v20585_v5  ;;  %v4671_v19 = vpop.f32.mrf.mxu1  ;;  %v5033_v56 = vmax.f32 %v4921_v18, 0.0  ;;  %v4791_v43 = vadd.f32 %v4498_v2, %v25131_v35  ;;  %6461 = vmatpush2.bf16.msra.mxu1 %v17142_v28  ;;  %v17153_v0 = vld [vmem:[%s24682_s5 + $0x144] ss:$16 sps:$4 sm:$0xff]  }
 0x397   :  { %v5035_v36 = vmax.f32 %v4923_v38, 0.0  ;;  %v4793_v32 = vadd.f32 %v4671_v19, %v25132_v25  ;;  %v5108_v8 = vmax.f32 %v5032_v22, %v5034_v45  ;;  %v4924_v5 = vadd.f32 %v20224_v49, %v4790_v29  ;;  %v4502_v50 = vpop.f32.mrf.mxu0  ;;  %6462 = vmatprep.subr.bf16.mxu1 %v17150_v46  ;;  %v25134_v22 = vld [vmem:[#allocation40_spill] sm:$0xff] }
 0x398   :  { %v4926_v55 = vadd.f32 %v20227_v20, %v4792_v62  ;;  %v4675_v27 = vpop.f32.mrf.mxu1  ;;  %v4925_v10 = vadd.f32 %v20230_v34, %v4791_v43  ;;  %v4794_v28 = vadd.f32 %v4502_v50, %v25133_v41  ;;  %6360 = vmatpush2.bf16.msra.mxu0 %v17145_v13  ;;  %v25136_v43 = vld [vmem:[#allocation41_spill] sm:$0xff] }
 0x399   :  { %v5109_v42 = vmax.f32 %v5033_v56, %v5035_v36  ;;  %v4927_v1 = vadd.f32 %v20233_v12, %v4793_v32  ;;  %v5144_v21 = vmax.f32 %v21014_v39, %v5108_v8  ;;  %v5036_v23 = vmax.f32 %v4924_v5, 0.0  ;;  %v4504_v38 = vpop.f32.mrf.mxu0  ;;  %v17156_v39 = vld [vmem:[%s24682_s5 + $0x14c] ss:$16 sps:$4 sm:$0xff]   ;;  %v17151_v13 = vld [vmem:[%s24682_s5 + $0x140] ss:$16 sps:$4 sm:$0xff]   ;;  %6361 = vmatprep.subr.bf16.mxu0 %v17153_v0 }
 0x39a   :  { %v5038_v6 = vmax.f32 %v4926_v55, 0.0  ;;  %v4796_v18 = vadd.f32 %v4675_v27, %v25134_v22  ;;  %v4677_v51 = vpop.f32.mrf.mxu1  ;;  %v21079_v46 = vld [vmem:[#allocation3 + $0x44] ss:$8 sps:$4 sm:$0xff]   ;;  %v5037_v58 = vmax.f32 %v4925_v10, 0.0  ;;  %v4928_v62 = vadd.f32 %v20224_v49, %v4794_v28  ;;  %v21083_v2 = vld [vmem:[#allocation3 + $0x40] ss:$8 sps:$4 sm:$0xff]   ;;  %6463 = vmatpush2.bf16.msra.mxu1 %v17148_v30 }
 0x39b   :  { %v5145_v45 = vmax.f32 %v21026_v40, %v5109_v42  ;;  %v5039_v29 = vmax.f32 %v4927_v1, 0.0  ;;  %v25135_v36 = vld [vmem:[#allocation128_spill] sm:$0xff]  ;;  %v4797_v25 = vadd.f32 %v4677_v51, %v25136_v43  ;;  %v4506_v40 = vpop.f32.mrf.mxu0  ;;  %14707 = vmatprep.mubr.msk.bf16.mxu0 %vm2651_vm5, %v21079_v46  ;;  %v25137_v50 = vld [vmem:[#allocation129_spill] sm:$0xff]  ;;  %14714 = vmatprep.mubr.msk.bf16.mxu1 %vm2651_vm5, %v21079_v46 }
 0x39c   :  { %v5110_v19 = vmax.f32 %v5036_v23, %v5038_v6  ;;  %v4930_v56 = vadd.f32 %v20227_v20, %v4796_v18  ;;  %v4795_v35 = vadd.f32 %v4504_v38, %v25135_v36  ;;  %v4679_v32 = vpop.f32.mrf.mxu1  ;;  %v17154_v30 = vld [vmem:[%s24682_s5 + $0x148] ss:$16 sps:$4 sm:$0xff]   ;;  %v5040_v55 = vmax.f32 %v4928_v62, 0.0  ;;  %5828 = vmatmul.mubr.bf16.gmra.mxu0 %v21083_v2  ;;  %v17162_v42 = vld [vmem:[%s24682_s5 + $0x124] ss:$16 sps:$4 sm:$0xff]   ;;  %5931 = vmatmul.mubr.bf16.gmra.mxu1 %v21083_v2 }
 0x39d   :  { %v16241_v8 = vpack.c.bf16 %v5145_v45, %v5144_v21  ;;  %v5111_v5 = vmax.f32 %v5037_v58, %v5039_v29  ;;  %v4798_v27 = vadd.f32 %v4506_v40, %v25137_v50  ;;  %v17165_v10 = vld [vmem:[%s24682_s5 + $0x12c] ss:$16 sps:$4 sm:$0xff]   ;;  %v4931_v21 = vadd.f32 %v20233_v12, %v4797_v25  ;;  %v4508_v23 = vpop.f32.mrf.mxu0  ;;  %6464 = vmatprep.subr.bf16.mxu1 %v17156_v39 }
 0x39e   :  { %v5146_v1 = vmax.f32 %v21053_v15, %v5110_v19  ;;  %v5042_v41 = vmax.f32 %v4930_v56, 0.0  ;;  %v4929_v28 = vadd.f32 %v20230_v34, %v4795_v35  ;;  %v4681_v6 = vpop.f32.mrf.mxu1  ;;  %v4800_v38 = vadd.f32 %v4679_v32, %v20617_v11  ;;  %6362 = vmatpush2.bf16.msra.mxu0 %v17151_v13  ;;  %6465 = vmatpush2.bf16.msra.mxu1 %v17154_v30  ;;  %v17163_v11 = vld [vmem:[%s24682_s5 + $0x128] ss:$16 sps:$4 sm:$0xff]   ;;  %v17171_v30 = vld [vmem:[%s24682_s5 + $0x10c] ss:$16 sps:$4 sm:$0xff]  }
 0x39f   :  { %5254 = vst.msk [vmem:[#allocation3 + $0x50] sm:$0xff] %vm18778_vm4, %v16241_v8  ;;  %v5147_v22 = vmax.f32 %v21057_v61, %v5111_v5  ;;  %v4932_v18 = vadd.f32 %v20224_v49, %v4798_v27  ;;  %v4799_v15 = vadd.f32 %v4508_v23, %v20623_v14  ;;  %v5043_v58 = vmax.f32 %v4931_v21, 0.0  ;;  %v4512_v62 = vpop.f32.mrf.mxu0  ;;  %v17160_v61 = vld [vmem:[%s24682_s5 + $0x120] ss:$16 sps:$4 sm:$0xff]   ;;  %6363 = vmatprep.subr.bf16.mxu0 %v17162_v42  ;;  %v25138_v25 = vld [vmem:[#allocation42_spill] sm:$0xff]  ;;  %v25140_v42 = vld [vmem:[#allocation120_spill] sm:$0xff] }
 0x3a0   :  { %v21119_v51 = vmax.f32 %v5040_v55, %v5042_v41  ;;  %v5041_v45 = vmax.f32 %v4929_v28, 0.0  ;;  %v4801_v29 = vadd.f32 %v4681_v6, %v20627_v53  ;;  %v4685_v0 = vpop.f32.mrf.mxu1  ;;  %v4934_v19 = vadd.f32 %v20227_v20, %v4800_v38  ;;  %6466 = vmatprep.subr.bf16.mxu1 %v17165_v10  ;;  %v17168_v53 = vld [vmem:[%s24682_s5 + $0x104] ss:$16 sps:$4 sm:$0xff]   ;;  %v25139_v27 = vld [vmem:[#allocation94_spill] sm:$0xff]  ;;  %v17166_v23 = vld [vmem:[%s24682_s5 + $0x100] ss:$16 sps:$4 sm:$0xff]  }
 0x3a1   :  { %v16242_v14 = vpack.c.bf16 %v5147_v22, %v5146_v1  ;;  %v5044_v39 = vmax.f32 %v4932_v18, 0.0  ;;  %v4933_v56 = vadd.f32 %v20230_v34, %v4799_v15  ;;  %v4802_v43 = vadd.f32 %v4512_v62, %v20631_v26  ;;  %v4514_v32 = vpop.f32.mrf.mxu0  ;;  %v25141_v18 = vld [vmem:[#allocation130_spill] sm:$0xff]  ;;  %v17177_v15 = vld [vmem:[%s24682_s5 + $0x464] ss:$16 sps:$4 sm:$0xff]  }
 0x3a2   :  { %v21133_v36 = vmax.f32 %v5041_v45, %v5043_v58  ;;  %v4935_v35 = vadd.f32 %v20233_v12, %v4801_v29  ;;  %v4804_v40 = vadd.f32 %v4685_v0, %v25138_v25  ;;  %v4687_v13 = vpop.f32.mrf.mxu1  ;;  %v5046_v8 = vmax.f32 %v4934_v19, 0.0  ;;  %6364 = vmatpush2.bf16.msra.mxu0 %v17160_v61  ;;  %6467 = vmatpush2.bf16.msra.mxu1 %v17163_v11  ;;  %v17180_v45 = vld [vmem:[%s24682_s5 + $0x46c] ss:$16 sps:$4 sm:$0xff]   ;;  %v25142_v0 = vld [vmem:[#allocation43_spill] sm:$0xff] }
 0x3a3   :  { %5255 = vst.msk [vmem:[#allocation3 + $0x58] sm:$0xff] %vm18778_vm4, %v16242_v14  ;;  %v5045_v5 = vmax.f32 %v4933_v56, 0.0  ;;  %v4803_v55 = vadd.f32 %v4514_v32, %v20643_v48  ;;  %v4805_v50 = vadd.f32 %v4687_v13, %v20647_v4  ;;  %v21147_v26 = vadd.f32 %v25140_v42, %v25139_v27  ;;  %v4516_v28 = vpop.f32.mrf.mxu0  ;;  %v17169_v48 = vld [vmem:[%s24682_s5 + $0x108] ss:$16 sps:$4 sm:$0xff]   ;;  %6365 = vmatprep.subr.bf16.mxu0 %v17168_v53 }
 0x3a4   :  { %v5047_v10 = vmax.f32 %v4935_v35, 0.0  ;;  %v4936_v1 = vadd.f32 %v20224_v49, %v4802_v43  ;;  %v4938_v41 = vadd.f32 %v20227_v20, %v4804_v40  ;;  %v4689_v21 = vpop.f32.mrf.mxu1  ;;  %v21157_v4 = vmax.f32 %v5044_v39, %v5046_v8  ;;  %6468 = vmatprep.subr.bf16.mxu1 %v17171_v30 }
 0x3a5   :  { %v4937_v6 = vadd.f32 %v20230_v34, %v4803_v55  ;;  %v4939_v22 = vadd.f32 %v20233_v12, %v4805_v50  ;;  %v4806_v38 = vadd.f32 %v4516_v28, %v25141_v18  ;;  %v4808_v61 = vadd.f32 %v4689_v21, %v25142_v0  ;;  %v4518_v11 = vpop.f32.mrf.mxu0 }
 0x3a6   :  { %v21168_v58 = vmax.f32 %v5045_v5, %v5047_v10  ;;  %v5048_v29 = vmax.f32 %v4936_v1, 0.0  ;;  %v5050_v62 = vmax.f32 %v4938_v41, 0.0  ;;  %v4691_v14 = vpop.f32.mrf.mxu1  ;;  %v4807_v53 = vadd.f32 %v4518_v11, %v20661_v9  ;;  %6366 = vmatpush2.bf16.msra.mxu0 %v17166_v23  ;;  %6469 = vmatpush2.bf16.msra.mxu1 %v17169_v48 }
 0x3a7   :  { %v5049_v39 = vmax.f32 %v4937_v6, 0.0  ;;  %v5051_v19 = vmax.f32 %v4939_v22, 0.0  ;;  %v4940_v56 = vadd.f32 %v20224_v49, %v4806_v38  ;;  %v4942_v43 = vadd.f32 %v20227_v20, %v4808_v61  ;;  %v4522_v40 = vpop.f32.mrf.mxu0  ;;  %6977 = vmatprep.subr.bf16.mxu0 %v17177_v15  ;;  %7080 = vmatprep.subr.bf16.mxu1 %v17180_v45 }
 0x3a8   :  { %v5116_v35 = vmax.f32 %v5048_v29, %v5050_v62  ;;  %v4809_v25 = vadd.f32 %v4691_v14, %v20665_v54  ;;  %v4695_v32 = vpop.f32.mrf.mxu1  ;;  %v4941_v5 = vadd.f32 %v20230_v34, %v4807_v53  ;;  %v4810_v30 = vadd.f32 %v4522_v40, %v20674_v24 }
 0x3a9   :  { %v5117_v13 = vmax.f32 %v5049_v39, %v5051_v19  ;;  %v5052_v8 = vmax.f32 %v4940_v56, 0.0  ;;  %v5054_v9 = vmax.f32 %v4942_v43, 0.0  ;;  %v4812_v27 = vadd.f32 %v4695_v32, %v20686_v59  ;;  %v4524_v54 = vpop.f32.mrf.mxu0  ;;  %v25143_v43 = vld [vmem:[#allocation95_spill] sm:$0xff] }
 0x3aa   :  { %v5148_v55 = vmax.f32 %v21119_v51, %v5116_v35  ;;  %v4943_v50 = vadd.f32 %v20233_v12, %v4809_v25  ;;  %v4697_v42 = vpop.f32.mrf.mxu1  ;;  %v21180_v10 = vld [vmem:[#allocation3 + $0x54] ss:$8 sps:$4 sm:$0xff]   ;;  %v21182_v1 = vld [vmem:[#allocation3 + $0x50] ss:$8 sps:$4 sm:$0xff]   ;;  %v5053_v28 = vmax.f32 %v4941_v5, 0.0  ;;  %v4944_v24 = vadd.f32 %v20224_v49, %v4810_v30  ;;  %v25145_v5 = vld [vmem:[#allocation96_spill] sm:$0xff] }
 0x3ab   :  { %v5149_v41 = vmax.f32 %v21133_v36, %v5117_v13  ;;  %v4811_v21 = vadd.f32 %v4524_v54, %v20691_v60  ;;  %v5118_v23 = vmax.f32 %v5052_v8, %v5054_v9  ;;  %v4946_v48 = vadd.f32 %v20227_v20, %v4812_v27  ;;  %v4526_v59 = vpop.f32.mrf.mxu0  ;;  %14708 = vmatprep.mubr.msk.bf16.mxu0 %vm2651_vm5, %v21180_v10  ;;  %v25144_v25 = vld [vmem:[#allocation33_spill] sm:$0xff] }
 0x3ac   :  { %v5055_v51 = vmax.f32 %v4943_v50, 0.0  ;;  %v4813_v6 = vadd.f32 %v4697_v42, %v20703_v47  ;;  %v4699_v22 = vpop.f32.mrf.mxu1  ;;  %14715 = vmatprep.mubr.msk.bf16.mxu1 %vm2651_vm5, %v21180_v10  ;;  %v5056_v18 = vmax.f32 %v4944_v24, 0.0  ;;  %v4814_v60 = vadd.f32 %v4526_v59, %v20707_v37  ;;  %5838 = vmatmul.mubr.bf16.gmra.mxu0 %v21182_v1  ;;  %v25148_v27 = vld [vmem:[#allocation125_spill] sm:$0xff] }
 0x3ad   :  { %v16243_v36 = vpack.c.bf16 %v5149_v41, %v5148_v55  ;;  %v4945_v38 = vadd.f32 %v20230_v34, %v4811_v21  ;;  %5941 = vmatmul.mubr.bf16.gmra.mxu1 %v21182_v1  ;;  %v5150_v47 = vmax.f32 %v21157_v4, %v5118_v23  ;;  %v5058_v45 = vmax.f32 %v4946_v48, 0.0  ;;  %v4528_v62 = vpop.f32.mrf.mxu0 }
 0x3ae   :  { %v5119_v15 = vmax.f32 %v5053_v28, %v5055_v51  ;;  %v4947_v29 = vadd.f32 %v20233_v12, %v4813_v6  ;;  %v4701_v0 = vpop.f32.mrf.mxu1  ;;  %v4948_v11 = vadd.f32 %v20224_v49, %v4814_v60  ;;  %v4816_v37 = vadd.f32 %v4699_v22, %v20749_v33  ;;  %v25146_v33 = vld [vmem:[#allocation37_spill] sm:$0xff] }
 0x3af   :  { %5256 = vst.msk [vmem:[#allocation3 + $0x60] sm:$0xff] %vm18778_vm4, %v16243_v36  ;;  %v5057_v61 = vmax.f32 %v4945_v38, 0.0  ;;  %v4815_v14 = vadd.f32 %v4528_v62, %v20760_v7  ;;  %v5120_v19 = vmax.f32 %v5056_v18, %v5058_v45  ;;  %v4817_v56 = vadd.f32 %v4701_v0, %v20825_v17  ;;  %v4532_v53 = vpop.f32.mrf.mxu0  ;;  %v25147_v17 = vld [vmem:[#allocation97_spill] sm:$0xff] }
 0x3b0   :  { %v5151_v39 = vmax.f32 %v21168_v58, %v5119_v15  ;;  %v5059_v4 = vmax.f32 %v4947_v29, 0.0  ;;  %v4705_v35 = vpop.f32.mrf.mxu1  ;;  %v3830_v40 = vadd.f32 %v25144_v25, %v25143_v43  ;;  %v5060_v32 = vmax.f32 %v4948_v11, 0.0 }
 0x3b1   :  { %v4950_v13 = vadd.f32 %v20227_v20, %v4816_v37  ;;  %v4818_v8 = vadd.f32 %v4532_v53, %v20849_v52  ;;  %v3659_v30 = vadd.f32 %v25146_v33, %v25145_v5  ;;  %v4820_v58 = vadd.f32 %v4705_v35, %v20922_v3  ;;  %v4534_v9 = vpop.f32.mrf.mxu0 }
 0x3b2   :  { %v16244_v7 = vpack.c.bf16 %v5151_v39, %v5150_v47  ;;  %v5121_v55 = vmax.f32 %v5057_v61, %v5059_v4  ;;  %v4707_v50 = vpop.f32.mrf.mxu1  ;;  %v3832_v54 = vadd.f32 %v25148_v27, %v25147_v17  ;;  %v4819_v28 = vadd.f32 %v4534_v9, %v20945_v44  ;;  %v17188_v9 = vld [vmem:[%s24682_s5 + $0x44c] ss:$16 sps:$4 sm:$0xff]   ;;  %v17186_v17 = vld [vmem:[%s24682_s5 + $0x448] ss:$16 sps:$4 sm:$0xff]   ;;  %v17192_v27 = vld [vmem:[%s24682_s5 + $0x424] ss:$16 sps:$4 sm:$0xff]  }
 0x3b3   :  { %v5062_v42 = vmax.f32 %v4950_v13, 0.0  ;;  %v4952_v41 = vadd.f32 %v20224_v49, %v4818_v8  ;;  %v4949_v52 = vadd.f32 %v20230_v34, %v4815_v14  ;;  %v4951_v24 = vadd.f32 %v20233_v12, %v4817_v56  ;;  %v4536_v23 = vpop.f32.mrf.mxu0  ;;  %v17174_v8 = vld [vmem:[#allocation3 + $0x4] ss:$8 sps:$4 sm:$0xff]  }
 0x3b4   :  { %5257 = vst.msk [vmem:[#allocation3 + $0x68] sm:$0xff] %vm18778_vm4, %v16244_v7  ;;  %v4954_v21 = vadd.f32 %v20227_v20, %v4820_v58  ;;  %v4821_v3 = vadd.f32 %v4707_v50, %v21044_v31  ;;  %v4709_v51 = vpop.f32.mrf.mxu1  ;;  %v4953_v59 = vadd.f32 %v20230_v34, %v4819_v28  ;;  %v4822_v22 = vadd.f32 %v4536_v23, %v21147_v26  ;;  %v17178_v7 = vld [vmem:[%s24682_s5 + $0x468] ss:$16 sps:$4 sm:$0xff]   ;;  %v17185_v58 = vld [vmem:[%s24682_s5 + $0x444] ss:$16 sps:$4 sm:$0xff]  }
 0x3b5   :  { %v5122_v48 = vmax.f32 %v5060_v32, %v5062_v42  ;;  %v5064_v6 = vmax.f32 %v4952_v41, 0.0  ;;  %v4824_v18 = vadd.f32 %v4709_v51, %v3830_v40  ;;  %v4538_v38 = vpop.f32.mrf.mxu0  ;;  %v5061_v31 = vmax.f32 %v4949_v52, 0.0  ;;  %v17183_v50 = vld [vmem:[%s24682_s5 + $0x440] ss:$16 sps:$4 sm:$0xff]   ;;  %v17193_v28 = vld [vmem:[%s24682_s5 + $0x428] ss:$16 sps:$4 sm:$0xff]  }
 0x3b6   :  { %v5066_v44 = vmax.f32 %v4954_v21, 0.0  ;;  %v4955_v36 = vadd.f32 %v20233_v12, %v4821_v3  ;;  %v4711_v60 = vpop.f32.mrf.mxu1  ;;  %v5065_v47 = vmax.f32 %v4953_v59, 0.0  ;;  %v4956_v15 = vadd.f32 %v20224_v49, %v4822_v22  ;;  %v17189_v42 = vld [vmem:[#allocation3 + $0x10] ss:$8 sps:$4 sm:$0xff]   ;;  %v21288_v52 = vld [vmem:[#allocation3 + $0x24] ss:$8 sps:$4 sm:$0xff]  }
 0x3b7   :  { %v4823_v45 = vadd.f32 %v4538_v38, %v3659_v30  ;;  %v4825_v29 = vadd.f32 %v4711_v60, %v3832_v54  ;;  %v4958_v61 = vadd.f32 %v20227_v20, %v4824_v18  ;;  %v5063_v11 = vmax.f32 %v4951_v24, 0.0  ;;  %v17175_v30 = vld [vmem:[%s24682_s5 + $0x460] ss:$16 sps:$4 sm:$0xff]   ;;  %v17195_v54 = vld [vmem:[%s24682_s5 + $0x42c] ss:$16 sps:$4 sm:$0xff]  }
 0x3b8   :  { %v5124_v62 = vmax.f32 %v5064_v6, %v5066_v44  ;;  %v5067_v0 = vmax.f32 %v4955_v36, 0.0  ;;  %v5068_v37 = vmax.f32 %v4956_v15, 0.0  ;;  %v17190_v41 = vld [vmem:[%s24682_s5 + $0x420] ss:$16 sps:$4 sm:$0xff]   ;;  %v17200_v24 = vld [vmem:[%s24682_s5 + $0x404] ss:$16 sps:$4 sm:$0xff]  }
 0x3b9   :  { %v4957_v26 = vadd.f32 %v20230_v34, %v4823_v45  ;;  %v4959_v14 = vadd.f32 %v20233_v12, %v4825_v29  ;;  %v5070_v56 = vmax.f32 %v4958_v61, 0.0  ;;  %v5123_v32 = vmax.f32 %v5061_v31, %v5063_v11  ;;  %v17203_v21 = vld [vmem:[%s24682_s5 + $0x40c] ss:$16 sps:$4 sm:$0xff]   ;;  %v17198_v3 = vld [vmem:[%s24682_s5 + $0x400] ss:$16 sps:$4 sm:$0xff]  }
 0x3ba   :  { %v5152_v39 = vmax.f32 %v5120_v19, %v5124_v62  ;;  %v5125_v4 = vmax.f32 %v5065_v47, %v5067_v0  ;;  %v17201_v23 = vld [vmem:[%s24682_s5 + $0x408] ss:$16 sps:$4 sm:$0xff]   ;;  %v17207_v51 = vld [vmem:[%s24682_s5 + $0x3e4] ss:$16 sps:$4 sm:$0xff]   ;;  %v17205_v59 = vld [vmem:[%s24682_s5 + $0x3e0] ss:$16 sps:$4 sm:$0xff]  }
 0x3bb   :  { %v5069_v53 = vmax.f32 %v4957_v26, 0.0  ;;  %v5071_v35 = vmax.f32 %v4959_v14, 0.0  ;;  %v21230_v43 = vld [vmem:[#allocation3 + $0x64] ss:$8 sps:$4 sm:$0xff]   ;;  %v5126_v25 = vmax.f32 %v5068_v37, %v5070_v56  ;;  %v21232_v40 = vld [vmem:[#allocation3 + $0x60] ss:$8 sps:$4 sm:$0xff]  }
 0x3bc   :  { %v5153_v49 = vmax.f32 %v5121_v55, %v5125_v4  ;;  %14709 = vmatprep.mubr.msk.bf16.mxu0 %vm2651_vm5, %v21230_v43  ;;  %14716 = vmatprep.mubr.msk.bf16.mxu1 %vm2651_vm5, %v21230_v43  ;;  %v17181_v55 = vld [vmem:[#allocation3 + $0x14] ss:$8 sps:$4 sm:$0xff]   ;;  %v21312_v6 = vld [vmem:[#allocation3 + $0x20] ss:$8 sps:$4 sm:$0xff]  }
 0x3bd   :  { %v5127_v13 = vmax.f32 %v5069_v53, %v5071_v35  ;;  %v5154_v20 = vmax.f32 %v5122_v48, %v5126_v25  ;;  %5848 = vmatmul.mubr.bf16.gmra.mxu0 %v21232_v40  ;;  %5951 = vmatmul.mubr.bf16.gmra.mxu1 %v21232_v40  ;;  %v17210_v48 = vld [vmem:[%s24682_s5 + $0x3ec] ss:$16 sps:$4 sm:$0xff]   ;;  %v17208_v22 = vld [vmem:[%s24682_s5 + $0x3e8] ss:$16 sps:$4 sm:$0xff]   ;;  %v17213_v44 = vld [vmem:[%s24682_s5 + $0x3c4] ss:$16 sps:$4 sm:$0xff]  }
 0x3be   :  { %v16245_v34 = vpack.c.bf16 %v5153_v49, %v5152_v39  ;;  %v17216_v36 = vld [vmem:[%s24682_s5 + $0x3cc] ss:$16 sps:$4 sm:$0xff]   ;;  %v17211_v18 = vld [vmem:[%s24682_s5 + $0x3c0] ss:$16 sps:$4 sm:$0xff]   ;;  %v17214_v38 = vld [vmem:[%s24682_s5 + $0x3c8] ss:$16 sps:$4 sm:$0xff]  }
 0x3bf   :  { %v5155_v12 = vmax.f32 %v5123_v32, %v5127_v13  ;;  %v17219_v60 = vld [vmem:[%s24682_s5 + $0x3a4] ss:$16 sps:$4 sm:$0xff]   ;;  %v17217_v47 = vld [vmem:[%s24682_s5 + $0x3a0] ss:$16 sps:$4 sm:$0xff]   ;;  %v17220_v15 = vld [vmem:[%s24682_s5 + $0x3a8] ss:$16 sps:$4 sm:$0xff]  }
 0x3c0   :  { %5258 = vst.msk [vmem:[#allocation3 + $0x70] sm:$0xff] %vm18778_vm4, %v16245_v34  ;;  %v17225_v45 = vld [vmem:[%s24682_s5 + $0x384] ss:$16 sps:$4 sm:$0xff]   ;;  %v17228_v29 = vld [vmem:[%s24682_s5 + $0x38c] ss:$16 sps:$4 sm:$0xff]  }
 0x3c1   :  { %v16246_v19 = vpack.c.bf16 %v5155_v12, %v5154_v20  ;;  %v17223_v31 = vld [vmem:[%s24682_s5 + $0x380] ss:$16 sps:$4 sm:$0xff]   ;;  %v17226_v62 = vld [vmem:[%s24682_s5 + $0x388] ss:$16 sps:$4 sm:$0xff]   ;;  %v17237_v11 = vld [vmem:[%s24682_s5 + $0x504] ss:$16 sps:$4 sm:$0xff]  }
 0x3c2   :  { %v17229_v0 = vld [vmem:[%s24682_s5 + $0x520] ss:$16 sps:$4 sm:$0xff]   ;;  %v17232_v61 = vld [vmem:[%s24682_s5 + $0x528] ss:$16 sps:$4 sm:$0xff]   ;;  %v17240_v37 = vld [vmem:[%s24682_s5 + $0x50c] ss:$16 sps:$4 sm:$0xff]  }
 0x3c3   :  { %5259 = vst.msk [vmem:[#allocation3 + $0x78] sm:$0xff] %vm18778_vm4, %v16246_v19  ;;  %v17235_v26 = vld [vmem:[%s24682_s5 + $0x500] ss:$16 sps:$4 sm:$0xff]   ;;  %v17238_v14 = vld [vmem:[%s24682_s5 + $0x508] ss:$16 sps:$4 sm:$0xff]  }
 0x3c4   :  { %v17246_v39 = vld [vmem:[%s24682_s5 + $0x4ec] ss:$16 sps:$4 sm:$0xff]   ;;  %v17241_v4 = vld [vmem:[%s24682_s5 + $0x4e0] ss:$16 sps:$4 sm:$0xff]   ;;  %v17244_v56 = vld [vmem:[%s24682_s5 + $0x4e8] ss:$16 sps:$4 sm:$0xff]  }
 0x3c5   :  { %v17249_v53 = vld [vmem:[%s24682_s5 + $0x4c4] ss:$16 sps:$4 sm:$0xff]   ;;  %v17252_v35 = vld [vmem:[%s24682_s5 + $0x4cc] ss:$16 sps:$4 sm:$0xff]   ;;  %v17247_v49 = vld [vmem:[%s24682_s5 + $0x4c0] ss:$16 sps:$4 sm:$0xff]  }
 0x3c6   :  { %v17250_v25 = vld [vmem:[%s24682_s5 + $0x4c8] ss:$16 sps:$4 sm:$0xff]   ;;  %v17255_v32 = vld [vmem:[%s24682_s5 + $0x4a4] ss:$16 sps:$4 sm:$0xff]   ;;  %v17258_v13 = vld [vmem:[%s24682_s5 + $0x4ac] ss:$16 sps:$4 sm:$0xff]  }
 0x3c7   :  { %v17253_v34 = vld [vmem:[%s24682_s5 + $0x4a0] ss:$16 sps:$4 sm:$0xff]   ;;  %v17256_v20 = vld [vmem:[%s24682_s5 + $0x4a8] ss:$16 sps:$4 sm:$0xff]   ;;  %v17261_v12 = vld [vmem:[%s24682_s5 + $0x484] ss:$16 sps:$4 sm:$0xff]  }
 0x3c8   :  { %v17264_v19 = vld [vmem:[%s24682_s5 + $0x48c] ss:$16 sps:$4 sm:$0xff]  }
 0x3ca   :  { %v21244_v5 = vld [vmem:[#allocation3 + $0x74] ss:$8 sps:$4 sm:$0xff]   ;;  %v21246_v33 = vld [vmem:[#allocation3 + $0x70] ss:$8 sps:$4 sm:$0xff]  }
 0x3cb   :  { %14710 = vmatprep.mubr.msk.bf16.mxu0 %vm2651_vm5, %v21244_v5  ;;  %14717 = vmatprep.mubr.msk.bf16.mxu1 %vm2651_vm5, %v21244_v5 }
 0x3cc   :  { %5858 = vmatmul.mubr.bf16.gmra.mxu0 %v21246_v33  ;;  %5961 = vmatmul.mubr.bf16.gmra.mxu1 %v21246_v33 }
 0x3cd   :  { %14788 = vmatprep.mubr.msk.bf16.mxu0 %vm2651_vm5, %v17174_v8  ;;  %14795 = vmatprep.mubr.msk.bf16.mxu1 %vm2651_vm5, %v17174_v8  ;;  %v17259_v8 = vld [vmem:[%s24682_s5 + $0x480] ss:$16 sps:$4 sm:$0xff]  }
 0x3d4   :  { %6368 = vmatmul.mubr.bf16.vlgmr.msra.gmra.mxu0 %v17172_v57  ;;  %6471 = vmatmul.mubr.bf16.vlgmr.msra.gmra.mxu1 %v17172_v57  ;;  %v17262_v57 = vld [vmem:[%s24682_s5 + $0x488] ss:$16 sps:$4 sm:$0xff]  }
 0x3d5   :  { %14789 = vmatprep.mubr.msk.bf16.mxu0 %vm2651_vm5, %v17181_v55  ;;  %14796 = vmatprep.mubr.msk.bf16.mxu1 %vm2651_vm5, %v17181_v55  ;;  %v17268_v55 = vld [vmem:[#allocation3 + $0x44] ss:$8 sps:$4 sm:$0xff]  }
 0x3d6   :  { %6978 = vmatpush1.bf16.msra.mxu0 %v17175_v30  ;;  %7081 = vmatpush1.bf16.msra.mxu1 %v17178_v7  ;;  %v17265_v30 = vld [vmem:[#allocation3 + $0x34] ss:$8 sps:$4 sm:$0xff]   ;;  %v17267_v7 = vld [vmem:[#allocation3 + $0x30] ss:$8 sps:$4 sm:$0xff]  }
 0x3d7   :  { %6979 = vmatprep.subr.bf16.mxu0 %v17185_v58  ;;  %7082 = vmatprep.subr.bf16.mxu1 %v17188_v9  ;;  %v17270_v58 = vld [vmem:[#allocation3 + $0x40] ss:$8 sps:$4 sm:$0xff]   ;;  %v17276_v9 = vld [vmem:[%s24684_s7 + $0x464] ss:$16 sps:$4 sm:$0xff]  }
 0x3da   :  { %6980 = vmatpush1.bf16.msra.mxu0 %v17183_v50  ;;  %7083 = vmatpush1.bf16.msra.mxu1 %v17186_v17  ;;  %v17274_v50 = vld [vmem:[%s24684_s7 + $0x460] ss:$16 sps:$4 sm:$0xff]   ;;  %v17279_v17 = vld [vmem:[%s24684_s7 + $0x444] ss:$16 sps:$4 sm:$0xff]  }
 0x3db   :  { %6981 = vmatprep.subr.bf16.mxu0 %v17192_v27  ;;  %7084 = vmatprep.subr.bf16.mxu1 %v17195_v54  ;;  %v17277_v27 = vld [vmem:[%s24684_s7 + $0x440] ss:$16 sps:$4 sm:$0xff]  }
 0x3dc   :  { %6378 = vmatmul.mubr.bf16.gmra.mxu0 %v17189_v42  ;;  %6481 = vmatmul.mubr.bf16.gmra.mxu1 %v17189_v42  ;;  %v17280_v54 = vld [vmem:[%s24684_s7 + $0x420] ss:$16 sps:$4 sm:$0xff]  }
 0x3dd   :  { %14790 = vmatprep.mubr.msk.bf16.mxu0 %vm2651_vm5, %v21288_v52  ;;  %14797 = vmatprep.mubr.msk.bf16.mxu1 %vm2651_vm5, %v21288_v52  ;;  %v17283_v42 = vld [vmem:[%s24684_s7 + $0x660] ss:$16 sps:$4 sm:$0xff]  }
 0x3de   :  { %6982 = vmatpush1.bf16.msra.mxu0 %v17190_v41  ;;  %7085 = vmatpush1.bf16.msra.mxu1 %v17193_v28  ;;  %v17285_v41 = vld [vmem:[%s24684_s7 + $0x664] ss:$16 sps:$4 sm:$0xff]  }
 0x3df   :  { %6983 = vmatprep.subr.bf16.mxu0 %v17200_v24  ;;  %7086 = vmatprep.subr.bf16.mxu1 %v17203_v21  ;;  %v17294_v28 = vld [vmem:[%s24684_s7 + $0x3e4] ss:$16 sps:$4 sm:$0xff]  }
 0x3e0   :  { %v17291_v24 = vld [vmem:[%s24684_s7 + $0x644] ss:$16 sps:$4 sm:$0xff]  }
 0x3e1   :  { %v17300_v21 = vld [vmem:[%s24684_s7 + $0x3c4] ss:$16 sps:$4 sm:$0xff]  }
 0x3e2   :  { %6984 = vmatpush1.bf16.msra.mxu0 %v17198_v3  ;;  %7087 = vmatpush1.bf16.msra.mxu1 %v17201_v23  ;;  %v17298_v3 = vld [vmem:[%s24684_s7 + $0x3c0] ss:$16 sps:$4 sm:$0xff]  }
 0x3e3   :  { %6985 = vmatprep.subr.bf16.mxu0 %v17207_v51  ;;  %7088 = vmatprep.subr.bf16.mxu1 %v17210_v48  ;;  %v17273_v23 = vld [vmem:[#allocation3 + $0x80] ss:$8 sps:$4 sm:$0xff]   ;;  %v17306_v51 = vld [vmem:[%s24684_s7 + $0x3a4] ss:$16 sps:$4 sm:$0xff]  }
 0x3e4   :  { %6388 = vmatmul.mubr.bf16.gmra.mxu0 %v21312_v6  ;;  %6491 = vmatmul.mubr.bf16.gmra.mxu1 %v21312_v6 }
 0x3e5   :  { %14791 = vmatprep.mubr.msk.bf16.mxu0 %vm2651_vm5, %v20980_v63  ;;  %14798 = vmatprep.mubr.msk.bf16.mxu1 %vm2651_vm5, %v20980_v63  ;;  %v17222_v63 = vld [vmem:[%s24682_s5 + $0x3ac] ss:$16 sps:$4 sm:$0xff]  }
 0x3e6   :  { %6986 = vmatpush1.bf16.msra.mxu0 %v17205_v59  ;;  %7089 = vmatpush1.bf16.msra.mxu1 %v17208_v22  ;;  %v17295_v59 = vld [vmem:[%s24684_s7 + $0x620] ss:$16 sps:$4 sm:$0xff]   ;;  %v17297_v22 = vld [vmem:[%s24684_s7 + $0x624] ss:$16 sps:$4 sm:$0xff]  }
 0x3e7   :  { %6987 = vmatprep.subr.bf16.mxu0 %v17213_v44  ;;  %7090 = vmatprep.subr.bf16.mxu1 %v17216_v36  ;;  %v17312_v44 = vld [vmem:[%s24684_s7 + $0x384] ss:$16 sps:$4 sm:$0xff]  }
 0x3ea   :  { %6988 = vmatpush1.bf16.msra.mxu0 %v17211_v18  ;;  %7091 = vmatpush1.bf16.msra.mxu1 %v17214_v38  ;;  %v17310_v38 = vld [vmem:[%s24684_s7 + $0x380] ss:$16 sps:$4 sm:$0xff]  }
 0x3eb   :  { %6989 = vmatprep.subr.bf16.mxu0 %v17219_v60  ;;  %7092 = vmatprep.subr.bf16.mxu1 %v17222_v63  ;;  %v17301_v60 = vld [vmem:[%s24684_s7 + $0x600] ss:$16 sps:$4 sm:$0xff]   ;;  %v17303_v63 = vld [vmem:[%s24684_s7 + $0x604] ss:$16 sps:$4 sm:$0xff]  }
 0x3ec   :  { %6398 = vmatmul.mubr.bf16.gmra.mxu0 %v20985_v16  ;;  %6501 = vmatmul.mubr.bf16.gmra.mxu1 %v20985_v16  ;;  %v17231_v16 = vld [vmem:[%s24682_s5 + $0x524] ss:$16 sps:$4 sm:$0xff]  }
 0x3ed   :  { %14792 = vmatprep.mubr.msk.bf16.mxu0 %vm2651_vm5, %v21079_v46  ;;  %14799 = vmatprep.mubr.msk.bf16.mxu1 %vm2651_vm5, %v21079_v46  ;;  %v17234_v46 = vld [vmem:[%s24682_s5 + $0x52c] ss:$16 sps:$4 sm:$0xff]  }
 0x3ee   :  { %6990 = vmatpush1.bf16.msra.mxu0 %v17217_v47  ;;  %7093 = vmatpush1.bf16.msra.mxu1 %v17220_v15  ;;  %v17315_v47 = vld [vmem:[%s24684_s7 + $0x564] ss:$16 sps:$4 sm:$0xff]  }
 0x3ef   :  { %6991 = vmatprep.subr.bf16.mxu0 %v17225_v45  ;;  %7094 = vmatprep.subr.bf16.mxu1 %v17228_v29  ;;  %v17313_v29 = vld [vmem:[%s24684_s7 + $0x560] ss:$16 sps:$4 sm:$0xff]  }
 0x3f2   :  { %6992 = vmatpush1.bf16.msra.mxu0 %v17223_v31  ;;  %7095 = vmatpush1.bf16.msra.mxu1 %v17226_v62  ;;  %v17307_v31 = vld [vmem:[%s24684_s7 + $0x5e0] ss:$16 sps:$4 sm:$0xff]   ;;  %v17309_v62 = vld [vmem:[%s24684_s7 + $0x5e4] ss:$16 sps:$4 sm:$0xff]  }
 0x3f3   :  { %6997 = vmatprep.subr.bf16.mxu0 %v17231_v16  ;;  %7100 = vmatprep.subr.bf16.mxu1 %v17234_v46  ;;  %v17321_v16 = vld [vmem:[%s24684_s7 + $0x544] ss:$16 sps:$4 sm:$0xff]  }
 0x3f4   :  { %6408 = vmatmul.mubr.bf16.gmra.mxu0 %v21083_v2  ;;  %6511 = vmatmul.mubr.bf16.gmra.mxu1 %v21083_v2  ;;  %v17243_v2 = vld [vmem:[%s24682_s5 + $0x4e4] ss:$16 sps:$4 sm:$0xff]  }
 0x3f5   :  { %14793 = vmatprep.mubr.msk.bf16.mxu0 %vm2651_vm5, %v21180_v10  ;;  %14800 = vmatprep.mubr.msk.bf16.mxu1 %vm2651_vm5, %v21180_v10 }
 0x3f6   :  { %6998 = vmatpush2.bf16.msra.mxu0 %v17229_v0  ;;  %7101 = vmatpush2.bf16.msra.mxu1 %v17232_v61  ;;  %v17319_v61 = vld [vmem:[%s24684_s7 + $0x540] ss:$16 sps:$4 sm:$0xff]  }
 0x3f7   :  { %6999 = vmatprep.subr.bf16.mxu0 %v17237_v11  ;;  %7102 = vmatprep.subr.bf16.mxu1 %v17240_v37 }
 0x3fa   :  { %7000 = vmatpush2.bf16.msra.mxu0 %v17235_v26  ;;  %7103 = vmatpush2.bf16.msra.mxu1 %v17238_v14  ;;  %v17316_v26 = vld [vmem:[%s24684_s7 + $0x5c0] ss:$16 sps:$4 sm:$0xff]   ;;  %v17318_v14 = vld [vmem:[%s24684_s7 + $0x5c4] ss:$16 sps:$4 sm:$0xff]  }
 0x3fb   :  { %7001 = vmatprep.subr.bf16.mxu0 %v17243_v2  ;;  %7104 = vmatprep.subr.bf16.mxu1 %v17246_v39  ;;  %v17327_v2 = vld [vmem:[%s24684_s7 + $0x524] ss:$16 sps:$4 sm:$0xff]   ;;  %v17325_v39 = vld [vmem:[%s24684_s7 + $0x520] ss:$16 sps:$4 sm:$0xff]  }
 0x3fc   :  { %6418 = vmatmul.mubr.bf16.gmra.mxu0 %v21182_v1  ;;  %6521 = vmatmul.mubr.bf16.gmra.mxu1 %v21182_v1 }
 0x3fd   :  { %14794 = vmatprep.mubr.msk.bf16.mxu0 %vm2651_vm5, %v21230_v43  ;;  %14801 = vmatprep.mubr.msk.bf16.mxu1 %vm2651_vm5, %v21230_v43 }
 0x3fe   :  { %7002 = vmatpush2.bf16.msra.mxu0 %v17241_v4  ;;  %7105 = vmatpush2.bf16.msra.mxu1 %v17244_v56 }
 0x3ff   :  { %7003 = vmatprep.subr.bf16.mxu0 %v17249_v53  ;;  %7106 = vmatprep.subr.bf16.mxu1 %v17252_v35  ;;  %v17322_v53 = vld [vmem:[%s24684_s7 + $0x5a0] ss:$16 sps:$4 sm:$0xff]   ;;  %v17324_v35 = vld [vmem:[%s24684_s7 + $0x5a4] ss:$16 sps:$4 sm:$0xff]  }
 0x402   :  { %7004 = vmatpush2.bf16.msra.mxu0 %v17247_v49  ;;  %7107 = vmatpush2.bf16.msra.mxu1 %v17250_v25  ;;  %v17333_v49 = vld [vmem:[%s24684_s7 + $0x504] ss:$16 sps:$4 sm:$0xff]   ;;  %v17331_v25 = vld [vmem:[%s24684_s7 + $0x500] ss:$16 sps:$4 sm:$0xff]  }
 0x403   :  { %7005 = vmatprep.subr.bf16.mxu0 %v17255_v32  ;;  %7108 = vmatprep.subr.bf16.mxu1 %v17258_v13 }
 0x404   :  { %6428 = vmatmul.mubr.bf16.gmra.mxu0 %v21232_v40  ;;  %6531 = vmatmul.mubr.bf16.gmra.mxu1 %v21232_v40 }
 0x405   :  { %14928 = vmatprep.mubr.msk.bf16.mxu0 %vm2651_vm5, %v21288_v52  ;;  %14935 = vmatprep.mubr.msk.bf16.mxu1 %vm2651_vm5, %v21288_v52  ;;  %v17292_v52 = vld [vmem:[%s24684_s7 + $0x3e0] ss:$16 sps:$4 sm:$0xff]  }
 0x406   :  { %7006 = vmatpush2.bf16.msra.mxu0 %v17253_v34  ;;  %7109 = vmatpush2.bf16.msra.mxu1 %v17256_v20  ;;  %v17339_v34 = vld [vmem:[%s24684_s7 + $0x4e4] ss:$16 sps:$4 sm:$0xff]   ;;  %v17337_v20 = vld [vmem:[%s24684_s7 + $0x4e0] ss:$16 sps:$4 sm:$0xff]  }
 0x407   :  { %7007 = vmatprep.subr.bf16.mxu0 %v17261_v12  ;;  %7110 = vmatprep.subr.bf16.mxu1 %v17264_v19  ;;  %v17330_v12 = vld [vmem:[%s24684_s7 + $0x584] ss:$16 sps:$4 sm:$0xff]  }
 0x40a   :  { %7008 = vmatpush2.bf16.msra.mxu0 %v17259_v8  ;;  %7111 = vmatpush2.bf16.msra.mxu1 %v17262_v57  ;;  %v17328_v57 = vld [vmem:[%s24684_s7 + $0x580] ss:$16 sps:$4 sm:$0xff]  }
 0x40b   :  { %8577 = vmatprep.subr.bf16.mxu0 %v17276_v9  ;;  %8680 = vmatprep.subr.bf16.mxu1 %v17285_v41  ;;  %v17336_v9 = vld [vmem:[%s24684_s7 + $0x6e4] ss:$16 sps:$4 sm:$0xff]   ;;  %v17340_v41 = vld [vmem:[%s24684_s7 + $0x6c0] ss:$16 sps:$4 sm:$0xff]  }
 0x40d   :  { %7010 = vmatmul.mubr.bf16.vlgmr.msra.gmra.mxu0 %v21312_v6  ;;  %7113 = vmatmul.mubr.bf16.vlgmr.msra.gmra.mxu1 %v21312_v6 }
 0x40e   :  { %14929 = vmatprep.mubr.msk.bf16.mxu0 %vm2651_vm5, %v17265_v30  ;;  %14936 = vmatprep.mubr.msk.bf16.mxu1 %vm2651_vm5, %v17265_v30  ;;  %v17345_v30 = vld [vmem:[%s24684_s7 + $0x4c4] ss:$16 sps:$4 sm:$0xff]  }
 0x40f   :  { %8578 = vmatpush1.bf16.msra.mxu0 %v17274_v50  ;;  %8681 = vmatpush1.bf16.msra.mxu1 %v17283_v42  ;;  %v17334_v50 = vld [vmem:[%s24684_s7 + $0x6e0] ss:$16 sps:$4 sm:$0xff]  }
 0x410   :  { %8579 = vmatprep.subr.bf16.mxu0 %v17279_v17  ;;  %8682 = vmatprep.subr.bf16.mxu1 %v17291_v24  ;;  %v17351_v17 = vld [vmem:[%s24684_s7 + $0x4a4] ss:$16 sps:$4 sm:$0xff]  }
 0x411   :  { %v18048_v42 = vld [vmem:[#allocation4] sm:$0xff] }
 0x412   :  { %7376 = vst.msk [vmem:[#allocation4 + $0x8] sm:$0xff] %vm21669_vm7, %v18048_v42  ;;  %7378 = vst.msk [vmem:[#allocation4 + $0x18] sm:$0xff] %vm21669_vm7, %v18048_v42  ;;  %v17348_v24 = vld [vmem:[%s24684_s7 + $0x6a4] ss:$16 sps:$4 sm:$0xff]  }
 0x413   :  { %8580 = vmatpush1.bf16.msra.mxu0 %v17277_v27  ;;  %7381 = vst.msk [vmem:[#allocation4 + $0x108] sm:$0xff] %vm21669_vm7, %v18048_v42  ;;  %7383 = vst.msk [vmem:[#allocation4 + $0x118] sm:$0xff] %vm21669_vm7, %v18048_v42 }
 0x415   :  { %7020 = vmatmul.mubr.bf16.gmra.mxu0 %v17267_v7  ;;  %7123 = vmatmul.mubr.bf16.gmra.mxu1 %v17267_v7 }
 0x416   :  { %14930 = vmatprep.mubr.msk.bf16.mxu0 %vm2651_vm5, %v17268_v55  ;;  %14937 = vmatprep.mubr.msk.bf16.mxu1 %vm2651_vm5, %v17268_v55 }
 0x41d   :  { %7030 = vmatmul.mubr.bf16.gmra.mxu0 %v17270_v58  ;;  %7133 = vmatmul.mubr.bf16.gmra.mxu1 %v17270_v58  ;;  %v17343_v58 = vld [vmem:[%s24684_s7 + $0x4c0] ss:$16 sps:$4 sm:$0xff]  }
 0x41e   :  { %14931 = vmatprep.mubr.msk.bf16.mxu0 %vm2651_vm5, %v21180_v10  ;;  %14938 = vmatprep.mubr.msk.bf16.mxu1 %vm2651_vm5, %v21180_v10  ;;  %v17282_v10 = vld [vmem:[%s24684_s7 + $0x424] ss:$16 sps:$4 sm:$0xff]  }
 0x41f   :  { %8581 = vmatprep.subr.bf16.mxu0 %v17282_v10 }
 0x420   :  { %8582 = vmatpush1.bf16.msra.mxu0 %v17280_v54  ;;  %v17349_v54 = vld [vmem:[%s24684_s7 + $0x4a0] ss:$16 sps:$4 sm:$0xff]  }
 0x425   :  { %7040 = vmatmul.mubr.bf16.gmra.mxu0 %v21182_v1  ;;  %7143 = vmatmul.mubr.bf16.gmra.mxu1 %v21182_v1  ;;  %v17288_v1 = vld [vmem:[%s24684_s7 + $0x404] ss:$16 sps:$4 sm:$0xff]  }
 0x426   :  { %14932 = vmatprep.mubr.msk.bf16.mxu0 %vm2651_vm5, %v21230_v43  ;;  %14939 = vmatprep.mubr.msk.bf16.mxu1 %vm2651_vm5, %v21230_v43  ;;  %v17286_v43 = vld [vmem:[%s24684_s7 + $0x400] ss:$16 sps:$4 sm:$0xff]  }
 0x427   :  { %8583 = vmatprep.subr.bf16.mxu0 %v17288_v1  ;;  %v25156_v1 = vmov 0 }
 0x428   :  { %8584 = vmatpush1.bf16.msra.mxu0 %v17286_v43  ;;  %v25157_v1 = vsel %vm21669_vm7, 4294967295, %v25156_v1  ;;  %v17342_v43 = vld [vmem:[%s24684_s7 + $0x6c4] ss:$16 sps:$4 sm:$0xff]  }
 0x429   :  { %8585 = vmatprep.subr.bf16.mxu0 %v17294_v28  ;;  %25158 = vst [vmem:[#allocation47_spill] sm:$0xff] %v25157_v1  ;;  %v17357_v28 = vld [vmem:[%s24684_s7 + $0x484] ss:$16 sps:$4 sm:$0xff]  }
 0x42c   :  { %8586 = vmatpush1.bf16.msra.mxu0 %v17292_v52  ;;  %v21535_v48 = vpop.f32.mrf.mxu0  ;;  %v21537_v6 = vpop.f32.mrf.mxu1 }
 0x42d   :  { %7050 = vmatmul.mubr.bf16.gmra.mxu0 %v21232_v40  ;;  %7153 = vmatmul.mubr.bf16.gmra.mxu1 %v21232_v40  ;;  %v17271_v40 = vld [vmem:[#allocation3 + $0x84] ss:$8 sps:$4 sm:$0xff]  }
 0x42e   :  { %14933 = vmatprep.mubr.msk.bf16.mxu0 %vm2651_vm5, %v21244_v5  ;;  %14940 = vmatprep.mubr.msk.bf16.mxu1 %vm2651_vm5, %v21244_v5  ;;  %v17289_v5 = vld [vmem:[%s24684_s7 + $0x640] ss:$16 sps:$4 sm:$0xff]   ;;  %v21551_v36 = vpop.f32.mrf.mxu0  ;;  %v21553_v18 = vpop.f32.mrf.mxu1 }
 0x42f   :  { %8587 = vmatprep.subr.bf16.mxu0 %v17300_v21  ;;  %8683 = vmatpush1.bf16.msra.mxu1 %v17289_v5  ;;  %v17355_v5 = vld [vmem:[%s24684_s7 + $0x480] ss:$16 sps:$4 sm:$0xff]  }
 0x430   :  { %8588 = vmatpush1.bf16.msra.mxu0 %v17298_v3  ;;  %8684 = vmatprep.subr.bf16.mxu1 %v17297_v22  ;;  %v21567_v15 = vpop.f32.mrf.mxu0  ;;  %v21569_v45 = vpop.f32.mrf.mxu1  ;;  %v17346_v21 = vld [vmem:[%s24684_s7 + $0x6a0] ss:$16 sps:$4 sm:$0xff]  }
 0x431   :  { %8589 = vmatprep.subr.bf16.mxu0 %v17306_v51  ;;  %v17354_v51 = vld [vmem:[%s24684_s7 + $0x684] ss:$16 sps:$4 sm:$0xff]   ;;  %v17352_v22 = vld [vmem:[%s24684_s7 + $0x680] ss:$16 sps:$4 sm:$0xff]  }
 0x432   :  { %v21583_v46 = vpop.f32.mrf.mxu0  ;;  %v21585_v0 = vpop.f32.mrf.mxu1 }
 0x433   :  { %8685 = vmatpush1.bf16.msra.mxu1 %v17295_v59 }
 0x434   :  { %8686 = vmatprep.subr.bf16.mxu1 %v17303_v63  ;;  %v17374_v63 = vld [vmem:[%s24684_s7 + $0x66c] ss:$16 sps:$4 sm:$0xff]  }
 0x435   :  { %7060 = vmatmul.mubr.bf16.gmra.mxu0 %v21246_v33  ;;  %7163 = vmatmul.mubr.bf16.gmra.mxu1 %v21246_v33  ;;  %v17304_v33 = vld [vmem:[%s24684_s7 + $0x3a0] ss:$16 sps:$4 sm:$0xff]  }
 0x436   :  { %14934 = vmatprep.mubr.msk.bf16.mxu0 %vm2651_vm5, %v17271_v40  ;;  %14941 = vmatprep.mubr.msk.bf16.mxu1 %vm2651_vm5, %v17271_v40 }
 0x437   :  { %8590 = vmatpush1.bf16.msra.mxu0 %v17304_v33  ;;  %8687 = vmatpush1.bf16.msra.mxu1 %v17301_v60 }
 0x438   :  { %8591 = vmatprep.subr.bf16.mxu0 %v17312_v44  ;;  %8688 = vmatprep.subr.bf16.mxu1 %v17309_v62  ;;  %v17363_v44 = vld [vmem:[%s24684_s7 + $0x46c] ss:$16 sps:$4 sm:$0xff]  }
 0x43b   :  { %8592 = vmatpush1.bf16.msra.mxu0 %v17310_v38  ;;  %8689 = vmatpush1.bf16.msra.mxu1 %v17307_v31 }
 0x43c   :  { %8593 = vmatprep.subr.bf16.mxu0 %v17315_v47  ;;  %v21590_v11 = vpop.f32.mrf.mxu0  ;;  %8690 = vmatprep.subr.bf16.mxu1 %v17318_v14 }
 0x43d   :  { %7070 = vmatmul.mubr.bf16.gmra.mxu0 %v17273_v23  ;;  %7173 = vmatmul.mubr.bf16.gmra.mxu1 %v17273_v23  ;;  %v21592_v37 = vpop.f32.mrf.mxu1 }
 0x43e   :  { %v21606_v4 = vpop.f32.mrf.mxu0 }
 0x43f   :  { %8594 = vmatpush2.bf16.msra.mxu0 %v17313_v29  ;;  %v21608_v56 = vpop.f32.mrf.mxu1  ;;  %8691 = vmatpush1.bf16.msra.mxu1 %v17316_v26 }
 0x440   :  { %8595 = vmatprep.subr.bf16.mxu0 %v17321_v16  ;;  %8692 = vmatprep.subr.bf16.mxu1 %v17324_v35  ;;  %v21622_v32 = vpop.f32.mrf.mxu0 }
 0x441   :  { %v21624_v13 = vpop.f32.mrf.mxu1 }
 0x442   :  { %25149 = vst [vmem:[#allocation131_spill] sm:$0xff] %v21624_v13  ;;  %v21635_v19 = vpop.f32.mrf.mxu0 }
 0x443   :  { %8596 = vmatpush2.bf16.msra.mxu0 %v17319_v61  ;;  %8693 = vmatpush1.bf16.msra.mxu1 %v17322_v53  ;;  %25150 = vst [vmem:[#allocation44_spill] sm:$0xff] %v21635_v19  ;;  %v21637_v8 = vpop.f32.mrf.mxu1  ;;  %v25209_v19 = vld [vmem:[#allocation8_spill] sm:$0xff] }
 0x444   :  { %8597 = vmatprep.subr.bf16.mxu0 %v17327_v2  ;;  %25151 = vst [vmem:[#allocation132_spill] sm:$0xff] %v21637_v8  ;;  %8694 = vmatprep.subr.bf16.mxu1 %v17330_v12 }
 0x447   :  { %8598 = vmatpush2.bf16.msra.mxu0 %v17325_v39  ;;  %8695 = vmatpush1.bf16.msra.mxu1 %v17328_v57 }
 0x448   :  { %8599 = vmatprep.subr.bf16.mxu0 %v17333_v49  ;;  %8704 = vmatprep.subr.bf16.mxu1 %v17336_v9 }
 0x44b   :  { %8600 = vmatpush2.bf16.msra.mxu0 %v17331_v25  ;;  %8705 = vmatpush2.bf16.msra.mxu1 %v17334_v50 }
 0x44c   :  { %8601 = vmatprep.subr.bf16.mxu0 %v17339_v34  ;;  %v21645_v7 = vpop.f32.mrf.mxu0  ;;  %8706 = vmatprep.subr.bf16.mxu1 %v17342_v43 }
 0x44d   :  { %25152 = vst [vmem:[#allocation45_spill] sm:$0xff] %v21645_v7  ;;  %v21647_v55 = vpop.f32.mrf.mxu1 }
 0x44e   :  { %25153 = vst [vmem:[#allocation133_spill] sm:$0xff] %v21647_v55  ;;  %v21661_v27 = vpop.f32.mrf.mxu0 }
 0x44f   :  { %8602 = vmatpush2.bf16.msra.mxu0 %v17337_v20  ;;  %25154 = vst [vmem:[#allocation46_spill] sm:$0xff] %v21661_v27  ;;  %v21663_v10 = vpop.f32.mrf.mxu1  ;;  %8707 = vmatpush2.bf16.msra.mxu1 %v17340_v41 }
 0x450   :  { %8603 = vmatprep.subr.bf16.mxu0 %v17345_v30  ;;  %25155 = vst [vmem:[#allocation134_spill] sm:$0xff] %v21663_v10  ;;  %v21690_v40 = vpop.f32.mrf.mxu0  ;;  %8708 = vmatprep.subr.bf16.mxu1 %v17348_v24 }
 0x451   :  { %25159 = vst [vmem:[#allocation135_spill] sm:$0xff] %v21690_v40  ;;  %v21692_v52 = vpop.f32.mrf.mxu1 }
 0x452   :  { %25160 = vst [vmem:[#allocation48_spill] sm:$0xff] %v21692_v52  ;;  %v21703_v3 = vpop.f32.mrf.mxu0 }
 0x453   :  { %8604 = vmatpush2.bf16.msra.mxu0 %v17343_v58  ;;  %25161 = vst [vmem:[#allocation136_spill] sm:$0xff] %v21703_v3  ;;  %v21705_v23 = vpop.f32.mrf.mxu1  ;;  %8709 = vmatpush2.bf16.msra.mxu1 %v17346_v21 }
 0x454   :  { %8605 = vmatprep.subr.bf16.mxu0 %v17351_v17  ;;  %25162 = vst [vmem:[#allocation49_spill] sm:$0xff] %v21705_v23  ;;  %8710 = vmatprep.subr.bf16.mxu1 %v17354_v51 }
 0x457   :  { %8606 = vmatpush2.bf16.msra.mxu0 %v17349_v54  ;;  %8711 = vmatpush2.bf16.msra.mxu1 %v17352_v22 }
 0x458   :  { %8607 = vmatprep.subr.bf16.mxu0 %v17357_v28  ;;  %8783 = vmatprep.subr.bf16.mxu1 %v17363_v44 }
 0x45b   :  { %8608 = vmatpush2.bf16.msra.mxu0 %v17355_v5 }
 0x45c   :  { %v21710_v33 = vpop.f32.mrf.mxu0  ;;  %v21712_v59 = vpop.f32.mrf.mxu1  ;;  %8886 = vmatprep.subr.bf16.mxu0 %v17374_v63 }
 0x45d   :  { %25163 = vst [vmem:[#allocation137_spill] sm:$0xff] %v21710_v33  ;;  %25164 = vst [vmem:[#allocation50_spill] sm:$0xff] %v21712_v59 }
 0x45e   :  { %v21720_v38 = vpop.f32.mrf.mxu0  ;;  %v21722_v60 = vpop.f32.mrf.mxu1 }
 0x45f   :  { %25165 = vst [vmem:[#allocation138_spill] sm:$0xff] %v21720_v38  ;;  %25166 = vst [vmem:[#allocation51_spill] sm:$0xff] %v21722_v60 }
 0x460   :  { %v21727_v47 = vpop.f32.mrf.mxu0  ;;  %v21729_v29 = vpop.f32.mrf.mxu1 }
 0x461   :  { %25167 = vst [vmem:[#allocation139_spill] sm:$0xff] %v21727_v47  ;;  %25168 = vst [vmem:[#allocation52_spill] sm:$0xff] %v21729_v29 }
 0x462   :  { %v21731_v31 = vpop.f32.mrf.mxu0  ;;  %v21733_v62 = vpop.f32.mrf.mxu1 }
 0x463   :  { %25169 = vst [vmem:[#allocation140_spill] sm:$0xff] %v21731_v31  ;;  %25170 = vst [vmem:[#allocation53_spill] sm:$0xff] %v21733_v62 }
 0x46c   :  { %v21735_v16 = vpop.f32.mrf.mxu0 }
 0x46d   :  { %25171 = vst [vmem:[#allocation141_spill] sm:$0xff] %v21735_v16  ;;  %v21737_v61 = vpop.f32.mrf.mxu1 }
 0x46e   :  { %25172 = vst [vmem:[#allocation54_spill] sm:$0xff] %v21737_v61  ;;  %v21739_v26 = vpop.f32.mrf.mxu0 }
 0x46f   :  { %25173 = vst [vmem:[#allocation142_spill] sm:$0xff] %v21739_v26  ;;  %v21741_v14 = vpop.f32.mrf.mxu1 }
 0x470   :  { %25174 = vst [vmem:[#allocation55_spill] sm:$0xff] %v21741_v14  ;;  %v21743_v2 = vpop.f32.mrf.mxu0 }
 0x471   :  { %25175 = vst [vmem:[#allocation143_spill] sm:$0xff] %v21743_v2  ;;  %v21745_v39 = vpop.f32.mrf.mxu1 }
 0x472   :  { %25176 = vst [vmem:[#allocation56_spill] sm:$0xff] %v21745_v39  ;;  %v21747_v53 = vpop.f32.mrf.mxu0 }
 0x473   :  { %25177 = vst [vmem:[#allocation144_spill] sm:$0xff] %v21747_v53  ;;  %v21749_v35 = vpop.f32.mrf.mxu1 }
 0x474   :  { %25178 = vst [vmem:[#allocation57_spill] sm:$0xff] %v21749_v35 }
 0x47d   :  { %v21751_v49 = vpop.f32.mrf.mxu0  ;;  %v21753_v25 = vpop.f32.mrf.mxu1 }
 0x47e   :  { %25179 = vst [vmem:[#allocation145_spill] sm:$0xff] %v21751_v49  ;;  %25180 = vst [vmem:[#allocation58_spill] sm:$0xff] %v21753_v25 }
 0x47f   :  { %v21755_v34 = vpop.f32.mrf.mxu0  ;;  %v21757_v20 = vpop.f32.mrf.mxu1 }
 0x480   :  { %25181 = vst [vmem:[#allocation146_spill] sm:$0xff] %v21755_v34  ;;  %25182 = vst [vmem:[#allocation59_spill] sm:$0xff] %v21757_v20 }
 0x481   :  { %v21759_v12 = vpop.f32.mrf.mxu0  ;;  %v21761_v57 = vpop.f32.mrf.mxu1 }
 0x482   :  { %25183 = vst [vmem:[#allocation60_spill] sm:$0xff] %v21759_v12  ;;  %25184 = vst [vmem:[#allocation147_spill] sm:$0xff] %v21761_v57 }
 0x483   :  { %v21763_v30 = vpop.f32.mrf.mxu0  ;;  %v21765_v58 = vpop.f32.mrf.mxu1 }
 0x484   :  { %25185 = vst [vmem:[#allocation61_spill] sm:$0xff] %v21763_v30  ;;  %25186 = vst [vmem:[#allocation148_spill] sm:$0xff] %v21765_v58 }
 0x48c   :  { %v21767_v9 = vpop.f32.mrf.mxu0  ;;  %v21769_v50 = vpop.f32.mrf.mxu1 }
 0x48d   :  { %25187 = vst [vmem:[#allocation62_spill] sm:$0xff] %v21767_v9  ;;  %25188 = vst [vmem:[#allocation149_spill] sm:$0xff] %v21769_v50 }
 0x48e   :  { %v21771_v17 = vpop.f32.mrf.mxu0  ;;  %v21773_v54 = vpop.f32.mrf.mxu1 }
 0x48f   :  { %25189 = vst [vmem:[#allocation63_spill] sm:$0xff] %v21771_v17  ;;  %25190 = vst [vmem:[#allocation150_spill] sm:$0xff] %v21773_v54 }
 0x490   :  { %v21775_v43 = vpop.f32.mrf.mxu0  ;;  %v21777_v42 = vpop.f32.mrf.mxu1 }
 0x491   :  { %25191 = vst [vmem:[#allocation64_spill] sm:$0xff] %v21775_v43  ;;  %25192 = vst [vmem:[#allocation151_spill] sm:$0xff] %v21777_v42 }
 0x492   :  { %v21779_v41 = vpop.f32.mrf.mxu0  ;;  %v21781_v28 = vpop.f32.mrf.mxu1 }
 0x493   :  { %25193 = vst [vmem:[#allocation65_spill] sm:$0xff] %v21779_v41  ;;  %25194 = vst [vmem:[#allocation66_spill] sm:$0xff] %v21781_v28 }
 0x494   :  { %v6369_v5 = vpop.f32.mrf.mxu0  ;;  %v6472_v24 = vpop.f32.mrf.mxu1 }
 0x496   :  { %v6371_v21 = vpop.f32.mrf.mxu0  ;;  %v6474_v51 = vpop.f32.mrf.mxu1 }
 0x498   :  { %v6373_v22 = vpop.f32.mrf.mxu0  ;;  %v6476_v44 = vpop.f32.mrf.mxu1 }
 0x49a   :  { %v6375_v63 = vpop.f32.mrf.mxu0  ;;  %v6478_v1 = vpop.f32.mrf.mxu1 }
 0x49c   :  { %v6379_v50 = vpop.f32.mrf.mxu0  ;;  %v6482_v17 = vpop.f32.mrf.mxu1 }
 0x49e   :  { %v6381_v9 = vpop.f32.mrf.mxu0  ;;  %v6484_v54 = vpop.f32.mrf.mxu1 }
 0x4a0   :  { %v6383_v58 = vpop.f32.mrf.mxu0  ;;  %v6486_v43 = vpop.f32.mrf.mxu1 }
 0x4a2   :  { %v6385_v30 = vpop.f32.mrf.mxu0  ;;  %v6488_v42 = vpop.f32.mrf.mxu1 }
 0x4a4   :  { %v6389_v57 = vpop.f32.mrf.mxu0  ;;  %v6492_v41 = vpop.f32.mrf.mxu1 }
 0x4a6   :  { %v6391_v12 = vpop.f32.mrf.mxu0  ;;  %v6494_v28 = vpop.f32.mrf.mxu1 }
 0x4a8   :  { %v6393_v20 = vpop.f32.mrf.mxu0  ;;  %v6496_v34 = vpop.f32.mrf.mxu1 }
 0x4aa   :  { %v6395_v25 = vpop.f32.mrf.mxu0  ;;  %v6498_v49 = vpop.f32.mrf.mxu1 }
 0x4ac   :  { %v6399_v35 = vpop.f32.mrf.mxu0  ;;  %v6502_v53 = vpop.f32.mrf.mxu1 }
 0x4ae   :  { %v6401_v39 = vpop.f32.mrf.mxu0  ;;  %v6504_v2 = vpop.f32.mrf.mxu1 }
 0x4b0   :  { %v6403_v14 = vpop.f32.mrf.mxu0  ;;  %v6506_v26 = vpop.f32.mrf.mxu1 }
 0x4b2   :  { %v6405_v61 = vpop.f32.mrf.mxu0  ;;  %v6508_v16 = vpop.f32.mrf.mxu1 }
 0x4b4   :  { %v6409_v62 = vpop.f32.mrf.mxu0  ;;  %v6512_v31 = vpop.f32.mrf.mxu1 }
 0x4b6   :  { %v6411_v29 = vpop.f32.mrf.mxu0  ;;  %v6514_v47 = vpop.f32.mrf.mxu1 }
 0x4b8   :  { %v6413_v60 = vpop.f32.mrf.mxu0  ;;  %v21783_v38 = vpop.f32.mrf.mxu1 }
 0x4b9   :  { %25195 = vst [vmem:[#allocation152_spill] sm:$0xff] %v21783_v38  ;;  %v7239_v38 = vld [vmem:[%s24685_s6] sm:$0xf] }
 0x4ba   :  { %v21785_v59 = vpop.f32.mrf.mxu0  ;;  %v21787_v33 = vpop.f32.mrf.mxu1  ;;  %v21823_v13 = vrot.slane %v7239_v38, %v25209_v19  ;;  %v25238_v19 = vld [vmem:[#allocation56_spill] sm:$0xff] }
 0x4bb   :  { %25196 = vst [vmem:[#allocation67_spill] sm:$0xff] %v21785_v59  ;;  %25197 = vst [vmem:[#allocation153_spill] sm:$0xff] %v21787_v33  ;;  %v25206_v33 = vld [vmem:[#allocation5_spill] sm:$0xff] }
 0x4bc   :  { %v21789_v23 = vpop.f32.mrf.mxu0  ;;  %v21791_v3 = vpop.f32.mrf.mxu1 }
 0x4bd   :  { %25198 = vst [vmem:[#allocation68_spill] sm:$0xff] %v21789_v23  ;;  %25199 = vst [vmem:[#allocation154_spill] sm:$0xff] %v21791_v3  ;;  %v21809_v23 = vrot.slane %v7239_v38, %v25206_v33  ;;  %v6370_v3 = vadd.f32 %v6369_v5, %v21535_v48  ;;  %v6372_v33 = vadd.f32 %v6371_v21, %v21551_v36 }
 0x4be   :  { %v21793_v52 = vpop.f32.mrf.mxu0  ;;  %v21795_v40 = vpop.f32.mrf.mxu1  ;;  %v21829_v48 = vadd.f32 %v6373_v22, %v21567_v15  ;;  %v21832_v5 = vadd.f32 %v6476_v44, %v21569_v45  ;;  %v21851_v15 = vadd.f32 %v6381_v9, %v21606_v4  ;;  %v21854_v45 = vadd.f32 %v6484_v54, %v21608_v56  ;;  %v25214_v56 = vld [vmem:[#allocation133_spill] sm:$0xff] }
 0x4bf   :  { %25200 = vst [vmem:[#allocation69_spill] sm:$0xff] %v21793_v52  ;;  %25201 = vst [vmem:[#allocation70_spill] sm:$0xff] %v21795_v40  ;;  %v21876_v54 = vadd.f32 %v6492_v41, %v25214_v56  ;;  %v25221_v41 = vld [vmem:[#allocation137_spill] sm:$0xff] }
 0x4c0   :  { %v21797_v10 = vpop.f32.mrf.mxu0  ;;  %v21799_v27 = vpop.f32.mrf.mxu1 }
 0x4c1   :  { %25202 = vst [vmem:[#allocation155_spill] sm:$0xff] %v21797_v10  ;;  %25203 = vst [vmem:[#allocation71_spill] sm:$0xff] %v21799_v27  ;;  %v25207_v10 = vld [vmem:[#allocation6_spill] sm:$0xff]  ;;  %v25208_v27 = vld [vmem:[#allocation7_spill] sm:$0xff] }
 0x4c2   :  { %v21804_v55 = vpop.f32.mrf.mxu0  ;;  %v21806_v59 = vpop.f32.mrf.mxu1  ;;  %v21817_v7 = vrot.slane %v7239_v38, %v25207_v10  ;;  %v21820_v8 = vrot.slane %v7239_v38, %v25208_v27  ;;  %v21835_v10 = vadd.f32 %v6375_v63, %v21583_v46  ;;  %v21838_v27 = vadd.f32 %v6478_v1, %v21585_v0  ;;  %v25210_v0 = vld [vmem:[#allocation131_spill] sm:$0xff] }
 0x4c3   :  { %25204 = vst [vmem:[#allocation156_spill] sm:$0xff] %v21804_v55  ;;  %25205 = vst [vmem:[#allocation72_spill] sm:$0xff] %v21806_v59  ;;  %v6473_v59 = vadd.f32 %v6472_v24, %v21537_v6  ;;  %v6475_v55 = vadd.f32 %v6474_v51, %v21553_v18  ;;  %v21841_v38 = vadd.f32 %v6379_v50, %v21590_v11  ;;  %v25211_v11 = vld [vmem:[#allocation44_spill] sm:$0xff] }
 0x4c4   :  { %v21812_v52 = vpop.f32.mrf.mxu0  ;;  %v21814_v40 = vpop.f32.mrf.mxu1  ;;  %v21848_v18 = vadd.f32 %v6482_v17, %v21592_v37  ;;  %v21857_v46 = vadd.f32 %v6383_v58, %v21622_v32  ;;  %v21860_v1 = vadd.f32 %v6486_v43, %v25210_v0  ;;  %v21863_v50 = vadd.f32 %v6385_v30, %v25211_v11  ;;  %v25212_v24 = vld [vmem:[#allocation132_spill] sm:$0xff]  ;;  %v25213_v37 = vld [vmem:[#allocation45_spill] sm:$0xff]  ;;  %v25215_v32 = vld [vmem:[#allocation46_spill] sm:$0xff] }
 0x4c5   :  { %v21866_v21 = vadd.f32 %v6488_v42, %v25212_v24  ;;  %v21869_v17 = vadd.f32 %v6389_v57, %v25213_v37  ;;  %v21879_v58 = vadd.f32 %v6391_v12, %v25215_v32  ;;  %v25216_v43 = vld [vmem:[#allocation134_spill] sm:$0xff]  ;;  %v25217_v30 = vld [vmem:[#allocation135_spill] sm:$0xff]  ;;  %v25218_v42 = vld [vmem:[#allocation48_spill] sm:$0xff]  ;;  %v21897_v24 = vadd.f32 %v6399_v35, %v25221_v41 }
 0x4c6   :  { %v21843_v6 = vpop.f32.mrf.mxu0  ;;  %v21845_v36 = vpop.f32.mrf.mxu1  ;;  %v21882_v51 = vadd.f32 %v6494_v28, %v25216_v43  ;;  %v21885_v22 = vadd.f32 %v6393_v20, %v25217_v30  ;;  %v21888_v44 = vadd.f32 %v6496_v34, %v25218_v42  ;;  %v25219_v57 = vld [vmem:[#allocation136_spill] sm:$0xff]  ;;  %v25220_v0 = vld [vmem:[#allocation49_spill] sm:$0xff]  ;;  %v25222_v28 = vld [vmem:[#allocation50_spill] sm:$0xff] }
 0x4c7   :  { %v21891_v63 = vadd.f32 %v6395_v25, %v25219_v57  ;;  %v21894_v11 = vadd.f32 %v6498_v49, %v25220_v0  ;;  %v21904_v56 = vadd.f32 %v6502_v53, %v25222_v28  ;;  %v25223_v20 = vld [vmem:[#allocation138_spill] sm:$0xff]  ;;  %v25224_v34 = vld [vmem:[#allocation51_spill] sm:$0xff]  ;;  %v25226_v49 = vld [vmem:[#allocation52_spill] sm:$0xff] }
 0x4c8   :  { %v21871_v4 = vpop.f32.mrf.mxu0  ;;  %v21873_v9 = vpop.f32.mrf.mxu1  ;;  %v21907_v32 = vadd.f32 %v6401_v39, %v25223_v20  ;;  %v21910_v43 = vadd.f32 %v6504_v2, %v25224_v34  ;;  %v25225_v25 = vld [vmem:[#allocation139_spill] sm:$0xff]  ;;  %v21916_v42 = vadd.f32 %v6506_v26, %v25226_v49  ;;  %v25227_v35 = vld [vmem:[#allocation140_spill] sm:$0xff]  ;;  %v25228_v0 = vld [vmem:[#allocation53_spill] sm:$0xff] }
 0x4c9   :  { %v21913_v30 = vadd.f32 %v6403_v14, %v25225_v25  ;;  %v21919_v57 = vadd.f32 %v6405_v61, %v25227_v35  ;;  %v21922_v41 = vadd.f32 %v6508_v16, %v25228_v0  ;;  %v25229_v53 = vld [vmem:[#allocation141_spill] sm:$0xff]  ;;  %v25231_v39 = vld [vmem:[#allocation54_spill] sm:$0xff]  ;;  %v25234_v14 = vld [vmem:[#allocation55_spill] sm:$0xff] }
 0x4ca   :  { %v21899_v12 = vpop.f32.mrf.mxu0  ;;  %v21901_v37 = vpop.f32.mrf.mxu1  ;;  %v21925_v28 = vadd.f32 %v6409_v62, %v25229_v53  ;;  %v21928_v20 = vadd.f32 %v6512_v31, %v25231_v39  ;;  %v25232_v2 = vld [vmem:[#allocation142_spill] sm:$0xff]  ;;  %v21934_v25 = vadd.f32 %v6514_v47, %v25234_v14  ;;  %v25236_v26 = vld [vmem:[#allocation143_spill] sm:$0xff]  ;;  %v25239_v16 = vld [vmem:[#allocation152_spill] sm:$0xff] }
 0x4cb   :  { %v21931_v34 = vadd.f32 %v6411_v29, %v25232_v2  ;;  %v21937_v49 = vadd.f32 %v6413_v60, %v25236_v26  ;;  %v21941_v0 = vadd.f32 %v25239_v16, %v25238_v19  ;;  %v25241_v62 = vld [vmem:[#allocation144_spill] sm:$0xff]  ;;  %v25242_v53 = vld [vmem:[#allocation67_spill] sm:$0xff]  ;;  %v25243_v29 = vld [vmem:[#allocation57_spill] sm:$0xff] }
 0x4cc   :  { %25230 = vst [vmem:[#allocation73_spill] sm:$0xff] %v21925_v28  ;;  %25235 = vst [vmem:[#allocation74_spill] sm:$0xff] %v21934_v25  ;;  %v21945_v28 = vadd.f32 %v25242_v53, %v25241_v62  ;;  %v25244_v2 = vld [vmem:[#allocation153_spill] sm:$0xff]  ;;  %v25247_v14 = vld [vmem:[#allocation68_spill] sm:$0xff] }
 0x4cd   :  { %25233 = vst [vmem:[#allocation157_spill] sm:$0xff] %v21931_v34  ;;  %25237 = vst [vmem:[#allocation158_spill] sm:$0xff] %v21937_v49  ;;  %v7011_v61 = vpop.f32.mrf.mxu0  ;;  %v7114_v35 = vpop.f32.mrf.mxu1  ;;  %v21949_v34 = vadd.f32 %v25244_v2, %v25243_v29  ;;  %v25246_v47 = vld [vmem:[#allocation145_spill] sm:$0xff]  ;;  %v25249_v26 = vld [vmem:[#allocation58_spill] sm:$0xff] }
 0x4ce   :  { %25240 = vst [vmem:[#allocation75_spill] sm:$0xff] %v21941_v0  ;;  %v7183_v31 = vadd.f32 %v7011_v61, %v6370_v3  ;;  %v7185_v39 = vadd.f32 %v7114_v35, %v6473_v59  ;;  %v21953_v60 = vadd.f32 %v25247_v14, %v25246_v47  ;;  %v25250_v49 = vld [vmem:[#allocation154_spill] sm:$0xff]  ;;  %v25253_v16 = vld [vmem:[#allocation69_spill] sm:$0xff]  ;;  %v25255_v29 = vld [vmem:[#allocation59_spill] sm:$0xff] }
 0x4cf   :  { %25245 = vst [vmem:[#allocation159_spill] sm:$0xff] %v21949_v34  ;;  %v21957_v25 = vadd.f32 %v25250_v49, %v25249_v26  ;;  %v25252_v19 = vld [vmem:[#allocation146_spill] sm:$0xff]  ;;  %v7013_v62 = vpop.f32.mrf.mxu0  ;;  %v7116_v53 = vpop.f32.mrf.mxu1  ;;  %v25257_v14 = vld [vmem:[#allocation60_spill] sm:$0xff]  ;;  %v25258_v49 = vld [vmem:[#allocation155_spill] sm:$0xff] }
 0x4d0   :  { %25248 = vst [vmem:[#allocation76_spill] sm:$0xff] %v21953_v60  ;;  %v21961_v0 = vadd.f32 %v25253_v16, %v25252_v19  ;;  %v21964_v3 = vadd.f32 %v21809_v23, %v7183_v31  ;;  %v7263_v59 = vadd.f32 %v21817_v7, %v7185_v39  ;;  %v7184_v61 = vadd.f32 %v7013_v62, %v6372_v33  ;;  %v25256_v2 = vld [vmem:[#allocation70_spill] sm:$0xff]  ;;  %v25260_v19 = vld [vmem:[#allocation71_spill] sm:$0xff]  ;;  %v25262_v60 = vld [vmem:[#allocation156_spill] sm:$0xff] }
 0x4d1   :  { %25251 = vst [vmem:[#allocation160_spill] sm:$0xff] %v21957_v25  ;;  %v7186_v35 = vadd.f32 %v7116_v53, %v6475_v55  ;;  %v21969_v47 = vadd.f32 %v25256_v2, %v25255_v29  ;;  %v21973_v26 = vadd.f32 %v25258_v49, %v25257_v14  ;;  %v25259_v25 = vld [vmem:[#allocation147_spill] sm:$0xff]  ;;  %v7015_v34 = vpop.f32.mrf.mxu0  ;;  %v7118_v39 = vpop.f32.mrf.mxu1  ;;  %v25264_v33 = vld [vmem:[#allocation148_spill] sm:$0xff]  ;;  %v25266_v53 = vld [vmem:[#allocation62_spill] sm:$0xff] }
 0x4d2   :  { %25254 = vst [vmem:[#allocation77_spill] sm:$0xff] %v21961_v0  ;;  %v21977_v16 = vadd.f32 %v25260_v19, %v25259_v25  ;;  %v25261_v0 = vld [vmem:[#allocation61_spill] sm:$0xff]  ;;  %v25265_v55 = vld [vmem:[#allocation72_spill] sm:$0xff]  ;;  %v21989_v29 = vadd.f32 %v21812_v52, %v25266_v53  ;;  %v21992_v2 = vadd.f32 %v21820_v8, %v7184_v61  ;;  %v7317_v14 = vmax.f32 %v21964_v3, 0.0 }
 0x4d3   :  { %v21981_v31 = vadd.f32 %v25262_v60, %v25261_v0  ;;  %v21985_v62 = vadd.f32 %v25265_v55, %v25264_v33  ;;  %v7264_v25 = vadd.f32 %v21823_v13, %v7186_v35  ;;  %v7319_v49 = vmax.f32 %v7263_v59, 0.0  ;;  %v7017_v19 = vpop.f32.mrf.mxu0  ;;  %v25268_v61 = vld [vmem:[#allocation149_spill] sm:$0xff]  ;;  %v25269_v35 = vld [vmem:[#allocation63_spill] sm:$0xff] }
 0x4d4   :  { %25267 = vst [vmem:[#allocation79_spill] sm:$0xff] %v21989_v29  ;;  %v7187_v0 = vadd.f32 %v7015_v34, %v21829_v48  ;;  %v7189_v60 = vadd.f32 %v7118_v39, %v21832_v5  ;;  %v7318_v33 = vmax.f32 %v21992_v2, 0.0  ;;  %v7188_v52 = vadd.f32 %v7017_v19, %v21835_v10 }
 0x4d5   :  { %25263 = vst [vmem:[#allocation78_spill] sm:$0xff] %v21981_v31  ;;  %v7120_v31 = vpop.f32.mrf.mxu1  ;;  %v7320_v55 = vmax.f32 %v7264_v25, 0.0  ;;  %v22003_v29 = vadd.f32 %v21814_v40, %v25268_v61  ;;  %v22007_v3 = vadd.f32 %v21843_v6, %v25269_v35  ;;  %v7021_v34 = vpop.f32.mrf.mxu0 }
 0x4d6   :  { %v7190_v53 = vadd.f32 %v7120_v31, %v21838_v27  ;;  %v7265_v48 = vadd.f32 %v21809_v23, %v7187_v0  ;;  %v7267_v5 = vadd.f32 %v21817_v7, %v7189_v60  ;;  %v16247_v39 = vpack.c.bf16 %v7318_v33, %v7317_v14  ;;  %v17435_v0 = vld [vmem:[%s24684_s7 + $0x50c] ss:$16 sps:$4 sm:$0xff]  }
 0x4d7   :  { %v7124_v59 = vpop.f32.mrf.mxu1  ;;  %v16248_v2 = vpack.c.bf16 %v7320_v55, %v7319_v49  ;;  %v7266_v10 = vadd.f32 %v21820_v8, %v7188_v52  ;;  %v7191_v40 = vadd.f32 %v7021_v34, %v21841_v38  ;;  %v7023_v6 = vpop.f32.mrf.mxu0  ;;  %v25271_v52 = vld [vmem:[#allocation150_spill] sm:$0xff] }
 0x4d8   :  { %v7268_v27 = vadd.f32 %v21823_v13, %v7190_v53  ;;  %v7321_v31 = vmax.f32 %v7265_v48, 0.0  ;;  %v7323_v25 = vmax.f32 %v7267_v5, 0.0  ;;  %v7193_v19 = vadd.f32 %v7124_v59, %v21848_v18  ;;  %7553 = vst [vmem:[#allocation4 + $0x20] sm:$0xff] %v16247_v39  ;;  %v25272_v48 = vld [vmem:[#allocation64_spill] sm:$0xff] }
 0x4d9   :  { %v7126_v61 = vpop.f32.mrf.mxu1  ;;  %7554 = vst.msk [vmem:[#allocation4 + $0x28] sm:$0xff] %vm21669_vm7, %v16248_v2  ;;  %v7322_v60 = vmax.f32 %v7266_v10, 0.0  ;;  %v7192_v49 = vadd.f32 %v7023_v6, %v21851_v15  ;;  %v22021_v53 = vadd.f32 %v21845_v36, %v25271_v52  ;;  %v22025_v38 = vadd.f32 %v21871_v4, %v25272_v48  ;;  %v7025_v34 = vpop.f32.mrf.mxu0 }
 0x4da   :  { %v7324_v35 = vmax.f32 %v7268_v27, 0.0  ;;  %v7194_v55 = vadd.f32 %v7126_v61, %v21854_v45  ;;  %v22028_v18 = vadd.f32 %v21809_v23, %v7191_v40  ;;  %v7271_v5 = vadd.f32 %v21817_v7, %v7193_v19 }
 0x4db   :  { %v7128_v59 = vpop.f32.mrf.mxu1  ;;  %v16249_v39 = vpack.c.bf16 %v7322_v60, %v7321_v31  ;;  %v22032_v15 = vadd.f32 %v21820_v8, %v7192_v49  ;;  %v7195_v4 = vadd.f32 %v7025_v34, %v21857_v46  ;;  %v7027_v40 = vpop.f32.mrf.mxu0  ;;  %v22045_v52 = vpack.c.bf16 %v7321_v31, %v7317_v14  ;;  %v17380_v14 = vld [vmem:[%s24684_s7 + $0x64c] ss:$16 sps:$4 sm:$0xff]  }
 0x4dc   :  { %v16250_v2 = vpack.c.bf16 %v7324_v35, %v7323_v25  ;;  %v7272_v45 = vadd.f32 %v21823_v13, %v7194_v55  ;;  %v7325_v36 = vmax.f32 %v22028_v18, 0.0  ;;  %v7327_v10 = vmax.f32 %v7271_v5, 0.0  ;;  %v17372_v5 = vld [vmem:[%s24684_s7 + $0x668] ss:$16 sps:$4 sm:$0xff]  }
 0x4dd   :  { %v7197_v27 = vadd.f32 %v7128_v59, %v21860_v1  ;;  %v7130_v6 = vpop.f32.mrf.mxu1  ;;  %7555 = vst [vmem:[#allocation4 + $0x30] sm:$0xff] %v16249_v39  ;;  %v7326_v25 = vmax.f32 %v22032_v15, 0.0  ;;  %v7196_v61 = vadd.f32 %v7027_v40, %v21863_v50  ;;  %v7273_v49 = vadd.f32 %v21809_v23, %v7195_v4  ;;  %v7031_v55 = vpop.f32.mrf.mxu0  ;;  %v17386_v15 = vld [vmem:[%s24684_s7 + $0x628] ss:$16 sps:$4 sm:$0xff]  }
 0x4de   :  { %7556 = vst.msk [vmem:[#allocation4 + $0x38] sm:$0xff] %vm21669_vm7, %v16250_v2  ;;  %v7328_v19 = vmax.f32 %v7272_v45, 0.0  ;;  %v7198_v35 = vadd.f32 %v7130_v6, %v21866_v21  ;;  %v22047_v48 = vpack.c.bf16 %v7322_v60, %v7318_v33  ;;  %v7199_v60 = vadd.f32 %v7031_v55, %v21869_v17  ;;  %v25273_v6 = vld [vmem:[#allocation151_spill] sm:$0xff] }
 0x4df   :  { %v7275_v46 = vadd.f32 %v21817_v7, %v7197_v27  ;;  %v7134_v1 = vpop.f32.mrf.mxu1  ;;  %v16251_v50 = vpack.c.bf16 %v7326_v25, %v7325_v36  ;;  %v7274_v34 = vadd.f32 %v21820_v8, %v7196_v61  ;;  %v7329_v33 = vmax.f32 %v7273_v49, 0.0  ;;  %v7033_v2 = vpop.f32.mrf.mxu0 }
 0x4e0   :  { %v16252_v21 = vpack.c.bf16 %v7328_v19, %v7327_v10  ;;  %v7276_v59 = vadd.f32 %v21823_v13, %v7198_v35  ;;  %v7201_v39 = vadd.f32 %v7134_v1, %v21876_v54  ;;  %8609 = vmatprep.mubr.bf16.mxu0 %v22047_v48  ;;  %v7200_v27 = vadd.f32 %v7033_v2, %v21879_v58  ;;  %v25274_v54 = vld [vmem:[#allocation65_spill] sm:$0xff]  ;;  %v17378_v58 = vld [vmem:[%s24684_s7 + $0x648] ss:$16 sps:$4 sm:$0xff]  }
 0x4e1   :  { %v7331_v31 = vmax.f32 %v7275_v46, 0.0  ;;  %v7136_v45 = vpop.f32.mrf.mxu1  ;;  %7557 = vst [vmem:[#allocation4 + $0x40] sm:$0xff] %v16251_v50  ;;  %v7330_v10 = vmax.f32 %v7274_v34, 0.0  ;;  %8610 = vmatmul.mubr.bf16.vlgmr.msra.gmra.mxu0 %v22045_v52  ;;  %v22071_v17 = vadd.f32 %v21873_v9, %v25273_v6  ;;  %v22075_v19 = vadd.f32 %v21899_v12, %v25274_v54  ;;  %v7035_v49 = vpop.f32.mrf.mxu0  ;;  %v17366_v6 = vld [vmem:[%s24684_s7 + $0x44c] ss:$16 sps:$4 sm:$0xff]  }
 0x4e2   :  { %7558 = vst.msk [vmem:[#allocation4 + $0x48] sm:$0xff] %vm21669_vm7, %v16252_v21  ;;  %v7332_v4 = vmax.f32 %v7276_v59, 0.0  ;;  %v7202_v40 = vadd.f32 %v7136_v45, %v21882_v51  ;;  %v22078_v61 = vadd.f32 %v21809_v23, %v7199_v60  ;;  %v7279_v35 = vadd.f32 %v21817_v7, %v7201_v39  ;;  %8887 = vmatpush1.bf16.msra.mxu0 %v17372_v5  ;;  %v17388_v54 = vld [vmem:[%s24684_s7 + $0x62c] ss:$16 sps:$4 sm:$0xff]  }
 0x4e3   :  { %v7138_v46 = vpop.f32.mrf.mxu1  ;;  %v16253_v51 = vpack.c.bf16 %v7330_v10, %v7329_v33  ;;  %v22085_v9 = vadd.f32 %v21820_v8, %v7200_v27  ;;  %8888 = vmatprep.subr.bf16.mxu0 %v17380_v14  ;;  %v7203_v21 = vadd.f32 %v7035_v49, %v21885_v22  ;;  %v7037_v5 = vpop.f32.mrf.mxu0  ;;  %v17361_v22 = vld [vmem:[%s24684_s7 + $0x468] ss:$16 sps:$4 sm:$0xff]  }
 0x4e4   :  { %v16254_v55 = vpack.c.bf16 %v7332_v4, %v7331_v31  ;;  %v7280_v12 = vadd.f32 %v21823_v13, %v7202_v40  ;;  %v7333_v1 = vmax.f32 %v22078_v61, 0.0  ;;  %v7335_v50 = vmax.f32 %v7279_v35, 0.0 }
 0x4e5   :  { %v7205_v34 = vadd.f32 %v7138_v46, %v21888_v44  ;;  %v7140_v59 = vpop.f32.mrf.mxu1  ;;  %v22091_v60 = vld [vmem:[#allocation4 + $0x28] ss:$16 sps:$4 sm:$0xff]   ;;  %7559 = vst [vmem:[#allocation4 + $0x50] sm:$0xff] %v16253_v51  ;;  %v7334_v31 = vmax.f32 %v22085_v9, 0.0  ;;  %v7204_v14 = vadd.f32 %v7037_v5, %v21891_v63  ;;  %v22098_v45 = vld [vmem:[#allocation4 + $0x2c] ss:$16 sps:$4 sm:$0xff]   ;;  %v22104_v44 = vadd.f32 %v21809_v23, %v7203_v21  ;;  %v7041_v27 = vpop.f32.mrf.mxu0 }
 0x4e6   :  { %7560 = vst.msk [vmem:[#allocation4 + $0x58] sm:$0xff] %vm21669_vm7, %v16254_v55  ;;  %v7336_v39 = vmax.f32 %v7280_v12, 0.0  ;;  %v7206_v2 = vadd.f32 %v7140_v59, %v21894_v11  ;;  %v22112_v63 = vpack.c.bf16 %v7329_v33, %v7325_v36  ;;  %v22116_v11 = vpack.c.bf16 %v7330_v10, %v7326_v25  ;;  %8889 = vmatpush1.bf16.msra.mxu0 %v17378_v58  ;;  %v17394_v55 = vld [vmem:[%s24684_s7 + $0x60c] ss:$16 sps:$4 sm:$0xff]   ;;  %v17364_v21 = vld [vmem:[%s24684_s7 + $0x448] ss:$16 sps:$4 sm:$0xff]  }
 0x4e7   :  { %v7283_v4 = vadd.f32 %v21817_v7, %v7205_v34  ;;  %v7144_v40 = vpop.f32.mrf.mxu1  ;;  %v16255_v35 = vpack.c.bf16 %v7334_v31, %v7333_v1  ;;  %v22126_v46 = vadd.f32 %v21820_v8, %v7204_v14  ;;  %15222 = vmatprep.mubr.msk.bf16.mxu1 %vm8555_vm8, %v22098_v45  ;;  %v7337_v36 = vmax.f32 %v22104_v44, 0.0  ;;  %v7043_v58 = vpop.f32.mrf.mxu0  ;;  %v25275_v34 = vld [vmem:[#allocation66_spill] sm:$0xff]  ;;  %8890 = vmatprep.subr.bf16.mxu0 %v17388_v54 }
 0x4e8   :  { %v16256_v49 = vpack.c.bf16 %v7336_v39, %v7335_v50  ;;  %v7284_v18 = vadd.f32 %v21823_v13, %v7206_v2  ;;  %v7207_v33 = vadd.f32 %v7041_v27, %v21897_v24  ;;  %v7209_v10 = vadd.f32 %v7144_v40, %v21904_v56  ;;  %8713 = vmatmul.mubr.bf16.vlgmr.msra.gmra.mxu1 %v22091_v60  ;;  %v17392_v27 = vld [vmem:[%s24684_s7 + $0x608] ss:$16 sps:$4 sm:$0xff]   ;;  %v17402_v40 = vld [vmem:[%s24684_s7 + $0x5ec] ss:$16 sps:$4 sm:$0xff]  }
 0x4e9   :  { %v7339_v25 = vmax.f32 %v7283_v4, 0.0  ;;  %v7146_v51 = vpop.f32.mrf.mxu1  ;;  %8619 = vmatprep.mubr.bf16.mxu0 %v22116_v11  ;;  %7561 = vst [vmem:[#allocation4 + $0x60] sm:$0xff] %v16255_v35  ;;  %v7338_v12 = vmax.f32 %v22126_v46, 0.0  ;;  %v7208_v24 = vadd.f32 %v7043_v58, %v21907_v32  ;;  %8784 = vmatpush1.bf16.msra.mxu1 %v17361_v22  ;;  %v22153_v5 = vadd.f32 %v21901_v37, %v25275_v34  ;;  %v7045_v14 = vpop.f32.mrf.mxu0  ;;  %v17406_v9 = vld [vmem:[%s24684_s7 + $0x5c8] ss:$16 sps:$4 sm:$0xff]  }
 0x4ea   :  { %7562 = vst.msk [vmem:[#allocation4 + $0x68] sm:$0xff] %vm21669_vm7, %v16256_v49  ;;  %v7340_v50 = vmax.f32 %v7284_v18, 0.0  ;;  %v7210_v56 = vadd.f32 %v7146_v51, %v21910_v43  ;;  %8620 = vmatmul.mubr.bf16.gmra.mxu0 %v22112_v63  ;;  %v22156_v59 = vadd.f32 %v21809_v23, %v7207_v33  ;;  %v7287_v39 = vadd.f32 %v21817_v7, %v7209_v10  ;;  %v17371_v43 = vld [vmem:[%s24684_s7 + $0x42c] ss:$16 sps:$4 sm:$0xff]  }
 0x4eb   :  { %v7148_v32 = vpop.f32.mrf.mxu1  ;;  %8785 = vmatprep.subr.bf16.mxu1 %v17366_v6  ;;  %v16257_v2 = vpack.c.bf16 %v7338_v12, %v7337_v36  ;;  %v22167_v22 = vadd.f32 %v21820_v8, %v7208_v24  ;;  %8891 = vmatpush1.bf16.msra.mxu0 %v17386_v15  ;;  %v7211_v35 = vadd.f32 %v7045_v14, %v21913_v30  ;;  %v7047_v18 = vpop.f32.mrf.mxu0  ;;  %v7726_v30 = vld [vmem:[#allocation4 + $0x48] sm:$0xff] }
 0x4ec   :  { %v16258_v37 = vpack.c.bf16 %v7340_v50, %v7339_v25  ;;  %v7288_v4 = vadd.f32 %v21823_v13, %v7210_v56  ;;  %v7341_v6 = vmax.f32 %v22156_v59, 0.0  ;;  %v7343_v54 = vmax.f32 %v7287_v39, 0.0  ;;  %8892 = vmatprep.subr.bf16.mxu0 %v17394_v55 }
 0x4ed   :  { %v7213_v49 = vadd.f32 %v7148_v32, %v21916_v42  ;;  %v7150_v25 = vpop.f32.mrf.mxu1  ;;  %v7728_v33 = vld [vmem:[#allocation4 + $0x58] sm:$0xff]  ;;  %7563 = vst [vmem:[#allocation4 + $0x70] sm:$0xff] %v16257_v2  ;;  %v7342_v15 = vmax.f32 %v22167_v22, 0.0  ;;  %v7212_v51 = vadd.f32 %v7047_v18, %v21919_v57  ;;  %8786 = vmatpush1.bf16.msra.mxu1 %v17364_v21  ;;  %v22190_v24 = vadd.f32 %v21809_v23, %v7211_v35  ;;  %v7051_v56 = vpop.f32.mrf.mxu0 }
 0x4ee   :  { %v22179_v10 = vld [vmem:[#allocation4 + $0x4c] ss:$16 sps:$4 sm:$0xff]   ;;  %7564 = vst.msk [vmem:[#allocation4 + $0x78] sm:$0xff] %vm21669_vm7, %v16258_v37  ;;  %v7344_v58 = vmax.f32 %v7288_v4, 0.0  ;;  %v7214_v50 = vadd.f32 %v7150_v25, %v21922_v41  ;;  %v17369_v42 = vld [vmem:[%s24684_s7 + $0x428] ss:$16 sps:$4 sm:$0xff]   ;;  %8787 = vmatprep.subr.bf16.mxu1 %v17371_v43  ;;  %v22195_v57 = vcombine.low %v7726_v30, %v7728_v33 }
 0x4ef   :  { %v7291_v55 = vadd.f32 %v21817_v7, %v7213_v49  ;;  %v7154_v34 = vpop.f32.mrf.mxu1  ;;  %15223 = vmatprep.mubr.msk.bf16.mxu1 %vm8555_vm8, %v22179_v10  ;;  %v17377_v41 = vld [vmem:[%s24684_s7 + $0x40c] ss:$16 sps:$4 sm:$0xff]   ;;  %v16259_v21 = vpack.c.bf16 %v7342_v15, %v7341_v6  ;;  %v22205_v14 = vadd.f32 %v21820_v8, %v7212_v51  ;;  %8893 = vmatpush1.bf16.msra.mxu0 %v17392_v27  ;;  %v17400_v43 = vld [vmem:[%s24684_s7 + $0x5e8] ss:$16 sps:$4 sm:$0xff]   ;;  %v7345_v2 = vmax.f32 %v22190_v24, 0.0  ;;  %v25276_v4 = vld [vmem:[#allocation73_spill] sm:$0xff]  ;;  %v7053_v18 = vpop.f32.mrf.mxu0 }
 0x4f0   :  { %v16260_v39 = vpack.c.bf16 %v7344_v58, %v7343_v54  ;;  %v7292_v32 = vadd.f32 %v21823_v13, %v7214_v50  ;;  %v7215_v35 = vadd.f32 %v7051_v56, %v25276_v4  ;;  %v7217_v49 = vadd.f32 %v7154_v34, %v21928_v20  ;;  %8723 = vmatmul.mubr.bf16.gmra.mxu1 %v22195_v57  ;;  %v17408_v27 = vld [vmem:[%s24684_s7 + $0x5cc] ss:$16 sps:$4 sm:$0xff]   ;;  %v25277_v58 = vld [vmem:[#allocation157_spill] sm:$0xff]  ;;  %v17421_v22 = vld [vmem:[%s24684_s7 + $0x588] ss:$16 sps:$4 sm:$0xff]  }
 0x4f1   :  { %v7347_v37 = vmax.f32 %v7291_v55, 0.0  ;;  %v7156_v25 = vpop.f32.mrf.mxu1  ;;  %8894 = vmatprep.subr.bf16.mxu0 %v17402_v40  ;;  %7565 = vst [vmem:[#allocation4 + $0x80] sm:$0xff] %v16259_v21  ;;  %v7346_v54 = vmax.f32 %v22205_v14, 0.0  ;;  %v7216_v51 = vadd.f32 %v7053_v18, %v25277_v58  ;;  %v25278_v50 = vld [vmem:[#allocation74_spill] sm:$0xff]  ;;  %8788 = vmatpush1.bf16.msra.mxu1 %v17369_v42  ;;  %v7055_v56 = vpop.f32.mrf.mxu0  ;;  %v22234_v21 = vpack.c.bf16 %v7337_v36, %v7333_v1 }
 0x4f2   :  { %7566 = vst.msk [vmem:[#allocation4 + $0x88] sm:$0xff] %vm21669_vm7, %v16260_v39  ;;  %v7348_v33 = vmax.f32 %v7292_v32, 0.0  ;;  %v7218_v20 = vadd.f32 %v7156_v25, %v25278_v50  ;;  %v17375_v40 = vld [vmem:[%s24684_s7 + $0x408] ss:$16 sps:$4 sm:$0xff]   ;;  %v22227_v30 = vadd.f32 %v21809_v23, %v7215_v35  ;;  %v7295_v55 = vadd.f32 %v21817_v7, %v7217_v49  ;;  %8789 = vmatprep.subr.bf16.mxu1 %v17377_v41  ;;  %v17385_v39 = vld [vmem:[%s24684_s7 + $0x3ec] ss:$16 sps:$4 sm:$0xff]  }
 0x4f3   :  { %v7158_v34 = vpop.f32.mrf.mxu1  ;;  %v22240_v42 = vpack.c.bf16 %v7338_v12, %v7334_v31  ;;  %v16261_v41 = vpack.c.bf16 %v7346_v54, %v7345_v2  ;;  %v22250_v44 = vadd.f32 %v21820_v8, %v7216_v51  ;;  %8895 = vmatpush1.bf16.msra.mxu0 %v17400_v43  ;;  %v17416_v31 = vld [vmem:[%s24684_s7 + $0x5ac] ss:$16 sps:$4 sm:$0xff]   ;;  %v7057_v35 = vpop.f32.mrf.mxu0  ;;  %v25281_v51 = vld [vmem:[#allocation159_spill] sm:$0xff] }
 0x4f4   :  { %v16262_v61 = vpack.c.bf16 %v7348_v33, %v7347_v37  ;;  %v7296_v1 = vadd.f32 %v21823_v13, %v7218_v20  ;;  %v7349_v46 = vmax.f32 %v22227_v30, 0.0  ;;  %v7351_v36 = vmax.f32 %v7295_v55, 0.0  ;;  %v25279_v12 = vld [vmem:[#allocation158_spill] sm:$0xff]  ;;  %v25280_v37 = vld [vmem:[#allocation75_spill] sm:$0xff]  ;;  %8896 = vmatprep.subr.bf16.mxu0 %v17408_v27 }
 0x4f5   :  { %v7219_v32 = vadd.f32 %v7055_v56, %v25279_v12  ;;  %v7221_v4 = vadd.f32 %v7158_v34, %v25280_v37  ;;  %v7160_v49 = vpop.f32.mrf.mxu1  ;;  %8629 = vmatprep.mubr.bf16.mxu0 %v22240_v42  ;;  %v7732_v43 = vld [vmem:[#allocation4 + $0x78] sm:$0xff]  ;;  %7567 = vst [vmem:[#allocation4 + $0x90] sm:$0xff] %v16261_v41  ;;  %v24704_v25 = vmax.f32 %v22250_v44, 0.0  ;;  %v7220_v58 = vadd.f32 %v7057_v35, %v21945_v28  ;;  %v7730_v20 = vld [vmem:[#allocation4 + $0x68] sm:$0xff]  ;;  %v7061_v34 = vpop.f32.mrf.mxu0 }
 0x4f6   :  { %v22263_v18 = vld [vmem:[#allocation4 + $0x6c] ss:$16 sps:$4 sm:$0xff]   ;;  %7568 = vst.msk [vmem:[#allocation4 + $0x98] sm:$0xff] %vm21669_vm7, %v16262_v61  ;;  %v7352_v33 = vmax.f32 %v7296_v1, 0.0  ;;  %v7222_v50 = vadd.f32 %v7160_v49, %v25281_v51  ;;  %8790 = vmatpush1.bf16.msra.mxu1 %v17375_v40  ;;  %v17383_v55 = vld [vmem:[%s24684_s7 + $0x3e8] ss:$16 sps:$4 sm:$0xff]   ;;  %8630 = vmatmul.mubr.bf16.gmra.mxu0 %v22234_v21  ;;  %v22280_v28 = vcombine.low %v7730_v20, %v7732_v43 }
 0x4f7   :  { %v22275_v27 = vadd.f32 %v21809_v23, %v7219_v32  ;;  %v7299_v56 = vadd.f32 %v21817_v7, %v7221_v4  ;;  %v7164_v41 = vpop.f32.mrf.mxu1  ;;  %15224 = vmatprep.mubr.msk.bf16.mxu1 %vm8555_vm8, %v22263_v18  ;;  %8791 = vmatprep.subr.bf16.mxu1 %v17385_v39  ;;  %v17391_v40 = vld [vmem:[%s24684_s7 + $0x3cc] ss:$16 sps:$4 sm:$0xff]   ;;  %v16263_v61 = vpack.c.bf16 %v24704_v25, %v7349_v46  ;;  %v17414_v39 = vld [vmem:[%s24684_s7 + $0x5a8] ss:$16 sps:$4 sm:$0xff]   ;;  %v7063_v20 = vpop.f32.mrf.mxu0 }
 0x4f8   :  { %v16264_v1 = vpack.c.bf16 %v7352_v33, %v7351_v36  ;;  %v22290_v12 = vadd.f32 %v21820_v8, %v7220_v58  ;;  %v7300_v32 = vadd.f32 %v21823_v13, %v7222_v50  ;;  %8897 = vmatpush1.bf16.msra.mxu0 %v17406_v9  ;;  %v25282_v35 = vld [vmem:[#allocation76_spill] sm:$0xff]  ;;  %8733 = vmatmul.mubr.bf16.gmra.mxu1 %v22280_v28  ;;  %v25284_v58 = vld [vmem:[#allocation77_spill] sm:$0xff] }
 0x4f9   :  { %v7353_v37 = vmax.f32 %v22275_v27, 0.0  ;;  %v7355_v4 = vmax.f32 %v7299_v56, 0.0  ;;  %v7223_v49 = vadd.f32 %v7061_v34, %v25282_v35  ;;  %v25283_v43 = vld [vmem:[#allocation160_spill] sm:$0xff]  ;;  %v7166_v25 = vpop.f32.mrf.mxu1  ;;  %8898 = vmatprep.subr.bf16.mxu0 %v17416_v31  ;;  %7569 = vst [vmem:[#allocation4 + $0xa0] sm:$0xff] %v16263_v61  ;;  %v7224_v50 = vadd.f32 %v7063_v20, %v25284_v58  ;;  %v7065_v61 = vpop.f32.mrf.mxu0  ;;  %v25285_v20 = vld [vmem:[#allocation78_spill] sm:$0xff] }
 0x4fa   :  { %v7225_v51 = vadd.f32 %v7164_v41, %v25283_v43  ;;  %v17423_v9 = vld [vmem:[%s24684_s7 + $0x58c] ss:$16 sps:$4 sm:$0xff]   ;;  %7570 = vst.msk [vmem:[#allocation4 + $0xa8] sm:$0xff] %vm21669_vm7, %v16264_v1  ;;  %v7354_v36 = vmax.f32 %v22290_v12, 0.0  ;;  %v7356_v33 = vmax.f32 %v7300_v32, 0.0  ;;  %v7226_v56 = vadd.f32 %v7166_v25, %v21969_v47  ;;  %8792 = vmatpush1.bf16.msra.mxu1 %v17383_v55 }
 0x4fb   :  { %v17389_v31 = vld [vmem:[%s24684_s7 + $0x3c8] ss:$16 sps:$4 sm:$0xff]   ;;  %v22312_v34 = vadd.f32 %v21809_v23, %v7223_v49  ;;  %v7168_v35 = vpop.f32.mrf.mxu1  ;;  %8793 = vmatprep.subr.bf16.mxu1 %v17391_v40  ;;  %v22319_v1 = vpack.c.bf16 %v7345_v2, %v7341_v6  ;;  %v22325_v47 = vpack.c.bf16 %v7346_v54, %v7342_v15  ;;  %v17399_v25 = vld [vmem:[%s24684_s7 + $0x3ac] ss:$16 sps:$4 sm:$0xff]   ;;  %v22335_v24 = vadd.f32 %v21820_v8, %v7224_v50  ;;  %v7067_v32 = vpop.f32.mrf.mxu0 }
 0x4fc   :  { %v7303_v41 = vadd.f32 %v21817_v7, %v7225_v51  ;;  %v16265_v55 = vpack.c.bf16 %v7354_v36, %v7353_v37  ;;  %v16266_v59 = vpack.c.bf16 %v7356_v33, %v7355_v4  ;;  %v7304_v6 = vadd.f32 %v21823_v13, %v7226_v56  ;;  %8899 = vmatpush1.bf16.msra.mxu0 %v17414_v39  ;;  %v17431_v15 = vld [vmem:[%s24684_s7 + $0x6ec] ss:$16 sps:$4 sm:$0xff]   ;;  %v17397_v58 = vld [vmem:[%s24684_s7 + $0x3a8] ss:$16 sps:$4 sm:$0xff]  }
 0x4fd   :  { %v7357_v14 = vmax.f32 %v22312_v34, 0.0  ;;  %v7227_v54 = vadd.f32 %v7065_v61, %v21973_v26  ;;  %v7229_v40 = vadd.f32 %v7168_v35, %v21977_v16  ;;  %v7170_v4 = vpop.f32.mrf.mxu1  ;;  %8639 = vmatprep.mubr.bf16.mxu0 %v22325_v47  ;;  %v7736_v39 = vld [vmem:[#allocation4 + $0x98] sm:$0xff]  ;;  %8900 = vmatprep.subr.bf16.mxu0 %v17423_v9  ;;  %v7358_v43 = vmax.f32 %v22335_v24, 0.0  ;;  %v7734_v16 = vld [vmem:[#allocation4 + $0x88] sm:$0xff]  ;;  %v7071_v56 = vpop.f32.mrf.mxu0 }
 0x4fe   :  { %v7359_v2 = vmax.f32 %v7303_v41, 0.0  ;;  %v22348_v49 = vld [vmem:[#allocation4 + $0x8c] ss:$16 sps:$4 sm:$0xff]   ;;  %7571 = vst [vmem:[#allocation4 + $0xb0] sm:$0xff] %v16265_v55  ;;  %7572 = vst.msk [vmem:[#allocation4 + $0xb8] sm:$0xff] %vm21669_vm7, %v16266_v59  ;;  %v7360_v51 = vmax.f32 %v7304_v6, 0.0  ;;  %v7228_v33 = vadd.f32 %v7067_v32, %v25285_v20  ;;  %v7230_v26 = vadd.f32 %v7170_v4, %v21985_v62  ;;  %8794 = vmatpush1.bf16.msra.mxu1 %v17389_v31 }
 0x4ff   :  { %8640 = vmatmul.mubr.bf16.gmra.mxu0 %v22319_v1  ;;  %v22360_v9 = vadd.f32 %v21809_v23, %v7227_v54  ;;  %v7307_v50 = vadd.f32 %v21817_v7, %v7229_v40  ;;  %v7174_v41 = vpop.f32.mrf.mxu1  ;;  %15225 = vmatprep.mubr.msk.bf16.mxu1 %vm8555_vm8, %v22348_v49  ;;  %v22365_v62 = vcombine.low %v7734_v16, %v7736_v39  ;;  %v17405_v31 = vld [vmem:[%s24684_s7 + $0x38c] ss:$16 sps:$4 sm:$0xff]   ;;  %v25286_v40 = vld [vmem:[#allocation79_spill] sm:$0xff]  ;;  %v7073_v39 = vpop.f32.mrf.mxu0  ;;  %v17418_v24 = vld [vmem:[%s24684_s7 + $0x548] ss:$16 sps:$4 sm:$0xff]  }
 0x500   :  { %8795 = vmatprep.subr.bf16.mxu1 %v17399_v25  ;;  %v16267_v61 = vpack.c.bf16 %v7358_v43, %v7357_v14  ;;  %v16268_v35 = vpack.c.bf16 %v7360_v51, %v7359_v2  ;;  %v22375_v55 = vadd.f32 %v21820_v8, %v7228_v33  ;;  %v7308_v59 = vadd.f32 %v21823_v13, %v7230_v26  ;;  %v17429_v25 = vld [vmem:[%s24684_s7 + $0x6e8] ss:$16 sps:$4 sm:$0xff]   ;;  %v17453_v34 = vld [vmem:[%s24684_s7 + $0x68c] ss:$16 sps:$4 sm:$0xff]  }
 0x501   :  { %8901 = vmatpush1.bf16.msra.mxu0 %v17421_v22  ;;  %v7361_v6 = vmax.f32 %v22360_v9, 0.0  ;;  %v7363_v54 = vmax.f32 %v7307_v50, 0.0  ;;  %v7231_v32 = vadd.f32 %v7071_v56, %v25286_v40  ;;  %v7233_v4 = vadd.f32 %v7174_v41, %v22003_v29  ;;  %v7176_v20 = vpop.f32.mrf.mxu1  ;;  %8743 = vmatmul.mubr.bf16.gmra.mxu1 %v22365_v62  ;;  %v17438_v22 = vld [vmem:[%s24684_s7 + $0x6cc] ss:$16 sps:$4 sm:$0xff]   ;;  %v7075_v9 = vpop.f32.mrf.mxu0 }
 0x502   :  { %8910 = vmatprep.subr.bf16.mxu0 %v17431_v15  ;;  %7573 = vst [vmem:[#allocation4 + $0xc0] sm:$0xff] %v16267_v61  ;;  %7574 = vst.msk [vmem:[#allocation4 + $0xc8] sm:$0xff] %vm21669_vm7, %v16268_v35  ;;  %v7362_v2 = vmax.f32 %v22375_v55, 0.0  ;;  %v7364_v51 = vmax.f32 %v7308_v59, 0.0  ;;  %v7232_v33 = vadd.f32 %v7073_v39, %v22007_v3  ;;  %v7234_v29 = vadd.f32 %v7176_v20, %v22021_v53  ;;  %v17403_v15 = vld [vmem:[%s24684_s7 + $0x388] ss:$16 sps:$4 sm:$0xff]  }
 0x503   :  { %8796 = vmatpush1.bf16.msra.mxu1 %v17397_v58  ;;  %v22397_v26 = vadd.f32 %v21809_v23, %v7231_v32  ;;  %v7311_v16 = vadd.f32 %v21817_v7, %v7233_v4  ;;  %v7178_v50 = vpop.f32.mrf.mxu1  ;;  %v22404_v3 = vpack.c.bf16 %v7353_v37, %v7349_v46  ;;  %v25287_v53 = vmax.f32 %v22250_v44, 0.0  ;;  %v17413_v56 = vld [vmem:[%s24684_s7 + $0x56c] ss:$16 sps:$4 sm:$0xff]   ;;  %v17436_v44 = vld [vmem:[%s24684_s7 + $0x6c8] ss:$16 sps:$4 sm:$0xff]   ;;  %v7077_v35 = vpop.f32.mrf.mxu0 }
 0x504   :  { %8797 = vmatprep.subr.bf16.mxu1 %v17405_v31  ;;  %v16269_v41 = vpack.c.bf16 %v7362_v2, %v7361_v6  ;;  %v16270_v61 = vpack.c.bf16 %v7364_v51, %v7363_v54  ;;  %v22416_v31 = vadd.f32 %v21820_v8, %v7232_v33  ;;  %v7312_v30 = vadd.f32 %v21823_v13, %v7234_v29  ;;  %v17446_v46 = vld [vmem:[%s24684_s7 + $0x6ac] ss:$16 sps:$4 sm:$0xff]  }
 0x505   :  { %v22410_v58 = vpack.c.bf16 %v7354_v36, %v25287_v53  ;;  %8911 = vmatpush2.bf16.msra.mxu0 %v17429_v25  ;;  %v7365_v27 = vmax.f32 %v22397_v26, 0.0  ;;  %v7367_v12 = vmax.f32 %v7311_v16, 0.0  ;;  %v7235_v37 = vadd.f32 %v7075_v9, %v22025_v38  ;;  %v7180_v55 = vpop.f32.mrf.mxu1  ;;  %v22429_v59 = vld [vmem:[#allocation4 + $0xac] ss:$16 sps:$4 sm:$0xff]   ;;  %v22440_v32 = vld [vmem:[#allocation4 + $0xa8] ss:$16 sps:$4 sm:$0xff]  }
 0x506   :  { %v7237_v36 = vadd.f32 %v7178_v50, %v22071_v17  ;;  %8912 = vmatprep.subr.bf16.mxu0 %v17438_v22  ;;  %7575 = vst [vmem:[#allocation4 + $0xd0] sm:$0xff] %v16269_v41  ;;  %7576 = vst.msk [vmem:[#allocation4 + $0xd8] sm:$0xff] %vm21669_vm7, %v16270_v61  ;;  %v7366_v25 = vmax.f32 %v22416_v31, 0.0  ;;  %v7368_v54 = vmax.f32 %v7312_v30, 0.0  ;;  %v7236_v40 = vadd.f32 %v7077_v35, %v22075_v19  ;;  %v17411_v17 = vld [vmem:[%s24684_s7 + $0x568] ss:$16 sps:$4 sm:$0xff]  }
 0x507   :  { %8649 = vmatprep.mubr.bf16.mxu0 %v22410_v58  ;;  %v7238_v38 = vadd.f32 %v7180_v55, %v22153_v5  ;;  %8798 = vmatpush1.bf16.msra.mxu1 %v17403_v15  ;;  %v7313_v4 = vadd.f32 %v21809_v23, %v7235_v37  ;;  %v17420_v19 = vld [vmem:[%s24684_s7 + $0x54c] ss:$16 sps:$4 sm:$0xff]   ;;  %v22451_v5 = vpack.c.bf16 %v7361_v6, %v7357_v14  ;;  %v17451_v15 = vld [vmem:[%s24684_s7 + $0x688] ss:$16 sps:$4 sm:$0xff]   ;;  %v17459_v26 = vld [vmem:[%s24684_s7 + $0xe4] ss:$16 sps:$4 sm:$0xff]  }
 0x508   :  { %8650 = vmatmul.mubr.bf16.gmra.mxu0 %v22404_v3  ;;  %v7315_v39 = vadd.f32 %v21817_v7, %v7237_v36  ;;  %15226 = vmatprep.mubr.msk.bf16.mxu1 %vm8555_vm8, %v22429_v59  ;;  %v16271_v20 = vpack.c.bf16 %v7366_v25, %v7365_v27  ;;  %v16272_v22 = vpack.c.bf16 %v7368_v54, %v7367_v12  ;;  %v17444_v7 = vld [vmem:[%s24684_s7 + $0x6a8] ss:$16 sps:$4 sm:$0xff]   ;;  %v17443_v61 = vld [vmem:[%s24684_s7 + $0x4ec] ss:$16 sps:$4 sm:$0xff]   ;;  %v17457_v37 = vld [vmem:[%s24684_s7 + $0xe0] ss:$16 sps:$4 sm:$0xff]  }
 0x509   :  { %8799 = vmatprep.subr.bf16.mxu1 %v17413_v56  ;;  %v7314_v51 = vadd.f32 %v21820_v8, %v7236_v40  ;;  %v7316_v23 = vadd.f32 %v21823_v13, %v7238_v38  ;;  %8913 = vmatpush2.bf16.msra.mxu0 %v17436_v44  ;;  %v22461_v33 = vpack.c.bf16 %v7362_v2, %v7358_v43  ;;  %v7369_v13 = vmax.f32 %v7313_v4, 0.0  ;;  %v17428_v43 = vld [vmem:[%s24684_s7 + $0x52c] ss:$16 sps:$4 sm:$0xff]   ;;  %v17426_v50 = vld [vmem:[%s24684_s7 + $0x528] ss:$16 sps:$4 sm:$0xff]  }
 0x50a   :  { %8753 = vmatmul.mubr.bf16.gmra.mxu1 %v22440_v32  ;;  %8914 = vmatprep.subr.bf16.mxu0 %v17446_v46  ;;  %7577 = vst [vmem:[#allocation4 + $0xe0] sm:$0xff] %v16271_v20  ;;  %7578 = vst.msk [vmem:[#allocation4 + $0xe8] sm:$0xff] %vm21669_vm7, %v16272_v22  ;;  %v7371_v8 = vmax.f32 %v7315_v39, 0.0  ;;  %v17433_v41 = vld [vmem:[%s24684_s7 + $0x508] ss:$16 sps:$4 sm:$0xff]  }
 0x50b   :  { %v7370_v14 = vmax.f32 %v7314_v51, 0.0  ;;  %v7372_v6 = vmax.f32 %v7316_v23, 0.0  ;;  %8800 = vmatpush2.bf16.msra.mxu1 %v17411_v17  ;;  %8659 = vmatprep.mubr.bf16.mxu0 %v22461_v33  ;;  %v22491_v53 = vpack.c.bf16 %v7369_v13, %v7365_v27  ;;  %v17441_v44 = vld [vmem:[%s24684_s7 + $0x4e8] ss:$16 sps:$4 sm:$0xff]   ;;  %v17450_v46 = vld [vmem:[%s24684_s7 + $0x4cc] ss:$16 sps:$4 sm:$0xff]  }
 0x50c   :  { %8801 = vmatprep.subr.bf16.mxu1 %v17420_v19  ;;  %v17448_v27 = vld [vmem:[%s24684_s7 + $0x4c8] ss:$16 sps:$4 sm:$0xff]   ;;  %v17456_v12 = vld [vmem:[%s24684_s7 + $0x4ac] ss:$16 sps:$4 sm:$0xff]   ;;  %v17463_v35 = vld [vmem:[%s24684_s7 + $0xc0] ss:$16 sps:$4 sm:$0xff]  }
 0x50d   :  { %v16273_v2 = vpack.c.bf16 %v7370_v14, %v7369_v13  ;;  %v16274_v29 = vpack.c.bf16 %v7372_v6, %v7371_v8  ;;  %8915 = vmatpush2.bf16.msra.mxu0 %v17444_v7  ;;  %v22481_v16 = vld [vmem:[#allocation4 + $0xcc] ss:$16 sps:$4 sm:$0xff]   ;;  %v22483_v9 = vld [vmem:[#allocation4 + $0xc8] ss:$16 sps:$4 sm:$0xff]   ;;  %v22493_v56 = vpack.c.bf16 %v7370_v14, %v7366_v25  ;;  %v17468_v55 = vld [vmem:[%s24684_s7 + $0xa4] ss:$16 sps:$4 sm:$0xff]  }
 0x50e   :  { %8916 = vmatprep.subr.bf16.mxu0 %v17453_v34  ;;  %15227 = vmatprep.mubr.msk.bf16.mxu1 %vm8555_vm8, %v22481_v16  ;;  %v17462_v36 = vld [vmem:[%s24684_s7 + $0x48c] ss:$16 sps:$4 sm:$0xff]   ;;  %v17466_v25 = vld [vmem:[%s24684_s7 + $0xa0] ss:$16 sps:$4 sm:$0xff]   ;;  %v17474_v54 = vld [vmem:[%s24684_s7 + $0x84] ss:$16 sps:$4 sm:$0xff]  }
 0x50f   :  { %7579 = vst [vmem:[#allocation4 + $0xf0] sm:$0xff] %v16273_v2  ;;  %7580 = vst.msk [vmem:[#allocation4 + $0xf8] sm:$0xff] %vm21669_vm7, %v16274_v29  ;;  %8802 = vmatpush2.bf16.msra.mxu1 %v17418_v24  ;;  %v17469_v40 = vld [vmem:[%s24684_s7 + $0x2e0] ss:$16 sps:$4 sm:$0xff]   ;;  %v17477_v17 = vld [vmem:[%s24684_s7 + $0x2c4] ss:$16 sps:$4 sm:$0xff]  }
 0x510   :  { %8660 = vmatmul.mubr.bf16.gmra.mxu0 %v22451_v5  ;;  %8803 = vmatprep.subr.bf16.mxu1 %v17428_v43  ;;  %v17472_v38 = vld [vmem:[%s24684_s7 + $0x80] ss:$16 sps:$4 sm:$0xff]   ;;  %v17480_v4 = vld [vmem:[%s24684_s7 + $0x64] ss:$16 sps:$4 sm:$0xff]  }
 0x511   :  { %8669 = vmatprep.mubr.bf16.mxu0 %v22493_v56  ;;  %8917 = vmatpush2.bf16.msra.mxu0 %v17451_v15  ;;  %v17483_v39 = vld [vmem:[%s24684_s7 + $0x2a4] ss:$16 sps:$4 sm:$0xff]   ;;  %v17484_v19 = vld [vmem:[%s24684_s7 + $0x40] ss:$16 sps:$4 sm:$0xff]  }
 0x512   :  { %8763 = vmatmul.mubr.bf16.gmra.mxu1 %v22483_v9  ;;  %9703 = vmatprep.subr.bf16.mxu0 %v17459_v26  ;;  %v17489_v20 = vld [vmem:[%s24684_s7 + $0x284] ss:$16 sps:$4 sm:$0xff]   ;;  %v17487_v22 = vld [vmem:[%s24684_s7 + $0x280] ss:$16 sps:$4 sm:$0xff]  }
 0x513   :  { %8804 = vmatpush2.bf16.msra.mxu1 %v17426_v50  ;;  %v17490_v51 = vld [vmem:[%s24684_s7 + $0x20] ss:$16 sps:$4 sm:$0xff]   ;;  %v17495_v23 = vld [vmem:[%s24684_s7 + $0x264] ss:$16 sps:$4 sm:$0xff]  }
 0x514   :  { %8805 = vmatprep.subr.bf16.mxu1 %v17435_v0  ;;  %v17496_v7 = vld [vmem:[%s24684_s7] ss:$16 sps:$4 sm:$0xff]   ;;  %v17504_v34 = vld [vmem:[%s24684_s7 + $0x244] ss:$16 sps:$4 sm:$0xff]  }
 0x515   :  { %v17501_v13 = vld [vmem:[%s24684_s7 + $0x1e4] ss:$16 sps:$4 sm:$0xff]   ;;  %v17502_v8 = vld [vmem:[%s24684_s7 + $0x240] ss:$16 sps:$4 sm:$0xff]  }
 0x516   :  { %v22508_v31 = vld [vmem:[#allocation4 + $0xec] ss:$16 sps:$4 sm:$0xff]   ;;  %v22510_v30 = vld [vmem:[#allocation4 + $0xe8] ss:$16 sps:$4 sm:$0xff]   ;;  %v17499_v14 = vld [vmem:[%s24684_s7 + $0x1e0] ss:$16 sps:$4 sm:$0xff]  }
 0x517   :  { %8806 = vmatpush2.bf16.msra.mxu1 %v17433_v41  ;;  %15228 = vmatprep.mubr.msk.bf16.mxu1 %vm8555_vm8, %v22508_v31  ;;  %v17507_v6 = vld [vmem:[%s24684_s7 + $0x1c4] ss:$16 sps:$4 sm:$0xff]   ;;  %v17505_v24 = vld [vmem:[%s24684_s7 + $0x1c0] ss:$16 sps:$4 sm:$0xff]  }
 0x518   :  { %8670 = vmatmul.mubr.bf16.gmra.mxu0 %v22491_v53  ;;  %8807 = vmatprep.subr.bf16.mxu1 %v17443_v61  ;;  %v17516_v43 = vld [vmem:[%s24684_s7 + $0x204] ss:$16 sps:$4 sm:$0xff]   ;;  %v17514_v29 = vld [vmem:[%s24684_s7 + $0x200] ss:$16 sps:$4 sm:$0xff]  }
 0x519   :  { %15229 = vmatprep.mubr.msk.bf16.mxu0 %vm8555_vm8, %v22098_v45  ;;  %v17465_v45 = vld [vmem:[%s24684_s7 + $0xc4] ss:$16 sps:$4 sm:$0xff]   ;;  %v17511_v15 = vld [vmem:[%s24684_s7 + $0x1a0] ss:$16 sps:$4 sm:$0xff]  }
 0x51a   :  { %8773 = vmatmul.mubr.bf16.gmra.mxu1 %v22510_v30  ;;  %v17513_v2 = vld [vmem:[%s24684_s7 + $0x1a4] ss:$16 sps:$4 sm:$0xff]   ;;  %v17517_v50 = vld [vmem:[%s24684_s7 + $0x180] ss:$16 sps:$4 sm:$0xff]  }
 0x51b   :  { %8808 = vmatpush2.bf16.msra.mxu1 %v17441_v44  ;;  %8815 = vmatprep.mubr.bf16.mxu1 %v22047_v48  ;;  %v17454_v48 = vld [vmem:[%s24684_s7 + $0x4a8] ss:$16 sps:$4 sm:$0xff]   ;;  %v17519_v26 = vld [vmem:[%s24684_s7 + $0x184] ss:$16 sps:$4 sm:$0xff]   ;;  %v17526_v61 = vld [vmem:[%s24684_s7 + $0x340] ss:$16 sps:$4 sm:$0xff]  }
 0x51c   :  { %8809 = vmatprep.subr.bf16.mxu1 %v17450_v46  ;;  %v17528_v0 = vld [vmem:[%s24684_s7 + $0x344] ss:$16 sps:$4 sm:$0xff]  }
 0x51d   :  { %v17525_v41 = vld [vmem:[%s24684_s7 + $0x164] ss:$16 sps:$4 sm:$0xff]  }
 0x51e   :  { %v17534_v44 = vld [vmem:[%s24684_s7 + $0x324] ss:$16 sps:$4 sm:$0xff]  }
 0x51f   :  { %8810 = vmatpush2.bf16.msra.mxu1 %v17448_v27  ;;  %v17532_v27 = vld [vmem:[%s24684_s7 + $0x320] ss:$16 sps:$4 sm:$0xff]  }
 0x520   :  { %8919 = vmatmul.mubr.bf16.vlgmr.msra.gmra.mxu0 %v22091_v60  ;;  %8811 = vmatprep.subr.bf16.mxu1 %v17456_v12  ;;  %v17460_v60 = vld [vmem:[%s24684_s7 + $0x488] ss:$16 sps:$4 sm:$0xff]   ;;  %v17529_v12 = vld [vmem:[%s24684_s7 + $0x140] ss:$16 sps:$4 sm:$0xff]  }
 0x521   :  { %9704 = vmatpush1.bf16.msra.mxu0 %v17457_v37  ;;  %15230 = vmatprep.mubr.msk.bf16.mxu0 %vm8555_vm8, %v22179_v10  ;;  %v17471_v10 = vld [vmem:[%s24684_s7 + $0x2e4] ss:$16 sps:$4 sm:$0xff]  }
 0x522   :  { %9705 = vmatprep.subr.bf16.mxu0 %v17465_v45  ;;  %v17540_v37 = vld [vmem:[%s24684_s7 + $0x304] ss:$16 sps:$4 sm:$0xff]   ;;  %v17538_v45 = vld [vmem:[%s24684_s7 + $0x300] ss:$16 sps:$4 sm:$0xff]  }
 0x523   :  { %8812 = vmatpush2.bf16.msra.mxu1 %v17454_v48  ;;  %v17535_v48 = vld [vmem:[%s24684_s7 + $0x120] ss:$16 sps:$4 sm:$0xff]  }
 0x524   :  { %8813 = vmatprep.subr.bf16.mxu1 %v17462_v36  ;;  %v17549_v36 = vld [vmem:[%s24684_s7 + $0xec] ss:$16 sps:$4 sm:$0xff]  }
 0x525   :  { %9706 = vmatpush1.bf16.msra.mxu0 %v17463_v35  ;;  %v17541_v35 = vld [vmem:[%s24684_s7 + $0x100] ss:$16 sps:$4 sm:$0xff]  }
 0x526   :  { %9707 = vmatprep.subr.bf16.mxu0 %v17468_v55  ;;  %v17563_v55 = vld [vmem:[%s24684_s7 + $0x2ec] ss:$16 sps:$4 sm:$0xff]  }
 0x527   :  { %8814 = vmatpush2.bf16.msra.mxu1 %v17460_v60 }
 0x528   :  { %8929 = vmatmul.mubr.bf16.gmra.mxu0 %v22195_v57  ;;  %9806 = vmatprep.subr.bf16.mxu1 %v17471_v10  ;;  %v17475_v57 = vld [vmem:[%s24684_s7 + $0x2c0] ss:$16 sps:$4 sm:$0xff]   ;;  %v17575_v10 = vld [vmem:[%s24684_s7 + $0x2cc] ss:$16 sps:$4 sm:$0xff]  }
 0x529   :  { %9708 = vmatpush1.bf16.msra.mxu0 %v17466_v25  ;;  %15231 = vmatprep.mubr.msk.bf16.mxu0 %vm8555_vm8, %v22263_v18  ;;  %v17478_v18 = vld [vmem:[%s24684_s7 + $0x60] ss:$16 sps:$4 sm:$0xff]   ;;  %v17561_v25 = vld [vmem:[%s24684_s7 + $0x2e8] ss:$16 sps:$4 sm:$0xff]  }
 0x52a   :  { %9709 = vmatprep.subr.bf16.mxu0 %v17474_v54  ;;  %8816 = vmatmul.mubr.bf16.vlgmr.msra.gmra.mxu1 %v22045_v52  ;;  %v17486_v52 = vld [vmem:[%s24684_s7 + $0x44] ss:$16 sps:$4 sm:$0xff]   ;;  %v22758_v54 = vld [vmem:[#allocation4 + $0x8] ss:$16 sps:$4 sm:$0xff]  }
 0x52b   :  { %8825 = vmatprep.mubr.bf16.mxu1 %v22116_v11  ;;  %9807 = vmatpush1.bf16.msra.mxu1 %v17469_v40  ;;  %v17481_v11 = vld [vmem:[%s24684_s7 + $0x2a0] ss:$16 sps:$4 sm:$0xff]   ;;  %v22760_v40 = vld [vmem:[#allocation4 + $0x24] ss:$16 sps:$4 sm:$0xff]  }
 0x52c   :  { %9808 = vmatprep.subr.bf16.mxu1 %v17477_v17  ;;  %v17573_v17 = vld [vmem:[%s24684_s7 + $0x2c8] ss:$16 sps:$4 sm:$0xff]  }
 0x52d   :  { %9710 = vmatpush1.bf16.msra.mxu0 %v17472_v38  ;;  %v17557_v38 = vld [vmem:[%s24684_s7 + $0xcc] ss:$16 sps:$4 sm:$0xff]  }
 0x52e   :  { %9711 = vmatprep.subr.bf16.mxu0 %v17480_v4  ;;  %v22773_v4 = vld [vmem:[#allocation4 + $0x2c] ss:$16 sps:$4 sm:$0xff]  }
 0x52f   :  { %9809 = vmatpush1.bf16.msra.mxu1 %v17475_v57  ;;  %v17581_v57 = vld [vmem:[%s24684_s7 + $0x2ac] ss:$16 sps:$4 sm:$0xff]  }
 0x530   :  { %8939 = vmatmul.mubr.bf16.gmra.mxu0 %v22280_v28  ;;  %9810 = vmatprep.subr.bf16.mxu1 %v17483_v39  ;;  %v17492_v28 = vld [vmem:[%s24684_s7 + $0x24] ss:$16 sps:$4 sm:$0xff]   ;;  %v17560_v39 = vld [vmem:[%s24684_s7 + $0xac] ss:$16 sps:$4 sm:$0xff]  }
 0x531   :  { %9712 = vmatpush1.bf16.msra.mxu0 %v17478_v18  ;;  %15232 = vmatprep.mubr.msk.bf16.mxu0 %vm8555_vm8, %v22348_v49  ;;  %v17555_v18 = vld [vmem:[%s24684_s7 + $0xc8] ss:$16 sps:$4 sm:$0xff]  }
 0x532   :  { %9713 = vmatprep.subr.bf16.mxu0 %v17486_v52  ;;  %8826 = vmatmul.mubr.bf16.gmra.mxu1 %v22112_v63  ;;  %v17498_v63 = vld [vmem:[%s24684_s7 + $0x4] ss:$16 sps:$4 sm:$0xff]   ;;  %v22787_v52 = vld [vmem:[#allocation4 + $0x20] ss:$16 sps:$4 sm:$0xff]  }
 0x533   :  { %8835 = vmatprep.mubr.bf16.mxu1 %v22240_v42  ;;  %9811 = vmatpush1.bf16.msra.mxu1 %v17481_v11  ;;  %v17493_v42 = vld [vmem:[%s24684_s7 + $0x260] ss:$16 sps:$4 sm:$0xff]   ;;  %v17579_v11 = vld [vmem:[%s24684_s7 + $0x2a8] ss:$16 sps:$4 sm:$0xff]  }
 0x534   :  { %9812 = vmatprep.subr.bf16.mxu1 %v17489_v20  ;;  %v17593_v20 = vld [vmem:[%s24684_s7 + $0x28c] ss:$16 sps:$4 sm:$0xff]  }
 0x535   :  { %9714 = vmatpush1.bf16.msra.mxu0 %v17484_v19  ;;  %v22792_v19 = vld [vmem:[#allocation4 + $0x44] ss:$16 sps:$4 sm:$0xff]  }
 0x536   :  { %9715 = vmatprep.subr.bf16.mxu0 %v17492_v28  ;;  %v17558_v28 = vld [vmem:[%s24684_s7 + $0xa8] ss:$16 sps:$4 sm:$0xff]  }
 0x537   :  { %9813 = vmatpush1.bf16.msra.mxu1 %v17487_v22  ;;  %v22801_v22 = vld [vmem:[#allocation4 + $0x28] ss:$16 sps:$4 sm:$0xff]  }
 0x538   :  { %8949 = vmatmul.mubr.bf16.gmra.mxu0 %v22365_v62  ;;  %9814 = vmatprep.subr.bf16.mxu1 %v17495_v23  ;;  %v22807_v23 = vld [vmem:[#allocation4 + $0x4c] ss:$16 sps:$4 sm:$0xff]  }
 0x539   :  { %9716 = vmatpush1.bf16.msra.mxu0 %v17490_v51  ;;  %15233 = vmatprep.mubr.msk.bf16.mxu0 %vm8555_vm8, %v22429_v59  ;;  %v17572_v51 = vld [vmem:[%s24684_s7 + $0x8c] ss:$16 sps:$4 sm:$0xff]  }
 0x53a   :  { %9717 = vmatprep.subr.bf16.mxu0 %v17498_v63  ;;  %8836 = vmatmul.mubr.bf16.gmra.mxu1 %v22234_v21  ;;  %v17510_v21 = vld [vmem:[%s24684_s7 + $0x224] ss:$16 sps:$4 sm:$0xff]   ;;  %v17591_v63 = vld [vmem:[%s24684_s7 + $0x288] ss:$16 sps:$4 sm:$0xff]  }
 0x53b   :  { %8845 = vmatprep.mubr.bf16.mxu1 %v22325_v47  ;;  %9815 = vmatpush1.bf16.msra.mxu1 %v17493_v42  ;;  %v17508_v47 = vld [vmem:[%s24684_s7 + $0x220] ss:$16 sps:$4 sm:$0xff]   ;;  %v17599_v42 = vld [vmem:[%s24684_s7 + $0x26c] ss:$16 sps:$4 sm:$0xff]  }
 0x53c   :  { %9816 = vmatprep.subr.bf16.mxu1 %v17504_v34  ;;  %v17578_v34 = vld [vmem:[%s24684_s7 + $0x6c] ss:$16 sps:$4 sm:$0xff]  }
 0x53d   :  { %9718 = vmatpush1.bf16.msra.mxu0 %v17496_v7  ;;  %v17570_v7 = vld [vmem:[%s24684_s7 + $0x88] ss:$16 sps:$4 sm:$0xff]  }
 0x53e   :  { %9719 = vmatprep.subr.bf16.mxu0 %v17501_v13  ;;  %v22824_v13 = vld [vmem:[#allocation4 + $0x40] ss:$16 sps:$4 sm:$0xff]  }
 0x53f   :  { %9817 = vmatpush1.bf16.msra.mxu1 %v17502_v8  ;;  %v17597_v8 = vld [vmem:[%s24684_s7 + $0x268] ss:$16 sps:$4 sm:$0xff]  }
 0x540   :  { %8959 = vmatmul.mubr.bf16.gmra.mxu0 %v22440_v32  ;;  %9818 = vmatprep.subr.bf16.mxu1 %v17510_v21  ;;  %v17576_v21 = vld [vmem:[%s24684_s7 + $0x68] ss:$16 sps:$4 sm:$0xff]  }
 0x541   :  { %9720 = vmatpush2.bf16.msra.mxu0 %v17499_v14  ;;  %15234 = vmatprep.mubr.msk.bf16.mxu0 %vm8555_vm8, %v22481_v16  ;;  %v22829_v14 = vld [vmem:[#allocation4 + $0x64] ss:$16 sps:$4 sm:$0xff]  }
 0x542   :  { %9721 = vmatprep.subr.bf16.mxu0 %v17507_v6  ;;  %8846 = vmatmul.mubr.bf16.gmra.mxu1 %v22319_v1  ;;  %v17522_v1 = vld [vmem:[%s24684_s7 + $0x364] ss:$16 sps:$4 sm:$0xff]   ;;  %v17609_v6 = vld [vmem:[%s24684_s7 + $0x24c] ss:$16 sps:$4 sm:$0xff]  }
 0x543   :  { %8855 = vmatprep.mubr.bf16.mxu1 %v22410_v58  ;;  %9819 = vmatpush1.bf16.msra.mxu1 %v17508_v47  ;;  %v17520_v58 = vld [vmem:[%s24684_s7 + $0x360] ss:$16 sps:$4 sm:$0xff]   ;;  %v22838_v47 = vld [vmem:[#allocation4 + $0x48] ss:$16 sps:$4 sm:$0xff]  }
 0x544   :  { %9820 = vmatprep.subr.bf16.mxu1 %v17516_v43  ;;  %v22844_v43 = vld [vmem:[#allocation4 + $0x6c] ss:$16 sps:$4 sm:$0xff]  }
 0x545   :  { %9722 = vmatpush2.bf16.msra.mxu0 %v17505_v24  ;;  %v17590_v24 = vld [vmem:[%s24684_s7 + $0x4c] ss:$16 sps:$4 sm:$0xff]  }
 0x546   :  { %9723 = vmatprep.subr.bf16.mxu0 %v17513_v2  ;;  %v17607_v2 = vld [vmem:[%s24684_s7 + $0x248] ss:$16 sps:$4 sm:$0xff]  }
 0x547   :  { %9821 = vmatpush1.bf16.msra.mxu1 %v17514_v29  ;;  %v17615_v29 = vld [vmem:[%s24684_s7 + $0x22c] ss:$16 sps:$4 sm:$0xff]  }
 0x548   :  { %8969 = vmatmul.mubr.bf16.gmra.mxu0 %v22483_v9  ;;  %9830 = vmatprep.subr.bf16.mxu1 %v17522_v1  ;;  %v22861_v1 = vld [vmem:[#allocation4 + $0x60] ss:$16 sps:$4 sm:$0xff]  }
 0x549   :  { %9724 = vmatpush2.bf16.msra.mxu0 %v17511_v15  ;;  %15235 = vmatprep.mubr.msk.bf16.mxu0 %vm8555_vm8, %v22508_v31  ;;  %v17523_v31 = vld [vmem:[%s24684_s7 + $0x160] ss:$16 sps:$4 sm:$0xff]   ;;  %v17588_v15 = vld [vmem:[%s24684_s7 + $0x48] ss:$16 sps:$4 sm:$0xff]  }
 0x54a   :  { %9725 = vmatprep.subr.bf16.mxu0 %v17519_v26  ;;  %8856 = vmatmul.mubr.bf16.gmra.mxu1 %v22404_v3  ;;  %v17531_v3 = vld [vmem:[%s24684_s7 + $0x144] ss:$16 sps:$4 sm:$0xff]   ;;  %v17596_v26 = vld [vmem:[%s24684_s7 + $0x2c] ss:$16 sps:$4 sm:$0xff]  }
 0x54b   :  { %8865 = vmatprep.mubr.bf16.mxu1 %v22461_v33  ;;  %9831 = vmatpush2.bf16.msra.mxu1 %v17520_v58  ;;  %v18049_v33 = vld [vmem:[#allocation4] sm:$0xff]  ;;  %v17613_v58 = vld [vmem:[%s24684_s7 + $0x228] ss:$16 sps:$4 sm:$0xff]  }
 0x54c   :  { %9832 = vmatprep.subr.bf16.mxu1 %v17528_v0  ;;  %v22709_v46 = vcombine.high %v18049_v33, %v18049_v33  ;;  %v22748_v60 = vcombine.low %v18049_v33, %v18049_v33  ;;  %v17624_v0 = vld [vmem:[%s24684_s7 + $0x20c] ss:$16 sps:$4 sm:$0xff]   ;;  %v17604_v33 = vld [vmem:[%s24684_s7 + $0x8] ss:$16 sps:$4 sm:$0xff]  }
 0x54d   :  { %9726 = vmatpush2.bf16.msra.mxu0 %v17517_v50  ;;  %v22866_v50 = vld [vmem:[#allocation4 + $0x84] ss:$16 sps:$4 sm:$0xff]  }
 0x54e   :  { %9727 = vmatprep.subr.bf16.mxu0 %v17525_v41  ;;  %v17594_v41 = vld [vmem:[%s24684_s7 + $0x28] ss:$16 sps:$4 sm:$0xff]  }
 0x54f   :  { %9833 = vmatpush2.bf16.msra.mxu1 %v17526_v61  ;;  %v22875_v61 = vld [vmem:[#allocation4 + $0x68] ss:$16 sps:$4 sm:$0xff]  }
 0x550   :  { %8979 = vmatmul.mubr.bf16.gmra.mxu0 %v22510_v30  ;;  %9834 = vmatprep.subr.bf16.mxu1 %v17534_v44  ;;  %v17537_v30 = vld [vmem:[%s24684_s7 + $0x124] ss:$16 sps:$4 sm:$0xff]   ;;  %v17622_v44 = vld [vmem:[%s24684_s7 + $0x208] ss:$16 sps:$4 sm:$0xff]  }
 0x551   :  { %9728 = vmatpush2.bf16.msra.mxu0 %v17523_v31  ;;  %9735 = vmatprep.mubr.bf16.mxu0 %v22709_v46  ;;  %v17606_v31 = vld [vmem:[%s24684_s7 + $0xc] ss:$16 sps:$4 sm:$0xff]  }
 0x552   :  { %9729 = vmatprep.subr.bf16.mxu0 %v17531_v3  ;;  %8866 = vmatmul.mubr.bf16.gmra.mxu1 %v22451_v5  ;;  %v17543_v5 = vld [vmem:[%s24684_s7 + $0x104] ss:$16 sps:$4 sm:$0xff]   ;;  %v17630_v3 = vld [vmem:[%s24684_s7 + $0x36c] ss:$16 sps:$4 sm:$0xff]  }
 0x553   :  { %8875 = vmatprep.mubr.bf16.mxu1 %v22493_v56  ;;  %9835 = vmatpush2.bf16.msra.mxu1 %v17532_v27  ;;  %v22739_v56 = vld [vmem:[#allocation4 + $0xc] ss:$16 sps:$4 sm:$0xff]  }
 0x554   :  { %9836 = vmatprep.subr.bf16.mxu1 %v17540_v37  ;;  %v17612_v27 = vld [vmem:[%s24684_s7 + $0x1ec] ss:$16 sps:$4 sm:$0xff]   ;;  %v17628_v37 = vld [vmem:[%s24684_s7 + $0x368] ss:$16 sps:$4 sm:$0xff]  }
 0x555   :  { %9730 = vmatpush2.bf16.msra.mxu0 %v17529_v12  ;;  %v22896_v12 = vld [vmem:[#allocation4 + $0x80] ss:$16 sps:$4 sm:$0xff]  }
 0x556   :  { %9731 = vmatprep.subr.bf16.mxu0 %v17537_v30  ;;  %v22901_v30 = vld [vmem:[#allocation4 + $0xa4] ss:$16 sps:$4 sm:$0xff]  }
 0x557   :  { %9837 = vmatpush2.bf16.msra.mxu1 %v17538_v45  ;;  %v17610_v45 = vld [vmem:[%s24684_s7 + $0x1e8] ss:$16 sps:$4 sm:$0xff]  }
 0x558   :  { %9909 = vmatprep.subr.bf16.mxu1 %v17549_v36  ;;  %v17637_v36 = vld [vmem:[%s24684_s7 + $0x348] ss:$16 sps:$4 sm:$0xff]  }
 0x559   :  { %9732 = vmatpush2.bf16.msra.mxu0 %v17535_v48  ;;  %v17621_v48 = vld [vmem:[%s24684_s7 + $0x1cc] ss:$16 sps:$4 sm:$0xff]  }
 0x55a   :  { %9733 = vmatprep.subr.bf16.mxu0 %v17543_v5  ;;  %8876 = vmatmul.mubr.bf16.gmra.mxu1 %v22491_v53  ;;  %v17547_v53 = vld [vmem:[%s24684_s7 + $0xe8] ss:$16 sps:$4 sm:$0xff]   ;;  %v17645_v5 = vld [vmem:[%s24684_s7 + $0x32c] ss:$16 sps:$4 sm:$0xff]  }
 0x55b   :  { %15376 = vmatprep.mubr.msk.bf16.mxu1 %vm8555_vm8, %v22739_v56 }
 0x55d   :  { %9734 = vmatpush2.bf16.msra.mxu0 %v17541_v35  ;;  %v17619_v35 = vld [vmem:[%s24684_s7 + $0x1c8] ss:$16 sps:$4 sm:$0xff]  }
 0x55e   :  { %10012 = vmatprep.subr.bf16.mxu0 %v17563_v55  ;;  %v17627_v55 = vld [vmem:[%s24684_s7 + $0x1ac] ss:$16 sps:$4 sm:$0xff]  }
 0x560   :  { %9736 = vmatmul.mubr.bf16.vlgmr.msra.gmra.mxu0 %v22748_v60 }
 0x561   :  { %9745 = vmatprep.mubr.bf16.mxu0 %v22760_v40  ;;  %10013 = vmatpush1.bf16.msra.mxu0 %v17561_v25  ;;  %v22929_v25 = vld [vmem:[#allocation4 + $0xa0] ss:$16 sps:$4 sm:$0xff]  }
 0x562   :  { %10014 = vmatprep.subr.bf16.mxu0 %v17575_v10  ;;  %9839 = vmatmul.mubr.bf16.vlgmr.msra.gmra.mxu1 %v22758_v54  ;;  %v17643_v10 = vld [vmem:[%s24684_s7 + $0x328] ss:$16 sps:$4 sm:$0xff]  }
 0x563   :  { %9910 = vmatpush1.bf16.msra.mxu1 %v17547_v53  ;;  %15377 = vmatprep.mubr.msk.bf16.mxu1 %vm8555_vm8, %v22773_v4  ;;  %v22934_v53 = vld [vmem:[#allocation4 + $0xc4] ss:$16 sps:$4 sm:$0xff]  }
 0x564   :  { %9911 = vmatprep.subr.bf16.mxu1 %v17557_v38  ;;  %v17651_v38 = vld [vmem:[%s24684_s7 + $0x30c] ss:$16 sps:$4 sm:$0xff]  }
 0x565   :  { %10015 = vmatpush1.bf16.msra.mxu0 %v17573_v17  ;;  %v17625_v17 = vld [vmem:[%s24684_s7 + $0x1a8] ss:$16 sps:$4 sm:$0xff]  }
 0x566   :  { %10016 = vmatprep.subr.bf16.mxu0 %v17581_v57  ;;  %v17636_v57 = vld [vmem:[%s24684_s7 + $0x18c] ss:$16 sps:$4 sm:$0xff]  }
 0x567   :  { %9912 = vmatpush1.bf16.msra.mxu1 %v17555_v18  ;;  %v17649_v18 = vld [vmem:[%s24684_s7 + $0x308] ss:$16 sps:$4 sm:$0xff]  }
 0x568   :  { %9746 = vmatmul.mubr.bf16.gmra.mxu0 %v22787_v52  ;;  %9913 = vmatprep.subr.bf16.mxu1 %v17560_v39  ;;  %v17657_v39 = vld [vmem:[%s24684_s7 + $0x7e4] ss:$16 sps:$4 sm:$0xff]  }
 0x569   :  { %9755 = vmatprep.mubr.bf16.mxu0 %v22792_v19  ;;  %10017 = vmatpush1.bf16.msra.mxu0 %v17579_v11  ;;  %v17634_v11 = vld [vmem:[%s24684_s7 + $0x188] ss:$16 sps:$4 sm:$0xff]  }
 0x56a   :  { %9849 = vmatmul.mubr.bf16.gmra.mxu1 %v22801_v22  ;;  %10018 = vmatprep.subr.bf16.mxu0 %v17593_v20  ;;  %v17642_v20 = vld [vmem:[%s24684_s7 + $0x16c] ss:$16 sps:$4 sm:$0xff]  }
 0x56b   :  { %9914 = vmatpush1.bf16.msra.mxu1 %v17558_v28  ;;  %15378 = vmatprep.mubr.msk.bf16.mxu1 %vm8555_vm8, %v22807_v23  ;;  %v22962_v28 = vld [vmem:[#allocation4 + $0xc0] ss:$16 sps:$4 sm:$0xff]  }
 0x56c   :  { %9915 = vmatprep.subr.bf16.mxu1 %v17572_v51  ;;  %v17648_v51 = vld [vmem:[%s24684_s7 + $0x14c] ss:$16 sps:$4 sm:$0xff]  }
 0x56d   :  { %10019 = vmatpush1.bf16.msra.mxu0 %v17591_v63  ;;  %v17646_v63 = vld [vmem:[%s24684_s7 + $0x148] ss:$16 sps:$4 sm:$0xff]  }
 0x56e   :  { %10020 = vmatprep.subr.bf16.mxu0 %v17599_v42  ;;  %v17654_v42 = vld [vmem:[%s24684_s7 + $0x12c] ss:$16 sps:$4 sm:$0xff]  }
 0x56f   :  { %9916 = vmatpush1.bf16.msra.mxu1 %v17570_v7  ;;  %v17655_v7 = vld [vmem:[%s24684_s7 + $0x7e0] ss:$16 sps:$4 sm:$0xff]  }
 0x570   :  { %9756 = vmatmul.mubr.bf16.gmra.mxu0 %v22824_v13  ;;  %9917 = vmatprep.subr.bf16.mxu1 %v17578_v34  ;;  %v17652_v34 = vld [vmem:[%s24684_s7 + $0x128] ss:$16 sps:$4 sm:$0xff]  }
 0x571   :  { %9765 = vmatprep.mubr.bf16.mxu0 %v22829_v14  ;;  %10021 = vmatpush1.bf16.msra.mxu0 %v17597_v8  ;;  %v17661_v8 = vld [vmem:[%s24684_s7 + $0x7c0] ss:$16 sps:$4 sm:$0xff]  }
 0x572   :  { %9859 = vmatmul.mubr.bf16.gmra.mxu1 %v22838_v47  ;;  %10022 = vmatprep.subr.bf16.mxu0 %v17609_v6  ;;  %v17666_v6 = vld [vmem:[%s24684_s7 + $0x7a4] ss:$16 sps:$4 sm:$0xff]  }
 0x573   :  { %9918 = vmatpush1.bf16.msra.mxu1 %v17576_v21  ;;  %15379 = vmatprep.mubr.msk.bf16.mxu1 %vm8555_vm8, %v22844_v43  ;;  %v17664_v21 = vld [vmem:[%s24684_s7 + $0x7a0] ss:$16 sps:$4 sm:$0xff]  }
 0x574   :  { %9919 = vmatprep.subr.bf16.mxu1 %v17590_v24  ;;  %v17672_v24 = vld [vmem:[%s24684_s7 + $0x784] ss:$16 sps:$4 sm:$0xff]  }
 0x575   :  { %10023 = vmatpush1.bf16.msra.mxu0 %v17607_v2  ;;  %v17667_v2 = vld [vmem:[%s24684_s7 + $0x9e0] ss:$16 sps:$4 sm:$0xff]  }
 0x576   :  { %10024 = vmatprep.subr.bf16.mxu0 %v17615_v29  ;;  %v17670_v29 = vld [vmem:[%s24684_s7 + $0x780] ss:$16 sps:$4 sm:$0xff]  }
 0x577   :  { %9920 = vmatpush1.bf16.msra.mxu1 %v17588_v15  ;;  %v17675_v15 = vld [vmem:[%s24684_s7 + $0x9c4] ss:$16 sps:$4 sm:$0xff]  }
 0x578   :  { %9766 = vmatmul.mubr.bf16.gmra.mxu0 %v22861_v1  ;;  %9921 = vmatprep.subr.bf16.mxu1 %v17596_v26  ;;  %v17678_v26 = vld [vmem:[%s24684_s7 + $0x764] ss:$16 sps:$4 sm:$0xff]  }
 0x579   :  { %9775 = vmatprep.mubr.bf16.mxu0 %v22866_v50  ;;  %10025 = vmatpush1.bf16.msra.mxu0 %v17613_v58 }
 0x57a   :  { %9869 = vmatmul.mubr.bf16.gmra.mxu1 %v22875_v61  ;;  %10026 = vmatprep.subr.bf16.mxu0 %v17624_v0  ;;  %v17676_v0 = vld [vmem:[%s24684_s7 + $0x760] ss:$16 sps:$4 sm:$0xff]  }
 0x57b   :  { %9922 = vmatpush1.bf16.msra.mxu1 %v17594_v41  ;;  %15380 = vmatprep.mubr.msk.bf16.mxu1 %vm8555_vm8, %v22348_v49  ;;  %v17639_v49 = vld [vmem:[%s24684_s7 + $0x34c] ss:$16 sps:$4 sm:$0xff]   ;;  %v17681_v41 = vld [vmem:[%s24684_s7 + $0x9a4] ss:$16 sps:$4 sm:$0xff]  }
 0x57c   :  { %9923 = vmatprep.subr.bf16.mxu1 %v17606_v31  ;;  %v17679_v31 = vld [vmem:[%s24684_s7 + $0x9a0] ss:$16 sps:$4 sm:$0xff]  }
 0x57d   :  { %10027 = vmatpush1.bf16.msra.mxu0 %v17622_v44 }
 0x57e   :  { %10036 = vmatprep.subr.bf16.mxu0 %v17630_v3  ;;  %v17682_v3 = vld [vmem:[%s24684_s7 + $0x740] ss:$16 sps:$4 sm:$0xff]  }
 0x57f   :  { %9924 = vmatpush1.bf16.msra.mxu1 %v17604_v33  ;;  %v17687_v33 = vld [vmem:[%s24684_s7 + $0x984] ss:$16 sps:$4 sm:$0xff]  }
 0x580   :  { %9776 = vmatmul.mubr.bf16.gmra.mxu0 %v22896_v12  ;;  %9925 = vmatprep.subr.bf16.mxu1 %v17612_v27 }
 0x581   :  { %9785 = vmatprep.mubr.bf16.mxu0 %v22901_v30  ;;  %10037 = vmatpush2.bf16.msra.mxu0 %v17628_v37  ;;  %v17690_v37 = vld [vmem:[%s24684_s7 + $0x724] ss:$16 sps:$4 sm:$0xff]  }
 0x582   :  { %9879 = vmatmul.mubr.bf16.gmra.mxu1 %v22365_v62  ;;  %10038 = vmatprep.subr.bf16.mxu0 %v17639_v49 }
 0x583   :  { %9926 = vmatpush2.bf16.msra.mxu1 %v17610_v45  ;;  %15381 = vmatprep.mubr.msk.bf16.mxu1 %vm8555_vm8, %v22429_v59 }
 0x584   :  { %9927 = vmatprep.subr.bf16.mxu1 %v17621_v48  ;;  %v17685_v48 = vld [vmem:[%s24684_s7 + $0x980] ss:$16 sps:$4 sm:$0xff]  }
 0x585   :  { %10039 = vmatpush2.bf16.msra.mxu0 %v17637_v36 }
 0x586   :  { %10040 = vmatprep.subr.bf16.mxu0 %v17645_v5 }
 0x587   :  { %9928 = vmatpush2.bf16.msra.mxu1 %v17619_v35  ;;  %v17688_v35 = vld [vmem:[%s24684_s7 + $0x720] ss:$16 sps:$4 sm:$0xff]  }
 0x588   :  { %9786 = vmatmul.mubr.bf16.gmra.mxu0 %v22929_v25  ;;  %9929 = vmatprep.subr.bf16.mxu1 %v17627_v55 }
 0x589   :  { %9795 = vmatprep.mubr.bf16.mxu0 %v22934_v53  ;;  %10041 = vmatpush2.bf16.msra.mxu0 %v17643_v10 }
 0x58a   :  { %9889 = vmatmul.mubr.bf16.gmra.mxu1 %v22440_v32  ;;  %10042 = vmatprep.subr.bf16.mxu0 %v17651_v38  ;;  %v17640_v32 = vld [vmem:[%s24684_s7 + $0x168] ss:$16 sps:$4 sm:$0xff]   ;;  %v17696_v38 = vld [vmem:[%s24684_s7 + $0x704] ss:$16 sps:$4 sm:$0xff]  }
 0x58b   :  { %9930 = vmatpush2.bf16.msra.mxu1 %v17625_v17  ;;  %15382 = vmatprep.mubr.msk.bf16.mxu1 %vm8555_vm8, %v22481_v16 }
 0x58c   :  { %9931 = vmatprep.subr.bf16.mxu1 %v17636_v57 }
 0x58d   :  { %10043 = vmatpush2.bf16.msra.mxu0 %v17649_v18  ;;  %v17691_v18 = vld [vmem:[%s24684_s7 + $0x960] ss:$16 sps:$4 sm:$0xff]  }
 0x58e   :  { %10971 = vmatprep.subr.bf16.mxu0 %v17657_v39 }
 0x58f   :  { %9932 = vmatpush2.bf16.msra.mxu1 %v17634_v11 }
 0x590   :  { %9796 = vmatmul.mubr.bf16.gmra.mxu0 %v22962_v28  ;;  %9933 = vmatprep.subr.bf16.mxu1 %v17642_v20  ;;  %v18050_v20 = vld [vmem:[#allocation4 + $0x8c] ss:$16 sps:$4 sm:$0xff]  }
 0x591   :  { %15383 = vmatprep.mubr.msk.bf16.mxu0 %vm8555_vm8, %v22739_v56  ;;  %v17663_v56 = vld [vmem:[%s24684_s7 + $0x7c4] ss:$16 sps:$4 sm:$0xff]  }
 0x592   :  { %9899 = vmatmul.mubr.bf16.gmra.mxu1 %v22483_v9 }
 0x593   :  { %9934 = vmatpush2.bf16.msra.mxu1 %v17640_v32  ;;  %9941 = vmatprep.mubr.bf16.mxu1 %v22709_v46  ;;  %v17660_v46 = vld [vmem:[%s24684_s7 + $0x10c] ss:$16 sps:$4 sm:$0xff]   ;;  %v17694_v32 = vld [vmem:[%s24684_s7 + $0x700] ss:$16 sps:$4 sm:$0xff]  }
 0x594   :  { %9935 = vmatprep.subr.bf16.mxu1 %v17648_v51  ;;  %v17702_v51 = vld [vmem:[%s24684_s7 + $0x944] ss:$16 sps:$4 sm:$0xff]  }
 0x597   :  { %9936 = vmatpush2.bf16.msra.mxu1 %v17646_v63 }
 0x598   :  { %10045 = vmatmul.mubr.bf16.vlgmr.msra.gmra.mxu0 %v22758_v54  ;;  %9937 = vmatprep.subr.bf16.mxu1 %v17654_v42  ;;  %v17658_v54 = vld [vmem:[%s24684_s7 + $0x108] ss:$16 sps:$4 sm:$0xff]   ;;  %v17699_v42 = vld [vmem:[%s24684_s7 + $0x8e4] ss:$16 sps:$4 sm:$0xff]  }
 0x599   :  { %10972 = vmatpush1.bf16.msra.mxu0 %v17655_v7  ;;  %15384 = vmatprep.mubr.msk.bf16.mxu0 %vm8555_vm8, %v22773_v4  ;;  %v17669_v4 = vld [vmem:[%s24684_s7 + $0x9e4] ss:$16 sps:$4 sm:$0xff]  }
 0x59a   :  { %10973 = vmatprep.subr.bf16.mxu0 %v17663_v56 }
 0x59b   :  { %9938 = vmatpush2.bf16.msra.mxu1 %v17652_v34 }
 0x59c   :  { %9939 = vmatprep.subr.bf16.mxu1 %v17660_v46  ;;  %v17700_v46 = vld [vmem:[%s24684_s7 + $0x940] ss:$16 sps:$4 sm:$0xff]  }
 0x59d   :  { %10974 = vmatpush1.bf16.msra.mxu0 %v17661_v8 }
 0x59e   :  { %10975 = vmatprep.subr.bf16.mxu0 %v17666_v6  ;;  %v17697_v6 = vld [vmem:[%s24684_s7 + $0x8e0] ss:$16 sps:$4 sm:$0xff]  }
 0x59f   :  { %9940 = vmatpush2.bf16.msra.mxu1 %v17658_v54 }
 0x5a0   :  { %10055 = vmatmul.mubr.bf16.gmra.mxu0 %v22801_v22  ;;  %11074 = vmatprep.subr.bf16.mxu1 %v17669_v4  ;;  %v17673_v22 = vld [vmem:[%s24684_s7 + $0x9c0] ss:$16 sps:$4 sm:$0xff]   ;;  %v17708_v4 = vld [vmem:[%s24684_s7 + $0x924] ss:$16 sps:$4 sm:$0xff]  }
 0x5a1   :  { %10976 = vmatpush1.bf16.msra.mxu0 %v17664_v21  ;;  %15385 = vmatprep.mubr.msk.bf16.mxu0 %vm8555_vm8, %v22807_v23  ;;  %v8611_v58 = vpop.f32.mrf.mxu0  ;;  %v17705_v21 = vld [vmem:[%s24684_s7 + $0x8c4] ss:$16 sps:$4 sm:$0xff]  }
 0x5a2   :  { %10977 = vmatprep.subr.bf16.mxu0 %v17672_v24  ;;  %9942 = vmatmul.mubr.bf16.vlgmr.msra.gmra.mxu1 %v22748_v60 }
 0x5a3   :  { %9951 = vmatprep.mubr.bf16.mxu1 %v22760_v40  ;;  %11075 = vmatpush1.bf16.msra.mxu1 %v17667_v2  ;;  %v8613_v60 = vpop.f32.mrf.mxu0  ;;  %v17684_v40 = vld [vmem:[%s24684_s7 + $0x744] ss:$16 sps:$4 sm:$0xff]  }
 0x5a4   :  { %11076 = vmatprep.subr.bf16.mxu1 %v17675_v15  ;;  %v17706_v15 = vld [vmem:[%s24684_s7 + $0x920] ss:$16 sps:$4 sm:$0xff]  }
 0x5a5   :  { %10978 = vmatpush1.bf16.msra.mxu0 %v17670_v29  ;;  %v8615_v44 = vpop.f32.mrf.mxu0 }
 0x5a6   :  { %10979 = vmatprep.subr.bf16.mxu0 %v17678_v26 }
 0x5a7   :  { %11077 = vmatpush1.bf16.msra.mxu1 %v17673_v22  ;;  %v8617_v27 = vpop.f32.mrf.mxu0  ;;  %v17703_v22 = vld [vmem:[%s24684_s7 + $0x8c0] ss:$16 sps:$4 sm:$0xff]  }
 0x5a8   :  { %10065 = vmatmul.mubr.bf16.gmra.mxu0 %v22838_v47  ;;  %11078 = vmatprep.subr.bf16.mxu1 %v17681_v41  ;;  %v8714_v49 = vpop.f32.mrf.mxu1  ;;  %v17711_v41 = vld [vmem:[%s24684_s7 + $0x8a4] ss:$16 sps:$4 sm:$0xff]  }
 0x5a9   :  { %10980 = vmatpush1.bf16.msra.mxu0 %v17676_v0  ;;  %15386 = vmatprep.mubr.msk.bf16.mxu0 %vm8555_vm8, %v22844_v43  ;;  %v23060_v45 = vadd.f32 %v8714_v49, %v8611_v58  ;;  %v17714_v58 = vld [vmem:[%s24684_s7 + $0x904] ss:$16 sps:$4 sm:$0xff]  }
 0x5aa   :  { %10981 = vmatprep.subr.bf16.mxu0 %v17684_v40  ;;  %9952 = vmatmul.mubr.bf16.gmra.mxu1 %v22787_v52  ;;  %v8621_v36 = vpop.f32.mrf.mxu0  ;;  %v8716_v5 = vpop.f32.mrf.mxu1  ;;  %v17693_v52 = vld [vmem:[%s24684_s7 + $0x964] ss:$16 sps:$4 sm:$0xff]  }
 0x5ab   :  { %9961 = vmatprep.mubr.bf16.mxu1 %v22792_v19  ;;  %11079 = vmatpush1.bf16.msra.mxu1 %v17679_v31  ;;  %v23068_v55 = vadd.f32 %v8716_v5, %v8613_v60  ;;  %v17712_v31 = vld [vmem:[%s24684_s7 + $0x900] ss:$16 sps:$4 sm:$0xff]   ;;  %v17720_v49 = vld [vmem:[%s24684_s7 + $0xa64] ss:$16 sps:$4 sm:$0xff]   ;;  %v18051_v5 = vld [vmem:[#allocation4 + $0xa8] ss:$16 sps:$4 sm:$0xff]  }
 0x5ac   :  { %11080 = vmatprep.subr.bf16.mxu1 %v17687_v33  ;;  %v8623_v10 = vpop.f32.mrf.mxu0  ;;  %v8718_v17 = vpop.f32.mrf.mxu1 }
 0x5ad   :  { %10982 = vmatpush1.bf16.msra.mxu0 %v17682_v3  ;;  %v23076_v57 = vadd.f32 %v8718_v17, %v8615_v44  ;;  %v17709_v3 = vld [vmem:[%s24684_s7 + $0x8a0] ss:$16 sps:$4 sm:$0xff]   ;;  %v17726_v17 = vld [vmem:[%s24684_s7 + $0xa44] ss:$16 sps:$4 sm:$0xff]  }
 0x5ae   :  { %10983 = vmatprep.subr.bf16.mxu0 %v17690_v37  ;;  %v8625_v39 = vpop.f32.mrf.mxu0  ;;  %v8720_v11 = vpop.f32.mrf.mxu1  ;;  %v17717_v37 = vld [vmem:[%s24684_s7 + $0x884] ss:$16 sps:$4 sm:$0xff]  }
 0x5af   :  { %11081 = vmatpush1.bf16.msra.mxu1 %v17685_v48  ;;  %v23089_v63 = vadd.f32 %v8720_v11, %v8617_v27  ;;  %v17723_v11 = vld [vmem:[%s24684_s7 + $0x864] ss:$16 sps:$4 sm:$0xff]  }
 0x5b0   :  { %10075 = vmatmul.mubr.bf16.gmra.mxu0 %v22875_v61  ;;  %11082 = vmatprep.subr.bf16.mxu1 %v17693_v52  ;;  %v8724_v7 = vpop.f32.mrf.mxu1  ;;  %v8627_v34 = vpop.f32.mrf.mxu0  ;;  %v17718_v52 = vld [vmem:[%s24684_s7 + $0xa60] ss:$16 sps:$4 sm:$0xff]  }
 0x5b1   :  { %10984 = vmatpush1.bf16.msra.mxu0 %v17688_v35  ;;  %15387 = vmatprep.mubr.msk.bf16.mxu0 %vm8555_vm8, %v18050_v20  ;;  %25288 = vst [vmem:[#allocation80_spill] sm:$0xff] %v23089_v63  ;;  %v23096_v56 = vadd.f32 %v8724_v7, %v8621_v36  ;;  %v17721_v7 = vld [vmem:[%s24684_s7 + $0x860] ss:$16 sps:$4 sm:$0xff]  }
 0x5b2   :  { %10985 = vmatprep.subr.bf16.mxu0 %v17696_v38  ;;  %9962 = vmatmul.mubr.bf16.gmra.mxu1 %v22824_v13  ;;  %v8726_v8 = vpop.f32.mrf.mxu1  ;;  %v17715_v38 = vld [vmem:[%s24684_s7 + $0x880] ss:$16 sps:$4 sm:$0xff]  }
 0x5b3   :  { %9971 = vmatprep.mubr.bf16.mxu1 %v22829_v14  ;;  %11083 = vmatpush1.bf16.msra.mxu1 %v17691_v18  ;;  %v23104_v54 = vadd.f32 %v8726_v8, %v8623_v10  ;;  %v17729_v8 = vld [vmem:[%s24684_s7 + $0x844] ss:$16 sps:$4 sm:$0xff]  }
 0x5b4   :  { %11084 = vmatprep.subr.bf16.mxu1 %v17702_v51  ;;  %v8728_v24 = vpop.f32.mrf.mxu1  ;;  %v17724_v51 = vld [vmem:[%s24684_s7 + $0xa40] ss:$16 sps:$4 sm:$0xff]  }
 0x5b5   :  { %10986 = vmatpush1.bf16.msra.mxu0 %v17694_v32  ;;  %v23112_v2 = vadd.f32 %v8728_v24, %v8625_v39 }
 0x5b6   :  { %10987 = vmatprep.subr.bf16.mxu0 %v17699_v42  ;;  %v8631_v29 = vpop.f32.mrf.mxu0  ;;  %v8730_v26 = vpop.f32.mrf.mxu1 }
 0x5b7   :  { %11085 = vmatpush1.bf16.msra.mxu1 %v17700_v46 }
 0x5b8   :  { %10085 = vmatmul.mubr.bf16.gmra.mxu0 %v22365_v62  ;;  %v23126_v62 = vadd.f32 %v8730_v26, %v8627_v34  ;;  %v8633_v0 = vpop.f32.mrf.mxu0  ;;  %11086 = vmatprep.subr.bf16.mxu1 %v17708_v4  ;;  %v17727_v26 = vld [vmem:[%s24684_s7 + $0x840] ss:$16 sps:$4 sm:$0xff]  }
 0x5b9   :  { %10988 = vmatpush2.bf16.msra.mxu0 %v17697_v6  ;;  %15388 = vmatprep.mubr.msk.bf16.mxu0 %vm8555_vm8, %v22429_v59  ;;  %v8734_v59 = vpop.f32.mrf.mxu1  ;;  %v17732_v6 = vld [vmem:[%s24684_s7 + $0xa24] ss:$16 sps:$4 sm:$0xff]  }
 0x5ba   :  { %25289 = vst [vmem:[#allocation81_spill] sm:$0xff] %v23126_v62  ;;  %10989 = vmatprep.subr.bf16.mxu0 %v17705_v21  ;;  %9972 = vmatmul.mubr.bf16.gmra.mxu1 %v22861_v1  ;;  %v23133_v60 = vadd.f32 %v8734_v59, %v8631_v29  ;;  %v8635_v40 = vpop.f32.mrf.mxu0  ;;  %v17730_v29 = vld [vmem:[%s24684_s7 + $0xa20] ss:$16 sps:$4 sm:$0xff]  }
 0x5bb   :  { %9981 = vmatprep.mubr.bf16.mxu1 %v22866_v50  ;;  %11087 = vmatpush1.bf16.msra.mxu1 %v17706_v15  ;;  %v8736_v44 = vpop.f32.mrf.mxu1 }
 0x5bc   :  { %11088 = vmatprep.subr.bf16.mxu1 %v17714_v58  ;;  %v23141_v33 = vadd.f32 %v8736_v44, %v8633_v0  ;;  %v8637_v27 = vpop.f32.mrf.mxu0  ;;  %v17735_v0 = vld [vmem:[%s24684_s7 + $0x824] ss:$16 sps:$4 sm:$0xff]   ;;  %v17733_v44 = vld [vmem:[%s24684_s7 + $0x820] ss:$16 sps:$4 sm:$0xff]  }
 0x5bd   :  { %10990 = vmatpush2.bf16.msra.mxu0 %v17703_v22  ;;  %v8738_v48 = vpop.f32.mrf.mxu1  ;;  %v17738_v22 = vld [vmem:[%s24684_s7 + $0xa04] ss:$16 sps:$4 sm:$0xff]  }
 0x5be   :  { %10991 = vmatprep.subr.bf16.mxu0 %v17711_v41  ;;  %v23149_v36 = vadd.f32 %v8738_v48, %v8635_v40  ;;  %v17736_v40 = vld [vmem:[%s24684_s7 + $0xa00] ss:$16 sps:$4 sm:$0xff]  }
 0x5bf   :  { %v8641_v35 = vpop.f32.mrf.mxu0  ;;  %11089 = vmatpush1.bf16.msra.mxu1 %v17712_v31  ;;  %v8740_v10 = vpop.f32.mrf.mxu1 }
 0x5c0   :  { %10095 = vmatmul.mubr.bf16.gmra.mxu0 %v18051_v5  ;;  %v23162_v18 = vadd.f32 %v8740_v10, %v8637_v27  ;;  %11098 = vmatprep.subr.bf16.mxu1 %v17720_v49  ;;  %v17741_v49 = vld [vmem:[%s24684_s7 + $0x804] ss:$16 sps:$4 sm:$0xff]   ;;  %v17739_v10 = vld [vmem:[%s24684_s7 + $0x800] ss:$16 sps:$4 sm:$0xff]  }
 0x5c1   :  { %10992 = vmatpush2.bf16.msra.mxu0 %v17709_v3  ;;  %15389 = vmatprep.mubr.msk.bf16.mxu0 %vm8555_vm8, %v22481_v16  ;;  %v8643_v39 = vpop.f32.mrf.mxu0  ;;  %v8744_v16 = vpop.f32.mrf.mxu1  ;;  %v17744_v3 = vld [vmem:[%s24684_s7 + $0x7ec] ss:$16 sps:$4 sm:$0xff]  }
 0x5c2   :  { %25290 = vst [vmem:[#allocation82_spill] sm:$0xff] %v23162_v18  ;;  %10993 = vmatprep.subr.bf16.mxu0 %v17717_v37  ;;  %9982 = vmatmul.mubr.bf16.gmra.mxu1 %v22896_v12  ;;  %v23169_v20 = vadd.f32 %v8744_v16, %v8641_v35  ;;  %v17817_v18 = vld [vmem:[%s24684_s7 + $0x888] ss:$16 sps:$4 sm:$0xff]  }
 0x5c3   :  { %9991 = vmatprep.mubr.bf16.mxu1 %v22901_v30  ;;  %v8645_v32 = vpop.f32.mrf.mxu0  ;;  %11099 = vmatpush2.bf16.msra.mxu1 %v17718_v52  ;;  %v8746_v42 = vpop.f32.mrf.mxu1 }
 0x5c4   :  { %11100 = vmatprep.subr.bf16.mxu1 %v17726_v17  ;;  %v23177_v34 = vadd.f32 %v8746_v42, %v8643_v39  ;;  %v17753_v39 = vld [vmem:[%s24684_s7 + $0x9ec] ss:$16 sps:$4 sm:$0xff]   ;;  %v17751_v42 = vld [vmem:[%s24684_s7 + $0x9e8] ss:$16 sps:$4 sm:$0xff]  }
 0x5c5   :  { %10994 = vmatpush2.bf16.msra.mxu0 %v17715_v38  ;;  %v8647_v46 = vpop.f32.mrf.mxu0  ;;  %v8748_v21 = vpop.f32.mrf.mxu1 }
 0x5c6   :  { %10995 = vmatprep.subr.bf16.mxu0 %v17723_v11  ;;  %v23185_v4 = vadd.f32 %v8748_v21, %v8645_v32 }
 0x5c7   :  { %11101 = vmatpush2.bf16.msra.mxu1 %v17724_v51  ;;  %v8750_v15 = vpop.f32.mrf.mxu1 }
 0x5c8   :  { %10105 = vmatmul.mubr.bf16.gmra.mxu0 %v22483_v9  ;;  %v8651_v24 = vpop.f32.mrf.mxu0  ;;  %v23198_v58 = vadd.f32 %v8750_v15, %v8647_v46  ;;  %11102 = vmatprep.subr.bf16.mxu1 %v17732_v6  ;;  %v17747_v15 = vld [vmem:[%s24684_s7 + $0x7cc] ss:$16 sps:$4 sm:$0xff]  }
 0x5c9   :  { %10996 = vmatpush2.bf16.msra.mxu0 %v17721_v7  ;;  %11003 = vmatprep.mubr.bf16.mxu0 %v22792_v19 }
 0x5ca   :  { %25291 = vst [vmem:[#allocation83_spill] sm:$0xff] %v23198_v58  ;;  %v8653_v9 = vpop.f32.mrf.mxu0  ;;  %10997 = vmatprep.subr.bf16.mxu0 %v17729_v8  ;;  %9992 = vmatmul.mubr.bf16.gmra.mxu1 %v22929_v25  ;;  %v8754_v19 = vpop.f32.mrf.mxu1  ;;  %v17761_v8 = vld [vmem:[%s24684_s7 + $0x9cc] ss:$16 sps:$4 sm:$0xff]  }
 0x5cb   :  { %10001 = vmatprep.mubr.bf16.mxu1 %v22934_v53  ;;  %v23205_v41 = vadd.f32 %v8754_v19, %v8651_v24  ;;  %11103 = vmatpush2.bf16.msra.mxu1 %v17730_v29  ;;  %v17745_v19 = vld [vmem:[%s24684_s7 + $0x7c8] ss:$16 sps:$4 sm:$0xff]  }
 0x5cc   :  { %v8655_v59 = vpop.f32.mrf.mxu0  ;;  %v8756_v31 = vpop.f32.mrf.mxu1  ;;  %11104 = vmatprep.subr.bf16.mxu1 %v17738_v22 }
 0x5cd   :  { %10998 = vmatpush2.bf16.msra.mxu0 %v17727_v26  ;;  %v23216_v27 = vadd.f32 %v8756_v31, %v8653_v9  ;;  %v17759_v26 = vld [vmem:[%s24684_s7 + $0x9c8] ss:$16 sps:$4 sm:$0xff]   ;;  %v17750_v31 = vld [vmem:[%s24684_s7 + $0x7ac] ss:$16 sps:$4 sm:$0xff]  }
 0x5ce   :  { %v8657_v37 = vpop.f32.mrf.mxu0  ;;  %10999 = vmatprep.subr.bf16.mxu0 %v17735_v0  ;;  %v8758_v48 = vpop.f32.mrf.mxu1 }
 0x5cf   :  { %v23221_v5 = vadd.f32 %v8758_v48, %v8655_v59  ;;  %11105 = vmatpush2.bf16.msra.mxu1 %v17736_v40  ;;  %v17748_v48 = vld [vmem:[%s24684_s7 + $0x7a8] ss:$16 sps:$4 sm:$0xff]  }
 0x5d0   :  { %v8661_v35 = vpop.f32.mrf.mxu0  ;;  %v8760_v52 = vpop.f32.mrf.mxu1  ;;  %11177 = vmatprep.subr.bf16.mxu1 %v17744_v3 }
 0x5d1   :  { %11000 = vmatpush2.bf16.msra.mxu0 %v17733_v44  ;;  %v23226_v38 = vadd.f32 %v8760_v52, %v8657_v37  ;;  %v17776_v37 = vld [vmem:[%s24684_s7 + $0x98c] ss:$16 sps:$4 sm:$0xff]  }
 0x5d2   :  { %v8663_v17 = vpop.f32.mrf.mxu0  ;;  %11001 = vmatprep.subr.bf16.mxu0 %v17741_v49  ;;  %10002 = vmatmul.mubr.bf16.gmra.mxu1 %v22962_v28  ;;  %v8764_v11 = vpop.f32.mrf.mxu1 }
 0x5d3   :  { %25292 = vst [vmem:[#allocation84_spill] sm:$0xff] %v23226_v38  ;;  %15642 = vmatprep.mubr.msk.bf16.mxu1 %vm8555_vm8, %v22807_v23  ;;  %v23234_v16 = vadd.f32 %v8764_v11, %v8661_v35  ;;  %v17742_v23 = vld [vmem:[%s24684_s7 + $0x7e8] ss:$16 sps:$4 sm:$0xff]  }
 0x5d4   :  { %v8665_v32 = vpop.f32.mrf.mxu0  ;;  %v8766_v51 = vpop.f32.mrf.mxu1  ;;  %v23453_v38 = vld [vmem:[#allocation4 + $0xe8] ss:$16 sps:$4 sm:$0xff]  }
 0x5d5   :  { %11002 = vmatpush2.bf16.msra.mxu0 %v17739_v10  ;;  %v23239_v7 = vadd.f32 %v8766_v51, %v8663_v17  ;;  %v17758_v10 = vld [vmem:[%s24684_s7 + $0x78c] ss:$16 sps:$4 sm:$0xff]  }
 0x5d6   :  { %v8667_v46 = vpop.f32.mrf.mxu0  ;;  %11280 = vmatprep.subr.bf16.mxu0 %v17753_v39  ;;  %v8768_v6 = vpop.f32.mrf.mxu1  ;;  %v23293_v39 = vld [vmem:[#allocation4 + $0x8c] ss:$16 sps:$4 sm:$0xff]  }
 0x5d7   :  { %v23244_v21 = vadd.f32 %v8768_v6, %v8665_v32  ;;  %v17774_v32 = vld [vmem:[%s24684_s7 + $0x988] ss:$16 sps:$4 sm:$0xff]  }
 0x5d8   :  { %11004 = vmatmul.mubr.bf16.vlgmr.msra.gmra.mxu0 %v22824_v13  ;;  %v8671_v24 = vpop.f32.mrf.mxu0  ;;  %v8770_v29 = vpop.f32.mrf.mxu1  ;;  %v17768_v13 = vld [vmem:[%s24684_s7 + $0x9ac] ss:$16 sps:$4 sm:$0xff]   ;;  %v17762_v6 = vld [vmem:[%s24684_s7 + $0x768] ss:$16 sps:$4 sm:$0xff]  }
 0x5d9   :  { %11013 = vmatprep.mubr.bf16.mxu0 %v22829_v14  ;;  %11281 = vmatpush1.bf16.msra.mxu0 %v17751_v42  ;;  %v23257_v22 = vadd.f32 %v8770_v29, %v8667_v46  ;;  %v17764_v42 = vld [vmem:[%s24684_s7 + $0x76c] ss:$16 sps:$4 sm:$0xff]   ;;  %v17781_v46 = vld [vmem:[%s24684_s7 + $0x968] ss:$16 sps:$4 sm:$0xff]  }
 0x5da   :  { %v8673_v9 = vpop.f32.mrf.mxu0  ;;  %11282 = vmatprep.subr.bf16.mxu0 %v17761_v8  ;;  %11107 = vmatmul.mubr.bf16.vlgmr.msra.gmra.mxu1 %v22838_v47  ;;  %v8774_v14 = vpop.f32.mrf.mxu1  ;;  %v17791_v8 = vld [vmem:[%s24684_s7 + $0x94c] ss:$16 sps:$4 sm:$0xff]  }
 0x5db   :  { %25293 = vst [vmem:[#allocation85_spill] sm:$0xff] %v23257_v22  ;;  %11178 = vmatpush1.bf16.msra.mxu1 %v17742_v23  ;;  %15643 = vmatprep.mubr.msk.bf16.mxu1 %vm8555_vm8, %v22844_v43  ;;  %v23265_v0 = vadd.f32 %v8774_v14, %v8671_v24  ;;  %v17766_v43 = vld [vmem:[%s24684_s7 + $0x9a8] ss:$16 sps:$4 sm:$0xff]   ;;  %v17773_v29 = vld [vmem:[%s24684_s7 + $0x74c] ss:$16 sps:$4 sm:$0xff]  }
 0x5dc   :  { %v8675_v59 = vpop.f32.mrf.mxu0  ;;  %11179 = vmatprep.subr.bf16.mxu1 %v17747_v15  ;;  %v8776_v40 = vpop.f32.mrf.mxu1  ;;  %v23320_v24 = vld [vmem:[#allocation4 + $0x88] ss:$16 sps:$4 sm:$0xff]   ;;  %v23326_v15 = vld [vmem:[#allocation4 + $0xac] ss:$16 sps:$4 sm:$0xff]  }
 0x5dd   :  { %11283 = vmatpush1.bf16.msra.mxu0 %v17759_v26  ;;  %v23273_v47 = vadd.f32 %v8776_v40, %v8673_v9  ;;  %v17789_v9 = vld [vmem:[%s24684_s7 + $0x948] ss:$16 sps:$4 sm:$0xff]   ;;  %v17779_v40 = vld [vmem:[%s24684_s7 + $0x72c] ss:$16 sps:$4 sm:$0xff]  }
 0x5de   :  { %v8677_v44 = vpop.f32.mrf.mxu0  ;;  %11284 = vmatprep.subr.bf16.mxu0 %v17768_v13  ;;  %v8778_v3 = vpop.f32.mrf.mxu1  ;;  %v17771_v14 = vld [vmem:[%s24684_s7 + $0x748] ss:$16 sps:$4 sm:$0xff]  }
 0x5df   :  { %11180 = vmatpush1.bf16.msra.mxu1 %v17745_v19  ;;  %v23281_v49 = vadd.f32 %v8778_v3, %v8675_v59 }
 0x5e0   :  { %11014 = vmatmul.mubr.bf16.gmra.mxu0 %v22861_v1  ;;  %v8920_v35 = vpop.f32.mrf.mxu0  ;;  %11181 = vmatprep.subr.bf16.mxu1 %v17750_v31  ;;  %v8780_v52 = vpop.f32.mrf.mxu1  ;;  %v17783_v1 = vld [vmem:[%s24684_s7 + $0x96c] ss:$16 sps:$4 sm:$0xff]  }
 0x5e1   :  { %11023 = vmatprep.mubr.bf16.mxu0 %v22866_v50  ;;  %v23291_v17 = vadd.f32 %v8780_v52, %v8677_v44  ;;  %11285 = vmatpush1.bf16.msra.mxu0 %v17766_v43  ;;  %v17756_v50 = vld [vmem:[%s24684_s7 + $0x788] ss:$16 sps:$4 sm:$0xff]  }
 0x5e2   :  { %v8922_v11 = vpop.f32.mrf.mxu0  ;;  %11117 = vmatmul.mubr.bf16.gmra.mxu1 %v22875_v61  ;;  %11286 = vmatprep.subr.bf16.mxu0 %v17776_v37  ;;  %v17796_v43 = vld [vmem:[%s24684_s7 + $0x928] ss:$16 sps:$4 sm:$0xff]   ;;  %v17809_v37 = vld [vmem:[%s24684_s7 + $0x90c] ss:$16 sps:$4 sm:$0xff]  }
 0x5e3   :  { %25294 = vst [vmem:[#allocation86_spill] sm:$0xff] %v23291_v17  ;;  %11182 = vmatpush1.bf16.msra.mxu1 %v17748_v48  ;;  %15644 = vmatprep.mubr.msk.bf16.mxu1 %vm8555_vm8, %v23293_v39 }
 0x5e4   :  { %v8924_v51 = vpop.f32.mrf.mxu0  ;;  %11183 = vmatprep.subr.bf16.mxu1 %v17758_v10 }
 0x5e5   :  { %11287 = vmatpush1.bf16.msra.mxu0 %v17774_v32  ;;  %v17788_v32 = vld [vmem:[%s24684_s7 + $0x70c] ss:$16 sps:$4 sm:$0xff]  }
 0x5e6   :  { %v8926_v61 = vpop.f32.mrf.mxu0  ;;  %11288 = vmatprep.subr.bf16.mxu0 %v17783_v1 }
 0x5e7   :  { %11184 = vmatpush1.bf16.msra.mxu1 %v17756_v50  ;;  %v23367_v50 = vld [vmem:[#allocation4 + $0xcc] ss:$16 sps:$4 sm:$0xff]  }
 0x5e8   :  { %11024 = vmatmul.mubr.bf16.gmra.mxu0 %v22896_v12  ;;  %v8930_v23 = vpop.f32.mrf.mxu0  ;;  %11185 = vmatprep.subr.bf16.mxu1 %v17764_v42 }
 0x5e9   :  { %11033 = vmatprep.mubr.bf16.mxu0 %v22901_v30  ;;  %11289 = vmatpush1.bf16.msra.mxu0 %v17781_v46  ;;  %v17798_v30 = vld [vmem:[%s24684_s7 + $0x92c] ss:$16 sps:$4 sm:$0xff]  }
 0x5ea   :  { %v8932_v26 = vpop.f32.mrf.mxu0  ;;  %11127 = vmatmul.mubr.bf16.gmra.mxu1 %v23320_v24  ;;  %v8817_v12 = vpop.f32.mrf.mxu1  ;;  %11290 = vmatprep.subr.bf16.mxu0 %v17791_v8 }
 0x5eb   :  { %11186 = vmatpush1.bf16.msra.mxu1 %v17762_v6  ;;  %v23335_v13 = vadd.f32 %v8920_v35, %v8817_v12  ;;  %15645 = vmatprep.mubr.msk.bf16.mxu1 %vm8555_vm8, %v23326_v15  ;;  %v17777_v35 = vld [vmem:[%s24684_s7 + $0x728] ss:$16 sps:$4 sm:$0xff]  }
 0x5ec   :  { %v8934_v19 = vpop.f32.mrf.mxu0  ;;  %v8819_v59 = vpop.f32.mrf.mxu1  ;;  %11187 = vmatprep.subr.bf16.mxu1 %v17773_v29  ;;  %v17794_v29 = vld [vmem:[%s24684_s7 + $0x8ec] ss:$16 sps:$4 sm:$0xff]  }
 0x5ed   :  { %v23345_v31 = vadd.f32 %v8922_v11, %v8819_v59  ;;  %11291 = vmatpush1.bf16.msra.mxu0 %v17789_v9  ;;  %v23359_v11 = vld [vmem:[#allocation4 + $0xa8] ss:$16 sps:$4 sm:$0xff]   ;;  %v17822_v59 = vld [vmem:[%s24684_s7 + $0xa4c] ss:$16 sps:$4 sm:$0xff]  }
 0x5ee   :  { %v8936_v44 = vpop.f32.mrf.mxu0  ;;  %v8821_v3 = vpop.f32.mrf.mxu1  ;;  %11292 = vmatprep.subr.bf16.mxu0 %v17798_v30 }
 0x5ef   :  { %11188 = vmatpush1.bf16.msra.mxu1 %v17771_v14  ;;  %v23353_v48 = vadd.f32 %v8924_v51, %v8821_v3  ;;  %v23391_v14 = vld [vmem:[#allocation4 + $0xe4] ss:$16 sps:$4 sm:$0xff]  }
 0x5f0   :  { %11034 = vmatmul.mubr.bf16.gmra.mxu0 %v22929_v25  ;;  %v8940_v52 = vpop.f32.mrf.mxu0  ;;  %v8823_v10 = vpop.f32.mrf.mxu1  ;;  %11189 = vmatprep.subr.bf16.mxu1 %v17779_v40  ;;  %v17807_v25 = vld [vmem:[%s24684_s7 + $0x908] ss:$16 sps:$4 sm:$0xff]  }
 0x5f1   :  { %11043 = vmatprep.mubr.bf16.mxu0 %v22934_v53  ;;  %v23365_v1 = vadd.f32 %v8926_v61, %v8823_v10  ;;  %11293 = vmatpush1.bf16.msra.mxu0 %v17796_v43  ;;  %v17816_v53 = vld [vmem:[%s24684_s7 + $0xa6c] ss:$16 sps:$4 sm:$0xff]   ;;  %v17786_v61 = vld [vmem:[%s24684_s7 + $0x708] ss:$16 sps:$4 sm:$0xff]  }
 0x5f2   :  { %v8942_v51 = vpop.f32.mrf.mxu0  ;;  %11137 = vmatmul.mubr.bf16.gmra.mxu1 %v23359_v11  ;;  %v8827_v42 = vpop.f32.mrf.mxu1  ;;  %11294 = vmatprep.subr.bf16.mxu0 %v17809_v37  ;;  %v23402_v37 = vld [vmem:[#allocation4 + $0xc8] ss:$16 sps:$4 sm:$0xff]  }
 0x5f3   :  { %11190 = vmatpush1.bf16.msra.mxu1 %v17777_v35  ;;  %v23376_v46 = vadd.f32 %v8930_v23, %v8827_v42  ;;  %15646 = vmatprep.mubr.msk.bf16.mxu1 %vm8555_vm8, %v23367_v50  ;;  %v17814_v23 = vld [vmem:[%s24684_s7 + $0xa68] ss:$16 sps:$4 sm:$0xff]   ;;  %v17806_v35 = vld [vmem:[%s24684_s7 + $0x8cc] ss:$16 sps:$4 sm:$0xff]  }
 0x5f4   :  { %v8944_v8 = vpop.f32.mrf.mxu0  ;;  %v8829_v6 = vpop.f32.mrf.mxu1  ;;  %11191 = vmatprep.subr.bf16.mxu1 %v17788_v32  ;;  %v17831_v42 = vld [vmem:[%s24684_s7 + $0xa2c] ss:$16 sps:$4 sm:$0xff]  }
 0x5f5   :  { %v23386_v9 = vadd.f32 %v8932_v26, %v8829_v6  ;;  %11295 = vmatpush1.bf16.msra.mxu0 %v17807_v25  ;;  %v17792_v26 = vld [vmem:[%s24684_s7 + $0x8e8] ss:$16 sps:$4 sm:$0xff]  }
 0x5f6   :  { %v8946_v12 = vpop.f32.mrf.mxu0  ;;  %v8831_v30 = vpop.f32.mrf.mxu1  ;;  %11304 = vmatprep.subr.bf16.mxu0 %v17816_v53 }
 0x5f7   :  { %11192 = vmatpush1.bf16.msra.mxu1 %v17786_v61  ;;  %v23396_v40 = vadd.f32 %v8934_v19, %v8831_v30  ;;  %v23410_v19 = vld [vmem:[#allocation4 + $0xec] ss:$16 sps:$4 sm:$0xff]   ;;  %v23435_v30 = vld [vmem:[#allocation4 + $0xe0] ss:$16 sps:$4 sm:$0xff]  }
 0x5f8   :  { %11044 = vmatmul.mubr.bf16.gmra.mxu0 %v22962_v28  ;;  %v8950_v43 = vpop.f32.mrf.mxu0  ;;  %v8833_v3 = vpop.f32.mrf.mxu1  ;;  %11193 = vmatprep.subr.bf16.mxu1 %v17794_v29  ;;  %v17820_v28 = vld [vmem:[%s24684_s7 + $0xa48] ss:$16 sps:$4 sm:$0xff]   ;;  %v17812_v29 = vld [vmem:[%s24684_s7 + $0x8ac] ss:$16 sps:$4 sm:$0xff]  }
 0x5f9   :  { %11053 = vmatprep.mubr.bf16.mxu0 %v23391_v14  ;;  %v23408_v10 = vadd.f32 %v8936_v44, %v8833_v3  ;;  %11305 = vmatpush2.bf16.msra.mxu0 %v17814_v23  ;;  %v17804_v44 = vld [vmem:[%s24684_s7 + $0x8c8] ss:$16 sps:$4 sm:$0xff]   ;;  %v23429_v23 = vld [vmem:[#allocation4] sm:$0xff] }
 0x5fa   :  { %v8952_v32 = vpop.f32.mrf.mxu0  ;;  %11147 = vmatmul.mubr.bf16.gmra.mxu1 %v23402_v37  ;;  %v8837_v25 = vpop.f32.mrf.mxu1  ;;  %11306 = vmatprep.subr.bf16.mxu0 %v17822_v59  ;;  %v17829_v3 = vld [vmem:[%s24684_s7 + $0xa28] ss:$16 sps:$4 sm:$0xff]  }
 0x5fb   :  { %11194 = vmatpush2.bf16.msra.mxu1 %v17792_v26  ;;  %v23419_v53 = vadd.f32 %v8940_v52, %v8837_v25  ;;  %15647 = vmatprep.mubr.msk.bf16.mxu1 %vm8555_vm8, %v23410_v19  ;;  %v23433_v52 = vcombine.high %v23429_v23, %v23429_v23  ;;  %v17837_v25 = vld [vmem:[%s24684_s7 + $0xa0c] ss:$16 sps:$4 sm:$0xff]  }
 0x5fc   :  { %v8954_v61 = vpop.f32.mrf.mxu0  ;;  %v8839_v6 = vpop.f32.mrf.mxu1  ;;  %11195 = vmatprep.subr.bf16.mxu1 %v17806_v35 }
 0x5fd   :  { %v23437_v59 = vadd.f32 %v8942_v51, %v8839_v6  ;;  %11307 = vmatpush2.bf16.msra.mxu0 %v17820_v28  ;;  %v17810_v51 = vld [vmem:[%s24684_s7 + $0x8a8] ss:$16 sps:$4 sm:$0xff]   ;;  %v23451_v6 = vld [vmem:[#allocation4 + $0x10c] ss:$16 sps:$4 sm:$0xff]  }
 0x5fe   :  { %v8956_v26 = vpop.f32.mrf.mxu0  ;;  %v8841_v35 = vpop.f32.mrf.mxu1  ;;  %11308 = vmatprep.subr.bf16.mxu0 %v17831_v42  ;;  %v17819_v42 = vld [vmem:[%s24684_s7 + $0x88c] ss:$16 sps:$4 sm:$0xff]  }
 0x5ff   :  { %11196 = vmatpush2.bf16.msra.mxu1 %v17804_v44  ;;  %v23445_v17 = vadd.f32 %v8944_v8, %v8841_v35  ;;  %v17835_v35 = vld [vmem:[%s24684_s7 + $0xa08] ss:$16 sps:$4 sm:$0xff]  }
 0x600   :  { %11054 = vmatmul.mubr.bf16.gmra.mxu0 %v23435_v30  ;;  %v8960_v28 = vpop.f32.mrf.mxu0  ;;  %v8843_v22 = vpop.f32.mrf.mxu1  ;;  %11197 = vmatprep.subr.bf16.mxu1 %v17812_v29 }
 0x601   :  { %25295 = vst [vmem:[#allocation9_spill] sm:$0xff] %v23445_v17  ;;  %11063 = vmatprep.mubr.bf16.mxu0 %v23433_v52  ;;  %v23459_v8 = vadd.f32 %v8946_v12, %v8843_v22  ;;  %11309 = vmatpush2.bf16.msra.mxu0 %v17829_v3  ;;  %v23472_v22 = vcombine.low %v23429_v23, %v23429_v23  ;;  %v17827_v3 = vld [vmem:[%s24684_s7 + $0x86c] ss:$16 sps:$4 sm:$0xff]  }
 0x602   :  { %v8962_v44 = vpop.f32.mrf.mxu0  ;;  %11157 = vmatmul.mubr.bf16.gmra.mxu1 %v23453_v38  ;;  %v8847_v58 = vpop.f32.mrf.mxu1  ;;  %11310 = vmatprep.subr.bf16.mxu0 %v17837_v25  ;;  %v18053_v17 = vld [vmem:[#allocation4 + $0x4c] ss:$16 sps:$4 sm:$0xff]  }
 0x603   :  { %25296 = vst [vmem:[#allocation87_spill] sm:$0xff] %v23459_v8  ;;  %11198 = vmatpush2.bf16.msra.mxu1 %v17810_v51  ;;  %v23465_v29 = vadd.f32 %v8950_v43, %v8847_v58  ;;  %15648 = vmatprep.mubr.msk.bf16.mxu1 %vm8555_vm8, %v23451_v6  ;;  %v23481_v51 = vld [vmem:[#allocation4 + $0x108] ss:$16 sps:$4 sm:$0xff]  }
 0x604   :  { %v8964_v62 = vpop.f32.mrf.mxu0  ;;  %v8849_v12 = vpop.f32.mrf.mxu1  ;;  %11199 = vmatprep.subr.bf16.mxu1 %v17819_v42 }
 0x605   :  { %25297 = vst [vmem:[#allocation88_spill] sm:$0xff] %v23465_v29  ;;  %v23479_v58 = vadd.f32 %v8952_v32, %v8849_v12  ;;  %11311 = vmatpush2.bf16.msra.mxu0 %v17835_v35  ;;  %v17825_v29 = vld [vmem:[%s24684_s7 + $0x868] ss:$16 sps:$4 sm:$0xff]   ;;  %v17834_v32 = vld [vmem:[%s24684_s7 + $0x84c] ss:$16 sps:$4 sm:$0xff]  }
 0x606   :  { %v8966_v43 = vpop.f32.mrf.mxu0  ;;  %v8851_v25 = vpop.f32.mrf.mxu1 }
 0x607   :  { %25298 = vst [vmem:[#allocation18_spill] sm:$0xff] %v23479_v58  ;;  %11200 = vmatpush2.bf16.msra.mxu1 %v17817_v18  ;;  %v23483_v63 = vadd.f32 %v8954_v61, %v8851_v25  ;;  %v18054_v25 = vld [vmem:[#allocation4 + $0x44] ss:$16 sps:$4 sm:$0xff]  }
 0x608   :  { %11064 = vmatmul.mubr.bf16.gmra.mxu0 %v23472_v22  ;;  %v8970_v42 = vpop.f32.mrf.mxu0  ;;  %v8853_v8 = vpop.f32.mrf.mxu1  ;;  %11201 = vmatprep.subr.bf16.mxu1 %v17827_v3  ;;  %v17832_v3 = vld [vmem:[%s24684_s7 + $0x848] ss:$16 sps:$4 sm:$0xff]  }
 0x609   :  { %25299 = vst [vmem:[#allocation10_spill] sm:$0xff] %v23483_v63  ;;  %15649 = vmatprep.mubr.msk.bf16.mxu0 %vm8555_vm8, %v18053_v17  ;;  %v23493_v35 = vadd.f32 %v8956_v26, %v8853_v8  ;;  %v17840_v26 = vld [vmem:[%s24684_s7 + $0x82c] ss:$16 sps:$4 sm:$0xff]  }
 0x60a   :  { %v8972_v18 = vpop.f32.mrf.mxu0  ;;  %11167 = vmatmul.mubr.bf16.gmra.mxu1 %v23481_v51  ;;  %v8857_v61 = vpop.f32.mrf.mxu1 }
 0x60b   :  { %25300 = vst [vmem:[#allocation98_spill] sm:$0xff] %v23493_v35  ;;  %11202 = vmatpush2.bf16.msra.mxu1 %v17825_v29  ;;  %v23496_v12 = vadd.f32 %v8960_v28, %v8857_v61  ;;  %11209 = vmatprep.mubr.bf16.mxu1 %v18054_v25  ;;  %v17838_v29 = vld [vmem:[%s24684_s7 + $0x828] ss:$16 sps:$4 sm:$0xff]  }
 0x60c   :  { %v8974_v17 = vpop.f32.mrf.mxu0  ;;  %v8859_v63 = vpop.f32.mrf.mxu1  ;;  %11203 = vmatprep.subr.bf16.mxu1 %v17834_v32  ;;  %v18055_v61 = vld [vmem:[#allocation4 + $0x48] ss:$16 sps:$4 sm:$0xff]   ;;  %v18056_v32 = vld [vmem:[#allocation4 + $0x6c] ss:$16 sps:$4 sm:$0xff]  }
 0x60d   :  { %v23504_v8 = vadd.f32 %v8962_v44, %v8859_v63  ;;  %v17843_v63 = vld [vmem:[%s24684_s7 + $0x80c] ss:$16 sps:$4 sm:$0xff]  }
 0x60e   :  { %v8976_v35 = vpop.f32.mrf.mxu0  ;;  %v8861_v58 = vpop.f32.mrf.mxu1 }
 0x60f   :  { %25301 = vst [vmem:[#allocation11_spill] sm:$0xff] %v23504_v8  ;;  %11204 = vmatpush2.bf16.msra.mxu1 %v17832_v3  ;;  %v23506_v28 = vadd.f32 %v8964_v62, %v8861_v58  ;;  %v17844_v8 = vld [vmem:[%s24686_s9 + $0x158] sm:$0xff]  }
 0x610   :  { %11313 = vmatmul.mubr.bf16.vlgmr.msra.gmra.mxu0 %v18055_v61  ;;  %v8863_v25 = vpop.f32.mrf.mxu1  ;;  %11205 = vmatprep.subr.bf16.mxu1 %v17840_v26  ;;  %v8980_v3 = vpop.f32.mrf.mxu0  ;;  %v17841_v61 = vld [vmem:[%s24684_s7 + $0x808] ss:$16 sps:$4 sm:$0xff]  }
 0x611   :  { %25302 = vst [vmem:[#allocation99_spill] sm:$0xff] %v23506_v28  ;;  %15650 = vmatprep.mubr.msk.bf16.mxu0 %vm8555_vm8, %v18056_v32  ;;  %v23515_v44 = vadd.f32 %v8966_v43, %v8863_v25  ;;  %v18057_v25 = vld [vmem:[#allocation4 + $0x68] ss:$16 sps:$4 sm:$0xff]   ;;  %16275 = vmatprep.subr.bf16.mxu0 %v17844_v8 }
 0x612   :  { %v8867_v62 = vpop.f32.mrf.mxu1  ;;  %v8982_v32 = vpop.f32.mrf.mxu0 }
 0x613   :  { %11206 = vmatpush2.bf16.msra.mxu1 %v17838_v29  ;;  %v23517_v58 = vadd.f32 %v8970_v42, %v8867_v62  ;;  %v17845_v29 = vld [vmem:[%s24686_s9 + $0x118] sm:$0xff]  }
 0x614   :  { %v8869_v28 = vpop.f32.mrf.mxu1  ;;  %11207 = vmatprep.subr.bf16.mxu1 %v17843_v63  ;;  %16276 = vmatpush3.bf16.msra.mxu0 %v17845_v29  ;;  %v17846_v63 = vld [vmem:[%s24686_s9 + $0x150] sm:$0xff]  }
 0x615   :  { %v23522_v26 = vadd.f32 %v8972_v18, %v8869_v28  ;;  %v8984_v18 = vpop.f32.mrf.mxu0  ;;  %16277 = vmatprep.subr.bf16.mxu0 %v17846_v63 }
 0x616   :  { %v8871_v43 = vpop.f32.mrf.mxu1 }
 0x617   :  { %11208 = vmatpush2.bf16.msra.mxu1 %v17841_v61  ;;  %v23530_v42 = vadd.f32 %v8974_v17, %v8871_v43  ;;  %v18058_v61 = vld [vmem:[#allocation4 + $0x40] ss:$16 sps:$4 sm:$0xff]   ;;  %v8986_v8 = vpop.f32.mrf.mxu0 }
 0x618   :  { %11323 = vmatmul.mubr.bf16.gmra.mxu0 %v18057_v25  ;;  %v8873_v62 = vpop.f32.mrf.mxu1  ;;  %11926 = vmatprep.subr.bf16.mxu1 %v23429_v23  ;;  %v17847_v43 = vld [vmem:[%s24686_s9 + $0x110] sm:$0xff]  }
 0x619   :  { %25303 = vst [vmem:[#allocation12_spill] sm:$0xff] %v23530_v42  ;;  %15651 = vmatprep.mubr.msk.bf16.mxu0 %vm8555_vm8, %v23293_v39  ;;  %v23534_v28 = vadd.f32 %v8976_v35, %v8873_v62  ;;  %v18059_v25 = vld [vmem:[#allocation4 + $0x64] ss:$16 sps:$4 sm:$0xff]   ;;  %16278 = vmatpush3.bf16.msra.mxu0 %v17847_v43  ;;  %v17848_v62 = vld [vmem:[%s24686_s9 + $0x148] sm:$0xff]  }
 0x61a   :  { %11210 = vmatmul.mubr.bf16.vlgmr.msra.gmra.mxu1 %v18058_v61  ;;  %v8877_v17 = vpop.f32.mrf.mxu1  ;;  %16279 = vmatprep.subr.bf16.mxu0 %v17848_v62  ;;  %v18061_v62 = vld [vmem:[#allocation4 + $0x84] ss:$16 sps:$4 sm:$0xff]  }
 0x61b   :  { %25304 = vst [vmem:[#allocation100_spill] sm:$0xff] %v23534_v28  ;;  %11219 = vmatprep.mubr.bf16.mxu1 %v18059_v25  ;;  %v23543_v39 = vadd.f32 %v8980_v3, %v8877_v17  ;;  %v17849_v28 = vld [vmem:[%s24686_s9 + $0x108] sm:$0xff]   ;;  %v17850_v25 = vld [vmem:[%s24686_s9 + $0x140] sm:$0xff]  }
 0x61c   :  { %v8879_v35 = vpop.f32.mrf.mxu1 }
 0x61d   :  { %v23545_v29 = vadd.f32 %v8982_v32, %v8879_v35  ;;  %16280 = vmatpush3.bf16.msra.mxu0 %v17849_v28 }
 0x61e   :  { %v8881_v61 = vpop.f32.mrf.mxu1  ;;  %16281 = vmatprep.subr.bf16.mxu0 %v17850_v25 }
 0x61f   :  { %v23553_v42 = vadd.f32 %v8984_v18, %v8881_v61  ;;  %v18060_v18 = vld [vmem:[#allocation4 + $0x60] ss:$16 sps:$4 sm:$0xff]  }
 0x620   :  { %11333 = vmatmul.mubr.bf16.gmra.mxu0 %v23320_v24  ;;  %v9737_v3 = vpop.f32.mrf.mxu0  ;;  %v8883_v63 = vpop.f32.mrf.mxu1 }
 0x621   :  { %v9738_v32 = vadd.f32 %v9737_v3, %v23060_v45  ;;  %15652 = vmatprep.mubr.msk.bf16.mxu0 %vm8555_vm8, %v23326_v15  ;;  %v23559_v17 = vadd.f32 %v8986_v8, %v8883_v63  ;;  %v17851_v45 = vld [vmem:[%s24686_s9 + $0x100] sm:$0xff]  }
 0x622   :  { %v9739_v43 = vpop.f32.mrf.mxu0  ;;  %11220 = vmatmul.mubr.bf16.gmra.mxu1 %v18060_v18  ;;  %v9840_v35 = vpop.f32.mrf.mxu1  ;;  %16282 = vmatpush3.bf16.msra.mxu0 %v17851_v45  ;;  %v17854_v45 = vld [vmem:[%s24686_s9 + $0x130] sm:$0xff]  }
 0x623   :  { %v9740_v24 = vadd.f32 %v9739_v43, %v23068_v55  ;;  %11229 = vmatprep.mubr.bf16.mxu1 %v18061_v62  ;;  %v23568_v15 = vadd.f32 %v9840_v35, %v9738_v32  ;;  %v17852_v55 = vld [vmem:[%s24686_s9 + $0x138] sm:$0xff]   ;;  %v18062_v62 = vld [vmem:[#allocation4 + $0x80] ss:$16 sps:$4 sm:$0xff]  }
 0x624   :  { %v9741_v8 = vpop.f32.mrf.mxu0  ;;  %v9842_v28 = vpop.f32.mrf.mxu1  ;;  %v17853_v32 = vld [vmem:[%s24686_s9 + $0xf8] sm:$0xff]   ;;  %16283 = vmatprep.subr.bf16.mxu0 %v17852_v55 }
 0x625   :  { %v9742_v61 = vadd.f32 %v9741_v8, %v23076_v57  ;;  %v23571_v3 = vadd.f32 %v9842_v28, %v9740_v24  ;;  %v17855_v28 = vld [vmem:[%s24686_s9 + $0xf0] sm:$0xff]  }
 0x626   :  { %v23573_v63 = vpop.f32.mrf.mxu0  ;;  %v9844_v43 = vpop.f32.mrf.mxu1  ;;  %16284 = vmatpush3.bf16.msra.mxu0 %v17853_v32 }
 0x627   :  { %v23581_v18 = vadd.f32 %v9844_v43, %v9742_v61  ;;  %v18063_v61 = vld [vmem:[#allocation4 + $0xa4] ss:$16 sps:$4 sm:$0xff]   ;;  %16285 = vmatprep.subr.bf16.mxu0 %v17854_v45 }
 0x628   :  { %11343 = vmatmul.mubr.bf16.gmra.mxu0 %v23359_v11  ;;  %v9747_v25 = vpop.f32.mrf.mxu0  ;;  %v23584_v57 = vpop.f32.mrf.mxu1 }
 0x629   :  { %v9748_v35 = vadd.f32 %v9747_v25, %v23096_v56  ;;  %15653 = vmatprep.mubr.msk.bf16.mxu0 %vm8555_vm8, %v23367_v50 }
 0x62a   :  { %v9749_v24 = vpop.f32.mrf.mxu0  ;;  %11230 = vmatmul.mubr.bf16.gmra.mxu1 %v18062_v62  ;;  %v9850_v8 = vpop.f32.mrf.mxu1  ;;  %16286 = vmatpush3.bf16.msra.mxu0 %v17855_v28  ;;  %v17858_v28 = vld [vmem:[%s24686_s9 + $0x120] sm:$0xff]  }
 0x62b   :  { %v9750_v11 = vadd.f32 %v9749_v24, %v23104_v54  ;;  %11239 = vmatprep.mubr.bf16.mxu1 %v18063_v61  ;;  %v23596_v56 = vadd.f32 %v9850_v8, %v9748_v35  ;;  %v17856_v54 = vld [vmem:[%s24686_s9 + $0x128] sm:$0xff]   ;;  %v18064_v61 = vld [vmem:[#allocation4 + $0xa0] ss:$16 sps:$4 sm:$0xff]  }
 0x62c   :  { %v9751_v50 = vpop.f32.mrf.mxu0  ;;  %v9852_v55 = vpop.f32.mrf.mxu1  ;;  %v17857_v35 = vld [vmem:[%s24686_s9 + $0xe8] sm:$0xff]   ;;  %16287 = vmatprep.subr.bf16.mxu0 %v17856_v54 }
 0x62d   :  { %v9752_v43 = vadd.f32 %v9751_v50, %v23112_v2  ;;  %v23599_v32 = vadd.f32 %v9852_v55, %v9750_v11  ;;  %v17859_v55 = vld [vmem:[%s24686_s9 + $0xe0] sm:$0xff]  }
 0x62e   :  { %v23601_v25 = vpop.f32.mrf.mxu0  ;;  %v9854_v24 = vpop.f32.mrf.mxu1  ;;  %16288 = vmatpush3.bf16.msra.mxu0 %v17857_v35 }
 0x62f   :  { %v23609_v62 = vadd.f32 %v9854_v24, %v9752_v43  ;;  %v18065_v43 = vld [vmem:[#allocation4 + $0xc4] ss:$16 sps:$4 sm:$0xff]   ;;  %16289 = vmatprep.subr.bf16.mxu0 %v17858_v28 }
 0x630   :  { %11353 = vmatmul.mubr.bf16.gmra.mxu0 %v23402_v37  ;;  %v9757_v45 = vpop.f32.mrf.mxu0  ;;  %v23612_v2 = vpop.f32.mrf.mxu1 }
 0x631   :  { %v9758_v8 = vadd.f32 %v9757_v45, %v23133_v60  ;;  %15654 = vmatprep.mubr.msk.bf16.mxu0 %vm8555_vm8, %v23410_v19 }
 0x632   :  { %v9759_v11 = vpop.f32.mrf.mxu0  ;;  %11240 = vmatmul.mubr.bf16.gmra.mxu1 %v18064_v61  ;;  %v9860_v50 = vpop.f32.mrf.mxu1  ;;  %16290 = vmatpush3.bf16.msra.mxu0 %v17859_v55 }
 0x633   :  { %v9760_v37 = vadd.f32 %v9759_v11, %v23141_v33  ;;  %11249 = vmatprep.mubr.bf16.mxu1 %v18065_v43  ;;  %v23624_v60 = vadd.f32 %v9860_v50, %v9758_v8  ;;  %v17860_v33 = vld [vmem:[%s24686_s9 + $0x78] sm:$0xff]  }
 0x634   :  { %v9761_v19 = vpop.f32.mrf.mxu0  ;;  %v9862_v54 = vpop.f32.mrf.mxu1  ;;  %16297 = vmatprep.subr.bf16.mxu0 %v17860_v33 }
 0x635   :  { %v9762_v24 = vadd.f32 %v9761_v19, %v23149_v36  ;;  %v23627_v35 = vadd.f32 %v9862_v54, %v9760_v37  ;;  %v18066_v37 = vld [vmem:[#allocation4 + $0xc0] ss:$16 sps:$4 sm:$0xff]  }
 0x636   :  { %v23629_v45 = vpop.f32.mrf.mxu0  ;;  %v9864_v11 = vpop.f32.mrf.mxu1 }
 0x637   :  { %v23634_v61 = vadd.f32 %v9864_v11, %v9762_v24 }
 0x638   :  { %11363 = vmatmul.mubr.bf16.gmra.mxu0 %v23453_v38  ;;  %v9767_v8 = vpop.f32.mrf.mxu0  ;;  %v23637_v28 = vpop.f32.mrf.mxu1 }
 0x639   :  { %v9768_v36 = vadd.f32 %v9767_v8, %v23169_v20  ;;  %15655 = vmatprep.mubr.msk.bf16.mxu0 %vm8555_vm8, %v23451_v6 }
 0x63a   :  { %v9769_v50 = vpop.f32.mrf.mxu0  ;;  %11250 = vmatmul.mubr.bf16.gmra.mxu1 %v18066_v37  ;;  %v9870_v55 = vpop.f32.mrf.mxu1 }
 0x63b   :  { %v9770_v43 = vadd.f32 %v9769_v50, %v23177_v34  ;;  %11259 = vmatprep.mubr.bf16.mxu1 %v23391_v14  ;;  %v23644_v19 = vadd.f32 %v9870_v55, %v9768_v36 }
 0x63c   :  { %v9771_v38 = vpop.f32.mrf.mxu0  ;;  %v9872_v54 = vpop.f32.mrf.mxu1 }
 0x63d   :  { %v9772_v24 = vadd.f32 %v9771_v38, %v23185_v4  ;;  %v23647_v33 = vadd.f32 %v9872_v54, %v9770_v43  ;;  %v17865_v43 = vld [vmem:[%s24686_s9 + $0x198] sm:$0xff]  }
 0x63e   :  { %v23649_v20 = vpop.f32.mrf.mxu0  ;;  %v9874_v11 = vpop.f32.mrf.mxu1  ;;  %11927 = vmatpush1.bf16.msra.mxu1 %v17865_v43 }
 0x63f   :  { %v23651_v6 = vadd.f32 %v9874_v11, %v9772_v24  ;;  %11928 = vmatprep.subr.bf16.mxu1 %v23429_v23 }
 0x640   :  { %v9777_v8 = vpop.f32.mrf.mxu0  ;;  %11373 = vmatmul.mubr.bf16.gmra.mxu0 %v23481_v51  ;;  %v23654_v37 = vpop.f32.mrf.mxu1 }
 0x641   :  { %v9778_v34 = vadd.f32 %v9777_v8, %v23205_v41 }
 0x642   :  { %v9779_v14 = vpop.f32.mrf.mxu0  ;;  %11260 = vmatmul.mubr.bf16.gmra.mxu1 %v23435_v30  ;;  %v9880_v36 = vpop.f32.mrf.mxu1 }
 0x643   :  { %v9780_v4 = vadd.f32 %v9779_v14, %v23216_v27  ;;  %v23659_v50 = vadd.f32 %v9880_v36, %v9778_v34  ;;  %11269 = vmatprep.mubr.bf16.mxu1 %v23433_v52  ;;  %v17869_v52 = vld [vmem:[%s24686_s9 + $0x190] sm:$0xff]  }
 0x644   :  { %v9781_v55 = vpop.f32.mrf.mxu0  ;;  %v9882_v51 = vpop.f32.mrf.mxu1  ;;  %11929 = vmatpush1.bf16.msra.mxu1 %v17869_v52 }
 0x645   :  { %v9782_v38 = vadd.f32 %v9781_v55, %v23221_v5  ;;  %v23666_v54 = vadd.f32 %v9882_v51, %v9780_v4  ;;  %11930 = vmatprep.subr.bf16.mxu1 %v23429_v23 }
 0x646   :  { %v23668_v41 = vpop.f32.mrf.mxu0  ;;  %v9884_v30 = vpop.f32.mrf.mxu1 }
 0x647   :  { %v23671_v27 = vadd.f32 %v9884_v30, %v9782_v38 }
 0x648   :  { %v9787_v24 = vpop.f32.mrf.mxu0  ;;  %v23676_v11 = vpop.f32.mrf.mxu1 }
 0x649   :  { %v9788_v8 = vadd.f32 %v9787_v24, %v23234_v16  ;;  %v17872_v16 = vld [vmem:[%s24686_s9 + $0x188] sm:$0xff]  }
 0x64a   :  { %v9789_v5 = vpop.f32.mrf.mxu0  ;;  %11270 = vmatmul.mubr.bf16.gmra.mxu1 %v23472_v22  ;;  %v9890_v34 = vpop.f32.mrf.mxu1 }
 0x64b   :  { %v9790_v14 = vadd.f32 %v9789_v5, %v23239_v7  ;;  %v23682_v36 = vadd.f32 %v9890_v34, %v9788_v8  ;;  %11931 = vmatpush1.bf16.msra.mxu1 %v17872_v16  ;;  %v17875_v8 = vld [vmem:[%s24686_s9 + $0x180] sm:$0xff]  }
 0x64c   :  { %v9791_v4 = vpop.f32.mrf.mxu0  ;;  %v9892_v55 = vpop.f32.mrf.mxu1  ;;  %11932 = vmatprep.subr.bf16.mxu1 %v23429_v23 }
 0x64d   :  { %v9792_v43 = vadd.f32 %v9791_v4, %v23244_v21  ;;  %v23685_v51 = vadd.f32 %v9892_v55, %v9790_v14 }
 0x64e   :  { %v23687_v38 = vpop.f32.mrf.mxu0  ;;  %v9894_v22 = vpop.f32.mrf.mxu1 }
 0x64f   :  { %v23692_v30 = vadd.f32 %v9894_v22, %v9792_v43  ;;  %11933 = vmatpush1.bf16.msra.mxu1 %v17875_v8  ;;  %v17878_v22 = vld [vmem:[%s24686_s9 + $0x178] sm:$0xff]  }
 0x650   :  { %v9797_v7 = vpop.f32.mrf.mxu0  ;;  %v23694_v24 = vpop.f32.mrf.mxu1  ;;  %11934 = vmatprep.subr.bf16.mxu1 %v23429_v23 }
 0x651   :  { %25305 = vst [vmem:[#allocation13_spill] sm:$0xff] %v23692_v30  ;;  %25306 = vst [vmem:[#allocation101_spill] sm:$0xff] %v23694_v24  ;;  %v9798_v52 = vadd.f32 %v9797_v7, %v23265_v0 }
 0x652   :  { %v9799_v21 = vpop.f32.mrf.mxu0  ;;  %v9900_v5 = vpop.f32.mrf.mxu1 }
 0x653   :  { %v9800_v34 = vadd.f32 %v9799_v21, %v23273_v47  ;;  %v23702_v14 = vadd.f32 %v9900_v5, %v9798_v52  ;;  %11935 = vmatpush1.bf16.msra.mxu1 %v17878_v22  ;;  %v17882_v52 = vld [vmem:[%s24686_s9 + $0x170] sm:$0xff]   ;;  %v17885_v21 = vld [vmem:[%s24686_s9 + $0x168] sm:$0xff]  }
 0x654   :  { %v9801_v4 = vpop.f32.mrf.mxu0  ;;  %v9902_v55 = vpop.f32.mrf.mxu1  ;;  %11936 = vmatprep.subr.bf16.mxu1 %v23429_v23 }
 0x655   :  { %25307 = vst [vmem:[#allocation14_spill] sm:$0xff] %v23702_v14  ;;  %v9802_v43 = vadd.f32 %v9801_v4, %v23281_v49  ;;  %v23706_v0 = vadd.f32 %v9902_v55, %v9800_v34 }
 0x656   :  { %v23708_v16 = vpop.f32.mrf.mxu0  ;;  %v9904_v7 = vpop.f32.mrf.mxu1 }
 0x657   :  { %25308 = vst [vmem:[#allocation102_spill] sm:$0xff] %v23706_v0  ;;  %25309 = vst [vmem:[#allocation15_spill] sm:$0xff] %v23708_v16  ;;  %v23713_v30 = vadd.f32 %v9904_v7, %v9802_v43  ;;  %11937 = vmatpush1.bf16.msra.mxu1 %v17882_v52  ;;  %v17889_v43 = vld [vmem:[%s24686_s9 + $0x160] sm:$0xff]   ;;  %v17892_v0 = vld [vmem:[%s24686_s9 + $0x1b8] sm:$0xff]  }
 0x658   :  { %v10046_v47 = vpop.f32.mrf.mxu0  ;;  %11938 = vmatprep.subr.bf16.mxu1 %v23429_v23  ;;  %v23725_v4 = vpop.f32.mrf.mxu1 }
 0x659   :  { %25310 = vst [vmem:[#allocation103_spill] sm:$0xff] %v23713_v30  ;;  %25312 = vst [vmem:[#allocation104_spill] sm:$0xff] %v23725_v4 }
 0x65a   :  { %v10048_v49 = vpop.f32.mrf.mxu0 }
 0x65b   :  { %11939 = vmatpush1.bf16.msra.mxu1 %v17885_v21 }
 0x65c   :  { %v10050_v8 = vpop.f32.mrf.mxu0  ;;  %11940 = vmatprep.subr.bf16.mxu1 %v23429_v23 }
 0x65e   :  { %v23723_v5 = vpop.f32.mrf.mxu0 }
 0x65f   :  { %25311 = vst [vmem:[#allocation16_spill] sm:$0xff] %v23723_v5  ;;  %11941 = vmatpush1.bf16.msra.mxu1 %v17889_v43 }
 0x660   :  { %v10056_v34 = vpop.f32.mrf.mxu0  ;;  %11950 = vmatprep.subr.bf16.mxu1 %v23429_v23 }
 0x662   :  { %v10058_v55 = vpop.f32.mrf.mxu0  ;;  %v9943_v22 = vpop.f32.mrf.mxu1 }
 0x663   :  { %v9944_v7 = vadd.f32 %v9943_v22, %v23335_v13  ;;  %11951 = vmatpush2.bf16.msra.mxu1 %v17892_v0  ;;  %v18067_v0 = vld [vmem:[#allocation4] sm:$0xff] }
 0x664   :  { %v10060_v30 = vpop.f32.mrf.mxu0  ;;  %v9945_v52 = vpop.f32.mrf.mxu1  ;;  %11952 = vmatprep.subr.bf16.mxu1 %v23429_v23 }
 0x665   :  { %v23733_v5 = vadd.f32 %v10046_v47, %v9944_v7  ;;  %v9946_v21 = vadd.f32 %v9945_v52, %v23345_v31  ;;  %v17895_v7 = vld [vmem:[%s24686_s9 + $0x1b0] sm:$0xff]  }
 0x666   :  { %v10062_v4 = vpop.f32.mrf.mxu0  ;;  %v9947_v16 = vpop.f32.mrf.mxu1 }
 0x667   :  { %v23739_v14 = vadd.f32 %v10048_v49, %v9946_v21  ;;  %v9948_v24 = vadd.f32 %v9947_v16, %v23353_v48  ;;  %11953 = vmatpush2.bf16.msra.mxu1 %v17895_v7 }
 0x668   :  { %v10066_v13 = vpop.f32.mrf.mxu0  ;;  %v9949_v43 = vpop.f32.mrf.mxu1  ;;  %11954 = vmatprep.subr.bf16.mxu1 %v18067_v0 }
 0x669   :  { %v23743_v22 = vadd.f32 %v10050_v8, %v9948_v24  ;;  %v23746_v47 = vadd.f32 %v9949_v43, %v23365_v1  ;;  %v17898_v1 = vld [vmem:[%s24686_s9 + $0x1a8] sm:$0xff]  }
 0x66a   :  { %v10068_v31 = vpop.f32.mrf.mxu0  ;;  %v9953_v52 = vpop.f32.mrf.mxu1 }
 0x66b   :  { %25313 = vst [vmem:[#allocation89_spill] sm:$0xff] %v23743_v22  ;;  %25314 = vst [vmem:[#allocation106_spill] sm:$0xff] %v23746_v47  ;;  %v9954_v49 = vadd.f32 %v9953_v52, %v23376_v46  ;;  %11955 = vmatpush2.bf16.msra.mxu1 %v17898_v1 }
 0x66c   :  { %v10070_v21 = vpop.f32.mrf.mxu0  ;;  %v9955_v48 = vpop.f32.mrf.mxu1  ;;  %11956 = vmatprep.subr.bf16.mxu1 %v18067_v0 }
 0x66d   :  { %v23752_v16 = vadd.f32 %v10056_v34, %v9954_v49  ;;  %v9956_v23 = vadd.f32 %v9955_v48, %v23386_v9  ;;  %v17901_v9 = vld [vmem:[%s24686_s9 + $0x1a0] sm:$0xff]  }
 0x66e   :  { %v10072_v24 = vpop.f32.mrf.mxu0  ;;  %v9957_v8 = vpop.f32.mrf.mxu1 }
 0x66f   :  { %25315 = vst [vmem:[#allocation17_spill] sm:$0xff] %v23752_v16  ;;  %v23758_v43 = vadd.f32 %v10058_v55, %v9956_v23  ;;  %v9958_v22 = vadd.f32 %v9957_v8, %v23396_v40  ;;  %11957 = vmatpush2.bf16.msra.mxu1 %v17901_v9 }
 0x670   :  { %v10076_v46 = vpop.f32.mrf.mxu0  ;;  %v9959_v7 = vpop.f32.mrf.mxu1  ;;  %12179 = vmatprep.subr.bf16.mxu1 %v18067_v0 }
 0x671   :  { %25316 = vst [vmem:[#allocation105_spill] sm:$0xff] %v23758_v43  ;;  %v23761_v52 = vadd.f32 %v10060_v30, %v9958_v22  ;;  %v9960_v34 = vadd.f32 %v9959_v7, %v23408_v10  ;;  %v25320_v7 = vld [vmem:[#allocation9_spill] sm:$0xff] }
 0x672   :  { %v10078_v49 = vpop.f32.mrf.mxu0  ;;  %v9963_v48 = vpop.f32.mrf.mxu1 }
 0x673   :  { %25317 = vst [vmem:[#allocation19_spill] sm:$0xff] %v23761_v52  ;;  %v23767_v16 = vadd.f32 %v10062_v4, %v9960_v34  ;;  %v9964_v55 = vadd.f32 %v9963_v48, %v23419_v53  ;;  %v25322_v34 = vld [vmem:[#allocation87_spill] sm:$0xff] }
 0x674   :  { %v10080_v23 = vpop.f32.mrf.mxu0  ;;  %v9965_v40 = vpop.f32.mrf.mxu1 }
 0x675   :  { %25318 = vst [vmem:[#allocation90_spill] sm:$0xff] %v23767_v16  ;;  %v23770_v1 = vadd.f32 %v10066_v13, %v9964_v55  ;;  %v9966_v30 = vadd.f32 %v9965_v40, %v23437_v59  ;;  %v25324_v13 = vld [vmem:[#allocation88_spill] sm:$0xff] }
 0x676   :  { %v10082_v22 = vpop.f32.mrf.mxu0  ;;  %v9967_v10 = vpop.f32.mrf.mxu1 }
 0x677   :  { %v23773_v8 = vadd.f32 %v10068_v31, %v9966_v30  ;;  %v9968_v52 = vadd.f32 %v9967_v10, %v25320_v7  ;;  %v25325_v31 = vld [vmem:[#allocation18_spill] sm:$0xff] }
 0x678   :  { %v10086_v43 = vpop.f32.mrf.mxu0  ;;  %v9969_v47 = vpop.f32.mrf.mxu1 }
 0x679   :  { %25319 = vst [vmem:[#allocation23_spill] sm:$0xff] %v23773_v8  ;;  %v23776_v4 = vadd.f32 %v10070_v21, %v9968_v52  ;;  %v9970_v53 = vadd.f32 %v9969_v47, %v25322_v34  ;;  %v25327_v21 = vld [vmem:[#allocation10_spill] sm:$0xff] }
 0x67a   :  { %v10088_v48 = vpop.f32.mrf.mxu0  ;;  %v9973_v9 = vpop.f32.mrf.mxu1 }
 0x67b   :  { %25321 = vst [vmem:[#allocation107_spill] sm:$0xff] %v23776_v4  ;;  %v23779_v16 = vadd.f32 %v10072_v24, %v9970_v53  ;;  %v9974_v0 = vadd.f32 %v9973_v9, %v25324_v13  ;;  %v25329_v24 = vld [vmem:[#allocation98_spill] sm:$0xff] }
 0x67c   :  { %v10090_v55 = vpop.f32.mrf.mxu0  ;;  %v9975_v59 = vpop.f32.mrf.mxu1 }
 0x67d   :  { %25323 = vst [vmem:[#allocation20_spill] sm:$0xff] %v23779_v16  ;;  %v23782_v40 = vadd.f32 %v10076_v46, %v9974_v0  ;;  %v9976_v30 = vadd.f32 %v9975_v59, %v25325_v31 }
 0x67e   :  { %v10092_v8 = vpop.f32.mrf.mxu0  ;;  %v9977_v10 = vpop.f32.mrf.mxu1 }
 0x67f   :  { %v23785_v7 = vadd.f32 %v10078_v49, %v9976_v30  ;;  %v9978_v52 = vadd.f32 %v9977_v10, %v25327_v21  ;;  %v25330_v49 = vld [vmem:[#allocation11_spill] sm:$0xff] }
 0x680   :  { %v10096_v4 = vpop.f32.mrf.mxu0  ;;  %v9979_v47 = vpop.f32.mrf.mxu1 }
 0x681   :  { %25326 = vst [vmem:[#allocation108_spill] sm:$0xff] %v23785_v7  ;;  %v23788_v34 = vadd.f32 %v10080_v23, %v9978_v52  ;;  %v9980_v53 = vadd.f32 %v9979_v47, %v25329_v24  ;;  %v25331_v23 = vld [vmem:[#allocation99_spill] sm:$0xff] }
 0x682   :  { %v10098_v16 = vpop.f32.mrf.mxu0  ;;  %v9983_v9 = vpop.f32.mrf.mxu1 }
 0x683   :  { %25328 = vst [vmem:[#allocation21_spill] sm:$0xff] %v23788_v34  ;;  %v23791_v13 = vadd.f32 %v10082_v22, %v9980_v53  ;;  %v9984_v46 = vadd.f32 %v9983_v9, %v23496_v12 }
 0x684   :  { %v10100_v0 = vpop.f32.mrf.mxu0  ;;  %v9985_v59 = vpop.f32.mrf.mxu1 }
 0x685   :  { %v23794_v31 = vadd.f32 %v10086_v43, %v9984_v46  ;;  %v9986_v30 = vadd.f32 %v9985_v59, %v25330_v49 }
 0x686   :  { %v10102_v7 = vpop.f32.mrf.mxu0  ;;  %v9987_v10 = vpop.f32.mrf.mxu1 }
 0x687   :  { %v23797_v21 = vadd.f32 %v10088_v48, %v9986_v30  ;;  %v9988_v52 = vadd.f32 %v9987_v10, %v25331_v23  ;;  %v25333_v10 = vld [vmem:[#allocation12_spill] sm:$0xff] }
 0x688   :  { %v9989_v34 = vpop.f32.mrf.mxu1  ;;  %v10106_v24 = vpop.f32.mrf.mxu0 }
 0x689   :  { %v23800_v47 = vadd.f32 %v10090_v55, %v9988_v52  ;;  %v9990_v22 = vadd.f32 %v9989_v34, %v23515_v44  ;;  %v25334_v34 = vld [vmem:[#allocation100_spill] sm:$0xff] }
 0x68a   :  { %v9993_v53 = vpop.f32.mrf.mxu1  ;;  %v10108_v48 = vpop.f32.mrf.mxu0 }
 0x68b   :  { %v23803_v12 = vadd.f32 %v10092_v8, %v9990_v22  ;;  %v9994_v43 = vadd.f32 %v9993_v53, %v23517_v58 }
 0x68c   :  { %v9995_v9 = vpop.f32.mrf.mxu1  ;;  %v10110_v44 = vpop.f32.mrf.mxu0 }
 0x68d   :  { %25332 = vst [vmem:[#allocation109_spill] sm:$0xff] %v23803_v12  ;;  %v23806_v46 = vadd.f32 %v10096_v4, %v9994_v43  ;;  %v9996_v59 = vadd.f32 %v9995_v9, %v23522_v26 }
 0x68e   :  { %v9997_v49 = vpop.f32.mrf.mxu1  ;;  %v10112_v53 = vpop.f32.mrf.mxu0 }
 0x68f   :  { %v23809_v30 = vadd.f32 %v10098_v16, %v9996_v59  ;;  %v9998_v55 = vadd.f32 %v9997_v49, %v25333_v10 }
 0x690   :  { %v9999_v23 = vpop.f32.mrf.mxu1 }
 0x691   :  { %v23812_v52 = vadd.f32 %v10100_v0, %v9998_v55  ;;  %v10000_v8 = vadd.f32 %v9999_v23, %v25334_v34  ;;  %v25337_v34 = vld [vmem:[#allocation5_spill] sm:$0xff] }
 0x692   :  { %v10003_v22 = vpop.f32.mrf.mxu1 }
 0x693   :  { %v23815_v12 = vadd.f32 %v10102_v7, %v10000_v8  ;;  %v10004_v58 = vadd.f32 %v10003_v22, %v23543_v39  ;;  %v23830_v39 = vld [vmem:[%s24687_s8] sm:$0xf] }
 0x694   :  { %v10005_v4 = vpop.f32.mrf.mxu1 }
 0x695   :  { %v23818_v26 = vadd.f32 %v10106_v24, %v10004_v58  ;;  %v10006_v16 = vadd.f32 %v10005_v4, %v23545_v29  ;;  %v25338_v4 = vld [vmem:[#allocation80_spill] sm:$0xff] }
 0x696   :  { %v10007_v43 = vpop.f32.mrf.mxu1 }
 0x697   :  { %v23821_v9 = vadd.f32 %v10108_v48, %v10006_v16  ;;  %v10008_v0 = vadd.f32 %v10007_v43, %v23553_v42  ;;  %v23836_v42 = vrot.slane %v23830_v39, %v25337_v34  ;;  %v9744_v16 = vadd.f32 %v23573_v63, %v25338_v4 }
 0x698   :  { %v11005_v59 = vpop.f32.mrf.mxu0  ;;  %v10009_v49 = vpop.f32.mrf.mxu1 }
 0x699   :  { %v23824_v10 = vadd.f32 %v10110_v44, %v10008_v0  ;;  %v10010_v7 = vadd.f32 %v10009_v49, %v23559_v17  ;;  %v25339_v0 = vld [vmem:[#allocation7_spill] sm:$0xff]  ;;  %v9847_v34 = vadd.f32 %v23584_v57, %v9744_v16 }
 0x69a   :  { %v11007_v24 = vpop.f32.mrf.mxu0  ;;  %v11108_v55 = vpop.f32.mrf.mxu1 }
 0x69b   :  { %25335 = vst [vmem:[#allocation22_spill] sm:$0xff] %v23824_v10  ;;  %v23832_v23 = vadd.f32 %v10112_v53, %v10010_v7  ;;  %v11109_v29 = vadd.f32 %v11108_v55, %v11005_v59  ;;  %v23844_v53 = vrot.slane %v23830_v39, %v25339_v0 }
 0x69c   :  { %v11009_v48 = vpop.f32.mrf.mxu0  ;;  %v11110_v8 = vpop.f32.mrf.mxu1 }
 0x69d   :  { %25336 = vst [vmem:[#allocation110_spill] sm:$0xff] %v23832_v23  ;;  %v11383_v44 = vadd.f32 %v11109_v29, %v23568_v15  ;;  %v11111_v22 = vadd.f32 %v11110_v8, %v11007_v24 }
 0x69e   :  { %v11011_v17 = vpop.f32.mrf.mxu0  ;;  %v11112_v58 = vpop.f32.mrf.mxu1 }
 0x69f   :  { %v11384_v43 = vadd.f32 %v11111_v22, %v23571_v3  ;;  %v11113_v59 = vadd.f32 %v11112_v58, %v11009_v48  ;;  %v11461_v7 = vadd.f32 %v23836_v42, %v11383_v44 }
 0x6a0   :  { %v11015_v49 = vpop.f32.mrf.mxu0  ;;  %v11114_v55 = vpop.f32.mrf.mxu1 }
 0x6a1   :  { %v11387_v15 = vadd.f32 %v11113_v59, %v23581_v18  ;;  %v11115_v24 = vadd.f32 %v11114_v55, %v11011_v17  ;;  %v11462_v63 = vadd.f32 %v23844_v53, %v11384_v43  ;;  %v11517_v23 = vmax.f32 %v11461_v7, 0.0  ;;  %v25340_v18 = vld [vmem:[#allocation81_spill] sm:$0xff] }
 0x6a2   :  { %v11017_v29 = vpop.f32.mrf.mxu0  ;;  %v11118_v8 = vpop.f32.mrf.mxu1  ;;  %v9754_v17 = vadd.f32 %v23601_v25, %v25340_v18  ;;  %v25341_v18 = vld [vmem:[#allocation82_spill] sm:$0xff] }
 0x6a3   :  { %v11465_v3 = vadd.f32 %v23836_v42, %v11387_v15  ;;  %v11388_v22 = vadd.f32 %v11115_v24, %v9847_v34  ;;  %v11119_v4 = vadd.f32 %v11118_v8, %v11015_v49  ;;  %v11518_v55 = vmax.f32 %v11462_v63, 0.0 }
 0x6a4   :  { %v11019_v0 = vpop.f32.mrf.mxu0  ;;  %v11120_v48 = vpop.f32.mrf.mxu1  ;;  %v9857_v8 = vadd.f32 %v23612_v2, %v9754_v17  ;;  %v9764_v17 = vadd.f32 %v23629_v45, %v25341_v18  ;;  %v25342_v18 = vld [vmem:[#allocation83_spill] sm:$0xff] }
 0x6a5   :  { %v11521_v58 = vmax.f32 %v11465_v3, 0.0  ;;  %v11466_v44 = vadd.f32 %v23844_v53, %v11388_v22  ;;  %v11391_v10 = vadd.f32 %v11119_v4, %v23596_v56  ;;  %v11121_v57 = vadd.f32 %v11120_v48, %v11017_v29 }
 0x6a6   :  { %v11021_v16 = vpop.f32.mrf.mxu0  ;;  %v11122_v59 = vpop.f32.mrf.mxu1 }
 0x6a7   :  { %v23855_v43 = vpack.c.bf16 %v11521_v58, %v11517_v23  ;;  %v11522_v15 = vmax.f32 %v11466_v44, 0.0  ;;  %v11392_v49 = vadd.f32 %v11121_v57, %v23599_v32  ;;  %v11123_v7 = vadd.f32 %v11122_v59, %v11019_v0 }
 0x6a8   :  { %v11025_v34 = vpop.f32.mrf.mxu0  ;;  %v11124_v24 = vpop.f32.mrf.mxu1  ;;  %v11469_v3 = vadd.f32 %v23836_v42, %v11391_v10 }
 0x6a9   :  { %v11125_v56 = vadd.f32 %v11124_v24, %v11021_v16  ;;  %v11574_v22 = vpack.c.bf16 %v11522_v15, %v11518_v55  ;;  %v11470_v4 = vadd.f32 %v23844_v53, %v11392_v49  ;;  %v11395_v25 = vadd.f32 %v11123_v7, %v23609_v62 }
 0x6aa   :  { %v11027_v29 = vpop.f32.mrf.mxu0  ;;  %v11128_v63 = vpop.f32.mrf.mxu1  ;;  %v11525_v0 = vmax.f32 %v11469_v3, 0.0 }
 0x6ab   :  { %v11396_v23 = vadd.f32 %v11125_v56, %v9857_v8  ;;  %v11129_v48 = vadd.f32 %v11128_v63, %v11025_v34  ;;  %v11473_v32 = vadd.f32 %v23836_v42, %v11395_v25  ;;  %v11526_v59 = vmax.f32 %v11470_v4, 0.0 }
 0x6ac   :  { %v11029_v58 = vpop.f32.mrf.mxu0  ;;  %v11130_v44 = vpop.f32.mrf.mxu1  ;;  %v9867_v56 = vadd.f32 %v23637_v28, %v9764_v17  ;;  %v9774_v17 = vadd.f32 %v23649_v20, %v25342_v18  ;;  %v17864_v20 = vld [vmem:[%s24686_s9 + $0x68] sm:$0xff]  }
 0x6ad   :  { %v11474_v57 = vadd.f32 %v23844_v53, %v11396_v23  ;;  %v11399_v2 = vadd.f32 %v11129_v48, %v23624_v60  ;;  %v11131_v10 = vadd.f32 %v11130_v44, %v11027_v29  ;;  %v11529_v55 = vmax.f32 %v11473_v32, 0.0  ;;  %v17861_v23 = vld [vmem:[%s24686_s9 + $0x38] sm:$0xff]  }
 0x6ae   :  { %v11031_v16 = vpop.f32.mrf.mxu0  ;;  %v11132_v62 = vpop.f32.mrf.mxu1 }
 0x6af   :  { %v11530_v15 = vmax.f32 %v11474_v57, 0.0  ;;  %v11477_v49 = vadd.f32 %v23836_v42, %v11399_v2  ;;  %v11400_v34 = vadd.f32 %v11131_v10, %v23627_v35  ;;  %v11133_v7 = vadd.f32 %v11132_v62, %v11029_v58  ;;  %v17863_v62 = vld [vmem:[%s24686_s9 + $0x30] sm:$0xff]  }
 0x6b0   :  { %v11035_v24 = vpop.f32.mrf.mxu0  ;;  %v11577_v8 = vpack.c.bf16 %v11529_v55, %v11525_v0  ;;  %v11134_v3 = vpop.f32.mrf.mxu1 }
 0x6b1   :  { %v11403_v60 = vadd.f32 %v11133_v7, %v23634_v61  ;;  %v11135_v29 = vadd.f32 %v11134_v3, %v11031_v16  ;;  %v11478_v45 = vadd.f32 %v23844_v53, %v11400_v34  ;;  %v11578_v63 = vpack.c.bf16 %v11530_v15, %v11526_v59  ;;  %v17862_v61 = vld [vmem:[%s24686_s9 + $0x70] sm:$0xff]  }
 0x6b2   :  { %v11037_v25 = vpop.f32.mrf.mxu0  ;;  %v11138_v4 = vpop.f32.mrf.mxu1  ;;  %v11533_v48 = vmax.f32 %v11477_v49, 0.0 }
 0x6b3   :  { %v11481_v35 = vadd.f32 %v23836_v42, %v11403_v60  ;;  %v11404_v58 = vadd.f32 %v11135_v29, %v9867_v56  ;;  %v11139_v32 = vadd.f32 %v11138_v4, %v11035_v24  ;;  %11917 = vmatprep.mubr.bf16.mxu0 %v11578_v63  ;;  %v11534_v59 = vmax.f32 %v11478_v45, 0.0  ;;  %v17866_v45 = vld [vmem:[%s24686_s9 + $0x28] sm:$0xff]  }
 0x6b4   :  { %v11039_v44 = vpop.f32.mrf.mxu0  ;;  %v11140_v28 = vpop.f32.mrf.mxu1  ;;  %11918 = vmatmul.mubr.bf16.vlgmr.msra.gmra.mxu0 %v11577_v8  ;;  %v9877_v8 = vadd.f32 %v23654_v37, %v9774_v17  ;;  %v17867_v37 = vld [vmem:[%s24686_s9 + $0x60] sm:$0xff]  }
 0x6b5   :  { %v11537_v0 = vmax.f32 %v11481_v35, 0.0  ;;  %v11482_v57 = vadd.f32 %v23844_v53, %v11404_v58  ;;  %v11407_v2 = vadd.f32 %v11139_v32, %v23644_v19  ;;  %v11141_v10 = vadd.f32 %v11140_v28, %v11037_v25  ;;  %16298 = vmatpush3.bf16.msra.mxu0 %v17861_v23  ;;  %12170 = vmatprep.mubr.bf16.mxu0 %v11574_v22 }
 0x6b6   :  { %v11041_v16 = vpop.f32.mrf.mxu0  ;;  %v11142_v55 = vpop.f32.mrf.mxu1  ;;  %16299 = vmatprep.subr.bf16.mxu0 %v17862_v61  ;;  %v25343_v61 = vld [vmem:[#allocation84_spill] sm:$0xff] }
 0x6b7   :  { %v23886_v15 = vpack.c.bf16 %v11537_v0, %v11533_v48  ;;  %v11538_v49 = vmax.f32 %v11482_v57, 0.0  ;;  %v11485_v34 = vadd.f32 %v23836_v42, %v11407_v2  ;;  %v11408_v19 = vadd.f32 %v11141_v10, %v23647_v33  ;;  %v17868_v10 = vld [vmem:[%s24686_s9 + $0x20] sm:$0xff]  }
 0x6b8   :  { %v11045_v7 = vpop.f32.mrf.mxu0  ;;  %v11143_v24 = vadd.f32 %v11142_v55, %v11039_v44  ;;  %v11144_v22 = vpop.f32.mrf.mxu1  ;;  %v9784_v28 = vadd.f32 %v23668_v41, %v25343_v61  ;;  %v17870_v41 = vld [vmem:[%s24686_s9 + $0x58] sm:$0xff]  }
 0x6b9   :  { %v11486_v3 = vadd.f32 %v23844_v53, %v11408_v19  ;;  %v11145_v56 = vadd.f32 %v11144_v22, %v11041_v16  ;;  %v23895_v29 = vpack.c.bf16 %v11538_v49, %v11534_v59  ;;  %16300 = vmatpush3.bf16.msra.mxu0 %v17863_v62  ;;  %v11541_v0 = vmax.f32 %v11485_v34, 0.0  ;;  %v17871_v22 = vld [vmem:[%s24686_s9 + $0x18] sm:$0xff]  }
 0x6ba   :  { %v11047_v60 = vpop.f32.mrf.mxu0  ;;  %v11411_v25 = vadd.f32 %v11143_v24, %v23651_v6  ;;  %v11148_v33 = vpop.f32.mrf.mxu1  ;;  %16301 = vmatprep.subr.bf16.mxu0 %v17864_v20  ;;  %v9887_v34 = vadd.f32 %v23676_v11, %v9784_v28 }
 0x6bb   :  { %v11412_v4 = vadd.f32 %v11145_v56, %v9877_v8  ;;  %v11149_v63 = vadd.f32 %v11148_v33, %v11045_v7  ;;  %v11542_v55 = vmax.f32 %v11486_v3, 0.0 }
 0x6bc   :  { %v11049_v23 = vpop.f32.mrf.mxu0  ;;  %v11489_v48 = vadd.f32 %v23836_v42, %v11411_v25  ;;  %v11150_v35 = vpop.f32.mrf.mxu1 }
 0x6bd   :  { %v11490_v58 = vadd.f32 %v23844_v53, %v11412_v4  ;;  %v11415_v6 = vadd.f32 %v11149_v63, %v23659_v50  ;;  %v11151_v32 = vadd.f32 %v11150_v35, %v11047_v60  ;;  %16302 = vmatpush3.bf16.msra.mxu0 %v17866_v45 }
 0x6be   :  { %v11051_v44 = vpop.f32.mrf.mxu0  ;;  %v11545_v57 = vmax.f32 %v11489_v48, 0.0  ;;  %v11152_v2 = vpop.f32.mrf.mxu1  ;;  %16303 = vmatprep.subr.bf16.mxu0 %v17867_v37  ;;  %v25344_v48 = vld [vmem:[#allocation85_spill] sm:$0xff] }
 0x6bf   :  { %v11546_v16 = vmax.f32 %v11490_v58, 0.0  ;;  %v11493_v18 = vadd.f32 %v23836_v42, %v11415_v6  ;;  %v11416_v17 = vadd.f32 %v11151_v32, %v23666_v54  ;;  %v11153_v59 = vadd.f32 %v11152_v2, %v11049_v23  ;;  %v17874_v32 = vld [vmem:[%s24686_s9 + $0x10] sm:$0xff]  }
 0x6c0   :  { %v11055_v50 = vpop.f32.mrf.mxu0  ;;  %v23917_v62 = vpack.c.bf16 %v11545_v57, %v11541_v0  ;;  %v11154_v49 = vpop.f32.mrf.mxu1  ;;  %v9794_v35 = vadd.f32 %v23687_v38, %v25344_v48  ;;  %v17876_v38 = vld [vmem:[%s24686_s9 + $0x48] sm:$0xff]  }
 0x6c1   :  { %v11494_v19 = vadd.f32 %v23844_v53, %v11416_v17  ;;  %v11419_v7 = vadd.f32 %v11153_v59, %v23671_v27  ;;  %v11155_v20 = vadd.f32 %v11154_v49, %v11051_v44  ;;  %16304 = vmatpush3.bf16.msra.mxu0 %v17868_v10  ;;  %v23925_v8 = vpack.c.bf16 %v11546_v16, %v11542_v55  ;;  %v17873_v27 = vld [vmem:[%s24686_s9 + $0x50] sm:$0xff]   ;;  %v17877_v49 = vld [vmem:[%s24686_s9 + $0x8] sm:$0xff]  }
 0x6c2   :  { %v11057_v24 = vpop.f32.mrf.mxu0  ;;  %v11158_v54 = vpop.f32.mrf.mxu1  ;;  %16305 = vmatprep.subr.bf16.mxu0 %v17870_v41  ;;  %v11549_v25 = vmax.f32 %v11493_v18, 0.0  ;;  %v25345_v10 = vld [vmem:[#allocation101_spill] sm:$0xff] }
 0x6c3   :  { %v11497_v3 = vadd.f32 %v23836_v42, %v11419_v7  ;;  %v11420_v56 = vadd.f32 %v11155_v20, %v9887_v34  ;;  %v11159_v60 = vadd.f32 %v11158_v54, %v11055_v50  ;;  %v11550_v58 = vmax.f32 %v11494_v19, 0.0  ;;  %v25346_v41 = vld [vmem:[#allocation13_spill] sm:$0xff]  ;;  %v17879_v20 = vld [vmem:[%s24686_s9 + $0x40] sm:$0xff]  }
 0x6c4   :  { %v11059_v11 = vpop.f32.mrf.mxu0  ;;  %v11160_v33 = vpop.f32.mrf.mxu1  ;;  %v9897_v16 = vadd.f32 %v25345_v10, %v9794_v35  ;;  %v25350_v35 = vld [vmem:[#allocation102_spill] sm:$0xff]  ;;  %v25352_v10 = vld [vmem:[#allocation103_spill] sm:$0xff] }
 0x6c5   :  { %v11553_v45 = vmax.f32 %v11497_v3, 0.0  ;;  %v11498_v4 = vadd.f32 %v23844_v53, %v11420_v56  ;;  %v11423_v63 = vadd.f32 %v11159_v60, %v23682_v36  ;;  %v11161_v23 = vadd.f32 %v11160_v33, %v11057_v24  ;;  %16306 = vmatpush3.bf16.msra.mxu0 %v17871_v22  ;;  %v25347_v3 = vld [vmem:[#allocation14_spill] sm:$0xff] }
 0x6c6   :  { %v11061_v37 = vpop.f32.mrf.mxu0  ;;  %v11162_v6 = vpop.f32.mrf.mxu1  ;;  %16307 = vmatprep.subr.bf16.mxu0 %v17873_v27  ;;  %v25348_v27 = vld [vmem:[#allocation86_spill] sm:$0xff] }
 0x6c7   :  { %v23938_v44 = vpack.c.bf16 %v11553_v45, %v11549_v25  ;;  %v11554_v61 = vmax.f32 %v11498_v4, 0.0  ;;  %v11501_v28 = vadd.f32 %v23836_v42, %v11423_v63  ;;  %v11424_v0 = vadd.f32 %v11161_v23, %v23685_v51  ;;  %v25349_v25 = vld [vmem:[#allocation15_spill] sm:$0xff] }
 0x6c8   :  { %v11065_v36 = vpop.f32.mrf.mxu0  ;;  %v11163_v57 = vadd.f32 %v11162_v6, %v11059_v11  ;;  %v11164_v2 = vpop.f32.mrf.mxu1  ;;  %v9804_v33 = vadd.f32 %v25349_v25, %v25348_v27  ;;  %v17880_v23 = vld [vmem:[%s24686_s9] sm:$0xff]   ;;  %v25353_v25 = vld [vmem:[#allocation6_spill] sm:$0xff] }
 0x6c9   :  { %v11502_v18 = vadd.f32 %v23844_v53, %v11424_v0  ;;  %v11165_v17 = vadd.f32 %v11164_v2, %v11061_v37  ;;  %v23947_v50 = vpack.c.bf16 %v11554_v61, %v11550_v58  ;;  %16308 = vmatpush3.bf16.msra.mxu0 %v17874_v32  ;;  %v11557_v45 = vmax.f32 %v11501_v28, 0.0  ;;  %v17881_v61 = vld [vmem:[%s24686_s9 + $0x238] sm:$0xff]  }
 0x6ca   :  { %v11067_v59 = vpop.f32.mrf.mxu0  ;;  %v11427_v55 = vadd.f32 %v11163_v57, %v25346_v41  ;;  %v11168_v51 = vpop.f32.mrf.mxu1  ;;  %16309 = vmatprep.subr.bf16.mxu0 %v17876_v38  ;;  %v25351_v38 = vld [vmem:[#allocation104_spill] sm:$0xff]  ;;  %v17883_v41 = vld [vmem:[%s24686_s9 + $0x1f8] sm:$0xff]  }
 0x6cb   :  { %v11428_v34 = vadd.f32 %v11165_v17, %v9897_v16  ;;  %v11169_v19 = vadd.f32 %v11168_v51, %v11065_v36  ;;  %v11558_v28 = vmax.f32 %v11502_v18, 0.0  ;;  %v9907_v57 = vadd.f32 %v25351_v38, %v9804_v33 }
 0x6cc   :  { %v11069_v7 = vpop.f32.mrf.mxu0  ;;  %v11505_v24 = vadd.f32 %v23836_v42, %v11427_v55  ;;  %v11170_v54 = vpop.f32.mrf.mxu1  ;;  %v24001_v33 = vrot.slane %v23830_v39, %v25353_v25 }
 0x6cd   :  { %v11506_v22 = vadd.f32 %v23844_v53, %v11428_v34  ;;  %v11431_v56 = vadd.f32 %v11169_v19, %v25347_v3  ;;  %v11171_v60 = vadd.f32 %v11170_v54, %v11067_v59  ;;  %16310 = vmatpush3.bf16.msra.mxu0 %v17877_v49  ;;  %v17884_v34 = vld [vmem:[%s24686_s9 + $0x230] sm:$0xff]  }
 0x6ce   :  { %v11071_v11 = vpop.f32.mrf.mxu0  ;;  %v11561_v4 = vmax.f32 %v11505_v24, 0.0  ;;  %v11172_v63 = vpop.f32.mrf.mxu1  ;;  %16311 = vmatprep.subr.bf16.mxu0 %v17879_v20 }
 0x6cf   :  { %v11562_v37 = vmax.f32 %v11506_v22, 0.0  ;;  %v11509_v48 = vadd.f32 %v23836_v42, %v11431_v56  ;;  %v11432_v58 = vadd.f32 %v11171_v60, %v25350_v35  ;;  %v11173_v6 = vadd.f32 %v11172_v63, %v11069_v7  ;;  %v25354_v35 = vld [vmem:[#allocation8_spill] sm:$0xff] }
 0x6d0   :  { %v11314_v32 = vpop.f32.mrf.mxu0  ;;  %v23969_v0 = vpack.c.bf16 %v11561_v4, %v11557_v45  ;;  %v11174_v36 = vpop.f32.mrf.mxu1  ;;  %v17890_v4 = vld [vmem:[%s24686_s9 + $0x220] sm:$0xff]  }
 0x6d1   :  { %v11510_v2 = vadd.f32 %v23844_v53, %v11432_v58  ;;  %v11435_v16 = vadd.f32 %v11173_v6, %v25352_v10  ;;  %v11175_v17 = vadd.f32 %v11174_v36, %v11071_v11  ;;  %16312 = vmatpush3.bf16.msra.mxu0 %v17880_v23  ;;  %v23977_v55 = vpack.c.bf16 %v11562_v37, %v11558_v28 }
 0x6d2   :  { %v11316_v59 = vpop.f32.mrf.mxu0  ;;  %16319 = vmatprep.subr.bf16.mxu0 %v17881_v61  ;;  %v11565_v19 = vmax.f32 %v11509_v48, 0.0  ;;  %v24009_v58 = vrot.slane %v23830_v39, %v25354_v35  ;;  %v25355_v39 = vld [vmem:[#allocation106_spill] sm:$0xff]  ;;  %v25359_v35 = vld [vmem:[#allocation105_spill] sm:$0xff] }
 0x6d3   :  { %v11513_v18 = vadd.f32 %v23836_v42, %v11435_v16  ;;  %v11436_v51 = vadd.f32 %v11175_v17, %v9907_v57  ;;  %v17886_v42 = vld [vmem:[%s24686_s9 + $0x1f0] sm:$0xff]   ;;  %v11566_v54 = vmax.f32 %v11510_v2, 0.0  ;;  %v25356_v2 = vld [vmem:[#allocation16_spill] sm:$0xff] }
 0x6d4   :  { %v11318_v49 = vpop.f32.mrf.mxu0  ;;  %12171 = vmatmul.mubr.bf16.vlgmr.msra.gmra.mxu0 %v23855_v43  ;;  %v10053_v10 = vadd.f32 %v25356_v2, %v25355_v39  ;;  %v25357_v16 = vld [vmem:[#allocation89_spill] sm:$0xff]  ;;  %v25360_v39 = vld [vmem:[#allocation19_spill] sm:$0xff] }
 0x6d5   :  { %v11569_v7 = vmax.f32 %v11513_v18, 0.0  ;;  %v11514_v20 = vadd.f32 %v23844_v53, %v11436_v51  ;;  %16320 = vmatpush3.bf16.msra.mxu0 %v17883_v41  ;;  %12480 = vmatprep.mubr.bf16.mxu0 %v23895_v29  ;;  %v17887_v53 = vld [vmem:[%s24686_s9 + $0x228] sm:$0xff]  }
 0x6d6   :  { %v11320_v24 = vpop.f32.mrf.mxu0  ;;  %16321 = vmatprep.subr.bf16.mxu0 %v17884_v34  ;;  %v17888_v29 = vld [vmem:[%s24686_s9 + $0x1e8] sm:$0xff]  }
 0x6d7   :  { %v23989_v22 = vpack.c.bf16 %v11569_v7, %v11565_v19  ;;  %v11570_v3 = vmax.f32 %v11514_v20, 0.0  ;;  %v17896_v20 = vld [vmem:[%s24686_s9 + $0x210] sm:$0xff]  }
 0x6d8   :  { %v11324_v56 = vpop.f32.mrf.mxu0 }
 0x6d9   :  { %v23994_v43 = vpack.c.bf16 %v11570_v3, %v11566_v54  ;;  %16322 = vmatpush3.bf16.msra.mxu0 %v17886_v42 }
 0x6da   :  { %v11326_v60 = vpop.f32.mrf.mxu0  ;;  %v11211_v11 = vpop.f32.mrf.mxu1  ;;  %16323 = vmatprep.subr.bf16.mxu0 %v17887_v53  ;;  %v25358_v53 = vld [vmem:[#allocation17_spill] sm:$0xff] }
 0x6db   :  { %v11315_v27 = vadd.f32 %v11314_v32, %v11211_v11  ;;  %v17891_v32 = vld [vmem:[%s24686_s9 + $0x1e0] sm:$0xff]  }
 0x6dc   :  { %v11328_v45 = vpop.f32.mrf.mxu0  ;;  %v11213_v63 = vpop.f32.mrf.mxu1 }
 0x6dd   :  { %v11385_v23 = vadd.f32 %v11315_v27, %v23733_v5  ;;  %v11317_v37 = vadd.f32 %v11316_v59, %v11213_v63  ;;  %16324 = vmatpush3.bf16.msra.mxu0 %v17888_v29  ;;  %v17893_v5 = vld [vmem:[%s24686_s9 + $0x218] sm:$0xff]  }
 0x6de   :  { %v11330_v48 = vpop.f32.mrf.mxu0  ;;  %v11215_v6 = vpop.f32.mrf.mxu1  ;;  %16325 = vmatprep.subr.bf16.mxu0 %v17890_v4 }
 0x6df   :  { %v11463_v61 = vadd.f32 %v24001_v33, %v11385_v23  ;;  %v11386_v28 = vadd.f32 %v11317_v37, %v23739_v14  ;;  %v11319_v36 = vadd.f32 %v11318_v49, %v11215_v6  ;;  %v17894_v14 = vld [vmem:[%s24686_s9 + $0x1d8] sm:$0xff]  }
 0x6e0   :  { %v11334_v38 = vpop.f32.mrf.mxu0  ;;  %v11217_v57 = vpop.f32.mrf.mxu1 }
 0x6e1   :  { %v11389_v17 = vadd.f32 %v11319_v36, %v25357_v16  ;;  %v11321_v59 = vadd.f32 %v11320_v24, %v11217_v57  ;;  %v11464_v18 = vadd.f32 %v24009_v58, %v11386_v28  ;;  %16326 = vmatpush3.bf16.msra.mxu0 %v17891_v32  ;;  %v11519_v24 = vmax.f32 %v11463_v61, 0.0  ;;  %v17900_v16 = vld [vmem:[%s24686_s9 + $0x1c8] sm:$0xff]  }
 0x6e2   :  { %v11336_v41 = vpop.f32.mrf.mxu0  ;;  %v11221_v51 = vpop.f32.mrf.mxu1  ;;  %16327 = vmatprep.subr.bf16.mxu0 %v17893_v5 }
 0x6e3   :  { %v11467_v49 = vadd.f32 %v24001_v33, %v11389_v17  ;;  %v11390_v34 = vadd.f32 %v11321_v59, %v10053_v10  ;;  %v11325_v19 = vadd.f32 %v11324_v56, %v11221_v51  ;;  %v11520_v25 = vmax.f32 %v11464_v18, 0.0  ;;  %v17897_v56 = vld [vmem:[%s24686_s9 + $0x1d0] sm:$0xff]   ;;  %v25361_v59 = vld [vmem:[#allocation90_spill] sm:$0xff] }
 0x6e4   :  { %v11338_v7 = vpop.f32.mrf.mxu0  ;;  %v11223_v42 = vpop.f32.mrf.mxu1 }
 0x6e5   :  { %v11523_v54 = vmax.f32 %v11467_v49, 0.0  ;;  %v11468_v3 = vadd.f32 %v24009_v58, %v11390_v34  ;;  %v11393_v11 = vadd.f32 %v11325_v19, %v25358_v53  ;;  %v11327_v29 = vadd.f32 %v11326_v60, %v11223_v42  ;;  %16328 = vmatpush3.bf16.msra.mxu0 %v17894_v14  ;;  %v17899_v60 = vld [vmem:[%s24686_s9 + $0x208] sm:$0xff]  }
 0x6e6   :  { %v11340_v27 = vpop.f32.mrf.mxu0  ;;  %v11225_v4 = vpop.f32.mrf.mxu1  ;;  %16329 = vmatprep.subr.bf16.mxu0 %v17896_v20 }
 0x6e7   :  { %v24035_v63 = vpack.c.bf16 %v11523_v54, %v11519_v24  ;;  %v11524_v23 = vmax.f32 %v11468_v3, 0.0  ;;  %v11471_v37 = vadd.f32 %v24001_v33, %v11393_v11  ;;  %v11394_v6 = vadd.f32 %v11327_v29, %v25359_v35 }
 0x6e8   :  { %v11344_v32 = vpop.f32.mrf.mxu0  ;;  %v11329_v61 = vadd.f32 %v11328_v45, %v11225_v4  ;;  %v11227_v28 = vpop.f32.mrf.mxu1  ;;  %v17902_v45 = vld [vmem:[%s24686_s9 + $0x200] sm:$0xff]  }
 0x6e9   :  { %v11576_v36 = vpack.c.bf16 %v11524_v23, %v11520_v25  ;;  %v11331_v5 = vadd.f32 %v11330_v48, %v11227_v28  ;;  %16330 = vmatpush3.bf16.msra.mxu0 %v17897_v56  ;;  %v11472_v17 = vadd.f32 %v24009_v58, %v11394_v6  ;;  %v11527_v42 = vmax.f32 %v11471_v37, 0.0  ;;  %v25362_v56 = vld [vmem:[#allocation23_spill] sm:$0xff] }
 0x6ea   :  { %v11346_v57 = vpop.f32.mrf.mxu0  ;;  %v11397_v2 = vadd.f32 %v11329_v61, %v25360_v39  ;;  %v11231_v10 = vpop.f32.mrf.mxu1  ;;  %16331 = vmatprep.subr.bf16.mxu0 %v17899_v60  ;;  %v25363_v6 = vld [vmem:[#allocation107_spill] sm:$0xff]  ;;  %v17904_v61 = vld [vmem:[%s24686_s9 + $0xb8] sm:$0xff]  }
 0x6eb   :  { %v11398_v18 = vadd.f32 %v11331_v5, %v25361_v59  ;;  %v11335_v51 = vadd.f32 %v11334_v38, %v11231_v10  ;;  %v17903_v38 = vld [vmem:[%s24686_s9 + $0x1c0] sm:$0xff]   ;;  %v11528_v53 = vmax.f32 %v11472_v17, 0.0  ;;  %v17906_v39 = vld [vmem:[%s24686_s9 + $0x2d8] sm:$0xff]   ;;  %v25364_v59 = vld [vmem:[#allocation20_spill] sm:$0xff] }
 0x6ec   :  { %v11348_v14 = vpop.f32.mrf.mxu0  ;;  %v11475_v48 = vadd.f32 %v24001_v33, %v11397_v2  ;;  %v11233_v49 = vpop.f32.mrf.mxu1 }
 0x6ed   :  { %v11476_v34 = vadd.f32 %v24009_v58, %v11398_v18  ;;  %v11401_v19 = vadd.f32 %v11335_v51, %v23770_v1  ;;  %v11337_v20 = vadd.f32 %v11336_v41, %v11233_v49  ;;  %16332 = vmatpush3.bf16.msra.mxu0 %v17900_v16  ;;  %v17905_v1 = vld [vmem:[%s24686_s9 + $0x318] sm:$0xff]  }
 0x6ee   :  { %v11350_v24 = vpop.f32.mrf.mxu0  ;;  %v11531_v54 = vmax.f32 %v11475_v48, 0.0  ;;  %v11235_v3 = vpop.f32.mrf.mxu1  ;;  %16333 = vmatprep.subr.bf16.mxu0 %v17902_v45 }
 0x6ef   :  { %v11532_v11 = vmax.f32 %v11476_v34, 0.0  ;;  %v11479_v29 = vadd.f32 %v24001_v33, %v11401_v19  ;;  %v11339_v25 = vadd.f32 %v11338_v7, %v11235_v3  ;;  %v11402_v23 = vadd.f32 %v11337_v20, %v25362_v56  ;;  %v17907_v34 = vld [vmem:[%s24686_s9 + $0xb0] sm:$0xff]  }
 0x6f0   :  { %v11354_v4 = vpop.f32.mrf.mxu0  ;;  %v11579_v41 = vpack.c.bf16 %v11531_v54, %v11527_v42  ;;  %v11237_v37 = vpop.f32.mrf.mxu1  ;;  %v17909_v54 = vld [vmem:[%s24686_s9 + $0x2d0] sm:$0xff]  }
 0x6f1   :  { %v11580_v35 = vpack.c.bf16 %v11532_v11, %v11528_v53  ;;  %v11405_v60 = vadd.f32 %v11339_v25, %v25363_v6  ;;  %v11341_v7 = vadd.f32 %v11340_v27, %v11237_v37  ;;  %16334 = vmatpush3.bf16.msra.mxu0 %v17903_v38  ;;  %v11480_v17 = vadd.f32 %v24009_v58, %v11402_v23  ;;  %v17908_v27 = vld [vmem:[%s24686_s9 + $0x310] sm:$0xff]  }
 0x6f2   :  { %v24066_v28 = vpop.f32.mrf.mxu0  ;;  %v11241_v5 = vpop.f32.mrf.mxu1  ;;  %16341 = vmatprep.subr.bf16.mxu0 %v17905_v1  ;;  %v11535_v45 = vmax.f32 %v11479_v29, 0.0  ;;  %v24098_v25 = vld [vmem:[#allocation4] sm:$0xff] }
 0x6f3   :  { %v11483_v2 = vadd.f32 %v24001_v33, %v11405_v60  ;;  %v11345_v10 = vadd.f32 %v11344_v32, %v11241_v5  ;;  %15740 = vmatprep.mubr.msk.bf16.mxu1 %vm8555_vm8, %v11580_v35  ;;  %v11406_v18 = vadd.f32 %v11341_v7, %v25364_v59  ;;  %v11536_v11 = vmax.f32 %v11480_v17, 0.0  ;;  %v17912_v60 = vld [vmem:[%s24686_s9 + $0x2c8] sm:$0xff]   ;;  %v17914_v5 = vld [vmem:[%s24686_s9 + $0x300] sm:$0xff]  }
 0x6f4   :  { %v24073_v16 = vpop.f32.mrf.mxu0  ;;  %v11243_v51 = vpop.f32.mrf.mxu1  ;;  %11959 = vmatmul.mubr.bf16.vlgmr.msra.gmra.mxu1 %v11579_v41  ;;  %12481 = vmatmul.mubr.bf16.vlgmr.msra.gmra.mxu0 %v23886_v15  ;;  %v25365_v15 = vld [vmem:[#allocation108_spill] sm:$0xff]  ;;  %v25366_v41 = vld [vmem:[#allocation21_spill] sm:$0xff] }
 0x6f5   :  { %v11539_v48 = vmax.f32 %v11483_v2, 0.0  ;;  %v11409_v49 = vadd.f32 %v11345_v10, %v23782_v40  ;;  %v11347_v32 = vadd.f32 %v11346_v57, %v11243_v51  ;;  %12180 = vmatpush1.bf16.msra.mxu1 %v17904_v61  ;;  %v11484_v20 = vadd.f32 %v24009_v58, %v11406_v18  ;;  %15769 = vmatprep.mubr.msk.bf16.mxu1 %vm8555_vm8, %v11576_v36  ;;  %v17911_v36 = vld [vmem:[%s24686_s9 + $0x308] sm:$0xff]  }
 0x6f6   :  { %v11360_v19 = vpop.f32.mrf.mxu0  ;;  %16342 = vmatpush3.bf16.msra.mxu0 %v17906_v39  ;;  %v11245_v42 = vpop.f32.mrf.mxu1  ;;  %12792 = vmatprep.mubr.bf16.mxu0 %v23925_v8  ;;  %v17910_v8 = vld [vmem:[%s24686_s9 + $0xa8] sm:$0xff]  }
 0x6f7   :  { %v24090_v40 = vpack.c.bf16 %v11539_v48, %v11535_v45  ;;  %v11487_v57 = vadd.f32 %v24001_v33, %v11409_v49  ;;  %v11410_v3 = vadd.f32 %v11347_v32, %v25365_v15  ;;  %v11349_v38 = vadd.f32 %v11348_v14, %v11245_v42  ;;  %12181 = vmatprep.subr.bf16.mxu1 %v24098_v25  ;;  %v17915_v45 = vld [vmem:[%s24686_s9 + $0x2c0] sm:$0xff]   ;;  %v17917_v32 = vld [vmem:[%s24686_s9 + $0x2f8] sm:$0xff]  }
 0x6f8   :  { %v11364_v53 = vpop.f32.mrf.mxu0  ;;  %v11540_v29 = vmax.f32 %v11484_v20, 0.0  ;;  %v11247_v1 = vpop.f32.mrf.mxu1  ;;  %16343 = vmatprep.subr.bf16.mxu0 %v17908_v27 }
 0x6f9   :  { %v11413_v56 = vadd.f32 %v11349_v38, %v25366_v41  ;;  %v11351_v23 = vadd.f32 %v11350_v24, %v11247_v1  ;;  %12182 = vmatpush1.bf16.msra.mxu1 %v17907_v34  ;;  %v11488_v35 = vadd.f32 %v24009_v58, %v11410_v3  ;;  %v11543_v39 = vmax.f32 %v11487_v57, 0.0  ;;  %v17916_v3 = vld [vmem:[%s24686_s9 + $0x98] sm:$0xff]  }
 0x6fa   :  { %v11366_v14 = vpop.f32.mrf.mxu0  ;;  %v24105_v37 = vpack.c.bf16 %v11540_v29, %v11536_v11  ;;  %16344 = vmatpush3.bf16.msra.mxu0 %v17909_v54  ;;  %v11251_v6 = vpop.f32.mrf.mxu1  ;;  %12183 = vmatprep.subr.bf16.mxu1 %v24098_v25  ;;  %v25367_v11 = vld [vmem:[#allocation109_spill] sm:$0xff] }
 0x6fb   :  { %v11491_v24 = vadd.f32 %v24001_v33, %v11413_v56  ;;  %v11414_v61 = vadd.f32 %v11351_v23, %v23791_v13  ;;  %v11355_v7 = vadd.f32 %v11354_v4, %v11251_v6  ;;  %16345 = vmatprep.subr.bf16.mxu0 %v17911_v36  ;;  %v17913_v13 = vld [vmem:[%s24686_s9 + $0xa0] sm:$0xff]   ;;  %v11544_v4 = vmax.f32 %v11488_v35, 0.0  ;;  %v17919_v35 = vld [vmem:[%s24686_s9 + $0x90] sm:$0xff]  }
 0x6fc   :  { %v11253_v2 = vpop.f32.mrf.mxu1  ;;  %v11368_v10 = vpop.f32.mrf.mxu0 }
 0x6fd   :  { %v11547_v17 = vmax.f32 %v11491_v24, 0.0  ;;  %v11492_v59 = vadd.f32 %v24009_v58, %v11414_v61  ;;  %v11417_v18 = vadd.f32 %v11355_v7, %v23794_v31  ;;  %v11357_v51 = vadd.f32 %v24066_v28, %v11253_v2  ;;  %12184 = vmatpush1.bf16.msra.mxu1 %v17910_v8  ;;  %v17921_v61 = vld [vmem:[%s24686_s9 + $0x2b0] sm:$0xff]   ;;  %v17923_v2 = vld [vmem:[%s24686_s9 + $0x2e8] sm:$0xff]  }
 0x6fe   :  { %16346 = vmatpush3.bf16.msra.mxu0 %v17912_v60  ;;  %v11255_v27 = vpop.f32.mrf.mxu1  ;;  %12185 = vmatprep.subr.bf16.mxu1 %v24098_v25  ;;  %v11370_v42 = vpop.f32.mrf.mxu0 }
 0x6ff   :  { %v24127_v48 = vpack.c.bf16 %v11547_v17, %v11543_v39  ;;  %v11548_v49 = vmax.f32 %v11492_v59, 0.0  ;;  %v11495_v31 = vadd.f32 %v24001_v33, %v11417_v18  ;;  %v11418_v28 = vadd.f32 %v11357_v51, %v23797_v21  ;;  %16347 = vmatprep.subr.bf16.mxu0 %v17914_v5 }
 0x700   :  { %v11359_v34 = vadd.f32 %v24073_v16, %v11255_v27  ;;  %v11257_v20 = vpop.f32.mrf.mxu1  ;;  %v17918_v16 = vld [vmem:[%s24686_s9 + $0x2b8] sm:$0xff]   ;;  %v11374_v36 = vpop.f32.mrf.mxu0  ;;  %v17924_v27 = vld [vmem:[%s24686_s9 + $0x2a8] sm:$0xff]  }
 0x701   :  { %v24135_v54 = vpack.c.bf16 %v11548_v49, %v11544_v4  ;;  %v11496_v57 = vadd.f32 %v24009_v58, %v11418_v28  ;;  %v11361_v15 = vadd.f32 %v11360_v19, %v11257_v20  ;;  %12186 = vmatpush1.bf16.msra.mxu1 %v17913_v13  ;;  %v17920_v19 = vld [vmem:[%s24686_s9 + $0x2f0] sm:$0xff]   ;;  %v11551_v6 = vmax.f32 %v11495_v31, 0.0 }
 0x702   :  { %v11421_v21 = vadd.f32 %v11359_v34, %v23800_v47  ;;  %16348 = vmatpush3.bf16.msra.mxu0 %v17915_v45  ;;  %v11261_v38 = vpop.f32.mrf.mxu1  ;;  %12187 = vmatprep.subr.bf16.mxu1 %v24098_v25  ;;  %v11376_v7 = vpop.f32.mrf.mxu0 }
 0x703   :  { %v11422_v29 = vadd.f32 %v11361_v15, %v25367_v11  ;;  %v11365_v1 = vadd.f32 %v11364_v53, %v11261_v38  ;;  %16349 = vmatprep.subr.bf16.mxu0 %v17917_v32  ;;  %v11552_v53 = vmax.f32 %v11496_v57, 0.0  ;;  %v17925_v15 = vld [vmem:[%s24686_s9 + $0x80] sm:$0xff]  }
 0x704   :  { %v11499_v41 = vadd.f32 %v24001_v33, %v11421_v21  ;;  %v11263_v47 = vpop.f32.mrf.mxu1  ;;  %v11378_v45 = vpop.f32.mrf.mxu0 }
 0x705   :  { %v11500_v56 = vadd.f32 %v24009_v58, %v11422_v29  ;;  %v11425_v23 = vadd.f32 %v11365_v1, %v23806_v46  ;;  %v11367_v8 = vadd.f32 %v11366_v14, %v11263_v47  ;;  %12188 = vmatpush1.bf16.msra.mxu1 %v17916_v3  ;;  %v25368_v47 = vld [vmem:[#allocation22_spill] sm:$0xff] }
 0x706   :  { %v11555_v60 = vmax.f32 %v11499_v41, 0.0  ;;  %16350 = vmatpush3.bf16.msra.mxu0 %v17918_v16  ;;  %v11265_v24 = vpop.f32.mrf.mxu1  ;;  %12189 = vmatprep.subr.bf16.mxu1 %v24098_v25  ;;  %v11380_v38 = vpop.f32.mrf.mxu0 }
 0x707   :  { %v11556_v5 = vmax.f32 %v11500_v56, 0.0  ;;  %v11503_v46 = vadd.f32 %v24001_v33, %v11425_v23  ;;  %v11426_v14 = vadd.f32 %v11367_v8, %v23809_v30  ;;  %v11369_v39 = vadd.f32 %v11368_v10, %v11265_v24  ;;  %16351 = vmatprep.subr.bf16.mxu0 %v17920_v19  ;;  %v17922_v30 = vld [vmem:[%s24686_s9 + $0x88] sm:$0xff]   ;;  %v17928_v8 = vld [vmem:[%s24686_s9 + $0xd8] sm:$0xff]  }
 0x708   :  { %v24165_v17 = vpack.c.bf16 %v11555_v60, %v11551_v6  ;;  %v11267_v59 = vpop.f32.mrf.mxu1 }
 0x709   :  { %v24167_v18 = vpack.c.bf16 %v11556_v5, %v11552_v53  ;;  %v11504_v51 = vadd.f32 %v24009_v58, %v11426_v14  ;;  %v11429_v13 = vadd.f32 %v11369_v39, %v23812_v52  ;;  %12190 = vmatpush1.bf16.msra.mxu1 %v17919_v35  ;;  %v11371_v10 = vadd.f32 %v11370_v42, %v11267_v59  ;;  %v17926_v52 = vld [vmem:[%s24686_s9 + $0x2e0] sm:$0xff]   ;;  %v25369_v53 = vld [vmem:[#allocation110_spill] sm:$0xff]  ;;  %v17930_v5 = vld [vmem:[%s24686_s9 + $0xd0] sm:$0xff]  }
 0x70a   :  { %16352 = vmatpush3.bf16.msra.mxu0 %v17921_v61  ;;  %v11271_v4 = vpop.f32.mrf.mxu1  ;;  %12191 = vmatprep.subr.bf16.mxu1 %v24098_v25  ;;  %v11559_v34 = vmax.f32 %v11503_v46, 0.0  ;;  %v17935_v59 = vld [vmem:[%s24686_s9 + $0x340] sm:$0xff]  }
 0x70b   :  { %v11507_v49 = vadd.f32 %v24001_v33, %v11429_v13  ;;  %v11375_v31 = vadd.f32 %v11374_v36, %v11271_v4  ;;  %16353 = vmatprep.subr.bf16.mxu0 %v17923_v2  ;;  %v11430_v28 = vadd.f32 %v11371_v10, %v23815_v12  ;;  %v17927_v12 = vld [vmem:[%s24686_s9 + $0x2a0] sm:$0xff]   ;;  %v11560_v29 = vmax.f32 %v11504_v51, 0.0  ;;  %v17936_v51 = vld [vmem:[%s24686_s9 + $0x278] sm:$0xff]   ;;  %v17939_v10 = vld [vmem:[%s24686_s9 + $0x330] sm:$0xff]  }
 0x70c   :  { %v11273_v32 = vpop.f32.mrf.mxu1  ;;  %v17934_v2 = vld [vmem:[%s24686_s9 + $0xc0] sm:$0xff]   ;;  %v17937_v13 = vld [vmem:[%s24686_s9 + $0x338] sm:$0xff]  }
 0x70d   :  { %v11563_v20 = vmax.f32 %v11507_v49, 0.0  ;;  %v11433_v42 = vadd.f32 %v11375_v31, %v23818_v26  ;;  %v11377_v57 = vadd.f32 %v11376_v7, %v11273_v32  ;;  %12192 = vmatpush1.bf16.msra.mxu1 %v17922_v30  ;;  %v11508_v3 = vadd.f32 %v24009_v58, %v11430_v28  ;;  %v17938_v30 = vld [vmem:[%s24686_s9 + $0x270] sm:$0xff]   ;;  %v17942_v4 = vld [vmem:[%s24686_s9 + $0x260] sm:$0xff]   ;;  %v17945_v49 = vld [vmem:[%s24686_s9 + $0x378] sm:$0xff]  }
 0x70e   :  { %16354 = vmatpush3.bf16.msra.mxu0 %v17924_v27  ;;  %v11275_v21 = vpop.f32.mrf.mxu1  ;;  %12193 = vmatprep.subr.bf16.mxu1 %v24098_v25  ;;  %v17943_v27 = vld [vmem:[%s24686_s9 + $0x320] sm:$0xff]   ;;  %v17946_v31 = vld [vmem:[%s24686_s9 + $0x250] sm:$0xff]   ;;  %v17948_v28 = vld [vmem:[%s24686_s9 + $0x248] sm:$0xff]  }
 0x70f   :  { %v24192_v16 = vpack.c.bf16 %v11563_v20, %v11559_v34  ;;  %v11511_v26 = vadd.f32 %v24001_v33, %v11433_v42  ;;  %v11434_v36 = vadd.f32 %v11377_v57, %v23821_v9  ;;  %v11379_v11 = vadd.f32 %v11378_v45, %v11275_v21  ;;  %16355 = vmatprep.subr.bf16.mxu0 %v17926_v52  ;;  %v17929_v9 = vld [vmem:[%s24686_s9 + $0x358] sm:$0xff]   ;;  %v17947_v52 = vld [vmem:[%s24686_s9 + $0x370] sm:$0xff]   ;;  %v17949_v32 = vld [vmem:[%s24686_s9 + $0x368] sm:$0xff]  }
 0x710   :  { %v11564_v1 = vmax.f32 %v11508_v3, 0.0  ;;  %v11277_v19 = vpop.f32.mrf.mxu1  ;;  %v17944_v45 = vld [vmem:[%s24686_s9 + $0x258] sm:$0xff]   ;;  %v17950_v34 = vld [vmem:[%s24686_s9 + $0x240] sm:$0xff]   ;;  %v17956_v3 = vld [vmem:[%s24686_s9 + $0x4d0] sm:$0xff]  }
 0x711   :  { %v11512_v41 = vadd.f32 %v24009_v58, %v11434_v36  ;;  %v11437_v56 = vadd.f32 %v11379_v11, %v25368_v47  ;;  %v11381_v23 = vadd.f32 %v11380_v38, %v11277_v19  ;;  %12194 = vmatpush1.bf16.msra.mxu1 %v17925_v15  ;;  %v11567_v24 = vmax.f32 %v11511_v26, 0.0  ;;  %v17951_v20 = vld [vmem:[%s24686_s9 + $0x360] sm:$0xff]   ;;  %v17953_v42 = vld [vmem:[%s24686_s9 + $0x4d8] sm:$0xff]   ;;  %v17955_v21 = vld [vmem:[%s24686_s9 + $0x290] sm:$0xff]  }
 0x712   :  { %v24201_v35 = vpack.c.bf16 %v11564_v1, %v11560_v29  ;;  %16356 = vmatpush3.bf16.msra.mxu0 %v17927_v12  ;;  %12203 = vmatprep.subr.bf16.mxu1 %v24098_v25  ;;  %v17952_v57 = vld [vmem:[%s24686_s9 + $0x298] sm:$0xff]   ;;  %v17957_v38 = vld [vmem:[%s24686_s9 + $0x490] sm:$0xff]   ;;  %v17959_v12 = vld [vmem:[%s24686_s9 + $0x4c8] sm:$0xff]  }
 0x713   :  { %v11515_v6 = vadd.f32 %v24001_v33, %v11437_v56  ;;  %v11438_v60 = vadd.f32 %v11381_v23, %v25369_v53  ;;  %12801 = vmatprep.subr.bf16.mxu0 %v24098_v25  ;;  %v17931_v33 = vld [vmem:[%s24686_s9 + $0x350] sm:$0xff]   ;;  %v11568_v46 = vmax.f32 %v11512_v41, 0.0  ;;  %v17954_v15 = vld [vmem:[%s24686_s9 + $0x498] sm:$0xff]   ;;  %v17962_v26 = vld [vmem:[%s24686_s9 + $0x4c0] sm:$0xff]  }
 0x714   :  { %v17961_v36 = vld [vmem:[%s24686_s9 + $0x280] sm:$0xff]   ;;  %v17964_v29 = vld [vmem:[%s24686_s9 + $0x3f8] sm:$0xff]   ;;  %v17968_v47 = vld [vmem:[%s24686_s9 + $0x3f0] sm:$0xff]  }
 0x715   :  { %v11571_v61 = vmax.f32 %v11515_v6, 0.0  ;;  %v11516_v7 = vadd.f32 %v24009_v58, %v11438_v60  ;;  %12204 = vmatpush2.bf16.msra.mxu1 %v17928_v8  ;;  %12793 = vmatmul.mubr.bf16.vlgmr.msra.gmra.mxu0 %v23917_v62  ;;  %v17932_v58 = vld [vmem:[%s24686_s9 + $0xc8] sm:$0xff]   ;;  %v17963_v11 = vld [vmem:[%s24686_s9 + $0x480] sm:$0xff]   ;;  %v17966_v1 = vld [vmem:[%s24686_s9 + $0x4b8] sm:$0xff]  }
 0x716   :  { %12802 = vmatpush1.bf16.msra.mxu0 %v17929_v9  ;;  %15939 = vmatprep.mubr.msk.bf16.mxu0 %vm8555_vm8, %v24135_v54  ;;  %v17933_v54 = vld [vmem:[%s24686_s9 + $0x348] sm:$0xff]   ;;  %v17965_v19 = vld [vmem:[%s24686_s9 + $0x3b8] sm:$0xff]   ;;  %v17970_v56 = vld [vmem:[%s24686_s9 + $0x4b0] sm:$0xff]  }
 0x717   :  { %v24220_v14 = vpack.c.bf16 %v11571_v61, %v11567_v24  ;;  %v11572_v39 = vmax.f32 %v11516_v7, 0.0  ;;  %12205 = vmatprep.subr.bf16.mxu1 %v24098_v25  ;;  %12803 = vmatprep.subr.bf16.mxu0 %v24098_v25  ;;  %v17967_v41 = vld [vmem:[%s24686_s9 + $0x478] sm:$0xff]   ;;  %v17969_v23 = vld [vmem:[%s24686_s9 + $0x3b0] sm:$0xff]   ;;  %v17972_v9 = vld [vmem:[%s24686_s9 + $0x3e8] sm:$0xff]  }
 0x718   :  { %v17971_v8 = vld [vmem:[%s24686_s9 + $0x470] sm:$0xff]   ;;  %v17975_v6 = vld [vmem:[%s24686_s9 + $0x468] sm:$0xff]   ;;  %v17976_v53 = vld [vmem:[%s24686_s9 + $0x3e0] sm:$0xff]  }
 0x719   :  { %v24224_v62 = vpack.c.bf16 %v11572_v39, %v11568_v46  ;;  %12206 = vmatpush2.bf16.msra.mxu1 %v17930_v5  ;;  %v17978_v60 = vld [vmem:[%s24686_s9 + $0x4a0] sm:$0xff]   ;;  %v17980_v7 = vld [vmem:[%s24686_s9 + $0x3d8] sm:$0xff]   ;;  %v17983_v46 = vld [vmem:[%s24686_s9 + $0x3d0] sm:$0xff]  }
 0x71a   :  { %12804 = vmatpush1.bf16.msra.mxu0 %v17931_v33  ;;  %12207 = vmatprep.subr.bf16.mxu1 %v24098_v25  ;;  %v17977_v24 = vld [vmem:[%s24686_s9 + $0x3a0] sm:$0xff]   ;;  %v17981_v5 = vld [vmem:[%s24686_s9 + $0x398] sm:$0xff]   ;;  %v17984_v39 = vld [vmem:[%s24686_s9 + $0x390] sm:$0xff]  }
 0x71b   :  { %12805 = vmatprep.subr.bf16.mxu0 %v24098_v25  ;;  %v17979_v61 = vld [vmem:[%s24686_s9 + $0x460] sm:$0xff]   ;;  %v17982_v33 = vld [vmem:[%s24686_s9 + $0x518] sm:$0xff]  }
 0x71d   :  { %12208 = vmatpush2.bf16.msra.mxu1 %v17932_v58  ;;  %v17985_v58 = vld [vmem:[%s24686_s9 + $0x510] sm:$0xff]  }
 0x71e   :  { %12806 = vmatpush1.bf16.msra.mxu0 %v17933_v54  ;;  %12209 = vmatprep.subr.bf16.mxu1 %v24098_v25  ;;  %v17986_v54 = vld [vmem:[%s24686_s9 + $0x3c8] sm:$0xff]  }
 0x71f   :  { %12807 = vmatprep.subr.bf16.mxu0 %v24098_v25 }
 0x721   :  { %12210 = vmatpush2.bf16.msra.mxu1 %v17934_v2  ;;  %v17989_v2 = vld [vmem:[%s24686_s9 + $0x3c0] sm:$0xff]  }
 0x722   :  { %12808 = vmatpush1.bf16.msra.mxu0 %v17935_v59  ;;  %12489 = vmatprep.subr.bf16.mxu1 %v24098_v25  ;;  %v17990_v59 = vld [vmem:[%s24686_s9 + $0x380] sm:$0xff]  }
 0x723   :  { %12809 = vmatprep.subr.bf16.mxu0 %v24098_v25 }
 0x724   :  { %12212 = vmatmul.mubr.bf16.vlgmr.msra.gmra.mxu1 %v24035_v63  ;;  %v17940_v63 = vld [vmem:[%s24686_s9 + $0x268] sm:$0xff]  }
 0x725   :  { %12490 = vmatpush1.bf16.msra.mxu1 %v17936_v51  ;;  %15854 = vmatprep.mubr.msk.bf16.mxu1 %vm8555_vm8, %v24105_v37  ;;  %v17941_v37 = vld [vmem:[%s24686_s9 + $0x328] sm:$0xff]   ;;  %v17991_v51 = vld [vmem:[%s24686_s9 + $0x500] sm:$0xff]  }
 0x726   :  { %12810 = vmatpush1.bf16.msra.mxu0 %v17937_v13  ;;  %12491 = vmatprep.subr.bf16.mxu1 %v24098_v25  ;;  %v17992_v13 = vld [vmem:[%s24686_s9 + $0x438] sm:$0xff]  }
 0x727   :  { %12811 = vmatprep.subr.bf16.mxu0 %v24098_v25 }
 0x729   :  { %12492 = vmatpush1.bf16.msra.mxu1 %v17938_v30  ;;  %v17993_v30 = vld [vmem:[%s24686_s9 + $0x4f8] sm:$0xff]  }
 0x72a   :  { %12812 = vmatpush1.bf16.msra.mxu0 %v17939_v10  ;;  %12493 = vmatprep.subr.bf16.mxu1 %v24098_v25 }
 0x72b   :  { %12813 = vmatprep.subr.bf16.mxu0 %v24098_v25 }
 0x72d   :  { %12494 = vmatpush1.bf16.msra.mxu1 %v17940_v63  ;;  %v17994_v63 = vld [vmem:[%s24686_s9 + $0x430] sm:$0xff]  }
 0x72e   :  { %12814 = vmatpush1.bf16.msra.mxu0 %v17941_v37  ;;  %12495 = vmatprep.subr.bf16.mxu1 %v24098_v25  ;;  %v17995_v37 = vld [vmem:[%s24686_s9 + $0x4f0] sm:$0xff]  }
 0x72f   :  { %12815 = vmatprep.subr.bf16.mxu0 %v24098_v25 }
 0x731   :  { %12496 = vmatpush1.bf16.msra.mxu1 %v17942_v4 }
 0x732   :  { %12816 = vmatpush1.bf16.msra.mxu0 %v17943_v27  ;;  %12497 = vmatprep.subr.bf16.mxu1 %v24098_v25 }
 0x733   :  { %12825 = vmatprep.subr.bf16.mxu0 %v24098_v25 }
 0x735   :  { %12498 = vmatpush1.bf16.msra.mxu1 %v17944_v45  ;;  %v17997_v45 = vld [vmem:[%s24686_s9 + $0x4e8] sm:$0xff]  }
 0x736   :  { %12826 = vmatpush2.bf16.msra.mxu0 %v17945_v49  ;;  %12499 = vmatprep.subr.bf16.mxu1 %v24098_v25 }
 0x737   :  { %12827 = vmatprep.subr.bf16.mxu0 %v24098_v25 }
 0x739   :  { %12500 = vmatpush1.bf16.msra.mxu1 %v17946_v31 }
 0x73a   :  { %12828 = vmatpush2.bf16.msra.mxu0 %v17947_v52  ;;  %12501 = vmatprep.subr.bf16.mxu1 %v24098_v25  ;;  %v17998_v52 = vld [vmem:[%s24686_s9 + $0x420] sm:$0xff]  }
 0x73b   :  { %12829 = vmatprep.subr.bf16.mxu0 %v24098_v25 }
 0x73d   :  { %12502 = vmatpush1.bf16.msra.mxu1 %v17948_v28  ;;  %v17999_v28 = vld [vmem:[%s24686_s9 + $0x4e0] sm:$0xff]  }
 0x73e   :  { %12830 = vmatpush2.bf16.msra.mxu0 %v17949_v32  ;;  %12503 = vmatprep.subr.bf16.mxu1 %v24098_v25  ;;  %v18000_v32 = vld [vmem:[%s24686_s9 + $0x418] sm:$0xff]  }
 0x73f   :  { %12831 = vmatprep.subr.bf16.mxu0 %v24098_v25 }
 0x741   :  { %12504 = vmatpush1.bf16.msra.mxu1 %v17950_v34  ;;  %v18001_v34 = vld [vmem:[%s24686_s9 + $0x538] sm:$0xff]  }
 0x742   :  { %12832 = vmatpush2.bf16.msra.mxu0 %v17951_v20  ;;  %12513 = vmatprep.subr.bf16.mxu1 %v24098_v25  ;;  %v18002_v20 = vld [vmem:[%s24686_s9 + $0x410] sm:$0xff]  }
 0x743   :  { %16385 = vmatprep.subr.bf16.mxu0 %v17953_v42  ;;  %v18003_v42 = vld [vmem:[%s24686_s9 + $0x530] sm:$0xff]  }
 0x745   :  { %12514 = vmatpush2.bf16.msra.mxu1 %v17952_v57  ;;  %12834 = vmatmul.mubr.bf16.vlgmr.msra.gmra.mxu0 %v24127_v48  ;;  %v17958_v48 = vld [vmem:[%s24686_s9 + $0x288] sm:$0xff]  }
 0x746   :  { %16386 = vmatpush3.bf16.msra.mxu0 %v17954_v15  ;;  %13416 = vmatprep.mubr.bf16.mxu0 %v23977_v55  ;;  %v17960_v55 = vld [vmem:[%s24686_s9 + $0x488] sm:$0xff]  }
 0x747   :  { %12515 = vmatprep.subr.bf16.mxu1 %v24098_v25  ;;  %16387 = vmatprep.subr.bf16.mxu0 %v17956_v3  ;;  %v18004_v57 = vld [vmem:[%s24686_s9 + $0x408] sm:$0xff]   ;;  %v18006_v3 = vld [vmem:[%s24686_s9 + $0x400] sm:$0xff]  }
 0x748   :  { %v18005_v15 = vld [vmem:[%s24686_s9 + $0x528] sm:$0xff]  }
 0x749   :  { %12516 = vmatpush2.bf16.msra.mxu1 %v17955_v21  ;;  %v18007_v21 = vld [vmem:[%s24686_s9 + $0x520] sm:$0xff]  }
 0x74a   :  { %16388 = vmatpush3.bf16.msra.mxu0 %v17957_v38  ;;  %12517 = vmatprep.subr.bf16.mxu1 %v24098_v25  ;;  %v18008_v38 = vld [vmem:[%s24686_s9 + $0x458] sm:$0xff]  }
 0x74b   :  { %16389 = vmatprep.subr.bf16.mxu0 %v17959_v12 }
 0x74d   :  { %12518 = vmatpush2.bf16.msra.mxu1 %v17958_v48  ;;  %v18009_v48 = vld [vmem:[%s24686_s9 + $0x450] sm:$0xff]  }
 0x74e   :  { %16390 = vmatpush3.bf16.msra.mxu0 %v17960_v55  ;;  %12519 = vmatprep.subr.bf16.mxu1 %v24098_v25 }
 0x74f   :  { %16391 = vmatprep.subr.bf16.mxu0 %v17962_v26 }
 0x751   :  { %12520 = vmatpush2.bf16.msra.mxu1 %v17961_v36 }
 0x752   :  { %16392 = vmatpush3.bf16.msra.mxu0 %v17963_v11  ;;  %16363 = vmatprep.subr.bf16.mxu1 %v17964_v29  ;;  %v18010_v11 = vld [vmem:[%s24686_s9 + $0x448] sm:$0xff]  }
 0x753   :  { %16393 = vmatprep.subr.bf16.mxu0 %v17966_v1 }
 0x754   :  { %12522 = vmatmul.mubr.bf16.vlgmr.msra.gmra.mxu1 %v24090_v40  ;;  %v17974_v40 = vld [vmem:[%s24686_s9 + $0x4a8] sm:$0xff]  }
 0x755   :  { %16364 = vmatpush3.bf16.msra.mxu1 %v17965_v19  ;;  %13104 = vmatprep.mubr.bf16.mxu1 %v23947_v50  ;;  %v17973_v50 = vld [vmem:[%s24686_s9 + $0x3a8] sm:$0xff]   ;;  %v18012_v19 = vld [vmem:[%s24686_s9 + $0x5b8] sm:$0xff]  }
 0x756   :  { %16394 = vmatpush3.bf16.msra.mxu0 %v17967_v41  ;;  %16365 = vmatprep.subr.bf16.mxu1 %v17968_v47  ;;  %v18013_v41 = vld [vmem:[%s24686_s9 + $0x578] sm:$0xff]   ;;  %v18014_v47 = vld [vmem:[%s24686_s9 + $0x5b0] sm:$0xff]  }
 0x757   :  { %16395 = vmatprep.subr.bf16.mxu0 %v17970_v56  ;;  %v18015_v56 = vld [vmem:[%s24686_s9 + $0x570] sm:$0xff]  }
 0x759   :  { %16366 = vmatpush3.bf16.msra.mxu1 %v17969_v23  ;;  %v18016_v23 = vld [vmem:[%s24686_s9 + $0x5a8] sm:$0xff]  }
 0x75a   :  { %16396 = vmatpush3.bf16.msra.mxu0 %v17971_v8  ;;  %16367 = vmatprep.subr.bf16.mxu1 %v17972_v9  ;;  %v18017_v8 = vld [vmem:[%s24686_s9 + $0x568] sm:$0xff]   ;;  %v18020_v9 = vld [vmem:[%s24686_s9 + $0x598] sm:$0xff]  }
 0x75b   :  { %16397 = vmatprep.subr.bf16.mxu0 %v17974_v40  ;;  %v18021_v40 = vld [vmem:[%s24686_s9 + $0x558] sm:$0xff]  }
 0x75d   :  { %16368 = vmatpush3.bf16.msra.mxu1 %v17973_v50  ;;  %v18022_v50 = vld [vmem:[%s24686_s9 + $0x590] sm:$0xff]  }
 0x75e   :  { %16398 = vmatpush3.bf16.msra.mxu0 %v17975_v6  ;;  %16369 = vmatprep.subr.bf16.mxu1 %v17976_v53 }
 0x75f   :  { %16399 = vmatprep.subr.bf16.mxu0 %v17978_v60 }
 0x761   :  { %16370 = vmatpush3.bf16.msra.mxu1 %v17977_v24  ;;  %v18023_v24 = vld [vmem:[%s24686_s9 + $0x550] sm:$0xff]  }
 0x762   :  { %16400 = vmatpush3.bf16.msra.mxu0 %v17979_v61  ;;  %16371 = vmatprep.subr.bf16.mxu1 %v17980_v7  ;;  %v18024_v7 = vld [vmem:[%s24686_s9 + $0x588] sm:$0xff]  }
 0x763   :  { %13425 = vmatprep.subr.bf16.mxu0 %v24098_v25 }
 0x765   :  { %16372 = vmatpush3.bf16.msra.mxu1 %v17981_v5  ;;  %13417 = vmatmul.mubr.bf16.vlgmr.msra.gmra.mxu0 %v23969_v0  ;;  %v17987_v0 = vld [vmem:[%s24686_s9 + $0x388] sm:$0xff]  }
 0x766   :  { %13426 = vmatpush1.bf16.msra.mxu0 %v17982_v33  ;;  %16109 = vmatprep.mubr.msk.bf16.mxu0 %vm8555_vm8, %v24201_v35  ;;  %v17988_v35 = vld [vmem:[%s24686_s9 + $0x508] sm:$0xff]  }
 0x767   :  { %16373 = vmatprep.subr.bf16.mxu1 %v17983_v46  ;;  %13427 = vmatprep.subr.bf16.mxu0 %v24098_v25 }
 0x769   :  { %16374 = vmatpush3.bf16.msra.mxu1 %v17984_v39 }
 0x76a   :  { %13428 = vmatpush1.bf16.msra.mxu0 %v17985_v58  ;;  %16375 = vmatprep.subr.bf16.mxu1 %v17986_v54 }
 0x76b   :  { %13429 = vmatprep.subr.bf16.mxu0 %v24098_v25 }
 0x76d   :  { %16376 = vmatpush3.bf16.msra.mxu1 %v17987_v0  ;;  %v18025_v0 = vld [vmem:[%s24686_s9 + $0x548] sm:$0xff]  }
 0x76e   :  { %13430 = vmatpush1.bf16.msra.mxu0 %v17988_v35  ;;  %16377 = vmatprep.subr.bf16.mxu1 %v17989_v2  ;;  %v18026_v2 = vld [vmem:[%s24686_s9 + $0x580] sm:$0xff]  }
 0x76f   :  { %13431 = vmatprep.subr.bf16.mxu0 %v24098_v25 }
 0x771   :  { %16378 = vmatpush3.bf16.msra.mxu1 %v17990_v59 }
 0x772   :  { %13432 = vmatpush1.bf16.msra.mxu0 %v17991_v51  ;;  %13113 = vmatprep.subr.bf16.mxu1 %v24098_v25 }
 0x773   :  { %13433 = vmatprep.subr.bf16.mxu0 %v24098_v25 }
 0x774   :  { %13105 = vmatmul.mubr.bf16.vlgmr.msra.gmra.mxu1 %v23938_v44  ;;  %v16291_v10 = vpop.f32.mrf.mxu0 }
 0x775   :  { %13114 = vmatpush1.bf16.msra.mxu1 %v17992_v13  ;;  %16024 = vmatprep.mubr.msk.bf16.mxu1 %vm8555_vm8, %v24167_v18  ;;  %v17996_v18 = vld [vmem:[%s24686_s9 + $0x428] sm:$0xff]  }
 0x776   :  { %13434 = vmatpush1.bf16.msra.mxu0 %v17993_v30  ;;  %13115 = vmatprep.subr.bf16.mxu1 %v24098_v25  ;;  %v16292_v4 = vpop.f32.mrf.mxu0  ;;  %v18027_v30 = vld [vmem:[%s24686_s9 + $0x540] sm:$0xff]  }
 0x777   :  { %13435 = vmatprep.subr.bf16.mxu0 %v24098_v25  ;;  %v24463_v44 = vadd.f32 %v16292_v4, %v16291_v10  ;;  %v18028_v10 = vld [vmem:[%s24686_s9 + $0x5f8] sm:$0xff]  }
 0x778   :  { %v16294_v27 = vpop.f32.mrf.mxu0 }
 0x779   :  { %13116 = vmatpush1.bf16.msra.mxu1 %v17994_v63  ;;  %v18029_v63 = vld [vmem:[%s24686_s9 + $0x5f0] sm:$0xff]  }
 0x77a   :  { %13436 = vmatpush1.bf16.msra.mxu0 %v17995_v37  ;;  %13117 = vmatprep.subr.bf16.mxu1 %v24098_v25  ;;  %v16295_v49 = vpop.f32.mrf.mxu0  ;;  %v18030_v37 = vld [vmem:[%s24686_s9 + $0x5e8] sm:$0xff]  }
 0x77b   :  { %13437 = vmatprep.subr.bf16.mxu0 %v24098_v25  ;;  %v24473_v31 = vadd.f32 %v16295_v49, %v16294_v27  ;;  %v18034_v49 = vld [vmem:[%s24686_s9 + $0x5c8] sm:$0xff]  }
 0x77d   :  { %13118 = vmatpush1.bf16.msra.mxu1 %v17996_v18 }
 0x77e   :  { %13438 = vmatpush1.bf16.msra.mxu0 %v17997_v45  ;;  %13119 = vmatprep.subr.bf16.mxu1 %v24098_v25 }
 0x77f   :  { %13439 = vmatprep.subr.bf16.mxu0 %v24098_v25 }
 0x781   :  { %13120 = vmatpush1.bf16.msra.mxu1 %v17998_v52 }
 0x782   :  { %13440 = vmatpush1.bf16.msra.mxu0 %v17999_v28  ;;  %13121 = vmatprep.subr.bf16.mxu1 %v24098_v25  ;;  %v18035_v28 = vld [vmem:[%s24686_s9 + $0x5c0] sm:$0xff]  }
 0x783   :  { %13449 = vmatprep.subr.bf16.mxu0 %v24098_v25 }
 0x785   :  { %13122 = vmatpush1.bf16.msra.mxu1 %v18000_v32  ;;  %v18036_v32 = vld [vmem:[%s24686_s9 + $0x618] sm:$0xff]  }
 0x786   :  { %13450 = vmatpush2.bf16.msra.mxu0 %v18001_v34  ;;  %13123 = vmatprep.subr.bf16.mxu1 %v24098_v25 }
 0x787   :  { %13451 = vmatprep.subr.bf16.mxu0 %v24098_v25 }
 0x789   :  { %13124 = vmatpush1.bf16.msra.mxu1 %v18002_v20 }
 0x78a   :  { %13452 = vmatpush2.bf16.msra.mxu0 %v18003_v42  ;;  %13125 = vmatprep.subr.bf16.mxu1 %v24098_v25  ;;  %v18037_v42 = vld [vmem:[%s24686_s9 + $0x610] sm:$0xff]  }
 0x78b   :  { %13453 = vmatprep.subr.bf16.mxu0 %v24098_v25 }
 0x78d   :  { %13126 = vmatpush1.bf16.msra.mxu1 %v18004_v57 }
 0x78e   :  { %13454 = vmatpush2.bf16.msra.mxu0 %v18005_v15  ;;  %13127 = vmatprep.subr.bf16.mxu1 %v24098_v25 }
 0x78f   :  { %13455 = vmatprep.subr.bf16.mxu0 %v24098_v25 }
 0x791   :  { %13128 = vmatpush1.bf16.msra.mxu1 %v18006_v3 }
 0x792   :  { %13456 = vmatpush2.bf16.msra.mxu0 %v18007_v21  ;;  %13137 = vmatprep.subr.bf16.mxu1 %v24098_v25  ;;  %v18038_v21 = vld [vmem:[%s24686_s9 + $0x608] sm:$0xff]  }
 0x794   :  { %v16313_v12 = vpop.f32.mrf.mxu0 }
 0x795   :  { %13138 = vmatpush2.bf16.msra.mxu1 %v18008_v38  ;;  %13458 = vmatmul.mubr.bf16.vlgmr.msra.gmra.mxu0 %v24192_v16  ;;  %v18011_v16 = vld [vmem:[%s24686_s9 + $0x440] sm:$0xff]  }
 0x796   :  { %13139 = vmatprep.subr.bf16.mxu1 %v24098_v25  ;;  %v16314_v55 = vpop.f32.mrf.mxu0 }
 0x797   :  { %v16315_v26 = vadd.f32 %v16314_v55, %v16313_v12  ;;  %v18039_v12 = vld [vmem:[%s24686_s9 + $0x600] sm:$0xff]  }
 0x798   :  { %v16316_v36 = vpop.f32.mrf.mxu0 }
 0x799   :  { %13140 = vmatpush2.bf16.msra.mxu1 %v18009_v48 }
 0x79a   :  { %13141 = vmatprep.subr.bf16.mxu1 %v24098_v25  ;;  %v16317_v29 = vpop.f32.mrf.mxu0 }
 0x79b   :  { %v16318_v1 = vadd.f32 %v16317_v29, %v16316_v36 }
 0x79d   :  { %13142 = vmatpush2.bf16.msra.mxu1 %v18010_v11 }
 0x79e   :  { %13143 = vmatprep.subr.bf16.mxu1 %v24098_v25 }
 0x7a1   :  { %13144 = vmatpush2.bf16.msra.mxu1 %v18011_v16  ;;  %v18040_v16 = vld [vmem:[%s24688_s11 + $0x38] sm:$0xff]  }
 0x7a2   :  { %16407 = vmatprep.subr.bf16.mxu1 %v18012_v19 }
 0x7a4   :  { %13146 = vmatmul.mubr.bf16.vlgmr.msra.gmra.mxu1 %v24165_v17  ;;  %v18018_v17 = vld [vmem:[%s24686_s9 + $0x5a0] sm:$0xff]  }
 0x7a5   :  { %16408 = vmatpush3.bf16.msra.mxu1 %v18013_v41  ;;  %13728 = vmatprep.mubr.bf16.mxu1 %v23994_v43  ;;  %v18019_v43 = vld [vmem:[%s24686_s9 + $0x560] sm:$0xff]  }
 0x7a6   :  { %16409 = vmatprep.subr.bf16.mxu1 %v18014_v47 }
 0x7a9   :  { %16410 = vmatpush3.bf16.msra.mxu1 %v18015_v56  ;;  %v18043_v56 = vld [vmem:[%s24688_s11 + $0x20] sm:$0xff]  }
 0x7aa   :  { %16411 = vmatprep.subr.bf16.mxu1 %v18016_v23 }
 0x7ad   :  { %16412 = vmatpush3.bf16.msra.mxu1 %v18017_v8 }
 0x7ae   :  { %16413 = vmatprep.subr.bf16.mxu1 %v18018_v17 }
 0x7b1   :  { %16414 = vmatpush3.bf16.msra.mxu1 %v18019_v43 }
 0x7b2   :  { %16415 = vmatprep.subr.bf16.mxu1 %v18020_v9 }
 0x7b4   :  { %v11960_v6 = vpop.f32.mrf.mxu1  ;;  %v16335_v60 = vpop.f32.mrf.mxu0 }
 0x7b5   :  { %v11961_v53 = vadd.f32 %v24463_v44, %v11960_v6  ;;  %16416 = vmatpush3.bf16.msra.mxu1 %v18021_v40  ;;  %v18033_v44 = vld [vmem:[%s24686_s9 + $0x5d0] sm:$0xff]  }
 0x7b6   :  { %v11962_v61 = vpop.f32.mrf.mxu1  ;;  %16417 = vmatprep.subr.bf16.mxu1 %v18022_v50  ;;  %v16336_v5 = vpop.f32.mrf.mxu0 }
 0x7b7   :  { %v12173_v33 = vadd.f32 %v16315_v26, %v11961_v53  ;;  %v24574_v46 = vadd.f32 %v16336_v5, %v16335_v60 }
 0x7b8   :  { %v11963_v39 = vpop.f32.mrf.mxu1  ;;  %v16338_v54 = vpop.f32.mrf.mxu0 }
 0x7b9   :  { %v11964_v58 = vadd.f32 %v24473_v31, %v11963_v39  ;;  %16418 = vmatpush3.bf16.msra.mxu1 %v18023_v24 }
 0x7ba   :  { %v11965_v35 = vpop.f32.mrf.mxu1  ;;  %16419 = vmatprep.subr.bf16.mxu1 %v18024_v7  ;;  %v16339_v59 = vpop.f32.mrf.mxu0 }
 0x7bb   :  { %v12176_v51 = vadd.f32 %v16318_v1, %v11964_v58  ;;  %v24583_v13 = vadd.f32 %v16339_v59, %v16338_v54  ;;  %v18084_v1 = vmov 0.0   ;;  %v18045_v54 = vld [vmem:[%s24688_s11 + $0x10] sm:$0xff]   ;;  %v18047_v59 = vld [vmem:[%s24688_s11] sm:$0xff]  }
 0x7bc   :  { %16438 = vmatprep.subr.bf16.mxu0 %v18084_v1  ;;  %16454 = vmatprep.mubr.msk.bf16.mxu0 %vm18085_vm9, %v18084_v1 }
 0x7bd   :  { %16420 = vmatpush3.bf16.msra.mxu1 %v18025_v0  ;;  %16439 = vmatpush3.bf16.msra.mxu0 %v18040_v16 }
 0x7be   :  { %16421 = vmatprep.subr.bf16.mxu1 %v18026_v2  ;;  %16440 = vmatprep.subr.bf16.mxu0 %v18084_v1  ;;  %v18046_v2 = vld [vmem:[%s24688_s11 + $0x8] sm:$0xff]  }
 0x7c1   :  { %16422 = vmatpush3.bf16.msra.mxu1 %v18027_v30 }
 0x7c2   :  { %13737 = vmatprep.subr.bf16.mxu1 %v24098_v25 }
 0x7c4   :  { %13729 = vmatmul.mubr.bf16.vlgmr.msra.gmra.mxu1 %v23989_v22  ;;  %v18031_v22 = vld [vmem:[%s24686_s9 + $0x5e0] sm:$0xff]  }
 0x7c5   :  { %13738 = vmatpush1.bf16.msra.mxu1 %v18028_v10  ;;  %16194 = vmatprep.mubr.msk.bf16.mxu1 %vm8555_vm8, %v24224_v62  ;;  %v18032_v62 = vld [vmem:[%s24686_s9 + $0x5d8] sm:$0xff]  }
 0x7c6   :  { %13739 = vmatprep.subr.bf16.mxu1 %v24098_v25 }
 0x7c9   :  { %13740 = vmatpush1.bf16.msra.mxu1 %v18029_v63 }
 0x7ca   :  { %13741 = vmatprep.subr.bf16.mxu1 %v24098_v25 }
 0x7cd   :  { %13742 = vmatpush1.bf16.msra.mxu1 %v18030_v37 }
 0x7ce   :  { %13743 = vmatprep.subr.bf16.mxu1 %v24098_v25 }
 0x7d1   :  { %13744 = vmatpush1.bf16.msra.mxu1 %v18031_v22 }
 0x7d2   :  { %13745 = vmatprep.subr.bf16.mxu1 %v24098_v25 }
 0x7d5   :  { %v16357_v4 = vpop.f32.mrf.mxu0  ;;  %13746 = vmatpush1.bf16.msra.mxu1 %v18032_v62 }
 0x7d6   :  { %13747 = vmatprep.subr.bf16.mxu1 %v24098_v25 }
 0x7d7   :  { %v16358_v27 = vpop.f32.mrf.mxu0 }
 0x7d8   :  { %v16359_v18 = vadd.f32 %v16358_v27, %v16357_v4 }
 0x7d9   :  { %v16360_v45 = vpop.f32.mrf.mxu0  ;;  %13748 = vmatpush1.bf16.msra.mxu1 %v18033_v44 }
 0x7da   :  { %13749 = vmatprep.subr.bf16.mxu1 %v24098_v25 }
 0x7db   :  { %v16361_v31 = vpop.f32.mrf.mxu0 }
 0x7dc   :  { %v16362_v52 = vadd.f32 %v16361_v31, %v16360_v45 }
 0x7dd   :  { %13750 = vmatpush1.bf16.msra.mxu1 %v18034_v49 }
 0x7de   :  { %13751 = vmatprep.subr.bf16.mxu1 %v24098_v25 }
 0x7e1   :  { %13752 = vmatpush1.bf16.msra.mxu1 %v18035_v28 }
 0x7e2   :  { %13761 = vmatprep.subr.bf16.mxu1 %v24098_v25 }
 0x7e4   :  { %v12213_v34 = vpop.f32.mrf.mxu1 }
 0x7e5   :  { %v12214_v20 = vadd.f32 %v12213_v34, %v12173_v33  ;;  %13762 = vmatpush2.bf16.msra.mxu1 %v18036_v32  ;;  %v18044_v33 = vld [vmem:[%s24688_s11 + $0x18] sm:$0xff]  }
 0x7e6   :  { %v12215_v57 = vpop.f32.mrf.mxu1  ;;  %13763 = vmatprep.subr.bf16.mxu1 %v24098_v25 }
 0x7e8   :  { %v12216_v15 = vpop.f32.mrf.mxu1 }
 0x7e9   :  { %v12217_v3 = vadd.f32 %v12216_v15, %v12176_v51  ;;  %13764 = vmatpush2.bf16.msra.mxu1 %v18037_v42 }
 0x7ea   :  { %v12218_v38 = vpop.f32.mrf.mxu1  ;;  %13765 = vmatprep.subr.bf16.mxu1 %v24098_v25 }
 0x7ed   :  { %13766 = vmatpush2.bf16.msra.mxu1 %v18038_v21 }
 0x7ee   :  { %13767 = vmatprep.subr.bf16.mxu1 %v24098_v25  ;;  %v18041_v25 = vld [vmem:[%s24688_s11 + $0x30] sm:$0xff]  }
 0x7ef   :  { %16441 = vmatpush3.bf16.msra.mxu0 %v18041_v25 }
 0x7f0   :  { %16442 = vmatprep.subr.bf16.mxu0 %v18084_v1 }
 0x7f1   :  { %13768 = vmatpush2.bf16.msra.mxu1 %v18039_v12  ;;  %v16195_v12 = vld [vmem:[%s24689_s10] ss:$0 sm:$0xff] }
 0x7f4   :  { %13770 = vmatmul.mubr.bf16.vlgmr.msra.gmra.mxu1 %v24220_v14  ;;  %v18042_v14 = vld [vmem:[%s24688_s11 + $0x28] sm:$0xff]  }
 0x7f5   :  { %16443 = vmatpush3.bf16.msra.mxu0 %v18042_v14  ;;  %v16196_v14 = vld [vmem:[%s24690_s12] ss:$0 sm:$0xff] }
 0x7f6   :  { %16444 = vmatprep.subr.bf16.mxu0 %v18084_v1 }
 0x7f9   :  { %16445 = vmatpush3.bf16.msra.mxu0 %v18043_v56 }
 0x7fa   :  { %16446 = vmatprep.subr.bf16.mxu0 %v18084_v1 }
 0x7fd   :  { %16447 = vmatpush3.bf16.msra.mxu0 %v18044_v33 }
 0x7fe   :  { %16448 = vmatprep.subr.bf16.mxu0 %v18084_v1 }
 0x801   :  { %16449 = vmatpush3.bf16.msra.mxu0 %v18045_v54 }
 0x802   :  { %16450 = vmatprep.subr.bf16.mxu0 %v18084_v1 }
 0x805   :  { %v12835_v48 = vpop.f32.mrf.mxu0  ;;  %16451 = vmatpush3.bf16.msra.mxu0 %v18046_v2 }
 0x806   :  { %v12836_v55 = vadd.f32 %v16359_v18, %v12835_v48  ;;  %16452 = vmatprep.subr.bf16.mxu0 %v18084_v1 }
 0x807   :  { %v12837_v26 = vpop.f32.mrf.mxu0 }
 0x809   :  { %v12838_v36 = vpop.f32.mrf.mxu0  ;;  %16453 = vmatpush3.bf16.msra.mxu0 %v18047_v59 }
 0x80a   :  { %v12839_v11 = vadd.f32 %v16362_v52, %v12838_v36 }
 0x80b   :  { %v12840_v29 = vpop.f32.mrf.mxu0 }
 0x814   :  { %v12523_v19 = vpop.f32.mrf.mxu1 }
 0x815   :  { %v12524_v41 = vadd.f32 %v24574_v46, %v12523_v19 }
 0x816   :  { %v12525_v47 = vpop.f32.mrf.mxu1 }
 0x817   :  { %v12530_v23 = vadd.f32 %v12524_v41, %v12214_v20 }
 0x818   :  { %v12526_v8 = vpop.f32.mrf.mxu1 }
 0x819   :  { %v12527_v17 = vadd.f32 %v24583_v13, %v12526_v8  ;;  %v12842_v43 = vadd.f32 %v12836_v55, %v12530_v23 }
 0x81a   :  { %v12528_v9 = vpop.f32.mrf.mxu1 }
 0x81b   :  { %v12531_v40 = vadd.f32 %v12527_v17, %v12217_v3 }
 0x81d   :  { %v12843_v50 = vadd.f32 %v12839_v11, %v12531_v40 }
 0x825   :  { %v16401_v6 = vpop.f32.mrf.mxu0 }
 0x827   :  { %v16402_v53 = vpop.f32.mrf.mxu0 }
 0x828   :  { %v16403_v60 = vadd.f32 %v16402_v53, %v16401_v6 }
 0x829   :  { %v16404_v24 = vpop.f32.mrf.mxu0 }
 0x82b   :  { %v16405_v61 = vpop.f32.mrf.mxu0 }
 0x82c   :  { %v16406_v7 = vadd.f32 %v16405_v61, %v16404_v24 }
 0x834   :  { %v16379_v5 = vpop.f32.mrf.mxu1 }
 0x836   :  { %v16380_v46 = vpop.f32.mrf.mxu1 }
 0x837   :  { %v16381_v39 = vadd.f32 %v16380_v46, %v16379_v5 }
 0x838   :  { %v16382_v58 = vpop.f32.mrf.mxu1 }
 0x83a   :  { %v16383_v0 = vpop.f32.mrf.mxu1 }
 0x83b   :  { %v16384_v35 = vadd.f32 %v16383_v0, %v16382_v58 }
 0x855   :  { %v13459_v51 = vpop.f32.mrf.mxu0 }
 0x856   :  { %v13460_v13 = vadd.f32 %v16403_v60, %v13459_v51 }
 0x857   :  { %v13461_v30 = vpop.f32.mrf.mxu0 }
 0x859   :  { %v13462_v10 = vpop.f32.mrf.mxu0 }
 0x85a   :  { %v13463_v63 = vadd.f32 %v16406_v7, %v13462_v10 }
 0x85b   :  { %v13464_v37 = vpop.f32.mrf.mxu0 }
 0x864   :  { %v13147_v22 = vpop.f32.mrf.mxu1 }
 0x865   :  { %v13148_v62 = vadd.f32 %v16381_v39, %v13147_v22 }
 0x866   :  { %v13149_v4 = vpop.f32.mrf.mxu1 }
 0x867   :  { %v13154_v44 = vadd.f32 %v13148_v62, %v12842_v43 }
 0x868   :  { %v13150_v27 = vpop.f32.mrf.mxu1 }
 0x869   :  { %v13151_v18 = vadd.f32 %v16384_v35, %v13150_v27  ;;  %v13466_v45 = vadd.f32 %v13460_v13, %v13154_v44 }
 0x86a   :  { %v13152_v49 = vpop.f32.mrf.mxu1 }
 0x86b   :  { %v13155_v31 = vadd.f32 %v13151_v18, %v12843_v50 }
 0x86d   :  { %v13467_v52 = vadd.f32 %v13463_v63, %v13155_v31 }
 0x884   :  { %v16423_v28 = vpop.f32.mrf.mxu1 }
 0x886   :  { %v16424_v32 = vpop.f32.mrf.mxu1 }
 0x887   :  { %v16425_v42 = vadd.f32 %v16424_v32, %v16423_v28 }
 0x888   :  { %v16426_v34 = vpop.f32.mrf.mxu1 }
 0x88a   :  { %v16427_v20 = vpop.f32.mrf.mxu1 }
 0x88b   :  { %v16428_v21 = vadd.f32 %v16427_v20, %v16426_v34 }
 0x8b4   :  { %v13771_v57 = vpop.f32.mrf.mxu1 }
 0x8b5   :  { %v13772_v15 = vadd.f32 %v16425_v42, %v13771_v57 }
 0x8b6   :  { %v13773_v3 = vpop.f32.mrf.mxu1 }
 0x8b7   :  { %v13778_v38 = vadd.f32 %v13772_v15, %v13466_v45 }
 0x8b8   :  { %v13774_v48 = vpop.f32.mrf.mxu1 }
 0x8b9   :  { %v13775_v55 = vadd.f32 %v16428_v21, %v13774_v48  ;;  %v13787_v36 = vadd.f32 %v16195_v12, %v13778_v38 }
 0x8ba   :  { %v13776_v26 = vpop.f32.mrf.mxu1 }
 0x8bb   :  { %v13779_v11 = vadd.f32 %v13775_v55, %v13467_v52  ;;  %v13789_v1 = vmax.f32 %v13787_v36, 0.0 }
 0x8bd   :  { %v13788_v29 = vadd.f32 %v16195_v12, %v13779_v11 }
 0x8bf   :  { %v13790_v16 = vmax.f32 %v13788_v29, 0.0 }
 0x8c1   :  { %v13791_v25 = vpack.c.bf16 %v13790_v16, %v13789_v1 }
 0x8c3   :  { %16455 = vmatmul.mubr.bf16.vlgmr.msra.gmra.mxu0 %v13791_v25 }
 0x983   :  { %v13897_v19 = vpop.f32.mrf.mxu0 }
 0x984   :  { %v13898_v41 = vadd.f32 %v16196_v14, %v13897_v19 }
 0x985   :  { %v16456_v47 = vpop.f32.mrf.mxu0 }
 0x986   :  { %13904 = vst [vmem:[%s24691_s13] sm:$0xff] %v13898_v41 }
 0x987   :  { %v13900_v56 = vpop.f32.mrf.mxu0 }
 0x988   :  { %v13901_v23 = vadd.f32 %v16196_v14, %v13900_v56 }
 0x989   :  { %v16457_v8 = vpop.f32.mrf.mxu0 }
 0x98a   :  { %13905 = vst [vmem:[%s24691_s13 + $0x8] sm:$0xff] %v13901_v23 }

</bundles_post_ra>
